<compile_context>
chip_gen: v7x
topology: tpu7x:2x2x1
jax: 0.10.0
libtpu: 0.0.40
codegen_flags: <defaults>
</compile_context>

<pallas_src>
import jax
import jax.numpy as jnp
import numpy as np
from jax.experimental import pallas as pl
from jax.experimental.pallas import tpu as pltpu


def _ru(x, m):
    return ((x + m - 1) // m) * m


# ---------------------------------------------------------------------------
# Pallas kernel: one grid step == bb batch elements (all dims lane-padded).
# ---------------------------------------------------------------------------
def attention_kernel(q_ref, keycat_ref, madd_ref,
                     wqT_ref, wkl_ref, locb_ref, wv_ref,
                     ctx_ref, attw_ref):
    f32 = jnp.float32
    bb, T = madd_ref.shape            # batch block, padded max_time
    A = wqT_ref.shape[1]              # padded attention_dim
    E = ctx_ref.shape[1]              # padded embedding_dim

    keycat = keycat_ref[...]          # (bb*T, W) bf16; [:, :E] is the key slab

    # ---- fused projections: two wide bf16 MXU matmuls, f32 accumulation ----
    q_proj = jnp.dot(q_ref[...], wqT_ref[...],
                     preferred_element_type=f32)                       # (bb, A)
    kl_proj = jnp.dot(keycat, wkl_ref[...],
                      preferred_element_type=f32)                      # (bb*T, A)

    # (bb*T, A) -> (bb, T, A) is a major-dim regrouping (layout preserving)
    hidden = jnp.tanh(kl_proj.reshape(bb, T, A)
                      + q_proj[:, None, :] + locb_ref[...])            # (bb, T, A)
    # TODO(synk): at realistic Tacotron2 T (~1000) chunk T here (fori_loop) and
    # compute tanh in bf16 on v6e/v7x; unnecessary at these shapes.

    # ---- energies + masked softmax over T (mask also covers T/batch padding) ----
    e = jnp.sum(hidden * wv_ref[...], axis=-1) + madd_ref[...]         # (bb, T)
    e_max = jnp.max(e, axis=-1, keepdims=True)
    p = jnp.exp(e - e_max)
    denom = jnp.sum(p, axis=-1, keepdims=True)
    attw = p * pl.reciprocal(denom, approx=True)                       # (bb, T)
    attw_ref[...] = attw

    # ---- context: ONE batched matmul + ONE dense (bb, E) slab store ----
    key3 = keycat[:, :E].reshape(bb, T, E)        # lane-aligned static view
    ctx = jnp.einsum('bqt,bte->bqe',
                     attw[:, None, :].astype(keycat.dtype), key3,
                     preferred_element_type=f32)                       # (bb, 1, E)
    ctx_ref[...] = ctx.reshape(bb, E)


# ---------------------------------------------------------------------------
# Wrapper (layout glue + weight folding, then pallas_call)
# ---------------------------------------------------------------------------
def attention_forward(query, key, attention_weight_cat, mask, params, *, block_b=8):
    wq = params["wq"]            # (A, R)
    wk = params["wk"]            # (A, E)
    wconv = params["wconv"]      # (F, 2, K)
    gamma, beta = params["bn_gamma"], params["bn_beta"]
    rmean, rvar = params["bn_mean"], params["bn_var"]
    wloc = params["wloc"]        # (A, F)
    wv = params["wv"]            # (1, A)

    B, R = query.shape
    _, T, E = key.shape
    F, C, K = wconv.shape
    A = wq.shape[0]
    assert C == 2 and K % 2 == 1, "SAME padding assumes odd kernel_size, 2 channels"
    assert block_b % 8 == 0
    pad = (K - 1) // 2

    f32, bf16 = jnp.float32, jnp.bfloat16

    # ---- lane-dim padding (everything to multiples of 128) ----
    Rp, Tp, Ep, Ap = _ru(R, 128), _ru(T, 128), _ru(E, 128), _ru(A, 128)
    CK = C * K
    W = _ru(Ep + CK, 128)        # fused contraction width of [key | im2col(awc)]

    # ---- batch blocking: pad to sublane granule, keep >=2 grid steps on v7x ----
    bb = min(_ru(B, 8), block_b)
    if _ru(B, 8) >= 16:          # enough batch -> give both v7x TensorCores work
        bb = min(bb, _ru(-(-B // 2), 8))
    n_blocks = -(-B // bb)
    Bp = n_blocks * bb

    # ---- inputs: additive mask (also masks T padding and padded batch rows) ----
    madd = jnp.where(mask, jnp.float32(-1e30), jnp.float32(0.0))
    madd = jnp.pad(madd, ((0, Bp - B), (0, Tp - T)), constant_values=-1e30)

    q = jnp.pad(query.astype(f32), ((0, Bp - B), (0, Rp - R))).astype(bf16)    # (Bp, Rp)

    key_p = jnp.pad(key.astype(f32),
                    ((0, Bp - B), (0, Tp - T), (0, Ep - E))).astype(bf16)      # (Bp, Tp, Ep)

    # im2col of the SAME-padded location-conv input: (Bp, Tp, 2K), column c*K+k
    awc = jnp.pad(attention_weight_cat.astype(f32),
                  ((0, Bp - B), (0, 0), (0, Tp - T)))                          # (Bp, 2, Tp)
    awc_pad = jnp.pad(awc, ((0, 0), (0, 0), (pad, pad)))                       # (Bp, 2, Tp+2p)
    cols = jnp.stack([awc_pad[:, :, k:k + Tp] for k in range(K)], axis=-1)     # (Bp, 2, Tp, K)
    xcol = cols.transpose(0, 2, 1, 3).reshape(Bp, Tp, CK).astype(bf16)         # (Bp, Tp, 2K)

    # single bf16 slab [key | im2col | zero-pad], flattened to (Bp*Tp, W)
    keycat = jnp.concatenate(
        [key_p, xcol, jnp.zeros((Bp, Tp, W - Ep - CK), bf16)], axis=-1
    ).reshape(Bp * Tp, W)

    # ---- fold conv + BatchNorm(eval) + location linear; stack with Wk^T ----
    scale = gamma / jnp.sqrt(rvar + 1e-5)                                      # (F,)
    shift = beta - rmean * scale                                               # (F,)
    wloc_s = wloc * scale[None, :]                                             # (A, F)
    w_eff = jnp.einsum("af,fck->cka", wloc_s, wconv).reshape(CK, A)            # (2K, A)
    loc_bias = wloc @ shift                                                    # (A,)

    wqT = jnp.pad(wq.T, ((0, Rp - R), (0, Ap - A))).astype(bf16)               # (Rp, Ap)
    wkl = jnp.zeros((W, Ap), f32)
    wkl = wkl.at[:E, :A].set(wk.T)
    wkl = wkl.at[Ep:Ep + CK, :A].set(w_eff)
    wkl = wkl.astype(bf16)                                                     # (W, Ap)

    locb = jnp.pad(loc_bias, (0, Ap - A)).reshape(1, 1, Ap).astype(f32)
    wv_row = jnp.pad(wv.reshape(A), (0, Ap - A)).reshape(1, 1, Ap).astype(f32)

    # ---- VMEM budget: raise the scoped limit only when the block needs it ----
    in_bytes = (bb * Rp * 2 + bb * Tp * W * 2 + bb * Tp * 4
                + Rp * Ap * 2 + W * Ap * 2 + 2 * Ap * 4)
    out_bytes = bb * Ep * 4 + bb * Tp * 4
    interm = 4 * bb * Tp * Ap * 4 + bb * Tp * Ep * 4
    vmem_need = 2 * (in_bytes + out_bytes) + interm
    cp_kwargs = dict(dimension_semantics=("parallel",))
    if vmem_need > 30 * 1024 * 1024:
        # TODO(synk): at very large T/E, chunk T (or shrink bb) per generation
        # (v5e 16 MiB default / v7x 64 MiB physical) instead of only raising this.
        cp_kwargs["vmem_limit_bytes"] = int(min(vmem_need + (8 << 20), 80 << 20))

    ctx, attw = pl.pallas_call(
        attention_kernel,
        out_shape=(jax.ShapeDtypeStruct((Bp, Ep), f32),
                   jax.ShapeDtypeStruct((Bp, Tp), f32)),
        grid_spec=pltpu.PrefetchScalarGridSpec(
            num_scalar_prefetch=0,
            grid=(n_blocks,),
            in_specs=[
                pl.BlockSpec((bb, Rp), lambda i: (i, 0)),             # query (bf16)
                pl.BlockSpec((bb * Tp, W), lambda i: (i, 0)),         # [key | im2col] slab
                pl.BlockSpec((bb, Tp), lambda i: (i, 0)),             # additive mask
                pl.BlockSpec((Rp, Ap), lambda i: (0, 0)),             # Wq^T (bf16)
                pl.BlockSpec((W, Ap), lambda i: (0, 0)),              # [Wk^T ; W_loc_eff]
                pl.BlockSpec((1, 1, Ap), lambda i: (0, 0, 0)),        # fused location bias
                pl.BlockSpec((1, 1, Ap), lambda i: (0, 0, 0)),        # v
            ],
            out_specs=[
                pl.BlockSpec((bb, Ep), lambda i: (i, 0)),             # context
                pl.BlockSpec((bb, Tp), lambda i: (i, 0)),             # attention weights
            ],
        ),
        compiler_params=pltpu.CompilerParams(**cp_kwargs),
    )(q, keycat, madd, wqT, wkl, locb, wv_row)

    return ctx[:B, :E], attw[:B, :T]


# ---------------------------------------------------------------------------
# Pure-JAX reference (mirrors the PyTorch forward, full f32)
# ---------------------------------------------------------------------------
def attention_reference(query, key, awc, mask, params):
    wq, wk, wconv = params["wq"], params["wk"], params["wconv"]
    gamma, beta = params["bn_gamma"], params["bn_beta"]
    rmean, rvar = params["bn_mean"], params["bn_var"]
    wloc, wv = params["wloc"], params["wv"]
    K = wconv.shape[2]
    pad = (K - 1) // 2

    qp = query @ wq.T                                    # (B, A)
    kp = key @ wk.T                                      # (B, T, A)
    conv = jax.lax.conv_general_dilated(
        awc, wconv, window_strides=(1,), padding=[(pad, pad)],
        dimension_numbers=("NCH", "OIH", "NCH"))         # (B, F, T)
    scale = gamma / jnp.sqrt(rvar + 1e-5)
    conv = conv * scale[None, :, None] + (beta - rmean * scale)[None, :, None]
    loc = jnp.einsum("bft,af->bta", conv, wloc)          # (B, T, A)
    hidden = jnp.tanh(qp[:, None, :] + kp + loc)
    e = jnp.einsum("bta,a->bt", hidden, wv[0])           # (B, T)
    e = jnp.where(mask, -jnp.inf, e)
    attw = jax.nn.softmax(e, axis=1)
    ctx = jnp.einsum("bt,bte->be", attw, key)
    return ctx, attw


if __name__ == "__main__":
    # small shapes consistent with the module
    B = 2
    attention_rnn_dim = 32   # R
    embedding_dim = 32       # E
    attention_dim = 32       # A
    n_filters = 8            # F
    kernel_size = 5          # K (odd -> SAME padding like Tacotron2)
    T = 16                   # max_time

    root = jax.random.PRNGKey(0)
    ks = jax.random.split(root, 10)

    params = {
        "wq": 0.1 * jax.random.normal(ks[0], (attention_dim, attention_rnn_dim), jnp.float32),
        "wk": 0.1 * jax.random.normal(ks[1], (attention_dim, embedding_dim), jnp.float32),
        "wconv": 0.1 * jax.random.normal(ks[2], (n_filters, 2, kernel_size), jnp.float32),
        # BatchNorm1d (eval mode) parameters / running stats
        "bn_gamma": jnp.ones((n_filters,), jnp.float32),
        "bn_beta": jnp.zeros((n_filters,), jnp.float32),
        "bn_mean": jnp.zeros((n_filters,), jnp.float32),
        "bn_var": jnp.ones((n_filters,), jnp.float32),
        "wloc": 0.1 * jax.random.normal(ks[3], (attention_dim, n_filters), jnp.float32),
        "wv": 0.1 * jax.random.normal(ks[4], (1, attention_dim), jnp.float32),
    }
    # TODO(synk): Conv1dWithBatchNorm definition not provided; assumed
    # bias-free Conv1d(SAME padding) + BatchNorm1d in eval mode (eps=1e-5).

    query = jax.random.normal(ks[5], (B, attention_rnn_dim), jnp.float32)
    key = jax.random.normal(ks[6], (B, T, embedding_dim), jnp.float32)
    awc = jax.nn.softmax(jax.random.normal(ks[7], (B, 2, T), jnp.float32), axis=-1)
    lengths = jnp.array([T, T - 4], jnp.int32)
    mask = jnp.arange(T)[None, :] >= lengths[:, None]    # (B, T) bool, True = masked

    ctx, attw = attention_forward(query, key, awc, mask, params)
    ctx, attw = jax.block_until_ready((ctx, attw))

    ctx_ref, attw_ref = attention_reference(query, key, awc, mask, params)
    # tolerance: query/key/location projections + context bmm use bf16 MXU
    # inputs (f32 accumulation), plus approximate reciprocal in the softmax.
    np.testing.assert_allclose(np.asarray(attw), np.asarray(attw_ref), rtol=2e-2, atol=1e-2)
    np.testing.assert_allclose(np.asarray(ctx), np.asarray(ctx_ref), rtol=2e-2, atol=1e-2)

    print("KERNEL_OK")
</pallas_src>

<mosaic_0001>
module attributes {stable_mosaic.version = 11 : i64} {
  func.func @attention_kernel(%arg0: i32, %arg1: memref<8x128xbf16, #tpu.memory_space<vmem>>, %arg2: memref<1024x256xbf16, #tpu.memory_space<vmem>>, %arg3: memref<8x128xf32, #tpu.memory_space<vmem>>, %arg4: memref<128x128xbf16, #tpu.memory_space<vmem>>, %arg5: memref<256x128xbf16, #tpu.memory_space<vmem>>, %arg6: memref<1x1x128xf32, #tpu.memory_space<vmem>>, %arg7: memref<1x1x128xf32, #tpu.memory_space<vmem>>, %arg8: memref<8x128xf32, #tpu.memory_space<vmem>>, %arg9: memref<8x128xf32, #tpu.memory_space<vmem>>) attributes {dimension_semantics = [#tpu.dimension_semantics<parallel>], iteration_bounds = array<i64: 1>, scalar_prefetch = 0 : i64, scratch_operands = 0 : i64, tpu.core_type = #tpu.core_type<tc>, window_params = [{transform_indices = @transform_0, window_bounds = array<i64: 8, 128>}, {transform_indices = @transform_1, window_bounds = array<i64: 1024, 256>}, {transform_indices = @transform_2, window_bounds = array<i64: 8, 128>}, {pipeline_mode = #tpu.pipeline_mode<synchronous>, transform_indices = @transform_3, window_bounds = array<i64: 128, 128>}, {pipeline_mode = #tpu.pipeline_mode<synchronous>, transform_indices = @transform_4, window_bounds = array<i64: 256, 128>}, {pipeline_mode = #tpu.pipeline_mode<synchronous>, transform_indices = @transform_5, window_bounds = array<i64: 1, 1, 128>}, {pipeline_mode = #tpu.pipeline_mode<synchronous>, transform_indices = @transform_6, window_bounds = array<i64: 1, 1, 128>}, {transform_indices = @transform_7, window_bounds = array<i64: 8, 128>}, {transform_indices = @transform_8, window_bounds = array<i64: 8, 128>}]} {
    %c0 = arith.constant 0 : index
    %c0_0 = arith.constant 0 : index
    %0 = vector.load %arg2[%c0, %c0_0] : memref<1024x256xbf16, #tpu.memory_space<vmem>>, vector<1024x256xbf16>
    %c0_1 = arith.constant 0 : index
    %c0_2 = arith.constant 0 : index
    %1 = vector.load %arg1[%c0_1, %c0_2] : memref<8x128xbf16, #tpu.memory_space<vmem>>, vector<8x128xbf16>
    %c0_3 = arith.constant 0 : index
    %c0_4 = arith.constant 0 : index
    %2 = vector.load %arg4[%c0_3, %c0_4] : memref<128x128xbf16, #tpu.memory_space<vmem>>, vector<128x128xbf16>
    %cst = arith.constant dense<0.000000e+00> : vector<8x128xf32>
    %3 = tpu.matmul %1, %2, %cst {dimension_numbers = #tpu.dot_dimension_numbers<[1], [0], [0], [1], [0, 0, 1, 1], [], []>} : vector<8x128xbf16>, vector<128x128xbf16>, vector<8x128xf32> -> vector<8x128xf32>
    %c0_5 = arith.constant 0 : index
    %c0_6 = arith.constant 0 : index
    %4 = vector.load %arg5[%c0_5, %c0_6] : memref<256x128xbf16, #tpu.memory_space<vmem>>, vector<256x128xbf16>
    %cst_7 = arith.constant dense<0.000000e+00> : vector<1024x128xf32>
    %5 = tpu.matmul %0, %4, %cst_7 {dimension_numbers = #tpu.dot_dimension_numbers<[1], [0], [0], [1], [0, 0, 1, 1], [], []>} : vector<1024x256xbf16>, vector<256x128xbf16>, vector<1024x128xf32> -> vector<1024x128xf32>
    %6 = vector.shape_cast %5 : vector<1024x128xf32> to vector<8x128x128xf32>
    %7 = vector.shape_cast %3 : vector<8x128xf32> to vector<8x1x128xf32>
    %8 = vector.broadcast %7 : vector<8x1x128xf32> to vector<8x128x128xf32>
    %9 = arith.addf %6, %8 : vector<8x128x128xf32>
    %c0_8 = arith.constant 0 : index
    %c0_9 = arith.constant 0 : index
    %c0_10 = arith.constant 0 : index
    %10 = vector.load %arg6[%c0_8, %c0_9, %c0_10] : memref<1x1x128xf32, #tpu.memory_space<vmem>>, vector<1x1x128xf32>
    %11 = vector.broadcast %10 : vector<1x1x128xf32> to vector<8x128x128xf32>
    %12 = arith.addf %9, %11 : vector<8x128x128xf32>
    %13 = math.tanh %12 : vector<8x128x128xf32>
    %c0_11 = arith.constant 0 : index
    %c0_12 = arith.constant 0 : index
    %c0_13 = arith.constant 0 : index
    %14 = vector.load %arg7[%c0_11, %c0_12, %c0_13] : memref<1x1x128xf32, #tpu.memory_space<vmem>>, vector<1x1x128xf32>
    %15 = vector.broadcast %14 : vector<1x1x128xf32> to vector<8x128x128xf32>
    %16 = arith.mulf %13, %15 : vector<8x128x128xf32>
    %cst_14 = arith.constant dense<0.000000e+00> : vector<8x128xf32>
    %17 = vector.multi_reduction <add>, %16, %cst_14 [2] : vector<8x128x128xf32> to vector<8x128xf32>
    %c0_15 = arith.constant 0 : index
    %c0_16 = arith.constant 0 : index
    %18 = vector.load %arg3[%c0_15, %c0_16] : memref<8x128xf32, #tpu.memory_space<vmem>>, vector<8x128xf32>
    %19 = arith.addf %17, %18 : vector<8x128xf32>
    %cst_17 = arith.constant dense<0xFF800000> : vector<8xf32>
    %20 = vector.multi_reduction <maximumf>, %19, %cst_17 [1] : vector<8x128xf32> to vector<8xf32>
    %21 = vector.shape_cast %20 : vector<8xf32> to vector<8x1xf32>
    %22 = vector.broadcast %21 : vector<8x1xf32> to vector<8x128xf32>
    %23 = arith.subf %19, %22 : vector<8x128xf32>
    %24 = math.exp %23 : vector<8x128xf32>
    %cst_18 = arith.constant dense<0.000000e+00> : vector<8xf32>
    %25 = vector.multi_reduction <add>, %24, %cst_18 [1] : vector<8x128xf32> to vector<8xf32>
    %26 = vector.shape_cast %25 : vector<8xf32> to vector<8x1xf32>
    %27 = tpu.reciprocal %26 {approx = true} : vector<8x1xf32> -> vector<8x1xf32>
    %28 = vector.broadcast %27 : vector<8x1xf32> to vector<8x128xf32>
    %29 = arith.mulf %24, %28 : vector<8x128xf32>
    %c0_19 = arith.constant 0 : index
    %c0_20 = arith.constant 0 : index
    %30 = vector.load %arg9[%c0_19, %c0_20] : memref<8x128xf32, #tpu.memory_space<vmem>>, vector<8x128xf32>
    tpu.vector_store %arg9[%c0_19, %c0_20], %29 {strides = array<i32>} : memref<8x128xf32, #tpu.memory_space<vmem>>, vector<8x128xf32>,
    %31 = vector.extract_strided_slice %0 {offsets = [0, 0], sizes = [1024, 128], strides = [1, 1]} : vector<1024x256xbf16> to vector<1024x128xbf16>
    %32 = vector.shape_cast %31 : vector<1024x128xbf16> to vector<8x128x128xbf16>
    %33 = vector.shape_cast %29 : vector<8x128xf32> to vector<8x1x128xf32>
    %34 = arith.truncf %33 : vector<8x1x128xf32> to vector<8x1x128xbf16>
    "tpu.trace_start"() <{level = 10 : i32, message = "bqt,bte->bqe"}> : () -> ()
    %cst_21 = arith.constant dense<0.000000e+00> : vector<8x1x128xf32>
    %35 = tpu.matmul %34, %32, %cst_21 {dimension_numbers = #tpu.dot_dimension_numbers<[2], [1], [1], [2], [0, 0, 0, 1, 1, 2], [0], [0]>} : vector<8x1x128xbf16>, vector<8x128x128xbf16>, vector<8x1x128xf32> -> vector<8x1x128xf32>
    "tpu.trace_stop"() : () -> ()
    %36 = vector.shape_cast %35 : vector<8x1x128xf32> to vector<8x128xf32>
    %c0_22 = arith.constant 0 : index
    %c0_23 = arith.constant 0 : index
    %37 = vector.load %arg8[%c0_22, %c0_23] : memref<8x128xf32, #tpu.memory_space<vmem>>, vector<8x128xf32>
    tpu.vector_store %arg8[%c0_22, %c0_23], %36 {strides = array<i32>} : memref<8x128xf32, #tpu.memory_space<vmem>>, vector<8x128xf32>,
    return
  }
  func.func @transform_0(%arg0: i32) -> (i32, i32) {
    %c0_i32 = arith.constant 0 : i32
    %c0_i32_0 = arith.constant 0 : i32
    return %arg0, %c0_i32 : i32, i32
  }
  func.func @transform_1(%arg0: i32) -> (i32, i32) {
    %c0_i32 = arith.constant 0 : i32
    %c0_i32_0 = arith.constant 0 : i32
    return %arg0, %c0_i32 : i32, i32
  }
  func.func @transform_2(%arg0: i32) -> (i32, i32) {
    %c0_i32 = arith.constant 0 : i32
    %c0_i32_0 = arith.constant 0 : i32
    return %arg0, %c0_i32 : i32, i32
  }
  func.func @transform_3(%arg0: i32) -> (i32, i32) {
    %c0_i32 = arith.constant 0 : i32
    %c0_i32_0 = arith.constant 0 : i32
    %c0_i32_1 = arith.constant 0 : i32
    return %c0_i32, %c0_i32_0 : i32, i32
  }
  func.func @transform_4(%arg0: i32) -> (i32, i32) {
    %c0_i32 = arith.constant 0 : i32
    %c0_i32_0 = arith.constant 0 : i32
    %c0_i32_1 = arith.constant 0 : i32
    return %c0_i32, %c0_i32_0 : i32, i32
  }
  func.func @transform_5(%arg0: i32) -> (i32, i32, i32) {
    %c0_i32 = arith.constant 0 : i32
    %c0_i32_0 = arith.constant 0 : i32
    %c0_i32_1 = arith.constant 0 : i32
    %c0_i32_2 = arith.constant 0 : i32
    return %c0_i32, %c0_i32_0, %c0_i32_1 : i32, i32, i32
  }
  func.func @transform_6(%arg0: i32) -> (i32, i32, i32) {
    %c0_i32 = arith.constant 0 : i32
    %c0_i32_0 = arith.constant 0 : i32
    %c0_i32_1 = arith.constant 0 : i32
    %c0_i32_2 = arith.constant 0 : i32
    return %c0_i32, %c0_i32_0, %c0_i32_1 : i32, i32, i32
  }
  func.func @transform_7(%arg0: i32) -> (i32, i32) {
    %c0_i32 = arith.constant 0 : i32
    %c0_i32_0 = arith.constant 0 : i32
    return %arg0, %c0_i32 : i32, i32
  }
  func.func @transform_8(%arg0: i32) -> (i32, i32) {
    %c0_i32 = arith.constant 0 : i32
    %c0_i32_0 = arith.constant 0 : i32
    return %arg0, %c0_i32 : i32, i32
  }
}

</mosaic_0001>

<bundles_post_ra>
// kernel: tpu_custom_call.1
= control target key start
LH: loop header
LB: loop body
LE: loop exit
PB: predicated region body
PF: predicated region fallthrough
CT: control target
= control target key end

     0   :  { %14 = vsyncpa [#allocation3], 0  ;;  %s16460_s0 = inlined_call_operand.hbm [shape: bf16[8,128], index: 0, kind: input, shape index: {}]   ;;  %s16461_s1 = inlined_call_operand.hbm [shape: bf16[1024,256], index: 1, kind: input, shape index: {}]   ;;  %s16462_s2 = inlined_call_operand.hbm [shape: f32[8,128], index: 2, kind: input, shape index: {}]   ;;  %s16463_s3 = inlined_call_operand.hbm [shape: bf16[128,128], index: 3, kind: input, shape index: {}]   ;;  %s16464_s4 = inlined_call_operand.hbm [shape: bf16[256,128], index: 4, kind: input, shape index: {}]   ;;  %s16465_s5 = inlined_call_operand.vmem [shape: f32[1,1,128], index: 5, kind: input, shape index: {}]   ;;  %s16466_s6 = inlined_call_operand.vmem [shape: f32[1,1,128], index: 6, kind: input, shape index: {}]   ;;  %s16467_s7 = inlined_call_operand.hbm [shape: f32[8,128], index: 7, kind: output, shape index: {0}]   ;;  %s16468_s8 = inlined_call_operand.hbm [shape: f32[8,128], index: 8, kind: output, shape index: {1}]  }
   0x1   :  { %15 = vsyncpa [#allocation6], 0 }
   0x2   :  { %16 = vsyncpa [#allocation9], 0 }
   0x3   :  { %17 = vsyncpa [#allocation4], 0 }
   0x4   :  { %18 = vsyncpa [#allocation13], 0  ;;  %s10484_s27 = smov [#allocation5]   ;;  %s10320_s9 = scalar_lea.hbm %s16461_s1, 16384 }
   0x5   :  { %s34_s28 = sshll.u32 %s10484_s27, 4  ;;  %p10321_p0 = scmp.ne.s32.totalorder %s16461_s1, %s10320_s9  ;;  %s35_s28 = int_to_ptr.vmem [resolvable:$true] %s34_s28 }
   0x6   :  { %p10324_p1 = scmp.lt.u32.totalorder %s10320_s9, %s16461_s1 }
   0x8   :  { %p10326_p2 = pnand %p10324_p1, %p10321_p0 }
   0xa   :  { %10329 = shalt.err (!%p10326_p2)
}
   0xb   :  { %s10330_s14 = scalar_lea.vmem %s35_s28, 16384  ;;  %p10335_p4 = scmp.lt.s32.totalorder %s35_s28, %s35_s28 }
   0xc   :  { %p10331_p3 = scmp.ne.s32.totalorder %s35_s28, %s10330_s14  ;;  %p10336_p5 = scmp.lt.s32.totalorder %s10330_s14, %s10330_s14 }
   0xe   :  { %p10337_p6 = por %p10336_p5, %p10335_p4 }
  0x10   :  { %p10338_p7 = pnand %p10337_p6, %p10331_p3 }
  0x12   :  { %10341 = shalt.err (!%p10338_p7)
}
  0x13   :  { %s10485_s15 = smov 128   ;;  %s10486_s16 = smov 8  }
  0x14   :  { %40 = dma.hbm_to_vmem [thread:$0]  %s16461_s1, 16384, %s35_s28, [#allocation6], %s10485_s15, %s10485_s15, %s10486_s16  }
  0x15   :  { %s10487_s19 = smov [#allocation8]   ;;  %s10342_s23 = scalar_lea.hbm %s16463_s3, 1024 }
  0x16   :  { %s56_s20 = sshll.u32 %s10487_s19, 4  ;;  %p10343_p8 = scmp.ne.s32.totalorder %s16463_s3, %s10342_s23  ;;  %s57_s20 = int_to_ptr.vmem [resolvable:$true] %s56_s20 }
  0x17   :  { %p10346_p9 = scmp.lt.u32.totalorder %s10342_s23, %s16463_s3 }
  0x19   :  { %p10348_p10 = pnand %p10346_p9, %p10343_p8 }
  0x1b   :  { %10351 = shalt.err (!%p10348_p10)
}
  0x1c   :  { %s10352_s29 = scalar_lea.vmem %s57_s20, 1024  ;;  %p10357_p12 = scmp.lt.s32.totalorder %s57_s20, %s57_s20 }
  0x1d   :  { %p10353_p11 = scmp.ne.s32.totalorder %s57_s20, %s10352_s29  ;;  %p10358_p13 = scmp.lt.s32.totalorder %s10352_s29, %s10352_s29 }
  0x1f   :  { %p10359_p0 = por %p10358_p13, %p10357_p12 }
  0x21   :  { %p10360_p1 = pnand %p10359_p0, %p10353_p11 }
  0x23   :  { %10363 = shalt.err (!%p10360_p1)
}
  0x24   :  { %s10488_s1 = smov 64   ;;  %s10489_s28 = smov 4  }
  0x25   :  { %62 = dma.hbm_to_vmem [thread:$0]  %s16463_s3, 1024, %s57_s20, [#allocation9], %s10488_s1, %s10488_s1, %s10489_s28  }
  0x26   :  { %s10490_s10 = smov [#allocation2]   ;;  %s10491_s12 = smov [#allocation7]  }
  0x27   :  { %s25_s11 = sshll.u32 %s10490_s10, 4  ;;  %s47_s13 = sshll.u32 %s10491_s12, 4  ;;  %s26_s11 = int_to_ptr.vmem [resolvable:$true] %s25_s11  ;;  %s48_s13 = int_to_ptr.vmem [resolvable:$true] %s47_s13 }
  0x28   :  { %s10364_s16 = scalar_lea.hbm %s16460_s0, 64 }
  0x29   :  { %p10365_p2 = scmp.ne.s32.totalorder %s16460_s0, %s10364_s16  ;;  %p10368_p3 = scmp.lt.u32.totalorder %s10364_s16, %s16460_s0 }
  0x2b   :  { %p10370_p4 = pnand %p10368_p3, %p10365_p2 }
  0x2d   :  { %10373 = shalt.err (!%p10370_p4)
}
  0x2e   :  { %s10374_s3 = scalar_lea.vmem %s26_s11, 64  ;;  %p10379_p6 = scmp.lt.s32.totalorder %s26_s11, %s26_s11 }
  0x2f   :  { %p10375_p5 = scmp.ne.s32.totalorder %s26_s11, %s10374_s3  ;;  %p10380_p7 = scmp.lt.s32.totalorder %s10374_s3, %s10374_s3 }
  0x31   :  { %p10381_p8 = por %p10380_p7, %p10379_p6 }
  0x33   :  { %p10382_p9 = pnand %p10381_p8, %p10375_p5 }
  0x35   :  { %10385 = shalt.err (!%p10382_p9)
}
  0x36   :  { %28 = dma.hbm_to_vmem [thread:$0]  %s16460_s0, 64, %s26_s11, [#allocation3]  }
  0x37   :  { %s10386_s25 = scalar_lea.hbm %s16462_s2, 128 }
  0x38   :  { %p10387_p10 = scmp.ne.s32.totalorder %s16462_s2, %s10386_s25  ;;  %p10390_p11 = scmp.lt.u32.totalorder %s10386_s25, %s16462_s2 }
  0x3a   :  { %p10392_p12 = pnand %p10390_p11, %p10387_p10 }
  0x3c   :  { %10395 = shalt.err (!%p10392_p12)
}
  0x3d   :  { %s10396_s9 = scalar_lea.vmem %s48_s13, 128  ;;  %p10401_p0 = scmp.lt.s32.totalorder %s48_s13, %s48_s13 }
  0x3e   :  { %p10397_p13 = scmp.ne.s32.totalorder %s48_s13, %s10396_s9  ;;  %p10402_p1 = scmp.lt.s32.totalorder %s10396_s9, %s10396_s9 }
  0x40   :  { %p10403_p2 = por %p10402_p1, %p10401_p0 }
  0x42   :  { %p10404_p3 = pnand %p10403_p2, %p10397_p13 }
  0x44   :  { %10407 = shalt.err (!%p10404_p3)
}
  0x45   :  { %50 = dma.hbm_to_vmem [thread:$0]  %s16462_s2, 128, %s48_s13, [#allocation6]  }
  0x46   :  { %s10492_s11 = smov [#allocation10]   ;;  %s10408_s16 = scalar_lea.hbm %s16464_s4, 2048 }
  0x47   :  { %s68_s12 = sshll.u32 %s10492_s11, 4  ;;  %p10409_p4 = scmp.ne.s32.totalorder %s16464_s4, %s10408_s16  ;;  %s69_s12 = int_to_ptr.vmem [resolvable:$true] %s68_s12 }
  0x48   :  { %p10412_p5 = scmp.lt.u32.totalorder %s10408_s16, %s16464_s4 }
  0x4a   :  { %p10414_p6 = pnand %p10412_p5, %p10409_p4 }
  0x4c   :  { %10417 = shalt.err (!%p10414_p6)
}
  0x4d   :  { %s10418_s3 = scalar_lea.vmem %s69_s12, 2048  ;;  %p10423_p8 = scmp.lt.s32.totalorder %s69_s12, %s69_s12 }
  0x4e   :  { %p10419_p7 = scmp.ne.s32.totalorder %s69_s12, %s10418_s3  ;;  %p10424_p9 = scmp.lt.s32.totalorder %s10418_s3, %s10418_s3 }
  0x50   :  { %p10425_p10 = por %p10424_p9, %p10423_p8 }
  0x52   :  { %p10426_p11 = pnand %p10425_p10, %p10419_p7 }
  0x54   :  { %10429 = shalt.err (!%p10426_p11)
}
  0x55   :  { %74 = dma.hbm_to_vmem [thread:$0]  %s16464_s4, 2048, %s69_s12, [#allocation9], %s10488_s1, %s10488_s1, %s10489_s28  }
  0x56   :  { %10474 = dma.done.wait [#allocation3], 64  }
  0x57   :  { %10475 = vsyncadd [#allocation3], 4294967232 }
  0x58   :  { %10476 = dma.done.wait [#allocation6], 16512  }
  0x59   :  { %10477 = vsyncadd [#allocation6], 4294950784 }
  0x5a   :  { %10478 = dma.done.wait [#allocation9], 3072  }
  0x5b   :  { %10479 = vsyncadd [#allocation9], 4294964224  ;;  %v16469_v0 = vlaneseq  ;;  %v16472_v1 = vmov 0.0   ;;  %v10494_v2 = vmov 0   ;;  %vm16619_vm0 = vmmov 0   ;;  %v9529_v5 = vld [vmem:[#allocation8] sm:$0xff]  }
  0x5c   :  { %9300 = vmatprep.subr.bf16.mxu0 %v16472_v1  ;;  %9480 = vmatprep.subr.bf16.mxu1 %v10494_v2  ;;  %v10622_v6 = vld [vmem:[#allocation10] sm:$0xff]   ;;  %v10624_v7 = vld [vmem:[#allocation7] sm:$0xff]  ;;  %v9531_v9 = vld [vmem:[#allocation8 + $0x8] sm:$0xff]   ;;  %vm3830_vm1 = vcmask 130112   ;;  %vm3837_vm2 = vcmask 195712   ;;  %vm3844_vm3 = vcmask 261312  }
  0x5d   :  { %v10613_v3 = vshrl.u32 %v16469_v0, 7  ;;  %9316 = vmatprep.mubr.msk.bf16.mxu0 %vm16619_vm0, %v16472_v1  ;;  %9527 = vset.pattern.permute.xlu1 %v10494_v2  ;;  %v10633_v10 = vld [vmem:[#allocation10 + $0x8] sm:$0xff]   ;;  %v9533_v11 = vld [vmem:[#allocation8 + $0x10] sm:$0xff]   ;;  %v9535_v13 = vld [vmem:[#allocation8 + $0x18] sm:$0xff]   ;;  %vm3851_vm4 = vcmask 326912   ;;  %vm3858_vm5 = vcmask 392512  }
  0x5e   :  { %9528 = vset.pattern.permute.xlu0 %v10494_v2  ;;  %9301 = vmatpush3.bf16.msra.mxu0 %v9529_v5  ;;  %v10639_v12 = vld [vmem:[#allocation10 + $0x10] sm:$0xff]   ;;  %v10646_v14 = vld [vmem:[#allocation10 + $0x18] sm:$0xff]   ;;  %v9537_v15 = vld [vmem:[#allocation8 + $0x20] sm:$0xff]   ;;  %vm3865_vm6 = vcmask 458112   ;;  %vm16770_vm7 = vcmask 523712   ;;  %vm16622_vm8 = vcmask 589312  }
  0x5f   :  { %16866 = vst [vmem:[#allocation19_spill] sm:$0xff] %v10613_v3  ;;  %v10620_v4 = vsub.s32 0, %v10613_v3  ;;  %9496 = vmatpush1.bf16.msra.mxu1 %v10622_v6  ;;  %9302 = vmatprep.subr.bf16.mxu0 %v16472_v1  ;;  %v10653_v16 = vld [vmem:[#allocation10 + $0x20] sm:$0xff]   ;;  %v9539_v17 = vld [vmem:[#allocation8 + $0x28] sm:$0xff]   ;;  %v9541_v19 = vld [vmem:[#allocation8 + $0x30] sm:$0xff]   ;;  %v10678_v24 = vsub.s32 1, %v10613_v3 }
  0x60   :  { %9481 = vmatprep.subr.bf16.mxu1 %v10494_v2  ;;  %v10660_v18 = vld [vmem:[#allocation10 + $0x28] sm:$0xff]   ;;  %v10667_v20 = vld [vmem:[#allocation10 + $0x30] sm:$0xff]   ;;  %v9543_v22 = vld [vmem:[#allocation8 + $0x38] sm:$0xff]   ;;  %v10731_v37 = vsub.s32 2, %v10613_v3  ;;  %v10747_v48 = vsub.s32 3, %v10613_v3  ;;  %vm16624_vm9 = vcmask 654912  }
  0x61   :  { %16867 = vst [vmem:[#allocation20_spill] sm:$0xff] %v10620_v4  ;;  %v10629_v8 = vrot.slane %v10624_v7, %v10620_v4  ;;  %v9555_v21 = vld [vmem:[#allocation5 + $0xf4] ss:$8 sps:$4 sm:$0xff]   ;;  %v10674_v23 = vld [vmem:[#allocation10 + $0x38] sm:$0xff]   ;;  %16868 = vst [vmem:[#allocation21_spill] sm:$0xff] %v10678_v24  ;;  %v10689_v27 = vrot.slane %v10624_v7, %v10678_v24  ;;  %vm16623_vm10 = vcmask 720512  }
  0x62   :  { %9303 = vmatpush3.bf16.msra.mxu0 %v9531_v9  ;;  %1248 = vmatprep.mubr.bf16.mxu1 %v9555_v21  ;;  %v223_v25 = vld [vmem:[#allocation2] sm:$0xf]  ;;  %v10684_v26 = vld [vmem:[#allocation10 + $0x40] sm:$0xff]   ;;  %v9546_v29 = vld [vmem:[#allocation10 + $0x48] sm:$0xff]   ;;  %16869 = vst [vmem:[#allocation22_spill] sm:$0xff] %v10731_v37  ;;  %v2652_v39 = vrot.slane %v10624_v7, %v10731_v37  ;;  %v10752_v51 = vrot.slane %v10624_v7, %v10747_v48  ;;  %vm16625_vm11 = vcmask 786112  }
  0x63   :  { %2524 = vbcast.lane.b32.xlu1 %v10629_v8, 264  ;;  %2520 = vbcast.lane.b32.xlu0 %v10629_v8, 256  ;;  %v9567_v28 = vld [vmem:[#allocation5 + $0x4] ss:$8 sps:$4 sm:$0xff]   ;;  %v9547_v30 = vld [vmem:[#allocation10 + $0x50] sm:$0xff]   ;;  %v9550_v33 = vld [vmem:[#allocation10 + $0x68] sm:$0xff]  }
  0x64   :  { %9497 = vmatpush1.bf16.msra.mxu1 %v10633_v10  ;;  %9304 = vmatprep.subr.bf16.mxu0 %v16472_v1  ;;  %v9548_v31 = vld [vmem:[#allocation10 + $0x58] sm:$0xff]   ;;  %v9549_v32 = vld [vmem:[#allocation10 + $0x60] sm:$0xff]   ;;  %v9551_v34 = vld [vmem:[#allocation10 + $0x70] sm:$0xff]   ;;  %16870 = vst [vmem:[#allocation23_spill] sm:$0xff] %v10747_v48  ;;  %vm16626_vm12 = vcmask 851712   ;;  %vm3914_vm13 = vcmask 917312  }
  0x65   :  { %9482 = vmatprep.subr.bf16.mxu1 %v10494_v2  ;;  %v9552_v35 = vld [vmem:[#allocation10 + $0x78] sm:$0xff]   ;;  %v9553_v36 = vld [vmem:[#allocation5 + $0xf0] ss:$8 sps:$4 sm:$0xff]   ;;  %v9559_v41 = vld [vmem:[#allocation5 + $0x114] ss:$8 sps:$4 sm:$0xff]   ;;  %vm3921_vm14 = vcmask 982912  }
  0x66   :  { %9305 = vmatpush3.bf16.msra.mxu0 %v9533_v11  ;;  %v9556_v38 = vld [vmem:[#allocation5 + $0x104] ss:$8 sps:$4 sm:$0xff]   ;;  %v9558_v40 = vld [vmem:[#allocation5 + $0x100] ss:$8 sps:$4 sm:$0xff]   ;;  %v9561_v42 = vld [vmem:[#allocation5 + $0x110] ss:$8 sps:$4 sm:$0xff]  }
  0x67   :  { %2528 = vbcast.lane.b32.xlu1 %v10629_v8, 272  ;;  %2536 = vbcast.lane.b32.xlu0 %v10629_v8, 288  ;;  %v9562_v43 = vld [vmem:[#allocation5 + $0x124] ss:$8 sps:$4 sm:$0xff]   ;;  %v9564_v44 = vld [vmem:[#allocation5 + $0x120] ss:$8 sps:$4 sm:$0xff]  }
  0x68   :  { %9498 = vmatpush1.bf16.msra.mxu1 %v10639_v12  ;;  %9306 = vmatprep.subr.bf16.mxu0 %v16472_v1  ;;  %v9568_v45 = vld [vmem:[#allocation5 + $0x134] ss:$8 sps:$4 sm:$0xff]   ;;  %v9565_v46 = vld [vmem:[#allocation5] ss:$8 sps:$4 sm:$0xff]   ;;  %v9570_v47 = vld [vmem:[#allocation5 + $0x130] ss:$8 sps:$4 sm:$0xff]  }
  0x69   :  { %9483 = vmatprep.subr.bf16.mxu1 %v10494_v2  ;;  %v9571_v49 = vld [vmem:[#allocation5 + $0x14] ss:$8 sps:$4 sm:$0xff]   ;;  %v9573_v50 = vld [vmem:[#allocation5 + $0x144] ss:$8 sps:$4 sm:$0xff]   ;;  %v9575_v52 = vld [vmem:[#allocation5 + $0x10] ss:$8 sps:$4 sm:$0xff]  }
  0x6a   :  { %9307 = vmatpush3.bf16.msra.mxu0 %v9535_v13  ;;  %v9576_v53 = vld [vmem:[#allocation5 + $0x140] ss:$8 sps:$4 sm:$0xff]   ;;  %v9577_v54 = vld [vmem:[#allocation5 + $0x24] ss:$8 sps:$4 sm:$0xff]   ;;  %v9579_v55 = vld [vmem:[#allocation5 + $0x154] ss:$8 sps:$4 sm:$0xff]  }
  0x6b   :  { %2532 = vbcast.lane.b32.xlu1 %v10629_v8, 280  ;;  %2544 = vbcast.lane.b32.xlu0 %v10629_v8, 304  ;;  %v9581_v56 = vld [vmem:[#allocation5 + $0x20] ss:$8 sps:$4 sm:$0xff]   ;;  %v9587_v57 = vld [vmem:[#allocation5 + $0x30] ss:$8 sps:$4 sm:$0xff]  }
  0x6c   :  { %9499 = vmatpush1.bf16.msra.mxu1 %v10646_v14  ;;  %9308 = vmatprep.subr.bf16.mxu0 %v16472_v1  ;;  %v9582_v58 = vld [vmem:[#allocation5 + $0x150] ss:$8 sps:$4 sm:$0xff]   ;;  %v9583_v59 = vld [vmem:[#allocation5 + $0x34] ss:$8 sps:$4 sm:$0xff]   ;;  %v9585_v60 = vld [vmem:[#allocation5 + $0x164] ss:$8 sps:$4 sm:$0xff]  }
  0x6d   :  { %9484 = vmatprep.subr.bf16.mxu1 %v10494_v2  ;;  %v9593_v61 = vld [vmem:[#allocation5 + $0x40] ss:$8 sps:$4 sm:$0xff]   ;;  %v9599_v62 = vld [vmem:[#allocation5 + $0x50] ss:$8 sps:$4 sm:$0xff]   ;;  %v9591_v5 = vld [vmem:[#allocation5 + $0x174] ss:$8 sps:$4 sm:$0xff]  }
  0x6e   :  { %9309 = vmatpush3.bf16.msra.mxu0 %v9537_v15  ;;  %v9588_v63 = vld [vmem:[#allocation5 + $0x160] ss:$8 sps:$4 sm:$0xff]   ;;  %v9594_v13 = vld [vmem:[#allocation5 + $0x170] ss:$8 sps:$4 sm:$0xff]   ;;  %v9595_v15 = vld [vmem:[#allocation5 + $0x54] ss:$8 sps:$4 sm:$0xff]  }
  0x6f   :  { %2540 = vbcast.lane.b32.xlu1 %v10629_v8, 296  ;;  %2552 = vbcast.lane.b32.xlu0 %v10629_v8, 320  ;;  %v9605_v9 = vld [vmem:[#allocation5 + $0x60] ss:$8 sps:$4 sm:$0xff]   ;;  %v9658_v0 = vld [vmem:[#allocation5 + $0x234] ss:$8 sps:$4 sm:$0xff]  }
  0x70   :  { %9500 = vmatpush1.bf16.msra.mxu1 %v10653_v16  ;;  %9310 = vmatprep.subr.bf16.mxu0 %v16472_v1  ;;  %v9663_v24 = vld [vmem:[#allocation5 + $0x240] ss:$8 sps:$4 sm:$0xff]   ;;  %vm3928_vm15 = vcmask 1048512  }
  0x71   :  { %9485 = vmatprep.subr.bf16.mxu1 %v10494_v2 }
  0x72   :  { %9311 = vmatpush3.bf16.msra.mxu0 %v9539_v17 }
  0x73   :  { %2548 = vbcast.lane.b32.xlu1 %v10629_v8, 312  ;;  %2560 = vbcast.lane.b32.xlu0 %v10629_v8, 336 }
  0x74   :  { %9501 = vmatpush1.bf16.msra.mxu1 %v10660_v18  ;;  %9312 = vmatprep.subr.bf16.mxu0 %v16472_v1 }
  0x75   :  { %9486 = vmatprep.subr.bf16.mxu1 %v10494_v2 }
  0x76   :  { %9313 = vmatpush3.bf16.msra.mxu0 %v9541_v19 }
  0x77   :  { %2556 = vbcast.lane.b32.xlu1 %v10629_v8, 328  ;;  %2568 = vbcast.lane.b32.xlu0 %v10629_v8, 352 }
  0x78   :  { %9502 = vmatpush1.bf16.msra.mxu1 %v10667_v20  ;;  %9314 = vmatprep.subr.bf16.mxu0 %v16472_v1 }
  0x79   :  { %9487 = vmatprep.subr.bf16.mxu1 %v10494_v2 }
  0x7a   :  { %9315 = vmatpush3.bf16.msra.mxu0 %v9543_v22  ;;  %v9600_v22 = vld [vmem:[#allocation5 + $0x180] ss:$8 sps:$4 sm:$0xff]  }
  0x7b   :  { %2564 = vbcast.lane.b32.xlu1 %v10629_v8, 344  ;;  %2576 = vbcast.lane.b32.xlu0 %v10629_v8, 368 }
  0x7c   :  { %9503 = vmatpush1.bf16.msra.mxu1 %v10674_v23  ;;  %1096 = vmatprep.subr.bf16.mxu0 %v10494_v2 }
  0x7d   :  { %9488 = vmatprep.subr.bf16.mxu1 %v10494_v2  ;;  %9317 = vmatmul.mubr.bf16.vlgmr.msra.gmra.mrb[0].mxu0 %v223_v25  ;;  %v9603_v25 = vld [vmem:[#allocation5 + $0x194] ss:$8 sps:$4 sm:$0xff]  }
  0x7e   :  { %1097 = vmatpush1.bf16.msra.mxu0 %v10622_v6  ;;  %1128 = vmatprep.mubr.bf16.mxu0 %v9567_v28 }
  0x7f   :  { %2572 = vbcast.lane.b32.xlu1 %v10629_v8, 360  ;;  %2587 = vbcast.lane.b32.xlu0 %v10689_v27, 256 }
  0x80   :  { %9504 = vmatpush1.bf16.msra.mxu1 %v10684_v26  ;;  %1098 = vmatprep.subr.bf16.mxu0 %v10494_v2 }
  0x81   :  { %9489 = vmatprep.subr.bf16.mxu1 %v10494_v2 }
  0x82   :  { %1099 = vmatpush1.bf16.msra.mxu0 %v10633_v10 }
  0x83   :  { %2580 = vbcast.lane.b32.xlu1 %v10629_v8, 376  ;;  %2595 = vbcast.lane.b32.xlu0 %v10689_v27, 272 }
  0x84   :  { %9505 = vmatpush1.bf16.msra.mxu1 %v9546_v29  ;;  %1100 = vmatprep.subr.bf16.mxu0 %v10494_v2 }
  0x85   :  { %9490 = vmatprep.subr.bf16.mxu1 %v10494_v2 }
  0x86   :  { %1101 = vmatpush1.bf16.msra.mxu0 %v10639_v12  ;;  %v9611_v12 = vld [vmem:[#allocation5 + $0x70] ss:$8 sps:$4 sm:$0xff]  }
  0x87   :  { %2591 = vbcast.lane.b32.xlu1 %v10689_v27, 264  ;;  %2603 = vbcast.lane.b32.xlu0 %v10689_v27, 288 }
  0x88   :  { %9506 = vmatpush1.bf16.msra.mxu1 %v9547_v30  ;;  %1102 = vmatprep.subr.bf16.mxu0 %v10494_v2 }
  0x89   :  { %9491 = vmatprep.subr.bf16.mxu1 %v10494_v2 }
  0x8a   :  { %1103 = vmatpush1.bf16.msra.mxu0 %v10646_v14  ;;  %v10783_v14 = vsub.s32 4, %v10613_v3 }
  0x8b   :  { %2599 = vbcast.lane.b32.xlu1 %v10689_v27, 280  ;;  %2611 = vbcast.lane.b32.xlu0 %v10689_v27, 304 }
  0x8c   :  { %9507 = vmatpush1.bf16.msra.mxu1 %v9548_v31  ;;  %1104 = vmatprep.subr.bf16.mxu0 %v10494_v2  ;;  %16871 = vst [vmem:[#allocation24_spill] sm:$0xff] %v10783_v14  ;;  %v10794_v19 = vrot.slane %v10624_v7, %v10783_v14  ;;  %v9661_v14 = vld [vmem:[#allocation5 + $0x244] ss:$8 sps:$4 sm:$0xff]  }
  0x8d   :  { %9492 = vmatprep.subr.bf16.mxu1 %v10494_v2 }
  0x8e   :  { %1105 = vmatpush1.bf16.msra.mxu0 %v10653_v16  ;;  %v9597_v16 = vld [vmem:[#allocation5 + $0x184] ss:$8 sps:$4 sm:$0xff]  }
  0x8f   :  { %2607 = vbcast.lane.b32.xlu1 %v10689_v27, 296  ;;  %2619 = vbcast.lane.b32.xlu0 %v10689_v27, 320 }
  0x90   :  { %9508 = vmatpush1.bf16.msra.mxu1 %v9549_v32  ;;  %1106 = vmatprep.subr.bf16.mxu0 %v10494_v2 }
  0x91   :  { %9493 = vmatprep.subr.bf16.mxu1 %v10494_v2 }
  0x92   :  { %1107 = vmatpush1.bf16.msra.mxu0 %v10660_v18 }
  0x93   :  { %2615 = vbcast.lane.b32.xlu1 %v10689_v27, 312  ;;  %2627 = vbcast.lane.b32.xlu0 %v10689_v27, 336 }
  0x94   :  { %9509 = vmatpush1.bf16.msra.mxu1 %v9550_v33  ;;  %1108 = vmatprep.subr.bf16.mxu0 %v10494_v2 }
  0x95   :  { %9494 = vmatprep.subr.bf16.mxu1 %v10494_v2 }
  0x96   :  { %1109 = vmatpush1.bf16.msra.mxu0 %v10667_v20 }
  0x97   :  { %2623 = vbcast.lane.b32.xlu1 %v10689_v27, 328  ;;  %2635 = vbcast.lane.b32.xlu0 %v10689_v27, 352 }
  0x98   :  { %9510 = vmatpush1.bf16.msra.mxu1 %v9551_v34  ;;  %1110 = vmatprep.subr.bf16.mxu0 %v10494_v2 }
  0x99   :  { %9495 = vmatprep.subr.bf16.mxu1 %v10494_v2 }
  0x9a   :  { %1111 = vmatpush1.bf16.msra.mxu0 %v10674_v23  ;;  %v9601_v23 = vld [vmem:[#allocation5 + $0x64] ss:$8 sps:$4 sm:$0xff]  }
  0x9b   :  { %2631 = vbcast.lane.b32.xlu1 %v10689_v27, 344  ;;  %2643 = vbcast.lane.b32.xlu0 %v10689_v27, 368 }
  0x9c   :  { %9511 = vmatpush1.bf16.msra.mxu1 %v9552_v35  ;;  %1112 = vmatprep.subr.bf16.mxu0 %v10494_v2 }
  0x9e   :  { %1113 = vmatpush1.bf16.msra.mxu0 %v10684_v26 }
  0x9f   :  { %2639 = vbcast.lane.b32.xlu1 %v10689_v27, 360  ;;  %1249 = vmatmul.mubr.bf16.vlgmr.msra.gmra.mrb[0].mxu1 %v9553_v36 }
  0xa0   :  { %1114 = vmatprep.subr.bf16.mxu0 %v10494_v2  ;;  %1256 = vmatprep.mubr.bf16.mxu1 %v9556_v38  ;;  %v9612_v38 = vld [vmem:[#allocation5 + $0x1a0] ss:$8 sps:$4 sm:$0xff]  }
  0xa1   :  { %2654 = vbcast.lane.b32.xlu0 %v2652_v39, 256 }
  0xa2   :  { %1115 = vmatpush1.bf16.msra.mxu0 %v9546_v29 }
  0xa3   :  { %2647 = vbcast.lane.b32.xlu1 %v10689_v27, 376  ;;  %1116 = vmatprep.subr.bf16.mxu0 %v10494_v2 }
  0xa5   :  { %2662 = vbcast.lane.b32.xlu0 %v2652_v39, 272 }
  0xa6   :  { %1117 = vmatpush1.bf16.msra.mxu0 %v9547_v30  ;;  %v9606_v30 = vld [vmem:[#allocation5 + $0x190] ss:$8 sps:$4 sm:$0xff]  }
  0xa7   :  { %2658 = vbcast.lane.b32.xlu1 %v2652_v39, 264  ;;  %1257 = vmatmul.mubr.bf16.gmra.mrb[4].mxu1 %v9558_v40  ;;  %v9615_v40 = vld [vmem:[#allocation5 + $0x1b4] ss:$8 sps:$4 sm:$0xff]  }
  0xa8   :  { %1118 = vmatprep.subr.bf16.mxu0 %v10494_v2  ;;  %1264 = vmatprep.mubr.bf16.mxu1 %v9559_v41 }
  0xa9   :  { %2670 = vbcast.lane.b32.xlu0 %v2652_v39, 288 }
  0xaa   :  { %1119 = vmatpush1.bf16.msra.mxu0 %v9548_v31  ;;  %v9607_v31 = vld [vmem:[#allocation5 + $0x74] ss:$8 sps:$4 sm:$0xff]  }
  0xab   :  { %2666 = vbcast.lane.b32.xlu1 %v2652_v39, 280  ;;  %1120 = vmatprep.subr.bf16.mxu0 %v10494_v2 }
  0xad   :  { %2678 = vbcast.lane.b32.xlu0 %v2652_v39, 304 }
  0xae   :  { %1121 = vmatpush1.bf16.msra.mxu0 %v9549_v32  ;;  %v9609_v32 = vld [vmem:[#allocation5 + $0x1a4] ss:$8 sps:$4 sm:$0xff]  }
  0xaf   :  { %2674 = vbcast.lane.b32.xlu1 %v2652_v39, 296  ;;  %1265 = vmatmul.mubr.bf16.gmra.mrb[8].mxu1 %v9561_v42 }
  0xb0   :  { %1122 = vmatprep.subr.bf16.mxu0 %v10494_v2  ;;  %1272 = vmatprep.mubr.bf16.mxu1 %v9562_v43 }
  0xb1   :  { %2686 = vbcast.lane.b32.xlu0 %v2652_v39, 320 }
  0xb2   :  { %1123 = vmatpush1.bf16.msra.mxu0 %v9550_v33 }
  0xb3   :  { %2682 = vbcast.lane.b32.xlu1 %v2652_v39, 312  ;;  %1124 = vmatprep.subr.bf16.mxu0 %v10494_v2 }
  0xb5   :  { %2694 = vbcast.lane.b32.xlu0 %v2652_v39, 336 }
  0xb6   :  { %1125 = vmatpush1.bf16.msra.mxu0 %v9551_v34 }
  0xb7   :  { %2690 = vbcast.lane.b32.xlu1 %v2652_v39, 328  ;;  %1273 = vmatmul.mubr.bf16.gmra.mrb[12].mxu1 %v9564_v44 }
  0xb8   :  { %1126 = vmatprep.subr.bf16.mxu0 %v10494_v2  ;;  %1280 = vmatprep.mubr.bf16.mxu1 %v9568_v45  ;;  %v9589_v2 = vld [vmem:[#allocation5 + $0x44] ss:$8 sps:$4 sm:$0xff]   ;;  %v9617_v45 = vld [vmem:[#allocation5 + $0x80] ss:$8 sps:$4 sm:$0xff]  }
  0xb9   :  { %2702 = vbcast.lane.b32.xlu0 %v2652_v39, 352 }
  0xba   :  { %1127 = vmatpush1.bf16.msra.mxu0 %v9552_v35 }
  0xbb   :  { %2698 = vbcast.lane.b32.xlu1 %v2652_v39, 344  ;;  %9320 = vmatprep.subr.bf16.mxu0 %v16472_v1 }
  0xbd   :  { %2710 = vbcast.lane.b32.xlu0 %v2652_v39, 368  ;;  %1129 = vmatmul.mubr.bf16.vlgmr.msra.gmra.mrb[4].mxu0 %v9565_v46 }
  0xbe   :  { %1136 = vmatprep.mubr.bf16.mxu0 %v9571_v49  ;;  %9321 = vmatpush3.bf16.msra.mxu0 %v9565_v46  ;;  %v9618_v46 = vld [vmem:[#allocation5 + $0x1b0] ss:$8 sps:$4 sm:$0xff]   ;;  %v9619_v49 = vld [vmem:[#allocation5 + $0x94] ss:$8 sps:$4 sm:$0xff]  }
  0xbf   :  { %2706 = vbcast.lane.b32.xlu1 %v2652_v39, 360  ;;  %1281 = vmatmul.mubr.bf16.gmra.mrb[16].mxu1 %v9570_v47  ;;  %v10839_v47 = vsub.s32 5, %v10613_v3 }
  0xc0   :  { %1288 = vmatprep.mubr.bf16.mxu1 %v9573_v50  ;;  %9322 = vmatprep.subr.bf16.mxu0 %v16472_v1  ;;  %v9621_v50 = vld [vmem:[#allocation5 + $0x1c4] ss:$8 sps:$4 sm:$0xff]  }
  0xc1   :  { %2721 = vbcast.lane.b32.xlu0 %v10752_v51, 256  ;;  %16881 = vst [vmem:[#allocation34_spill] sm:$0xff] %v10839_v47 }
  0xc2   :  { %9323 = vmatpush3.bf16.msra.mxu0 %v9575_v52 }
  0xc3   :  { %2714 = vbcast.lane.b32.xlu1 %v2652_v39, 376  ;;  %9324 = vmatprep.subr.bf16.mxu0 %v16472_v1  ;;  %v9613_v39 = vld [vmem:[#allocation5 + $0x84] ss:$8 sps:$4 sm:$0xff]  }
  0xc5   :  { %2729 = vbcast.lane.b32.xlu0 %v10752_v51, 272  ;;  %1137 = vmatmul.mubr.bf16.gmra.mrb[8].mxu0 %v9575_v52 }
  0xc6   :  { %1144 = vmatprep.mubr.bf16.mxu0 %v9577_v54  ;;  %9325 = vmatpush3.bf16.msra.mxu0 %v9581_v56 }
  0xc7   :  { %2725 = vbcast.lane.b32.xlu1 %v10752_v51, 264  ;;  %1289 = vmatmul.mubr.bf16.gmra.mrb[20].mxu1 %v9576_v53  ;;  %v10849_v53 = vrot.slane %v10624_v7, %v10839_v47 }
  0xc8   :  { %1296 = vmatprep.mubr.bf16.mxu1 %v9579_v55  ;;  %9326 = vmatprep.subr.bf16.mxu0 %v16472_v1 }
  0xc9   :  { %2737 = vbcast.lane.b32.xlu0 %v10752_v51, 288 }
  0xca   :  { %9327 = vmatpush3.bf16.msra.mxu0 %v9587_v57 }
  0xcb   :  { %2733 = vbcast.lane.b32.xlu1 %v10752_v51, 280  ;;  %9328 = vmatprep.subr.bf16.mxu0 %v16472_v1 }
  0xcd   :  { %2745 = vbcast.lane.b32.xlu0 %v10752_v51, 304  ;;  %1145 = vmatmul.mubr.bf16.gmra.mrb[12].mxu0 %v9581_v56  ;;  %v9623_v56 = vld [vmem:[#allocation5 + $0x90] ss:$8 sps:$4 sm:$0xff]  }
  0xce   :  { %1152 = vmatprep.mubr.bf16.mxu0 %v9583_v59  ;;  %9329 = vmatpush3.bf16.msra.mxu0 %v9593_v61  ;;  %v9627_v59 = vld [vmem:[#allocation5 + $0x1d4] ss:$8 sps:$4 sm:$0xff]  }
  0xcf   :  { %2741 = vbcast.lane.b32.xlu1 %v10752_v51, 296  ;;  %1297 = vmatmul.mubr.bf16.gmra.mrb[24].mxu1 %v9582_v58  ;;  %v9625_v58 = vld [vmem:[#allocation5 + $0xa4] ss:$8 sps:$4 sm:$0xff]  }
  0xd0   :  { %1304 = vmatprep.mubr.bf16.mxu1 %v9585_v60  ;;  %9330 = vmatprep.subr.bf16.mxu0 %v16472_v1 }
  0xd1   :  { %2753 = vbcast.lane.b32.xlu0 %v10752_v51, 320 }
  0xd2   :  { %9331 = vmatpush3.bf16.msra.mxu0 %v9599_v62 }
  0xd3   :  { %2749 = vbcast.lane.b32.xlu1 %v10752_v51, 312  ;;  %9332 = vmatprep.subr.bf16.mxu0 %v16472_v1 }
  0xd5   :  { %v10768_v6 = vpop.permute.xlu1 %2524  ;;  %2761 = vbcast.lane.b32.xlu0 %v10752_v51, 336  ;;  %v10771_v8 = vpop.permute.xlu0 %2520  ;;  %1153 = vmatmul.mubr.bf16.gmra.mrb[16].mxu0 %v9587_v57  ;;  %v9624_v57 = vld [vmem:[#allocation5 + $0x1c0] ss:$8 sps:$4 sm:$0xff]  }
  0xd6   :  { %1160 = vmatprep.mubr.bf16.mxu0 %v9589_v2  ;;  %9333 = vmatpush3.bf16.msra.mxu0 %v9605_v9  ;;  %v9630_v2 = vld [vmem:[#allocation5 + $0x1d0] ss:$8 sps:$4 sm:$0xff]  }
  0xd7   :  { %2757 = vbcast.lane.b32.xlu1 %v10752_v51, 328  ;;  %1305 = vmatmul.mubr.bf16.gmra.mrb[28].mxu1 %v9588_v63  ;;  %v9629_v63 = vld [vmem:[#allocation5 + $0xa0] ss:$8 sps:$4 sm:$0xff]  }
  0xd8   :  { %1312 = vmatprep.mubr.bf16.mxu1 %v9591_v5  ;;  %9334 = vmatprep.subr.bf16.mxu0 %v16472_v1  ;;  %v9631_v5 = vld [vmem:[#allocation5 + $0xb4] ss:$8 sps:$4 sm:$0xff]  }
  0xd9   :  { %v10775_v10 = vpop.permute.xlu1 %2528  ;;  %2769 = vbcast.lane.b32.xlu0 %v10752_v51, 352  ;;  %v10778_v11 = vpop.permute.xlu0 %2536 }
  0xda   :  { %9335 = vmatpush3.bf16.msra.mxu0 %v9611_v12 }
  0xdb   :  { %2765 = vbcast.lane.b32.xlu1 %v10752_v51, 344  ;;  %9340 = vmatprep.subr.bf16.mxu0 %v16472_v1 }
  0xdd   :  { %v10785_v17 = vpop.permute.xlu1 %2532  ;;  %2777 = vbcast.lane.b32.xlu0 %v10752_v51, 368  ;;  %v10788_v18 = vpop.permute.xlu0 %2544  ;;  %1161 = vmatmul.mubr.bf16.gmra.mrb[20].mxu0 %v9593_v61 }
  0xde   :  { %1168 = vmatprep.mubr.bf16.mxu0 %v9595_v15 }
  0xdf   :  { %2773 = vbcast.lane.b32.xlu1 %v10752_v51, 360  ;;  %1313 = vmatmul.mubr.bf16.gmra.mrb[32].mxu1 %v9594_v13 }
  0xe0   :  { %1320 = vmatprep.mubr.bf16.mxu1 %v9597_v16  ;;  %v9635_v16 = vld [vmem:[#allocation5 + $0xb0] ss:$8 sps:$4 sm:$0xff]  }
  0xe1   :  { %v10796_v20 = vpop.permute.xlu1 %2540  ;;  %2788 = vbcast.lane.b32.xlu0 %v10794_v19, 256  ;;  %v10799_v21 = vpop.permute.xlu0 %2552 }
  0xe3   :  { %2781 = vbcast.lane.b32.xlu1 %v10752_v51, 376 }
  0xe5   :  { %v10802_v26 = vpop.permute.xlu1 %2548  ;;  %2796 = vbcast.lane.b32.xlu0 %v10794_v19, 272  ;;  %v10805_v27 = vpop.permute.xlu0 %2560  ;;  %1169 = vmatmul.mubr.bf16.gmra.mrb[24].mxu0 %v9599_v62 }
  0xe6   :  { %1176 = vmatprep.mubr.bf16.mxu0 %v9601_v23 }
  0xe7   :  { %2792 = vbcast.lane.b32.xlu1 %v10794_v19, 264  ;;  %1321 = vmatmul.mubr.bf16.gmra.mrb[36].mxu1 %v9600_v22  ;;  %v9637_v22 = vld [vmem:[#allocation5 + $0xc4] ss:$8 sps:$4 sm:$0xff]  }
  0xe8   :  { %1328 = vmatprep.mubr.bf16.mxu1 %v9603_v25  ;;  %v9639_v25 = vld [vmem:[#allocation5 + $0x1f4] ss:$8 sps:$4 sm:$0xff]  }
  0xe9   :  { %v10808_v28 = vpop.permute.xlu1 %2556  ;;  %2804 = vbcast.lane.b32.xlu0 %v10794_v19, 288  ;;  %v10811_v29 = vpop.permute.xlu0 %2568 }
  0xea   :  { %16872 = vst [vmem:[#allocation25_spill] sm:$0xff] %v10811_v29 }
  0xeb   :  { %2800 = vbcast.lane.b32.xlu1 %v10794_v19, 280 }
  0xed   :  { %v10814_v33 = vpop.permute.xlu1 %2564  ;;  %2812 = vbcast.lane.b32.xlu0 %v10794_v19, 304  ;;  %v10817_v34 = vpop.permute.xlu0 %2576  ;;  %1177 = vmatmul.mubr.bf16.gmra.mrb[28].mxu0 %v9605_v9  ;;  %v9633_v9 = vld [vmem:[#allocation5 + $0x1e4] ss:$8 sps:$4 sm:$0xff]  }
  0xee   :  { %16873 = vst [vmem:[#allocation26_spill] sm:$0xff] %v10814_v33  ;;  %16874 = vst [vmem:[#allocation27_spill] sm:$0xff] %v10817_v34  ;;  %1184 = vmatprep.mubr.bf16.mxu0 %v9607_v31 }
  0xef   :  { %2808 = vbcast.lane.b32.xlu1 %v10794_v19, 296  ;;  %1329 = vmatmul.mubr.bf16.gmra.mrb[40].mxu1 %v9606_v30 }
  0xf0   :  { %1336 = vmatprep.mubr.bf16.mxu1 %v9609_v32 }
  0xf1   :  { %v10820_v35 = vpop.permute.xlu1 %2572  ;;  %2820 = vbcast.lane.b32.xlu0 %v10794_v19, 320  ;;  %v10823_v36 = vpop.permute.xlu0 %2587 }
  0xf2   :  { %16875 = vst [vmem:[#allocation28_spill] sm:$0xff] %v10820_v35  ;;  %16876 = vst [vmem:[#allocation29_spill] sm:$0xff] %v10823_v36 }
  0xf3   :  { %2816 = vbcast.lane.b32.xlu1 %v10794_v19, 312 }
  0xf5   :  { %v10826_v41 = vpop.permute.xlu1 %2580  ;;  %2828 = vbcast.lane.b32.xlu0 %v10794_v19, 336  ;;  %v10829_v42 = vpop.permute.xlu0 %2595  ;;  %1185 = vmatmul.mubr.bf16.gmra.mrb[32].mxu0 %v9611_v12 }
  0xf6   :  { %16877 = vst [vmem:[#allocation30_spill] sm:$0xff] %v10826_v41  ;;  %16878 = vst [vmem:[#allocation31_spill] sm:$0xff] %v10829_v42  ;;  %1192 = vmatprep.mubr.bf16.mxu0 %v9613_v39  ;;  %v9642_v39 = vld [vmem:[#allocation5 + $0x1f0] ss:$8 sps:$4 sm:$0xff]  }
  0xf7   :  { %2824 = vbcast.lane.b32.xlu1 %v10794_v19, 328  ;;  %1337 = vmatmul.mubr.bf16.gmra.mrb[44].mxu1 %v9612_v38  ;;  %v9641_v38 = vld [vmem:[#allocation5 + $0xc0] ss:$8 sps:$4 sm:$0xff]  }
  0xf8   :  { %1344 = vmatprep.mubr.bf16.mxu1 %v9615_v40  ;;  %v10892_v40 = vsub.s32 6, %v10613_v3 }
  0xf9   :  { %v10832_v43 = vpop.permute.xlu1 %2591  ;;  %2836 = vbcast.lane.b32.xlu0 %v10794_v19, 352  ;;  %v10835_v44 = vpop.permute.xlu0 %2603 }
  0xfa   :  { %16879 = vst [vmem:[#allocation32_spill] sm:$0xff] %v10832_v43  ;;  %16880 = vst [vmem:[#allocation33_spill] sm:$0xff] %v10835_v44  ;;  %v9684_v43 = vld [vmem:[#allocation5 + $0x2b0] ss:$8 sps:$4 sm:$0xff]  }
  0xfb   :  { %2832 = vbcast.lane.b32.xlu1 %v10794_v19, 344  ;;  %16892 = vst [vmem:[#allocation45_spill] sm:$0xff] %v10892_v40 }
  0xfd   :  { %v10841_v51 = vpop.permute.xlu1 %2599  ;;  %2844 = vbcast.lane.b32.xlu0 %v10794_v19, 368  ;;  %v10844_v52 = vpop.permute.xlu0 %2611  ;;  %1193 = vmatmul.mubr.bf16.gmra.mrb[36].mxu0 %v9617_v45  ;;  %v9643_v45 = vld [vmem:[#allocation5 + $0xd4] ss:$8 sps:$4 sm:$0xff]  }
  0xfe   :  { %16882 = vst [vmem:[#allocation35_spill] sm:$0xff] %v10841_v51  ;;  %16883 = vst [vmem:[#allocation36_spill] sm:$0xff] %v10844_v52  ;;  %1200 = vmatprep.mubr.bf16.mxu0 %v9619_v49  ;;  %v9645_v49 = vld [vmem:[#allocation5 + $0x204] ss:$8 sps:$4 sm:$0xff]  }
  0xff   :  { %2840 = vbcast.lane.b32.xlu1 %v10794_v19, 360  ;;  %1345 = vmatmul.mubr.bf16.gmra.mrb[48].mxu1 %v9618_v46 }
 0x100   :  { %1352 = vmatprep.mubr.bf16.mxu1 %v9621_v50 }
 0x101   :  { %v10851_v54 = vpop.permute.xlu1 %2607  ;;  %2855 = vbcast.lane.b32.xlu0 %v10849_v53, 256  ;;  %v10854_v55 = vpop.permute.xlu0 %2619 }
 0x102   :  { %16884 = vst [vmem:[#allocation37_spill] sm:$0xff] %v10851_v54  ;;  %16885 = vst [vmem:[#allocation38_spill] sm:$0xff] %v10854_v55  ;;  %v9670_v54 = vld [vmem:[#allocation5 + $0x274] ss:$8 sps:$4 sm:$0xff]  }
 0x103   :  { %2848 = vbcast.lane.b32.xlu1 %v10794_v19, 376  ;;  %v9636_v19 = vld [vmem:[#allocation5 + $0x1e0] ss:$8 sps:$4 sm:$0xff]  }
 0x105   :  { %v10857_v60 = vpop.permute.xlu1 %2615  ;;  %2863 = vbcast.lane.b32.xlu0 %v10849_v53, 272  ;;  %v10860_v7 = vpop.permute.xlu0 %2627  ;;  %1201 = vmatmul.mubr.bf16.gmra.mrb[40].mxu0 %v9623_v56  ;;  %v10259_v56 = vld [vmem:[#allocation7] sm:$0xff] }
 0x106   :  { %16886 = vst [vmem:[#allocation39_spill] sm:$0xff] %v10857_v60  ;;  %16887 = vst [vmem:[#allocation40_spill] sm:$0xff] %v10860_v7  ;;  %1208 = vmatprep.mubr.bf16.mxu0 %v9625_v58  ;;  %v9667_v7 = vld [vmem:[#allocation5 + $0x264] ss:$8 sps:$4 sm:$0xff]   ;;  %v9669_v60 = vld [vmem:[#allocation5 + $0x260] ss:$8 sps:$4 sm:$0xff]  }
 0x107   :  { %2859 = vbcast.lane.b32.xlu1 %v10849_v53, 264  ;;  %1353 = vmatmul.mubr.bf16.gmra.mrb[52].mxu1 %v9624_v57  ;;  %v2920_v57 = vrot.slane %v10259_v56, %v10892_v40 }
 0x108   :  { %1360 = vmatprep.mubr.bf16.mxu1 %v9627_v59 }
 0x109   :  { %v10863_v61 = vpop.permute.xlu1 %2623  ;;  %2871 = vbcast.lane.b32.xlu0 %v10849_v53, 288  ;;  %v10866_v62 = vpop.permute.xlu0 %2635 }
 0x10a   :  { %16888 = vst [vmem:[#allocation41_spill] sm:$0xff] %v10863_v61  ;;  %16889 = vst [vmem:[#allocation42_spill] sm:$0xff] %v10866_v62  ;;  %v9664_v62 = vld [vmem:[#allocation5 + $0x254] ss:$8 sps:$4 sm:$0xff]  }
 0x10b   :  { %2867 = vbcast.lane.b32.xlu1 %v10849_v53, 280 }
 0x10d   :  { %v10869_v12 = vpop.permute.xlu1 %2631  ;;  %2879 = vbcast.lane.b32.xlu0 %v10849_v53, 304  ;;  %v10872_v13 = vpop.permute.xlu0 %2643  ;;  %1209 = vmatmul.mubr.bf16.gmra.mrb[44].mxu0 %v9629_v63  ;;  %v9647_v63 = vld [vmem:[#allocation5 + $0xd0] ss:$8 sps:$4 sm:$0xff]  }
 0x10e   :  { %16890 = vst [vmem:[#allocation43_spill] sm:$0xff] %v10869_v12  ;;  %1216 = vmatprep.mubr.bf16.mxu0 %v9631_v5  ;;  %v9649_v5 = vld [vmem:[#allocation5 + $0xe4] ss:$8 sps:$4 sm:$0xff]  }
 0x10f   :  { %2875 = vbcast.lane.b32.xlu1 %v10849_v53, 296  ;;  %1361 = vmatmul.mubr.bf16.gmra.mrb[56].mxu1 %v9630_v2  ;;  %v9648_v2 = vld [vmem:[#allocation5 + $0x200] ss:$8 sps:$4 sm:$0xff]  }
 0x110   :  { %1368 = vmatprep.mubr.bf16.mxu1 %v9633_v9 }
 0x111   :  { %v10875_v15 = vpop.permute.xlu1 %2639  ;;  %2887 = vbcast.lane.b32.xlu0 %v10849_v53, 320 }
 0x112   :  { %16891 = vst [vmem:[#allocation44_spill] sm:$0xff] %v10875_v15 }
 0x113   :  { %2883 = vbcast.lane.b32.xlu1 %v10849_v53, 312  ;;  %v10879_v23 = vpop.permute.xlu0 %2654 }
 0x115   :  { %v10881_v30 = vpop.permute.xlu1 %2647  ;;  %2895 = vbcast.lane.b32.xlu0 %v10849_v53, 336  ;;  %1217 = vmatmul.mubr.bf16.gmra.mrb[48].mxu0 %v9635_v16  ;;  %v9651_v16 = vld [vmem:[#allocation5 + $0x214] ss:$8 sps:$4 sm:$0xff]  }
 0x116   :  { %1224 = vmatprep.mubr.bf16.mxu0 %v9637_v22 }
 0x117   :  { %2891 = vbcast.lane.b32.xlu1 %v10849_v53, 328  ;;  %1369 = vmatmul.mubr.bf16.gmra.mrb[60].mxu1 %v9636_v19  ;;  %v10885_v31 = vpop.permute.xlu0 %2662 }
 0x118   :  { %1376 = vmatprep.mubr.bf16.mxu1 %v9639_v25 }
 0x119   :  { %v10887_v32 = vpop.permute.xlu1 %2658  ;;  %2903 = vbcast.lane.b32.xlu0 %v10849_v53, 352 }
 0x11b   :  { %2899 = vbcast.lane.b32.xlu1 %v10849_v53, 344  ;;  %v10894_v46 = vpop.permute.xlu0 %2670 }
 0x11d   :  { %v10896_v50 = vpop.permute.xlu1 %2666  ;;  %2911 = vbcast.lane.b32.xlu0 %v10849_v53, 368  ;;  %1225 = vmatmul.mubr.bf16.gmra.mrb[52].mxu0 %v9641_v38  ;;  %v9654_v38 = vld [vmem:[#allocation5 + $0x210] ss:$8 sps:$4 sm:$0xff]  }
 0x11e   :  { %1232 = vmatprep.mubr.bf16.mxu0 %v9643_v45  ;;  %v9655_v45 = vld [vmem:[#allocation5 + $0x224] ss:$8 sps:$4 sm:$0xff]  }
 0x11f   :  { %2907 = vbcast.lane.b32.xlu1 %v10849_v53, 360  ;;  %1377 = vmatmul.mubr.bf16.gmra.mrb[64].mxu1 %v9642_v39  ;;  %v10901_v58 = vpop.permute.xlu0 %2678 }
 0x120   :  { %1384 = vmatprep.mubr.bf16.mxu1 %v9645_v49 }
 0x121   :  { %v10903_v59 = vpop.permute.xlu1 %2674  ;;  %2922 = vbcast.lane.b32.xlu0 %v2920_v57, 256 }
 0x123   :  { %2915 = vbcast.lane.b32.xlu1 %v10849_v53, 376  ;;  %v10906_v9 = vpop.permute.xlu0 %2686  ;;  %v9653_v53 = vld [vmem:[#allocation5 + $0xe0] ss:$8 sps:$4 sm:$0xff]  }
 0x125   :  { %v10908_v19 = vpop.permute.xlu1 %2682  ;;  %2930 = vbcast.lane.b32.xlu0 %v2920_v57, 272  ;;  %1233 = vmatmul.mubr.bf16.gmra.mrb[56].mxu0 %v9647_v63 }
 0x126   :  { %1240 = vmatprep.mubr.bf16.mxu0 %v9649_v5  ;;  %v9657_v5 = vld [vmem:[#allocation5 + $0x220] ss:$8 sps:$4 sm:$0xff]  }
 0x127   :  { %2926 = vbcast.lane.b32.xlu1 %v2920_v57, 264  ;;  %1385 = vmatmul.mubr.bf16.gmra.mrb[68].mxu1 %v9648_v2  ;;  %v10910_v22 = vpop.permute.xlu0 %2694 }
 0x128   :  { %1392 = vmatprep.mubr.bf16.mxu1 %v9651_v16 }
 0x129   :  { %v10912_v25 = vpop.permute.xlu1 %2690  ;;  %2938 = vbcast.lane.b32.xlu0 %v2920_v57, 288 }
 0x12b   :  { %2934 = vbcast.lane.b32.xlu1 %v2920_v57, 280  ;;  %v10914_v39 = vpop.permute.xlu0 %2702 }
 0x12d   :  { %v10916_v49 = vpop.permute.xlu1 %2698  ;;  %2946 = vbcast.lane.b32.xlu0 %v2920_v57, 304  ;;  %1241 = vmatmul.mubr.bf16.gmra.mrb[60].mxu0 %v9653_v53 }
 0x12e   :  { %9336 = vmatprep.mubr.msk.bf16.mxu0 %vm16619_vm0, %v16472_v1  ;;  %v10933_v1 = vsub.s32 7, %v10613_v3  ;;  %vm16621_vm0 = vcmask 1041409  }
 0x12f   :  { %2942 = vbcast.lane.b32.xlu1 %v2920_v57, 296  ;;  %1393 = vmatmul.mubr.bf16.gmra.mrb[72].mxu1 %v9654_v38  ;;  %v10918_v63 = vpop.permute.xlu0 %2710 }
 0x130   :  { %1400 = vmatprep.mubr.bf16.mxu1 %v9655_v45  ;;  %v9660_v45 = vld [vmem:[#allocation5 + $0x230] ss:$8 sps:$4 sm:$0xff]   ;;  %16895 = vst [vmem:[#allocation48_spill] sm:$0xff] %v10933_v1 }
 0x131   :  { %v10922_v2 = vpop.permute.xlu1 %2706  ;;  %2954 = vbcast.lane.b32.xlu0 %v2920_v57, 320 }
 0x133   :  { %2950 = vbcast.lane.b32.xlu1 %v2920_v57, 312  ;;  %v10924_v16 = vpop.permute.xlu0 %2721 }
 0x135   :  { %v10926_v40 = vpop.permute.xlu1 %2714  ;;  %2962 = vbcast.lane.b32.xlu0 %v2920_v57, 336 }
 0x137   :  { %2958 = vbcast.lane.b32.xlu1 %v2920_v57, 328  ;;  %1401 = vmatmul.mubr.bf16.gmra.mrb[76].mxu1 %v9657_v5  ;;  %v10928_v53 = vpop.permute.xlu0 %2729  ;;  %v10940_v5 = vrot.slane %v10259_v56, %v10933_v1  ;;  %v9666_v1 = vld [vmem:[#allocation5 + $0x250] ss:$8 sps:$4 sm:$0xff]  }
 0x138   :  { %16893 = vst [vmem:[#allocation46_spill] sm:$0xff] %v10928_v53  ;;  %1408 = vmatprep.mubr.bf16.mxu1 %v9658_v0 }
 0x139   :  { %v10930_v38 = vpop.permute.xlu1 %2725  ;;  %2970 = vbcast.lane.b32.xlu0 %v2920_v57, 352 }
 0x13a   :  { %16894 = vst [vmem:[#allocation47_spill] sm:$0xff] %v10930_v38 }
 0x13b   :  { %2966 = vbcast.lane.b32.xlu1 %v2920_v57, 344  ;;  %v10935_v47 = vpop.permute.xlu0 %2737 }
 0x13c   :  { %16896 = vst [vmem:[#allocation49_spill] sm:$0xff] %v10935_v47 }
 0x13d   :  { %v10937_v48 = vpop.permute.xlu1 %2733  ;;  %2978 = vbcast.lane.b32.xlu0 %v2920_v57, 368 }
 0x13e   :  { %16897 = vst [vmem:[#allocation50_spill] sm:$0xff] %v10937_v48 }
 0x13f   :  { %2974 = vbcast.lane.b32.xlu1 %v2920_v57, 360  ;;  %1409 = vmatmul.mubr.bf16.gmra.mrb[80].mxu1 %v9660_v45  ;;  %v10942_v0 = vpop.permute.xlu0 %2745 }
 0x140   :  { %16898 = vst [vmem:[#allocation51_spill] sm:$0xff] %v10942_v0  ;;  %1416 = vmatprep.mubr.bf16.mxu1 %v9661_v14 }
 0x141   :  { %v10944_v37 = vpop.permute.xlu1 %2741  ;;  %2989 = vbcast.lane.b32.xlu0 %v10940_v5, 256 }
 0x142   :  { %16899 = vst [vmem:[#allocation52_spill] sm:$0xff] %v10944_v37 }
 0x143   :  { %2982 = vbcast.lane.b32.xlu1 %v2920_v57, 376  ;;  %v10947_v15 = vpop.permute.xlu0 %2753  ;;  %v10496_v57 = vmov 1966171168  }
 0x144   :  { %16900 = vst [vmem:[#allocation53_spill] sm:$0xff] %v10947_v15  ;;  %v1644_v45 = vunpack.c.l.s4 %v10496_v57 }
 0x145   :  { %v10949_v12 = vpop.permute.xlu1 %2749  ;;  %2997 = vbcast.lane.b32.xlu0 %v10940_v5, 272 }
 0x146   :  { %16901 = vst [vmem:[#allocation54_spill] sm:$0xff] %v10949_v12 }
 0x147   :  { %2993 = vbcast.lane.b32.xlu1 %v10940_v5, 264  ;;  %1417 = vmatmul.mubr.bf16.gmra.mrb[84].mxu1 %v9663_v24  ;;  %v10953_v56 = vpop.permute.xlu0 %2761  ;;  %v1645_v24 = vunpack.c.0.s8 %v1644_v45 }
 0x148   :  { %16902 = vst [vmem:[#allocation55_spill] sm:$0xff] %v10953_v56  ;;  %1424 = vmatprep.mubr.bf16.mxu1 %v9664_v62 }
 0x149   :  { %v10955_v14 = vpop.permute.xlu1 %2757  ;;  %3005 = vbcast.lane.b32.xlu0 %v10940_v5, 288 }
 0x14a   :  { %16903 = vst [vmem:[#allocation56_spill] sm:$0xff] %v10955_v14 }
 0x14b   :  { %3001 = vbcast.lane.b32.xlu1 %v10940_v5, 280  ;;  %v10959_v15 = vpop.permute.xlu0 %2769 }
 0x14c   :  { %16904 = vst [vmem:[#allocation57_spill] sm:$0xff] %v10959_v15  ;;  %v1648_v15 = vsub.s32 %v1645_v24, %v10613_v3  ;;  %v9672_v24 = vld [vmem:[#allocation5 + $0x270] ss:$8 sps:$4 sm:$0xff]  }
 0x14d   :  { %v10961_v61 = vpop.permute.xlu1 %2765  ;;  %3013 = vbcast.lane.b32.xlu0 %v10940_v5, 304 }
 0x14e   :  { %16905 = vst [vmem:[#allocation58_spill] sm:$0xff] %v10961_v61 }
 0x14f   :  { %3009 = vbcast.lane.b32.xlu1 %v10940_v5, 296  ;;  %1425 = vmatmul.mubr.bf16.gmra.mrb[88].mxu1 %v9666_v1  ;;  %v10965_v62 = vpop.permute.xlu0 %2777 }
 0x150   :  { %16906 = vst [vmem:[#allocation59_spill] sm:$0xff] %v10965_v62  ;;  %1432 = vmatprep.mubr.bf16.mxu1 %v9667_v7  ;;  %v322_v14 = vpop.f32.mrb[0].mxu0 }
 0x151   :  { %v10967_v56 = vpop.permute.xlu1 %2773  ;;  %3021 = vbcast.lane.b32.xlu0 %v10940_v5, 320  ;;  %v1642_v57 = vcombine.high %v322_v14, %v322_v14  ;;  %v9318_v61 = vpop.f32.mrb[1].mxu0 }
 0x152   :  { %16907 = vst [vmem:[#allocation60_spill] sm:$0xff] %v10967_v56  ;;  %v325_v55 = vpop.f32.mrb[2].mxu0 }
 0x153   :  { %3017 = vbcast.lane.b32.xlu1 %v10940_v5, 312  ;;  %v10972_v52 = vpop.permute.xlu0 %2788  ;;  %v1656_v45 = vrot.slane %v1642_v57, %v1648_v15  ;;  %v9319_v1 = vpop.f32.mrb[3].mxu0 }
 0x154   :  { %16908 = vst [vmem:[#allocation61_spill] sm:$0xff] %v10972_v52  ;;  %v9673_v1 = vld [vmem:[#allocation5 + $0x284] ss:$8 sps:$4 sm:$0xff]   ;;  %v1649_v52 = vrot.slane %v322_v14, %v1648_v15 }
 0x155   :  { %v10974_v62 = vpop.permute.xlu1 %2781  ;;  %3029 = vbcast.lane.b32.xlu0 %v10940_v5, 336  ;;  %v1658_v7 = vcombine.high %v1656_v45, %v1656_v45  ;;  %v10977_v56 = vrot.slane %v1656_v45, %v1648_v15 }
 0x156   :  { %16909 = vst [vmem:[#allocation62_spill] sm:$0xff] %v10974_v62 }
 0x157   :  { %3025 = vbcast.lane.b32.xlu1 %v10940_v5, 328  ;;  %1433 = vmatmul.mubr.bf16.gmra.mrb[92].mxu1 %v9669_v60  ;;  %v10980_v44 = vpop.permute.xlu0 %2796  ;;  %v10982_v61 = vrot.slane %v1658_v7, %v1648_v15  ;;  %v9675_v7 = vld [vmem:[#allocation5 + $0x280] ss:$8 sps:$4 sm:$0xff]  }
 0x158   :  { %16910 = vst [vmem:[#allocation63_spill] sm:$0xff] %v10980_v44  ;;  %1440 = vmatprep.mubr.bf16.mxu1 %v9670_v54  ;;  %v9676_v44 = vld [vmem:[#allocation5 + $0x294] ss:$8 sps:$4 sm:$0xff]  }
 0x159   :  { %v10984_v55 = vpop.permute.xlu1 %2792  ;;  %3037 = vbcast.lane.b32.xlu0 %v10940_v5, 352 }
 0x15a   :  { %16911 = vst [vmem:[#allocation64_spill] sm:$0xff] %v10984_v55 }
 0x15b   :  { %3033 = vbcast.lane.b32.xlu1 %v10940_v5, 344  ;;  %v10988_v57 = vpop.permute.xlu0 %2804 }
 0x15c   :  { %16912 = vst [vmem:[#allocation65_spill] sm:$0xff] %v10988_v57 }
 0x15d   :  { %v10990_v45 = vpop.permute.xlu1 %2800  ;;  %3045 = vbcast.lane.b32.xlu0 %v10940_v5, 368 }
 0x15e   :  { %16913 = vst [vmem:[#allocation66_spill] sm:$0xff] %v10990_v45 }
 0x15f   :  { %3041 = vbcast.lane.b32.xlu1 %v10940_v5, 360  ;;  %1441 = vmatmul.mubr.bf16.gmra.mrb[96].mxu1 %v9672_v24  ;;  %v10994_v60 = vpop.permute.xlu0 %2812  ;;  %v1657_v24 = vcombine.high %v1649_v52, %v1649_v52 }
 0x160   :  { %16914 = vst [vmem:[#allocation67_spill] sm:$0xff] %v10994_v60  ;;  %1448 = vmatprep.mubr.bf16.mxu1 %v9673_v1  ;;  %v9678_v60 = vld [vmem:[#allocation5 + $0x290] ss:$8 sps:$4 sm:$0xff]   ;;  %v9679_v1 = vld [vmem:[#allocation5 + $0x2a4] ss:$8 sps:$4 sm:$0xff]  }
 0x161   :  { %v10996_v54 = vpop.permute.xlu1 %2808 }
 0x162   :  { %16915 = vst [vmem:[#allocation68_spill] sm:$0xff] %v10996_v54  ;;  %v11009_v54 = vrot.slane %v1657_v24, %v1648_v15 }
 0x163   :  { %3049 = vbcast.lane.b32.xlu1 %v10940_v5, 376  ;;  %v10999_v3 = vpop.permute.xlu0 %2820 }
 0x164   :  { %16916 = vst [vmem:[#allocation69_spill] sm:$0xff] %v10999_v3  ;;  %v11013_v3 = vrot.slane %v1649_v52, %v1648_v15  ;;  %v11017_v14 = vrot.slane %v11009_v54, %v10620_v4  ;;  %v9682_v15 = vld [vmem:[#allocation5 + $0x2b4] ss:$8 sps:$4 sm:$0xff]  }
 0x165   :  { %v11001_v57 = vpop.permute.xlu1 %2816 }
 0x166   :  { %16917 = vst [vmem:[#allocation70_spill] sm:$0xff] %v11001_v57 }
 0x167   :  { %1449 = vmatmul.mubr.bf16.gmra.mrb[100].mxu1 %v9675_v7  ;;  %v11003_v45 = vpop.permute.xlu0 %2828  ;;  %v11022_v7 = vld [vmem:[%s16465_s5] ss:$0 sm:$0xff] }
 0x168   :  { %16918 = vst [vmem:[#allocation71_spill] sm:$0xff] %v11003_v45  ;;  %1456 = vmatprep.mubr.bf16.mxu1 %v9676_v44 }
 0x169   :  { %v11005_v55 = vpop.permute.xlu1 %2824 }
 0x16a   :  { %16919 = vst [vmem:[#allocation72_spill] sm:$0xff] %v11005_v55 }
 0x16b   :  { %v11007_v62 = vpop.permute.xlu0 %2836 }
 0x16c   :  { %16920 = vst [vmem:[#allocation73_spill] sm:$0xff] %v11007_v62 }
 0x16d   :  { %v11011_v5 = vpop.permute.xlu1 %2832 }
 0x16e   :  { %16921 = vst [vmem:[#allocation74_spill] sm:$0xff] %v11011_v5  ;;  %v9681_v5 = vld [vmem:[#allocation5 + $0x2a0] ss:$8 sps:$4 sm:$0xff]  }
 0x16f   :  { %1457 = vmatmul.mubr.bf16.gmra.mrb[104].mxu1 %v9678_v60  ;;  %v11024_v45 = vpop.permute.xlu0 %2844 }
 0x170   :  { %1464 = vmatprep.mubr.bf16.mxu1 %v9679_v1  ;;  %16922 = vst [vmem:[#allocation75_spill] sm:$0xff] %v11024_v45  ;;  %v1687_v1 = vcombine.high %v11013_v3, %v11013_v3 }
 0x171   :  { %v11027_v60 = vpop.permute.xlu1 %2840 }
 0x172   :  { %v1250_v44 = vpop.f32.mrb[0].mxu1  ;;  %16923 = vst [vmem:[#allocation76_spill] sm:$0xff] %v11027_v60 }
 0x173   :  { %v1761_v24 = vadd.f32 %v11017_v14, %v1250_v44  ;;  %v1252_v62 = vpop.f32.mrb[1].mxu1  ;;  %v11034_v44 = vpop.permute.xlu0 %2855 }
 0x174   :  { %v1253_v52 = vpop.f32.mrb[2].mxu1  ;;  %16924 = vst [vmem:[#allocation77_spill] sm:$0xff] %v11034_v44  ;;  %v11037_v62 = vrot.slane %v1687_v1, %v10620_v4  ;;  %v9687_v44 = vld [vmem:[#allocation5 + $0x2c0] ss:$8 sps:$4 sm:$0xff]  }
 0x175   :  { %v1896_v55 = vadd.f32 %v11022_v7, %v1761_v24  ;;  %v1762_v57 = vadd.f32 %v11017_v14, %v1253_v52  ;;  %v1255_v51 = vpop.f32.mrb[3].mxu1  ;;  %v11039_v45 = vpop.permute.xlu1 %2848 }
 0x176   :  { %16925 = vst [vmem:[#allocation78_spill] sm:$0xff] %v11039_v45  ;;  %v9685_v51 = vld [vmem:[#allocation5 + $0x2c4] ss:$8 sps:$4 sm:$0xff]   ;;  %v9688_v45 = vld [vmem:[#allocation5 + $0x2d4] ss:$8 sps:$4 sm:$0xff]  }
 0x177   :  { %9745 = vtanh.f32 %v1896_v55  ;;  %v1897_v42 = vadd.f32 %v11022_v7, %v1762_v57  ;;  %1465 = vmatmul.mubr.bf16.gmra.mrb[108].mxu1 %v9681_v5 }
 0x178   :  { %1472 = vmatprep.mubr.bf16.mxu1 %v9682_v15  ;;  %v11044_v15 = vpop.permute.xlu0 %2863 }
 0x179   :  { %9747 = vtanh.f32 %v1897_v42  ;;  %16926 = vst [vmem:[#allocation79_spill] sm:$0xff] %v11044_v15  ;;  %v11050_v42 = vld [vmem:[%s16466_s6] ss:$0 sm:$0xff] }
 0x17a   :  { %v1258_v60 = vpop.f32.mrb[4].mxu1 }
 0x17b   :  { %v1763_v12 = vadd.f32 %v11037_v62, %v1258_v60  ;;  %v1260_v24 = vpop.f32.mrb[5].mxu1  ;;  %v11052_v60 = vpop.permute.xlu1 %2859 }
 0x17c   :  { %v1261_v52 = vpop.f32.mrb[6].mxu1  ;;  %16927 = vst [vmem:[#allocation80_spill] sm:$0xff] %v11052_v60  ;;  %v11057_v0 = vpop.permute.xlu0 %2871 }
 0x17d   :  { %v1898_v55 = vadd.f32 %v11022_v7, %v1763_v12  ;;  %v1764_v57 = vadd.f32 %v11037_v62, %v1261_v52  ;;  %v1263_v5 = vpop.f32.mrb[7].mxu1  ;;  %16928 = vst [vmem:[#allocation81_spill] sm:$0xff] %v11057_v0 }
 0x17f   :  { %9749 = vtanh.f32 %v1898_v55  ;;  %v1899_v1 = vadd.f32 %v11022_v7, %v1764_v57  ;;  %1473 = vmatmul.mubr.bf16.gmra.mrb[112].mxu1 %v9684_v43  ;;  %v11061_v36 = vpop.permute.xlu1 %2867 }
 0x180   :  { %1480 = vmatprep.mubr.bf16.mxu1 %v9685_v51  ;;  %16929 = vst [vmem:[#allocation82_spill] sm:$0xff] %v11061_v36 }
 0x181   :  { %v9746_v24 = vpop.eup %9745  ;;  %9751 = vtanh.f32 %v1899_v1 }
 0x182   :  { %v1266_v12 = vpop.f32.mrb[8].mxu1  ;;  %v2159_v52 = vmul.f32 %v9746_v24, %v11050_v42 }
 0x183   :  { %v9748_v5 = vpop.eup %9747  ;;  %v1765_v15 = vadd.f32 %v11037_v62, %v1266_v12  ;;  %v1268_v55 = vpop.f32.mrb[9].mxu1 }
 0x184   :  { %2317 = vadd.xlane.f32.xlu0 %v2159_v52  ;;  %v1269_v43 = vpop.f32.mrb[10].mxu1  ;;  %v2160_v57 = vmul.f32 %v9748_v5, %v11050_v42  ;;  %v11065_v55 = vpop.permute.xlu0 %2879 }
 0x185   :  { %v1900_v60 = vadd.f32 %v11022_v7, %v1765_v15  ;;  %v1766_v51 = vadd.f32 %v11037_v62, %v1269_v43  ;;  %v1271_v1 = vpop.f32.mrb[11].mxu1  ;;  %16930 = vst [vmem:[#allocation83_spill] sm:$0xff] %v11065_v55  ;;  %v11068_v37 = vpop.permute.xlu1 %2875 }
 0x186   :  { %v9690_v1 = vld [vmem:[#allocation5 + $0x2d0] ss:$8 sps:$4 sm:$0xff]   ;;  %16931 = vst [vmem:[#allocation84_spill] sm:$0xff] %v11068_v37  ;;  %v9693_v37 = vld [vmem:[#allocation5 + $0x2e0] ss:$8 sps:$4 sm:$0xff]  }
 0x187   :  { %2319 = vadd.xlane.f32.xlu1 %v2160_v57  ;;  %9753 = vtanh.f32 %v1900_v60  ;;  %v1901_v24 = vadd.f32 %v11022_v7, %v1766_v51  ;;  %1481 = vmatmul.mubr.bf16.gmra.mrb[116].mxu1 %v9687_v44  ;;  %v9691_v44 = vld [vmem:[#allocation5 + $0x2e4] ss:$8 sps:$4 sm:$0xff]  }
 0x188   :  { %1488 = vmatprep.mubr.bf16.mxu1 %v9688_v45 }
 0x189   :  { %v9750_v12 = vpop.eup %9749  ;;  %9755 = vtanh.f32 %v1901_v24  ;;  %v11080_v55 = vpop.permute.xlu1 %2883 }
 0x18a   :  { %v1274_v52 = vpop.f32.mrb[12].mxu1  ;;  %v2161_v5 = vmul.f32 %v9750_v12, %v11050_v42  ;;  %16933 = vst [vmem:[#allocation86_spill] sm:$0xff] %v11080_v55 }
 0x18b   :  { %v9752_v0 = vpop.eup %9751  ;;  %v1767_v15 = vadd.f32 %v11037_v62, %v1274_v52  ;;  %v1276_v43 = vpop.f32.mrb[13].mxu1  ;;  %v11076_v52 = vrot.slane %v11013_v3, %v10620_v4 }
 0x18c   :  { %2321 = vadd.xlane.f32.xlu0 %v2161_v5  ;;  %v1277_v60 = vpop.f32.mrb[14].mxu1  ;;  %v2162_v57 = vmul.f32 %v9752_v0, %v11050_v42  ;;  %v11078_v5 = vpop.permute.xlu0 %2887 }
 0x18d   :  { %v1902_v45 = vadd.f32 %v11022_v7, %v1767_v15  ;;  %v1768_v51 = vadd.f32 %v11037_v62, %v1277_v60  ;;  %v1279_v24 = vpop.f32.mrb[15].mxu1  ;;  %16932 = vst [vmem:[#allocation85_spill] sm:$0xff] %v11078_v5 }
 0x18e   :  { %2323 = vadd.xlane.f32.xlu1 %v2162_v57 }
 0x18f   :  { %9757 = vtanh.f32 %v1902_v45  ;;  %v1903_v12 = vadd.f32 %v11022_v7, %v1768_v51  ;;  %1489 = vmatmul.mubr.bf16.gmra.mrb[120].mxu1 %v9690_v1 }
 0x190   :  { %1496 = vmatprep.mubr.bf16.mxu1 %v9691_v44  ;;  %v1130_v0 = vpop.f32.mrb[4].mxu0 }
 0x191   :  { %v9754_v43 = vpop.eup %9753  ;;  %9759 = vtanh.f32 %v1903_v12  ;;  %v1731_v15 = vadd.f32 %v11076_v52, %v1130_v0  ;;  %v1132_v57 = vpop.f32.mrb[5].mxu0  ;;  %v9694_v0 = vld [vmem:[#allocation5 + $0x2f4] ss:$8 sps:$4 sm:$0xff]  }
 0x192   :  { %v1282_v60 = vpop.f32.mrb[16].mxu1  ;;  %v2163_v45 = vmul.f32 %v9754_v43, %v11050_v42  ;;  %v1133_v3 = vpop.f32.mrb[6].mxu0 }
 0x193   :  { %v9756_v51 = vpop.eup %9755  ;;  %v1769_v1 = vadd.f32 %v11037_v62, %v1282_v60  ;;  %v1284_v24 = vpop.f32.mrb[17].mxu1  ;;  %v1866_v44 = vadd.f32 %v11022_v7, %v1731_v15  ;;  %v1732_v12 = vadd.f32 %v11076_v52, %v1133_v3 }
 0x194   :  { %2325 = vadd.xlane.f32.xlu0 %v2163_v45  ;;  %v1285_v5 = vpop.f32.mrb[18].mxu1  ;;  %v1135_v36 = vpop.f32.mrb[7].mxu0  ;;  %v2164_v55 = vmul.f32 %v9756_v51, %v11050_v42 }
 0x195   :  { %v1904_v57 = vadd.f32 %v11022_v7, %v1769_v1  ;;  %v1770_v43 = vadd.f32 %v11037_v62, %v1285_v5  ;;  %v1287_v41 = vpop.f32.mrb[19].mxu1  ;;  %9761 = vtanh.f32 %v1866_v44  ;;  %v1867_v15 = vadd.f32 %v11022_v7, %v1732_v12  ;;  %v11092_v45 = vpop.permute.xlu0 %2895  ;;  %v9696_v12 = vld [vmem:[#allocation5 + $0x2f0] ss:$8 sps:$4 sm:$0xff]  }
 0x196   :  { %2327 = vadd.xlane.f32.xlu1 %v2164_v55  ;;  %16934 = vst [vmem:[#allocation87_spill] sm:$0xff] %v11092_v45  ;;  %v11094_v51 = vpop.permute.xlu1 %2891 }
 0x197   :  { %v1905_v60 = vadd.f32 %v11022_v7, %v1770_v43  ;;  %1497 = vmatmul.mubr.bf16.gmra.mrb[124].mxu1 %v9693_v37  ;;  %9763 = vtanh.f32 %v1904_v57  ;;  %16935 = vst [vmem:[#allocation88_spill] sm:$0xff] %v11094_v51  ;;  %v9697_v51 = vld [vmem:[#allocation5 + $0x304] ss:$8 sps:$4 sm:$0xff]  }
 0x198   :  { %1504 = vmatprep.mubr.bf16.mxu1 %v9694_v0  ;;  %v1138_v24 = vpop.f32.mrb[8].mxu0 }
 0x199   :  { %v9758_v36 = vpop.eup %9757  ;;  %9765 = vtanh.f32 %v1905_v60  ;;  %v1733_v1 = vadd.f32 %v11076_v52, %v1138_v24  ;;  %v1140_v41 = vpop.f32.mrb[9].mxu0 }
 0x19a   :  { %v1290_v5 = vpop.f32.mrb[20].mxu1  ;;  %v2165_v55 = vmul.f32 %v9758_v36, %v11050_v42  ;;  %v1141_v57 = vpop.f32.mrb[10].mxu0  ;;  %9767 = vtanh.f32 %v1867_v15 }
 0x19b   :  { %v9760_v3 = vpop.eup %9759  ;;  %v1771_v37 = vadd.f32 %v11037_v62, %v1290_v5  ;;  %v1292_v44 = vpop.f32.mrb[21].mxu1  ;;  %v1868_v0 = vadd.f32 %v11022_v7, %v1733_v1  ;;  %v1734_v43 = vadd.f32 %v11076_v52, %v1141_v57 }
 0x19c   :  { %2329 = vadd.xlane.f32.xlu0 %v2165_v55  ;;  %v1293_v60 = vpop.f32.mrb[22].mxu1  ;;  %v1143_v45 = vpop.f32.mrb[11].mxu0  ;;  %v2166_v24 = vmul.f32 %v9760_v3, %v11050_v42 }
 0x19d   :  { %v1906_v41 = vadd.f32 %v11022_v7, %v1771_v37  ;;  %v1772_v36 = vadd.f32 %v11037_v62, %v1293_v60  ;;  %v1295_v47 = vpop.f32.mrb[23].mxu1  ;;  %9769 = vtanh.f32 %v1868_v0  ;;  %v1869_v5 = vadd.f32 %v11022_v7, %v1734_v43  ;;  %v11105_v1 = vpop.permute.xlu0 %2903 }
 0x19e   :  { %2331 = vadd.xlane.f32.xlu1 %v2166_v24  ;;  %16936 = vst [vmem:[#allocation89_spill] sm:$0xff] %v11105_v1  ;;  %v11108_v55 = vpop.permute.xlu1 %2899 }
 0x19f   :  { %1505 = vmatmul.mubr.bf16.gmra.mrb[128].mxu1 %v9696_v12  ;;  %v9762_v15 = vpop.eup %9761  ;;  %9771 = vtanh.f32 %v1906_v41  ;;  %v1907_v45 = vadd.f32 %v11022_v7, %v1772_v36  ;;  %16937 = vst [vmem:[#allocation90_spill] sm:$0xff] %v11108_v55  ;;  %v9700_v55 = vld [vmem:[#allocation5 + $0x314] ss:$8 sps:$4 sm:$0xff]  }
 0x1a0   :  { %1512 = vmatprep.mubr.bf16.mxu1 %v9697_v51  ;;  %9773 = vtanh.f32 %v1869_v5  ;;  %v1146_v3 = vpop.f32.mrb[12].mxu0  ;;  %v2129_v37 = vmul.f32 %v9762_v15, %v11050_v42  ;;  %v9699_v51 = vld [vmem:[#allocation5 + $0x300] ss:$8 sps:$4 sm:$0xff]  }
 0x1a1   :  { %v9764_v44 = vpop.eup %9763  ;;  %v1735_v47 = vadd.f32 %v11076_v52, %v1146_v3  ;;  %v1148_v0 = vpop.f32.mrb[13].mxu0  ;;  %9775 = vtanh.f32 %v1907_v45 }
 0x1a2   :  { %v1298_v57 = vpop.f32.mrb[24].mxu1  ;;  %2257 = vadd.xlane.f32.xlu0 %v2129_v37  ;;  %v1149_v24 = vpop.f32.mrb[14].mxu0 }
 0x1a3   :  { %v9766_v43 = vpop.eup %9765  ;;  %v1773_v12 = vadd.f32 %v11037_v62, %v1298_v57  ;;  %v1300_v60 = vpop.f32.mrb[25].mxu1  ;;  %v1870_v41 = vadd.f32 %v11022_v7, %v1735_v47  ;;  %v1736_v5 = vadd.f32 %v11076_v52, %v1149_v24  ;;  %v2167_v57 = vmul.f32 %v9764_v44, %v11050_v42 }
 0x1a4   :  { %v1301_v36 = vpop.f32.mrb[26].mxu1  ;;  %v1151_v1 = vpop.f32.mrb[15].mxu0  ;;  %v2168_v15 = vmul.f32 %v9766_v43, %v11050_v42 }
 0x1a5   :  { %v1908_v3 = vadd.f32 %v11022_v7, %v1773_v12  ;;  %v1774_v0 = vadd.f32 %v11037_v62, %v1301_v36  ;;  %v1303_v34 = vpop.f32.mrb[27].mxu1  ;;  %v9768_v37 = vpop.eup %9767  ;;  %9777 = vtanh.f32 %v1870_v41  ;;  %v1871_v60 = vadd.f32 %v11022_v7, %v1736_v5 }
 0x1a6   :  { %2335 = vadd.xlane.f32.xlu1 %v2168_v15  ;;  %2333 = vadd.xlane.f32.xlu0 %v2167_v57  ;;  %v11120_v1 = vpop.permute.xlu0 %2911  ;;  %v11122_v45 = vpop.permute.xlu1 %2907  ;;  %v2130_v44 = vmul.f32 %v9768_v37, %v11050_v42  ;;  %v9702_v57 = vld [vmem:[#allocation5 + $0x310] ss:$8 sps:$4 sm:$0xff]  }
 0x1a7   :  { %1513 = vmatmul.mubr.bf16.gmra.mrb[132].mxu1 %v9699_v51  ;;  %v9770_v47 = vpop.eup %9769  ;;  %9779 = vtanh.f32 %v1908_v3  ;;  %16938 = vst [vmem:[#allocation91_spill] sm:$0xff] %v11120_v1  ;;  %16939 = vst [vmem:[#allocation92_spill] sm:$0xff] %v11122_v45  ;;  %v1909_v43 = vadd.f32 %v11022_v7, %v1774_v0 }
 0x1a8   :  { %1520 = vmatprep.mubr.bf16.mxu1 %v9700_v55  ;;  %9781 = vtanh.f32 %v1871_v60  ;;  %v1154_v34 = vpop.f32.mrb[16].mxu0  ;;  %v2131_v12 = vmul.f32 %v9770_v47, %v11050_v42  ;;  %v9703_v47 = vld [vmem:[#allocation5 + $0x324] ss:$8 sps:$4 sm:$0xff]  }
 0x1a9   :  { %v9772_v24 = vpop.eup %9771  ;;  %v1737_v41 = vadd.f32 %v11076_v52, %v1154_v34  ;;  %v1156_v36 = vpop.f32.mrb[17].mxu0  ;;  %9783 = vtanh.f32 %v1909_v43 }
 0x1aa   :  { %v1306_v51 = vpop.f32.mrb[28].mxu1  ;;  %v9774_v5 = vpop.eup %9773  ;;  %2259 = vadd.xlane.f32.xlu0 %v2130_v44  ;;  %2261 = vadd.xlane.f32.xlu1 %v2131_v12 }
 0x1ab   :  { %v1775_v15 = vadd.f32 %v11037_v62, %v1306_v51  ;;  %v1308_v3 = vpop.f32.mrb[29].mxu1  ;;  %v1157_v55 = vpop.f32.mrb[18].mxu0  ;;  %v1872_v0 = vadd.f32 %v11022_v7, %v1737_v41  ;;  %v2169_v51 = vmul.f32 %v9772_v24, %v11050_v42  ;;  %v2132_v12 = vmul.f32 %v9774_v5, %v11050_v42 }
 0x1ac   :  { %v1309_v60 = vpop.f32.mrb[30].mxu1  ;;  %v1738_v37 = vadd.f32 %v11076_v52, %v1157_v55  ;;  %v1159_v1 = vpop.f32.mrb[19].mxu0 }
 0x1ad   :  { %v1910_v34 = vadd.f32 %v11022_v7, %v1775_v15  ;;  %v1776_v36 = vadd.f32 %v11037_v62, %v1309_v60  ;;  %v1311_v45 = vpop.f32.mrb[31].mxu1  ;;  %9785 = vtanh.f32 %v1872_v0  ;;  %v9776_v3 = vpop.eup %9775 }
 0x1ae   :  { %v1873_v44 = vadd.f32 %v11022_v7, %v1738_v37  ;;  %2337 = vadd.xlane.f32.xlu0 %v2169_v51  ;;  %v11136_v55 = vpop.permute.xlu1 %2915  ;;  %2263 = vadd.xlane.f32.xlu1 %v2132_v12  ;;  %v11138_v1 = vpop.permute.xlu0 %2922  ;;  %v2170_v60 = vmul.f32 %v9776_v3, %v11050_v42  ;;  %v9705_v12 = vld [vmem:[#allocation5 + $0x320] ss:$8 sps:$4 sm:$0xff]  }
 0x1af   :  { %1521 = vmatmul.mubr.bf16.gmra.mrb[136].mxu1 %v9702_v57  ;;  %v9778_v41 = vpop.eup %9777  ;;  %16940 = vst [vmem:[#allocation93_spill] sm:$0xff] %v11136_v55  ;;  %9787 = vtanh.f32 %v1910_v34  ;;  %16941 = vst [vmem:[#allocation94_spill] sm:$0xff] %v11138_v1  ;;  %v1911_v45 = vadd.f32 %v11022_v7, %v1776_v36  ;;  %v1689_v36 = vcombine.high %v11009_v54, %v11009_v54 }
 0x1b0   :  { %1528 = vmatprep.mubr.bf16.mxu1 %v9703_v47  ;;  %9789 = vtanh.f32 %v1873_v44  ;;  %v1162_v43 = vpop.f32.mrb[20].mxu0  ;;  %v2133_v24 = vmul.f32 %v9778_v41, %v11050_v42 }
 0x1b1   :  { %v9780_v15 = vpop.eup %9779  ;;  %v1739_v5 = vadd.f32 %v11076_v52, %v1162_v43  ;;  %v1164_v57 = vpop.f32.mrb[21].mxu0  ;;  %9791 = vtanh.f32 %v1911_v45 }
 0x1b2   :  { %v1314_v0 = vpop.f32.mrb[32].mxu1  ;;  %v9782_v37 = vpop.eup %9781  ;;  %2265 = vadd.xlane.f32.xlu0 %v2133_v24  ;;  %2339 = vadd.xlane.f32.xlu1 %v2170_v60  ;;  %v9706_v57 = vld [vmem:[#allocation5 + $0x334] ss:$8 sps:$4 sm:$0xff]   ;;  %v2171_v24 = vmul.f32 %v9780_v15, %v11050_v42 }
 0x1b3   :  { %v1777_v34 = vadd.f32 %v11037_v62, %v1314_v0  ;;  %v1316_v51 = vpop.f32.mrb[33].mxu1  ;;  %v1165_v47 = vpop.f32.mrb[22].mxu0  ;;  %v1874_v44 = vadd.f32 %v11022_v7, %v1739_v5  ;;  %v2134_v54 = vmul.f32 %v9782_v37, %v11050_v42 }
 0x1b4   :  { %v1317_v41 = vpop.f32.mrb[34].mxu1  ;;  %v1740_v43 = vadd.f32 %v11076_v52, %v1165_v47  ;;  %v1167_v1 = vpop.f32.mrb[23].mxu0 }
 0x1b5   :  { %v1912_v3 = vadd.f32 %v11022_v7, %v1777_v34  ;;  %v1778_v0 = vadd.f32 %v11037_v62, %v1317_v41  ;;  %v1319_v51 = vpop.f32.mrb[35].mxu1  ;;  %9793 = vtanh.f32 %v1874_v44  ;;  %v9784_v5 = vpop.eup %9783  ;;  %v11157_v1 = vrot.slane %v1689_v36, %v10620_v4 }
 0x1b6   :  { %v1875_v55 = vadd.f32 %v11022_v7, %v1740_v43  ;;  %2341 = vadd.xlane.f32.xlu0 %v2171_v24  ;;  %v11154_v47 = vpop.permute.xlu1 %2926  ;;  %2267 = vadd.xlane.f32.xlu1 %v2134_v54  ;;  %v11159_v62 = vpop.permute.xlu0 %2930  ;;  %v2172_v43 = vmul.f32 %v9784_v5, %v11050_v42  ;;  %v9708_v24 = vld [vmem:[#allocation5 + $0x330] ss:$8 sps:$4 sm:$0xff]  }
 0x1b7   :  { %1529 = vmatmul.mubr.bf16.gmra.mrb[140].mxu1 %v9705_v12  ;;  %v9786_v60 = vpop.eup %9785  ;;  %16942 = vst [vmem:[#allocation95_spill] sm:$0xff] %v11154_v47  ;;  %9795 = vtanh.f32 %v1912_v3  ;;  %16943 = vst [vmem:[#allocation96_spill] sm:$0xff] %v11159_v62  ;;  %v1913_v45 = vadd.f32 %v11022_v7, %v1778_v0  ;;  %v9709_v62 = vld [vmem:[#allocation5 + $0x344] ss:$8 sps:$4 sm:$0xff]  }
 0x1b8   :  { %1536 = vmatprep.mubr.bf16.mxu1 %v9706_v57  ;;  %9797 = vtanh.f32 %v1875_v55  ;;  %v1170_v15 = vpop.f32.mrb[24].mxu0  ;;  %v2135_v37 = vmul.f32 %v9786_v60, %v11050_v42 }
 0x1b9   :  { %v9788_v34 = vpop.eup %9787  ;;  %v1741_v12 = vadd.f32 %v11076_v52, %v1170_v15  ;;  %v1172_v41 = vpop.f32.mrb[25].mxu0  ;;  %9799 = vtanh.f32 %v1913_v45 }
 0x1ba   :  { %v1322_v44 = vpop.f32.mrb[36].mxu1  ;;  %v9790_v3 = vpop.eup %9789  ;;  %2269 = vadd.xlane.f32.xlu0 %v2135_v37  ;;  %2343 = vadd.xlane.f32.xlu1 %v2172_v43 }
 0x1bb   :  { %v1779_v57 = vadd.f32 %v11157_v1, %v1322_v44  ;;  %v1324_v36 = vpop.f32.mrb[37].mxu1  ;;  %v1173_v51 = vpop.f32.mrb[26].mxu0  ;;  %v1876_v0 = vadd.f32 %v11022_v7, %v1741_v12  ;;  %v2173_v44 = vmul.f32 %v9788_v34, %v11050_v42 }
 0x1bc   :  { %v1325_v55 = vpop.f32.mrb[38].mxu1  ;;  %v1742_v54 = vadd.f32 %v11076_v52, %v1173_v51  ;;  %v1175_v60 = vpop.f32.mrb[27].mxu0  ;;  %v2136_v36 = vmul.f32 %v9790_v3, %v11050_v42 }
 0x1bd   :  { %v1914_v15 = vadd.f32 %v11022_v7, %v1779_v57  ;;  %v1780_v5 = vadd.f32 %v11157_v1, %v1325_v55  ;;  %v1327_v41 = vpop.f32.mrb[39].mxu1  ;;  %9801 = vtanh.f32 %v1876_v0  ;;  %v9792_v12 = vpop.eup %9791 }
 0x1be   :  { %v1877_v37 = vadd.f32 %v11022_v7, %v1742_v54  ;;  %2345 = vadd.xlane.f32.xlu0 %v2173_v44  ;;  %v11173_v51 = vpop.permute.xlu1 %2934  ;;  %2271 = vadd.xlane.f32.xlu1 %v2136_v36  ;;  %v11175_v45 = vpop.permute.xlu0 %2938  ;;  %v2174_v60 = vmul.f32 %v9792_v12, %v11050_v42  ;;  %v9711_v36 = vld [vmem:[#allocation5 + $0x340] ss:$8 sps:$4 sm:$0xff]  }
 0x1bf   :  { %1537 = vmatmul.mubr.bf16.gmra.mrb[144].mxu1 %v9708_v24  ;;  %v9794_v43 = vpop.eup %9793  ;;  %16944 = vst [vmem:[#allocation97_spill] sm:$0xff] %v11173_v51  ;;  %9803 = vtanh.f32 %v1914_v15  ;;  %16945 = vst [vmem:[#allocation98_spill] sm:$0xff] %v11175_v45  ;;  %v1915_v57 = vadd.f32 %v11022_v7, %v1780_v5  ;;  %v9712_v51 = vld [vmem:[#allocation5 + $0x354] ss:$8 sps:$4 sm:$0xff]  }
 0x1c0   :  { %1544 = vmatprep.mubr.bf16.mxu1 %v9709_v62  ;;  %9805 = vtanh.f32 %v1877_v37  ;;  %v1178_v34 = vpop.f32.mrb[28].mxu0  ;;  %v2137_v0 = vmul.f32 %v9794_v43, %v11050_v42 }
 0x1c1   :  { %v9796_v55 = vpop.eup %9795  ;;  %v1743_v3 = vadd.f32 %v11076_v52, %v1178_v34  ;;  %v1180_v24 = vpop.f32.mrb[29].mxu0  ;;  %9807 = vtanh.f32 %v1915_v57 }
 0x1c2   :  { %v1330_v54 = vpop.f32.mrb[40].mxu1  ;;  %v9798_v41 = vpop.eup %9797  ;;  %2273 = vadd.xlane.f32.xlu0 %v2137_v0  ;;  %2347 = vadd.xlane.f32.xlu1 %v2174_v60 }
 0x1c3   :  { %v1781_v15 = vadd.f32 %v11157_v1, %v1330_v54  ;;  %v1332_v44 = vpop.f32.mrb[41].mxu1  ;;  %v1181_v62 = vpop.f32.mrb[30].mxu0  ;;  %v1878_v5 = vadd.f32 %v11022_v7, %v1743_v3  ;;  %v2175_v54 = vmul.f32 %v9796_v55, %v11050_v42 }
 0x1c4   :  { %v1333_v37 = vpop.f32.mrb[42].mxu1  ;;  %v1744_v43 = vadd.f32 %v11076_v52, %v1181_v62  ;;  %v1183_v45 = vpop.f32.mrb[31].mxu0  ;;  %v2138_v44 = vmul.f32 %v9798_v41, %v11050_v42 }
 0x1c5   :  { %v1916_v34 = vadd.f32 %v11022_v7, %v1781_v15  ;;  %v1782_v12 = vadd.f32 %v11157_v1, %v1333_v37  ;;  %v1335_v24 = vpop.f32.mrb[43].mxu1  ;;  %9809 = vtanh.f32 %v1878_v5  ;;  %v9800_v3 = vpop.eup %9799 }
 0x1c6   :  { %v1879_v0 = vadd.f32 %v11022_v7, %v1744_v43  ;;  %2349 = vadd.xlane.f32.xlu0 %v2175_v54  ;;  %v11189_v62 = vpop.permute.xlu1 %2942  ;;  %2275 = vadd.xlane.f32.xlu1 %v2138_v44  ;;  %v11191_v45 = vpop.permute.xlu0 %2946  ;;  %v2176_v43 = vmul.f32 %v9800_v3, %v11050_v42  ;;  %v9714_v44 = vld [vmem:[#allocation5 + $0x350] ss:$8 sps:$4 sm:$0xff]  }
 0x1c7   :  { %1545 = vmatmul.mubr.bf16.gmra.mrb[148].mxu1 %v9711_v36  ;;  %v9802_v60 = vpop.eup %9801  ;;  %16946 = vst [vmem:[#allocation99_spill] sm:$0xff] %v11189_v62  ;;  %9811 = vtanh.f32 %v1916_v34  ;;  %16947 = vst [vmem:[#allocation100_spill] sm:$0xff] %v11191_v45  ;;  %v1917_v57 = vadd.f32 %v11022_v7, %v1782_v12  ;;  %v9715_v62 = vld [vmem:[#allocation5 + $0x364] ss:$8 sps:$4 sm:$0xff]  }
 0x1c8   :  { %1552 = vmatprep.mubr.bf16.mxu1 %v9712_v51  ;;  %9813 = vtanh.f32 %v1879_v0  ;;  %v1186_v55 = vpop.f32.mrb[32].mxu0  ;;  %v2139_v15 = vmul.f32 %v9802_v60, %v11050_v42 }
 0x1c9   :  { %v9804_v5 = vpop.eup %9803  ;;  %v1745_v41 = vadd.f32 %v11076_v52, %v1186_v55  ;;  %v1188_v36 = vpop.f32.mrb[33].mxu0  ;;  %9815 = vtanh.f32 %v1917_v57 }
 0x1ca   :  { %v1338_v37 = vpop.f32.mrb[44].mxu1  ;;  %v9806_v24 = vpop.eup %9805  ;;  %2277 = vadd.xlane.f32.xlu0 %v2139_v15  ;;  %2351 = vadd.xlane.f32.xlu1 %v2176_v43 }
 0x1cb   :  { %v1783_v34 = vadd.f32 %v11157_v1, %v1338_v37  ;;  %v1340_v54 = vpop.f32.mrb[45].mxu1  ;;  %v1189_v51 = vpop.f32.mrb[34].mxu0  ;;  %v1880_v12 = vadd.f32 %v11022_v7, %v1745_v41  ;;  %v2177_v37 = vmul.f32 %v9804_v5, %v11050_v42 }
 0x1cc   :  { %v1341_v0 = vpop.f32.mrb[46].mxu1  ;;  %v1746_v60 = vadd.f32 %v11076_v52, %v1189_v51  ;;  %v1191_v45 = vpop.f32.mrb[35].mxu0  ;;  %v2140_v54 = vmul.f32 %v9806_v24, %v11050_v42 }
 0x1cd   :  { %v1918_v55 = vadd.f32 %v11022_v7, %v1783_v34  ;;  %v1784_v3 = vadd.f32 %v11157_v1, %v1341_v0  ;;  %v1343_v36 = vpop.f32.mrb[47].mxu1  ;;  %9817 = vtanh.f32 %v1880_v12  ;;  %v9808_v41 = vpop.eup %9807 }
 0x1ce   :  { %v1881_v15 = vadd.f32 %v11022_v7, %v1746_v60  ;;  %2353 = vadd.xlane.f32.xlu0 %v2177_v37  ;;  %v11205_v52 = vpop.permute.xlu1 %2950  ;;  %2279 = vadd.xlane.f32.xlu1 %v2140_v54  ;;  %v11207_v45 = vpop.permute.xlu0 %2954  ;;  %v2178_v0 = vmul.f32 %v9808_v41, %v11050_v42  ;;  %v9717_v37 = vld [vmem:[#allocation5 + $0x360] ss:$8 sps:$4 sm:$0xff]  }
 0x1cf   :  { %1553 = vmatmul.mubr.bf16.gmra.mrb[152].mxu1 %v9714_v44  ;;  %v9810_v43 = vpop.eup %9809  ;;  %16948 = vst [vmem:[#allocation101_spill] sm:$0xff] %v11205_v52  ;;  %9819 = vtanh.f32 %v1918_v55  ;;  %16949 = vst [vmem:[#allocation102_spill] sm:$0xff] %v11207_v45  ;;  %v1919_v57 = vadd.f32 %v11022_v7, %v1784_v3  ;;  %v9718_v45 = vld [vmem:[#allocation5 + $0x374] ss:$8 sps:$4 sm:$0xff]  }
 0x1d0   :  { %1560 = vmatprep.mubr.bf16.mxu1 %v9715_v62  ;;  %9821 = vtanh.f32 %v1881_v15  ;;  %v1194_v5 = vpop.f32.mrb[36].mxu0  ;;  %v2141_v34 = vmul.f32 %v9810_v43, %v11050_v42 }
 0x1d1   :  { %v9812_v51 = vpop.eup %9811  ;;  %v1747_v24 = vadd.f32 %v11017_v14, %v1194_v5  ;;  %v1196_v44 = vpop.f32.mrb[37].mxu0  ;;  %9823 = vtanh.f32 %v1919_v57 }
 0x1d2   :  { %v1346_v12 = vpop.f32.mrb[48].mxu1  ;;  %v9814_v60 = vpop.eup %9813  ;;  %2281 = vadd.xlane.f32.xlu0 %v2141_v34  ;;  %2355 = vadd.xlane.f32.xlu1 %v2178_v0 }
 0x1d3   :  { %v1785_v55 = vadd.f32 %v11157_v1, %v1346_v12  ;;  %v1348_v36 = vpop.f32.mrb[49].mxu1  ;;  %v1197_v62 = vpop.f32.mrb[38].mxu0  ;;  %v1882_v3 = vadd.f32 %v11022_v7, %v1747_v24  ;;  %v2179_v12 = vmul.f32 %v9812_v51, %v11050_v42 }
 0x1d4   :  { %v1349_v15 = vpop.f32.mrb[50].mxu1  ;;  %v1748_v54 = vadd.f32 %v11017_v14, %v1197_v62  ;;  %v1199_v43 = vpop.f32.mrb[39].mxu0  ;;  %v2142_v36 = vmul.f32 %v9814_v60, %v11050_v42 }
 0x1d5   :  { %v1920_v5 = vadd.f32 %v11022_v7, %v1785_v55  ;;  %v1786_v41 = vadd.f32 %v11157_v1, %v1349_v15  ;;  %v1351_v44 = vpop.f32.mrb[51].mxu1  ;;  %9825 = vtanh.f32 %v1882_v3  ;;  %v9816_v24 = vpop.eup %9815 }
 0x1d6   :  { %v1883_v34 = vadd.f32 %v11022_v7, %v1748_v54  ;;  %v11221_v52 = vpop.permute.xlu0 %2962  ;;  %2357 = vadd.xlane.f32.xlu0 %v2179_v12  ;;  %2283 = vadd.xlane.f32.xlu1 %v2142_v36  ;;  %v11223_v57 = vpop.permute.xlu1 %2958  ;;  %v9720_v12 = vld [vmem:[#allocation5 + $0x370] ss:$8 sps:$4 sm:$0xff]  }
 0x1d7   :  { %16950 = vst [vmem:[#allocation103_spill] sm:$0xff] %v11221_v52  ;;  %1561 = vmatmul.mubr.bf16.gmra.mrb[156].mxu1 %v9717_v37  ;;  %v9818_v0 = vpop.eup %9817  ;;  %9827 = vtanh.f32 %v1920_v5  ;;  %16951 = vst [vmem:[#allocation104_spill] sm:$0xff] %v11223_v57  ;;  %v1921_v55 = vadd.f32 %v11022_v7, %v1786_v41  ;;  %v2180_v37 = vmul.f32 %v9816_v24, %v11050_v42  ;;  %v9721_v52 = vld [vmem:[#allocation5 + $0x384] ss:$8 sps:$4 sm:$0xff]  }
 0x1d8   :  { %1568 = vmatprep.mubr.bf16.mxu1 %v9718_v45  ;;  %9829 = vtanh.f32 %v1883_v34  ;;  %v1202_v51 = vpop.f32.mrb[40].mxu0  ;;  %v2143_v62 = vmul.f32 %v9818_v0, %v11050_v42 }
 0x1d9   :  { %v9820_v3 = vpop.eup %9819  ;;  %v1749_v60 = vadd.f32 %v11017_v14, %v1202_v51  ;;  %v1204_v54 = vpop.f32.mrb[41].mxu0  ;;  %9831 = vtanh.f32 %v1921_v55 }
 0x1da   :  { %v1354_v15 = vpop.f32.mrb[52].mxu1  ;;  %v9822_v43 = vpop.eup %9821  ;;  %2285 = vadd.xlane.f32.xlu0 %v2143_v62  ;;  %2359 = vadd.xlane.f32.xlu1 %v2180_v37 }
 0x1db   :  { %v1787_v5 = vadd.f32 %v11157_v1, %v1354_v15  ;;  %v1356_v44 = vpop.f32.mrb[53].mxu1  ;;  %v1205_v45 = vpop.f32.mrb[42].mxu0  ;;  %v1884_v41 = vadd.f32 %v11022_v7, %v1749_v60  ;;  %v2181_v15 = vmul.f32 %v9820_v3, %v11050_v42  ;;  %v2144_v60 = vmul.f32 %v9822_v43, %v11050_v42 }
 0x1dc   :  { %v1357_v34 = vpop.f32.mrb[54].mxu1  ;;  %v1750_v36 = vadd.f32 %v11017_v14, %v1205_v45  ;;  %v1207_v0 = vpop.f32.mrb[43].mxu0 }
 0x1dd   :  { %v11232_v51 = vpop.permute.xlu0 %2970  ;;  %v1922_v24 = vadd.f32 %v11022_v7, %v1787_v5  ;;  %v1788_v54 = vadd.f32 %v11157_v1, %v1357_v34  ;;  %9833 = vtanh.f32 %v1884_v41  ;;  %v1359_v44 = vpop.f32.mrb[55].mxu1 }
 0x1de   :  { %16952 = vst [vmem:[#allocation105_spill] sm:$0xff] %v11232_v51  ;;  %v1885_v62 = vadd.f32 %v11022_v7, %v1750_v36  ;;  %v9824_v37 = vpop.eup %9823  ;;  %2361 = vadd.xlane.f32.xlu0 %v2181_v15  ;;  %2287 = vadd.xlane.f32.xlu1 %v2144_v60  ;;  %v11240_v55 = vpop.permute.xlu1 %2966  ;;  %v9724_v51 = vld [vmem:[#allocation5 + $0x394] ss:$8 sps:$4 sm:$0xff]  }
 0x1df   :  { %1569 = vmatmul.mubr.bf16.gmra.mrb[160].mxu1 %v9720_v12  ;;  %v9826_v45 = vpop.eup %9825  ;;  %9835 = vtanh.f32 %v1922_v24  ;;  %v1923_v0 = vadd.f32 %v11022_v7, %v1788_v54  ;;  %16953 = vst [vmem:[#allocation106_spill] sm:$0xff] %v11240_v55  ;;  %v2182_v12 = vmul.f32 %v9824_v37, %v11050_v42 }
 0x1e0   :  { %1576 = vmatprep.mubr.bf16.mxu1 %v9721_v52  ;;  %9837 = vtanh.f32 %v1885_v62  ;;  %v1210_v5 = vpop.f32.mrb[44].mxu0  ;;  %v2145_v3 = vmul.f32 %v9826_v45, %v11050_v42  ;;  %v9723_v52 = vld [vmem:[#allocation5 + $0x380] ss:$8 sps:$4 sm:$0xff]  }
 0x1e1   :  { %v9828_v41 = vpop.eup %9827  ;;  %v1751_v34 = vadd.f32 %v11017_v14, %v1210_v5  ;;  %v1212_v43 = vpop.f32.mrb[45].mxu0  ;;  %9839 = vtanh.f32 %v1923_v0 }
 0x1e2   :  { %v1362_v36 = vpop.f32.mrb[56].mxu1  ;;  %v9830_v15 = vpop.eup %9829  ;;  %2289 = vadd.xlane.f32.xlu0 %v2145_v3  ;;  %2363 = vadd.xlane.f32.xlu1 %v2182_v12 }
 0x1e3   :  { %v11245_v44 = vpop.permute.xlu0 %2978  ;;  %v1789_v24 = vadd.f32 %v11157_v1, %v1362_v36  ;;  %v1364_v54 = vpop.f32.mrb[57].mxu1  ;;  %v1886_v62 = vadd.f32 %v11022_v7, %v1751_v34  ;;  %v2146_v3 = vmul.f32 %v9830_v15, %v11050_v42 }
 0x1e4   :  { %16954 = vst [vmem:[#allocation107_spill] sm:$0xff] %v11245_v44  ;;  %v1365_v60 = vpop.f32.mrb[58].mxu1  ;;  %v1213_v45 = vpop.f32.mrb[46].mxu0  ;;  %v2183_v44 = vmul.f32 %v9828_v41, %v11050_v42 }
 0x1e5   :  { %v1924_v5 = vadd.f32 %v11022_v7, %v1789_v24  ;;  %v1790_v43 = vadd.f32 %v11157_v1, %v1365_v60  ;;  %v1752_v37 = vadd.f32 %v11017_v14, %v1213_v45  ;;  %v1215_v55 = vpop.f32.mrb[47].mxu0  ;;  %9841 = vtanh.f32 %v1886_v62  ;;  %v1367_v36 = vpop.f32.mrb[59].mxu1 }
 0x1e6   :  { %v9832_v0 = vpop.eup %9831  ;;  %2365 = vadd.xlane.f32.xlu0 %v2183_v44  ;;  %v11255_v54 = vpop.permute.xlu1 %2974  ;;  %2291 = vadd.xlane.f32.xlu1 %v2146_v3  ;;  %v9726_v3 = vld [vmem:[#allocation5 + $0x390] ss:$8 sps:$4 sm:$0xff]  }
 0x1e7   :  { %v1887_v34 = vadd.f32 %v11022_v7, %v1752_v37  ;;  %1577 = vmatmul.mubr.bf16.gmra.mrb[164].mxu1 %v9723_v52  ;;  %v9834_v12 = vpop.eup %9833  ;;  %16955 = vst [vmem:[#allocation108_spill] sm:$0xff] %v11255_v54  ;;  %9843 = vtanh.f32 %v1924_v5  ;;  %v11257_v24 = vpop.permute.xlu0 %2989  ;;  %v1925_v55 = vadd.f32 %v11022_v7, %v1790_v43  ;;  %v2184_v44 = vmul.f32 %v9832_v0, %v11050_v42  ;;  %v9727_v54 = vld [vmem:[#allocation5 + $0x3a4] ss:$8 sps:$4 sm:$0xff]  }
 0x1e8   :  { %1584 = vmatprep.mubr.bf16.mxu1 %v9724_v51  ;;  %16956 = vst [vmem:[#allocation109_spill] sm:$0xff] %v11257_v24  ;;  %v1218_v41 = vpop.f32.mrb[48].mxu0  ;;  %v2147_v62 = vmul.f32 %v9834_v12, %v11050_v42 }
 0x1e9   :  { %v9836_v60 = vpop.eup %9835  ;;  %9845 = vtanh.f32 %v1887_v34  ;;  %v1753_v15 = vadd.f32 %v11017_v14, %v1218_v41  ;;  %v1220_v52 = vpop.f32.mrb[49].mxu0 }
 0x1ea   :  { %v1370_v45 = vpop.f32.mrb[60].mxu1  ;;  %v9838_v37 = vpop.eup %9837  ;;  %2293 = vadd.xlane.f32.xlu0 %v2147_v62  ;;  %2367 = vadd.xlane.f32.xlu1 %v2184_v44  ;;  %9847 = vtanh.f32 %v1925_v55  ;;  %v11272_v62 = vld [vmem:[%s16465_s5] ss:$0 sm:$0xff] }
 0x1eb   :  { %v1791_v5 = vadd.f32 %v11157_v1, %v1370_v45  ;;  %v1372_v36 = vpop.f32.mrb[61].mxu1  ;;  %v1221_v51 = vpop.f32.mrb[50].mxu0  ;;  %v1888_v43 = vadd.f32 %v11022_v7, %v1753_v15  ;;  %v2185_v45 = vmul.f32 %v9836_v60, %v11050_v42  ;;  %v2148_v44 = vmul.f32 %v9838_v37, %v11050_v42 }
 0x1ec   :  { %v1373_v24 = vpop.f32.mrb[62].mxu1  ;;  %v1754_v12 = vadd.f32 %v11017_v14, %v1221_v51  ;;  %v1223_v34 = vpop.f32.mrb[51].mxu0 }
 0x1ed   :  { %v1926_v41 = vadd.f32 %v11022_v7, %v1791_v5  ;;  %v1792_v0 = vadd.f32 %v11157_v1, %v1373_v24  ;;  %v1375_v52 = vpop.f32.mrb[63].mxu1  ;;  %v9840_v36 = vpop.eup %9839  ;;  %9849 = vtanh.f32 %v1888_v43 }
 0x1ee   :  { %v1889_v15 = vadd.f32 %v11272_v62, %v1754_v12  ;;  %2369 = vadd.xlane.f32.xlu0 %v2185_v45  ;;  %v11276_v7 = vpop.permute.xlu1 %2982  ;;  %2295 = vadd.xlane.f32.xlu1 %v2148_v44  ;;  %v11278_v24 = vpop.permute.xlu0 %2997  ;;  %v2186_v34 = vmul.f32 %v9840_v36, %v11050_v42  ;;  %v9729_v45 = vld [vmem:[#allocation5 + $0x3a0] ss:$8 sps:$4 sm:$0xff]  }
 0x1ef   :  { %1585 = vmatmul.mubr.bf16.gmra.mrb[168].mxu1 %v9726_v3  ;;  %v9842_v55 = vpop.eup %9841  ;;  %16957 = vst [vmem:[#allocation110_spill] sm:$0xff] %v11276_v7  ;;  %9851 = vtanh.f32 %v1926_v41  ;;  %16958 = vst [vmem:[#allocation111_spill] sm:$0xff] %v11278_v24  ;;  %v1927_v60 = vadd.f32 %v11272_v62, %v1792_v0  ;;  %v9730_v7 = vld [vmem:[#allocation5 + $0x3b4] ss:$8 sps:$4 sm:$0xff]  }
 0x1f0   :  { %1592 = vmatprep.mubr.bf16.mxu1 %v9727_v54  ;;  %9853 = vtanh.f32 %v1889_v15  ;;  %v1226_v5 = vpop.f32.mrb[52].mxu0  ;;  %v2149_v51 = vmul.f32 %v9842_v55, %v11050_v42 }
 0x1f1   :  { %v9844_v43 = vpop.eup %9843  ;;  %v1755_v12 = vadd.f32 %v11017_v14, %v1226_v5  ;;  %v1228_v3 = vpop.f32.mrb[53].mxu0  ;;  %9855 = vtanh.f32 %v1927_v60 }
 0x1f2   :  { %v1378_v37 = vpop.f32.mrb[64].mxu1  ;;  %2297 = vadd.xlane.f32.xlu0 %v2149_v51  ;;  %v1229_v54 = vpop.f32.mrb[54].mxu0  ;;  %2371 = vadd.xlane.f32.xlu1 %v2186_v34  ;;  %v11292_v51 = vld [vmem:[%s16466_s6] ss:$0 sm:$0xff] }
 0x1f3   :  { %v1793_v52 = vadd.f32 %v11157_v1, %v1378_v37  ;;  %v1380_v41 = vpop.f32.mrb[65].mxu1  ;;  %v9846_v44 = vpop.eup %9845  ;;  %v1890_v0 = vadd.f32 %v11272_v62, %v1755_v12  ;;  %v1756_v55 = vadd.f32 %v11017_v14, %v1229_v54  ;;  %v2187_v37 = vmul.f32 %v11292_v51, %v9844_v43 }
 0x1f4   :  { %v1381_v15 = vpop.f32.mrb[66].mxu1  ;;  %v1231_v24 = vpop.f32.mrb[55].mxu0  ;;  %v2150_v3 = vmul.f32 %v11292_v51, %v9846_v44 }
 0x1f5   :  { %v1928_v5 = vadd.f32 %v11272_v62, %v1793_v52  ;;  %v1794_v42 = vadd.f32 %v11157_v1, %v1381_v15  ;;  %v1383_v36 = vpop.f32.mrb[67].mxu1  ;;  %9857 = vtanh.f32 %v1890_v0  ;;  %v1891_v12 = vadd.f32 %v11272_v62, %v1756_v55  ;;  %v9848_v24 = vpop.eup %9847 }
 0x1f6   :  { %2373 = vadd.xlane.f32.xlu0 %v2187_v37  ;;  %v11297_v34 = vpop.permute.xlu1 %2993  ;;  %2299 = vadd.xlane.f32.xlu1 %v2150_v3  ;;  %v11301_v1 = vrot.slane %v10977_v56, %v10620_v4  ;;  %v11303_v52 = vpop.permute.xlu0 %3005  ;;  %v2188_v55 = vmul.f32 %v11292_v51, %v9848_v24  ;;  %v9732_v3 = vld [vmem:[#allocation5 + $0x3b0] ss:$8 sps:$4 sm:$0xff]  }
 0x1f7   :  { %1593 = vmatmul.mubr.bf16.gmra.mrb[172].mxu1 %v9729_v45  ;;  %v9850_v60 = vpop.eup %9849  ;;  %16959 = vst [vmem:[#allocation112_spill] sm:$0xff] %v11297_v34  ;;  %9859 = vtanh.f32 %v1928_v5  ;;  %16960 = vst [vmem:[#allocation113_spill] sm:$0xff] %v11303_v52  ;;  %v1929_v43 = vadd.f32 %v11272_v62, %v1794_v42  ;;  %v9733_v34 = vld [vmem:[#allocation5 + $0x3c4] ss:$8 sps:$4 sm:$0xff]  }
 0x1f8   :  { %1600 = vmatprep.mubr.bf16.mxu1 %v9730_v7  ;;  %9861 = vtanh.f32 %v1891_v12  ;;  %v1234_v41 = vpop.f32.mrb[56].mxu0  ;;  %v2151_v54 = vmul.f32 %v11292_v51, %v9850_v60 }
 0x1f9   :  { %v9852_v45 = vpop.eup %9851  ;;  %v1757_v44 = vadd.f32 %v11017_v14, %v1234_v41  ;;  %v1236_v15 = vpop.f32.mrb[57].mxu0  ;;  %9863 = vtanh.f32 %v1929_v43 }
 0x1fa   :  { %v1386_v0 = vpop.f32.mrb[68].mxu1  ;;  %v9854_v7 = vpop.eup %9853  ;;  %2301 = vadd.xlane.f32.xlu0 %v2151_v54  ;;  %2375 = vadd.xlane.f32.xlu1 %v2188_v55 }
 0x1fb   :  { %v1795_v5 = vadd.f32 %v11301_v1, %v1386_v0  ;;  %v1388_v36 = vpop.f32.mrb[69].mxu1  ;;  %v1237_v37 = vpop.f32.mrb[58].mxu0  ;;  %v1892_v42 = vadd.f32 %v11272_v62, %v1757_v44  ;;  %v2189_v0 = vmul.f32 %v11292_v51, %v9852_v45 }
 0x1fc   :  { %v1389_v12 = vpop.f32.mrb[70].mxu1  ;;  %v1758_v60 = vadd.f32 %v11017_v14, %v1237_v37  ;;  %v1239_v52 = vpop.f32.mrb[59].mxu0  ;;  %v2152_v36 = vmul.f32 %v11292_v51, %v9854_v7 }
 0x1fd   :  { %v1930_v41 = vadd.f32 %v11272_v62, %v1795_v5  ;;  %v1796_v24 = vadd.f32 %v11301_v1, %v1389_v12  ;;  %v1391_v15 = vpop.f32.mrb[71].mxu1  ;;  %9865 = vtanh.f32 %v1892_v42  ;;  %v9856_v44 = vpop.eup %9855 }
 0x1fe   :  { %v1893_v54 = vadd.f32 %v11272_v62, %v1758_v60  ;;  %2377 = vadd.xlane.f32.xlu0 %v2189_v0  ;;  %v11317_v37 = vpop.permute.xlu1 %3001  ;;  %2303 = vadd.xlane.f32.xlu1 %v2152_v36  ;;  %v11319_v52 = vpop.permute.xlu0 %3013  ;;  %v2190_v60 = vmul.f32 %v11292_v51, %v9856_v44  ;;  %v9735_v36 = vld [vmem:[#allocation5 + $0x3c0] ss:$8 sps:$4 sm:$0xff]  }
 0x1ff   :  { %1601 = vmatmul.mubr.bf16.gmra.mrb[176].mxu1 %v9732_v3  ;;  %v9858_v55 = vpop.eup %9857  ;;  %16961 = vst [vmem:[#allocation114_spill] sm:$0xff] %v11317_v37  ;;  %9867 = vtanh.f32 %v1930_v41  ;;  %16962 = vst [vmem:[#allocation115_spill] sm:$0xff] %v11319_v52  ;;  %v1931_v43 = vadd.f32 %v11272_v62, %v1796_v24 }
 0x200   :  { %1608 = vmatprep.mubr.bf16.mxu1 %v9733_v34  ;;  %9869 = vtanh.f32 %v1893_v54  ;;  %v1242_v45 = vpop.f32.mrb[60].mxu0  ;;  %v2153_v5 = vmul.f32 %v11292_v51, %v9858_v55  ;;  %v9736_v55 = vld [vmem:[#allocation5 + $0x3d4] ss:$8 sps:$4 sm:$0xff]  }
 0x201   :  { %v9860_v42 = vpop.eup %9859  ;;  %v1759_v7 = vadd.f32 %v11017_v14, %v1242_v45  ;;  %v1244_v3 = vpop.f32.mrb[61].mxu0  ;;  %9871 = vtanh.f32 %v1931_v43 }
 0x202   :  { %v1394_v12 = vpop.f32.mrb[72].mxu1  ;;  %v9862_v15 = vpop.eup %9861  ;;  %2305 = vadd.xlane.f32.xlu0 %v2153_v5  ;;  %2379 = vadd.xlane.f32.xlu1 %v2190_v60  ;;  %v2191_v44 = vmul.f32 %v11292_v51, %v9860_v42 }
 0x203   :  { %v1797_v41 = vadd.f32 %v11301_v1, %v1394_v12  ;;  %v1396_v0 = vpop.f32.mrb[73].mxu1  ;;  %v11326_v34 = vpop.f32.mrb[62].mxu0  ;;  %v1894_v24 = vadd.f32 %v11272_v62, %v1759_v7  ;;  %v2154_v5 = vmul.f32 %v11292_v51, %v9862_v15 }
 0x204   :  { %v1397_v54 = vpop.f32.mrb[74].mxu1  ;;  %v1247_v52 = vpop.f32.mrb[63].mxu0 }
 0x205   :  { %v1932_v45 = vadd.f32 %v11272_v62, %v1797_v41  ;;  %v11331_v3 = vadd.f32 %v11301_v1, %v1397_v54  ;;  %v1399_v12 = vpop.f32.mrb[75].mxu1  ;;  %v11334_v0 = vpop.permute.xlu1 %3009  ;;  %9873 = vtanh.f32 %v1894_v24 }
 0x206   :  { %16963 = vst [vmem:[#allocation116_spill] sm:$0xff] %v11334_v0  ;;  %v9864_v37 = vpop.eup %9863  ;;  %2381 = vadd.xlane.f32.xlu0 %v2191_v44  ;;  %2307 = vadd.xlane.f32.xlu1 %v2154_v5  ;;  %v11338_v60 = vpop.permute.xlu0 %3021 }
 0x207   :  { %1609 = vmatmul.mubr.bf16.gmra.mrb[180].mxu1 %v9735_v36  ;;  %v9866_v7 = vpop.eup %9865  ;;  %9875 = vtanh.f32 %v1932_v45  ;;  %16964 = vst [vmem:[#allocation117_spill] sm:$0xff] %v11338_v60  ;;  %v2192_v42 = vmul.f32 %v11292_v51, %v9864_v37  ;;  %v9738_v36 = vld [vmem:[#allocation5 + $0x3d0] ss:$8 sps:$4 sm:$0xff]  }
 0x208   :  { %1616 = vmatprep.mubr.bf16.mxu1 %v9736_v55  ;;  %v2155_v52 = vmul.f32 %v11292_v51, %v9866_v7  ;;  %v9739_v55 = vld [vmem:[#allocation5 + $0x3e4] ss:$8 sps:$4 sm:$0xff]  }
 0x209   :  { %v9868_v43 = vpop.eup %9867  ;;  %v11344_v44 = vpop.permute.xlu1 %3017 }
 0x20a   :  { %v1402_v41 = vpop.f32.mrb[76].mxu1  ;;  %v9870_v54 = vpop.eup %9869  ;;  %2309 = vadd.xlane.f32.xlu0 %v2155_v52  ;;  %16965 = vst [vmem:[#allocation118_spill] sm:$0xff] %v11344_v44  ;;  %2383 = vadd.xlane.f32.xlu1 %v2192_v42  ;;  %v2193_v5 = vmul.f32 %v11292_v51, %v9868_v43 }
 0x20b   :  { %v11342_v24 = vadd.f32 %v11301_v1, %v1402_v41  ;;  %v1404_v15 = vpop.f32.mrb[77].mxu1  ;;  %v2156_v37 = vmul.f32 %v11292_v51, %v9870_v54  ;;  %v9872_v60 = vpop.eup %9871 }
 0x20c   :  { %v1405_v45 = vpop.f32.mrb[78].mxu1  ;;  %v11351_v15 = vpop.permute.xlu0 %3029  ;;  %v2194_v0 = vmul.f32 %v11292_v51, %v9872_v60 }
 0x20d   :  { %v11347_v12 = vadd.f32 %v11301_v1, %v1405_v45  ;;  %v1407_v7 = vpop.f32.mrb[79].mxu1  ;;  %16966 = vst [vmem:[#allocation119_spill] sm:$0xff] %v11351_v15  ;;  %v11354_v44 = vpop.permute.xlu1 %3025 }
 0x20e   :  { %2385 = vadd.xlane.f32.xlu0 %v2193_v5  ;;  %2311 = vadd.xlane.f32.xlu1 %v2156_v37  ;;  %16967 = vst [vmem:[#allocation120_spill] sm:$0xff] %v11354_v44  ;;  %v9742_v7 = vld [vmem:[#allocation5 + $0x3f4] ss:$8 sps:$4 sm:$0xff]  }
 0x20f   :  { %1617 = vmatmul.mubr.bf16.gmra.mrb[184].mxu1 %v9738_v36  ;;  %v9874_v41 = vpop.eup %9873  ;;  %v9741_v36 = vld [vmem:[#allocation5 + $0x3e0] ss:$8 sps:$4 sm:$0xff]  }
 0x210   :  { %1624 = vmatprep.mubr.bf16.mxu1 %v9739_v55  ;;  %v2157_v52 = vmul.f32 %v11292_v51, %v9874_v41  ;;  %v11364_v15 = vpop.permute.xlu0 %3037 }
 0x211   :  { %v9876_v42 = vpop.eup %9875  ;;  %16968 = vst [vmem:[#allocation121_spill] sm:$0xff] %v11364_v15  ;;  %v11366_v60 = vpop.permute.xlu1 %3033 }
 0x212   :  { %v1410_v45 = vpop.f32.mrb[80].mxu1  ;;  %2313 = vadd.xlane.f32.xlu0 %v2157_v52  ;;  %2387 = vadd.xlane.f32.xlu1 %v2194_v0  ;;  %v2195_v55 = vmul.f32 %v11292_v51, %v9876_v42  ;;  %16969 = vst [vmem:[#allocation122_spill] sm:$0xff] %v11366_v60  ;;  %v9744_v0 = vld [vmem:[#allocation5 + $0x3f0] ss:$8 sps:$4 sm:$0xff]  }
 0x213   :  { %v11358_v43 = vadd.f32 %v11301_v1, %v1410_v45  ;;  %v1412_v54 = vpop.f32.mrb[81].mxu1 }
 0x214   :  { %v1413_v5 = vpop.f32.mrb[82].mxu1  ;;  %v11371_v44 = vpop.permute.xlu0 %3045 }
 0x215   :  { %v11361_v37 = vadd.f32 %v11301_v1, %v1413_v5  ;;  %v1415_v41 = vpop.f32.mrb[83].mxu1  ;;  %16970 = vst [vmem:[#allocation123_spill] sm:$0xff] %v11371_v44 }
 0x216   :  { %2389 = vadd.xlane.f32.xlu0 %v2195_v55  ;;  %v11376_v41 = vpop.permute.xlu1 %3041 }
 0x217   :  { %1625 = vmatmul.mubr.bf16.gmra.mrb[188].mxu1 %v9741_v36  ;;  %16971 = vst [vmem:[#allocation124_spill] sm:$0xff] %v11376_v41 }
 0x218   :  { %1632 = vmatprep.mubr.bf16.mxu1 %v9742_v7  ;;  %v2318_v36 = vpop.xlane.xlu0 %2317 }
 0x219   :  { %v11379_v7 = vadd.f32 %v10872_v13, %v2318_v36 }
 0x21a   :  { %v1418_v45 = vpop.f32.mrb[84].mxu1  ;;  %v11384_v15 = vpop.permute.xlu1 %3049 }
 0x21b   :  { %v11369_v52 = vadd.f32 %v11301_v1, %v1418_v45  ;;  %v1420_v54 = vpop.f32.mrb[85].mxu1  ;;  %16972 = vst [vmem:[#allocation125_spill] sm:$0xff] %v11379_v7  ;;  %16973 = vst [vmem:[#allocation126_spill] sm:$0xff] %v11384_v15 }
 0x21c   :  { %v1421_v5 = vpop.f32.mrb[86].mxu1 }
 0x21d   :  { %v11374_v57 = vadd.f32 %v11301_v1, %v1421_v5  ;;  %v1423_v42 = vpop.f32.mrb[87].mxu1 }
 0x21e   :  { %v2320_v42 = vpop.xlane.xlu1 %2319 }
 0x21f   :  { %1633 = vmatmul.mubr.bf16.gmra.mrb[192].mxu1 %v9744_v0  ;;  %v11391_v41 = vadd.f32 %v10881_v30, %v2320_v42 }
 0x221   :  { %16974 = vst [vmem:[#allocation127_spill] sm:$0xff] %v11391_v41 }
 0x222   :  { %v1426_v55 = vpop.f32.mrb[88].mxu1 }
 0x223   :  { %v11382_v45 = vadd.f32 %v11301_v1, %v1426_v55  ;;  %v1428_v54 = vpop.f32.mrb[89].mxu1  ;;  %3526 = vperm.xlu1 %9527, %v11379_v7   ;;  %v1760_v7 = vadd.f32 %v11017_v14, %v11326_v34  ;;  %v1933_v14 = vadd.f32 %v11272_v62, %v11331_v3 }
 0x224   :  { %v1429_v44 = vpop.f32.mrb[90].mxu1 }
 0x225   :  { %v11387_v60 = vadd.f32 %v11301_v1, %v1429_v44  ;;  %v1431_v5 = vpop.f32.mrb[91].mxu1  ;;  %v1895_v47 = vadd.f32 %v11272_v62, %v1760_v7 }
 0x227   :  { %9877 = vtanh.f32 %v1895_v47 }
 0x22a   :  { %v1434_v0 = vpop.f32.mrb[92].mxu1 }
 0x22b   :  { %v11394_v13 = vadd.f32 %v11301_v1, %v1434_v0  ;;  %v1436_v36 = vpop.f32.mrb[93].mxu1 }
 0x22c   :  { %v1437_v55 = vpop.f32.mrb[94].mxu1  ;;  %3529 = vperm.xlu0 %9528, %v11391_v41  }
 0x22d   :  { %v11397_v54 = vadd.f32 %v11301_v1, %v1437_v55  ;;  %v1439_v44 = vpop.f32.mrb[95].mxu1  ;;  %v11411_v55 = vrot.slane %v10982_v61, %v10620_v4 }
 0x22e   :  { %v1934_v44 = vadd.f32 %v11272_v62, %v11342_v24 }
 0x230   :  { %9879 = vtanh.f32 %v1934_v44 }
 0x231   :  { %9881 = vtanh.f32 %v1933_v14  ;;  %v9878_v48 = vpop.eup %9877 }
 0x232   :  { %v1442_v5 = vpop.f32.mrb[96].mxu1 }
 0x233   :  { %v11403_v15 = vadd.f32 %v11301_v1, %v1442_v5  ;;  %v1444_v30 = vpop.f32.mrb[97].mxu1 }
 0x234   :  { %v1445_v42 = vpop.f32.mrb[98].mxu1 }
 0x235   :  { %v11406_v0 = vadd.f32 %v11301_v1, %v1445_v42  ;;  %v1447_v36 = vpop.f32.mrb[99].mxu1 }
 0x23a   :  { %v1450_v34 = vpop.f32.mrb[100].mxu1  ;;  %v9880_v35 = vpop.eup %9879 }
 0x23b   :  { %v11418_v5 = vadd.f32 %v11411_v55, %v1450_v34  ;;  %v1452_v1 = vpop.f32.mrb[101].mxu1  ;;  %v9882_v44 = vpop.eup %9881 }
 0x23c   :  { %v1453_v30 = vpop.f32.mrb[102].mxu1  ;;  %v2158_v1 = vmul.f32 %v11292_v51, %v9878_v48 }
 0x23d   :  { %v11421_v7 = vadd.f32 %v11411_v55, %v1453_v30  ;;  %v1455_v42 = vpop.f32.mrb[103].mxu1 }
 0x23e   :  { %v2197_v42 = vmul.f32 %v11292_v51, %v9880_v35 }
 0x242   :  { %v1458_v36 = vpop.f32.mrb[104].mxu1 }
 0x243   :  { %v11424_v41 = vadd.f32 %v11411_v55, %v1458_v36  ;;  %v1460_v24 = vpop.f32.mrb[105].mxu1 }
 0x244   :  { %v1461_v3 = vpop.f32.mrb[106].mxu1  ;;  %v2196_v24 = vmul.f32 %v11292_v51, %v9882_v44 }
 0x245   :  { %v11427_v47 = vadd.f32 %v11411_v55, %v1461_v3  ;;  %v1463_v34 = vpop.f32.mrb[107].mxu1 }
 0x247   :  { %2315 = vadd.xlane.f32.xlu1 %v2158_v1 }
 0x24a   :  { %v1466_v30 = vpop.f32.mrb[108].mxu1 }
 0x24b   :  { %v11432_v14 = vadd.f32 %v11411_v55, %v1466_v30  ;;  %v1468_v36 = vpop.f32.mrb[109].mxu1  ;;  %2393 = vadd.xlane.f32.xlu0 %v2197_v42  ;;  %2391 = vadd.xlane.f32.xlu1 %v2196_v24 }
 0x24c   :  { %v1469_v53 = vpop.f32.mrb[110].mxu1  ;;  %v2322_v36 = vpop.xlane.xlu0 %2321 }
 0x24d   :  { %v11436_v3 = vadd.f32 %v11411_v55, %v1469_v53  ;;  %v1471_v34 = vpop.f32.mrb[111].mxu1  ;;  %v11448_v53 = vadd.f32 %v10879_v23, %v2322_v36 }
 0x24e   :  { %v2324_v34 = vpop.xlane.xlu1 %2323 }
 0x24f   :  { %16976 = vst [vmem:[#allocation129_spill] sm:$0xff] %v11448_v53 }
 0x252   :  { %v1474_v29 = vpop.f32.mrb[112].mxu1 }
 0x253   :  { %v11439_v48 = vadd.f32 %v11411_v55, %v1474_v29  ;;  %v1476_v1 = vpop.f32.mrb[113].mxu1 }
 0x254   :  { %v1477_v38 = vpop.f32.mrb[114].mxu1 }
 0x255   :  { %v11442_v35 = vadd.f32 %v11411_v55, %v1477_v38  ;;  %v1479_v30 = vpop.f32.mrb[115].mxu1  ;;  %v11455_v38 = vadd.f32 %v10887_v32, %v2324_v34 }
 0x257   :  { %16975 = vst [vmem:[#allocation128_spill] sm:$0xff] %v11442_v35  ;;  %16978 = vst [vmem:[#allocation131_spill] sm:$0xff] %v11455_v38 }
 0x25a   :  { %v1482_v33 = vpop.f32.mrb[116].mxu1 }
 0x25b   :  { %v11445_v44 = vadd.f32 %v11411_v55, %v1482_v33  ;;  %v1484_v42 = vpop.f32.mrb[117].mxu1 }
 0x25c   :  { %v1485_v24 = vpop.f32.mrb[118].mxu1  ;;  %3532 = vperm.xlu1 %9527, %v11448_v53  }
 0x25d   :  { %v11451_v29 = vadd.f32 %v11411_v55, %v1485_v24  ;;  %v1487_v1 = vpop.f32.mrb[119].mxu1 }
 0x25f   :  { %16977 = vst [vmem:[#allocation130_spill] sm:$0xff] %v11451_v29 }
 0x261   :  { %3535 = vperm.xlu0 %9528, %v11455_v38  }
 0x262   :  { %v1490_v30 = vpop.f32.mrb[120].mxu1 }
 0x263   :  { %v11459_v33 = vadd.f32 %v11411_v55, %v1490_v30  ;;  %v1492_v42 = vpop.f32.mrb[121].mxu1  ;;  %v1936_v30 = vadd.f32 %v11272_v62, %v11358_v43 }
 0x264   :  { %v1493_v23 = vpop.f32.mrb[122].mxu1  ;;  %v1935_v42 = vadd.f32 %v11272_v62, %v11347_v12 }
 0x265   :  { %v11462_v36 = vadd.f32 %v11411_v55, %v1493_v23  ;;  %v1495_v35 = vpop.f32.mrb[123].mxu1  ;;  %9883 = vtanh.f32 %v1936_v30 }
 0x266   :  { %9885 = vtanh.f32 %v1935_v42 }
 0x267   :  { %16979 = vst [vmem:[#allocation132_spill] sm:$0xff] %v11462_v36 }
 0x26a   :  { %v1498_v24 = vpop.f32.mrb[124].mxu1 }
 0x26b   :  { %v11465_v1 = vadd.f32 %v11411_v55, %v1498_v24  ;;  %v1500_v53 = vpop.f32.mrb[125].mxu1 }
 0x26c   :  { %v1501_v29 = vpop.f32.mrb[126].mxu1  ;;  %v1688_v53 = vcombine.high %v10977_v56, %v10977_v56 }
 0x26d   :  { %v11468_v32 = vadd.f32 %v11411_v55, %v1501_v29  ;;  %v1503_v34 = vpop.f32.mrb[127].mxu1 }
 0x26e   :  { %v11483_v43 = vrot.slane %v1688_v53, %v10620_v4 }
 0x26f   :  { %16980 = vst [vmem:[#allocation133_spill] sm:$0xff] %v11468_v32  ;;  %v9884_v42 = vpop.eup %9883 }
 0x270   :  { %v2199_v56 = vmul.f32 %v11292_v51, %v9884_v42 }
 0x272   :  { %v1506_v23 = vpop.f32.mrb[128].mxu1 }
 0x273   :  { %v11475_v35 = vadd.f32 %v11411_v55, %v1506_v23  ;;  %v1508_v24 = vpop.f32.mrb[129].mxu1 }
 0x274   :  { %v1509_v38 = vpop.f32.mrb[130].mxu1 }
 0x275   :  { %16981 = vst [vmem:[#allocation134_spill] sm:$0xff] %v11475_v35  ;;  %v11480_v29 = vadd.f32 %v11411_v55, %v1509_v38  ;;  %v1511_v34 = vpop.f32.mrb[131].mxu1  ;;  %v9886_v35 = vpop.eup %9885 }
 0x276   :  { %v2198_v55 = vmul.f32 %v11292_v51, %v9886_v35 }
 0x277   :  { %16982 = vst [vmem:[#allocation135_spill] sm:$0xff] %v11480_v29 }
 0x27a   :  { %v1514_v32 = vpop.f32.mrb[132].mxu1 }
 0x27b   :  { %v11486_v12 = vadd.f32 %v11483_v43, %v1514_v32  ;;  %v1516_v30 = vpop.f32.mrb[133].mxu1 }
 0x27c   :  { %v1517_v23 = vpop.f32.mrb[134].mxu1 }
 0x27d   :  { %16983 = vst [vmem:[#allocation136_spill] sm:$0xff] %v11486_v12  ;;  %v11489_v24 = vadd.f32 %v11483_v43, %v1517_v23  ;;  %v1519_v36 = vpop.f32.mrb[135].mxu1 }
 0x27f   :  { %16984 = vst [vmem:[#allocation137_spill] sm:$0xff] %v11489_v24 }
 0x280   :  { %2397 = vadd.xlane.f32.xlu0 %v2199_v56  ;;  %2395 = vadd.xlane.f32.xlu1 %v2198_v55  ;;  %v2326_v55 = vpop.xlane.xlu0 %2325 }
 0x282   :  { %v1522_v38 = vpop.f32.mrb[136].mxu1 }
 0x283   :  { %v11494_v53 = vadd.f32 %v11483_v43, %v1522_v38  ;;  %v1524_v32 = vpop.f32.mrb[137].mxu1  ;;  %v11506_v38 = vadd.f32 %v10885_v31, %v2326_v55 }
 0x284   :  { %v1525_v34 = vpop.f32.mrb[138].mxu1  ;;  %v2328_v32 = vpop.xlane.xlu1 %2327 }
 0x285   :  { %v11497_v30 = vadd.f32 %v11483_v43, %v1525_v34  ;;  %v1527_v29 = vpop.f32.mrb[139].mxu1  ;;  %16986 = vst [vmem:[#allocation139_spill] sm:$0xff] %v11506_v38 }
 0x28a   :  { %v1530_v12 = vpop.f32.mrb[140].mxu1 }
 0x28b   :  { %v11500_v23 = vadd.f32 %v11483_v43, %v1530_v12  ;;  %v1532_v36 = vpop.f32.mrb[141].mxu1 }
 0x28c   :  { %v1533_v42 = vpop.f32.mrb[142].mxu1  ;;  %v11513_v36 = vadd.f32 %v10896_v50, %v2328_v32  ;;  %v1938_v50 = vadd.f32 %v11272_v62, %v11369_v52 }
 0x28d   :  { %v11503_v35 = vadd.f32 %v11483_v43, %v1533_v42  ;;  %v1535_v56 = vpop.f32.mrb[143].mxu1 }
 0x28e   :  { %16988 = vst [vmem:[#allocation141_spill] sm:$0xff] %v11513_v36  ;;  %9887 = vtanh.f32 %v1938_v50 }
 0x28f   :  { %16985 = vst [vmem:[#allocation138_spill] sm:$0xff] %v11503_v35 }
 0x291   :  { %3538 = vperm.xlu1 %9527, %v11506_v38  }
 0x292   :  { %v1538_v24 = vpop.f32.mrb[144].mxu1 }
 0x293   :  { %v11509_v34 = vadd.f32 %v11483_v43, %v1538_v24  ;;  %v1540_v29 = vpop.f32.mrb[145].mxu1 }
 0x294   :  { %v1541_v12 = vpop.f32.mrb[146].mxu1 }
 0x295   :  { %16987 = vst [vmem:[#allocation140_spill] sm:$0xff] %v11509_v34  ;;  %v11516_v42 = vadd.f32 %v11483_v43, %v1541_v12  ;;  %v1543_v56 = vpop.f32.mrb[147].mxu1 }
 0x296   :  { %3541 = vperm.xlu0 %9528, %v11513_v36   ;;  %v1937_v56 = vadd.f32 %v11272_v62, %v11361_v37 }
 0x297   :  { %16989 = vst [vmem:[#allocation142_spill] sm:$0xff] %v11516_v42 }
 0x298   :  { %9889 = vtanh.f32 %v1937_v56  ;;  %v1690_v56 = vcombine.high %v10982_v61, %v10982_v61 }
 0x29a   :  { %v1546_v31 = vpop.f32.mrb[148].mxu1 }
 0x29b   :  { %v11520_v55 = vadd.f32 %v11483_v43, %v1546_v31  ;;  %v1548_v35 = vpop.f32.mrb[149].mxu1 }
 0x29c   :  { %v1549_v24 = vpop.f32.mrb[150].mxu1 }
 0x29d   :  { %16990 = vst [vmem:[#allocation143_spill] sm:$0xff] %v11520_v55  ;;  %v11523_v29 = vadd.f32 %v11483_v43, %v1549_v24  ;;  %v1551_v38 = vpop.f32.mrb[151].mxu1 }
 0x29f   :  { %16991 = vst [vmem:[#allocation144_spill] sm:$0xff] %v11523_v29 }
 0x2a2   :  { %v1554_v34 = vpop.f32.mrb[152].mxu1 }
 0x2a3   :  { %v11528_v32 = vadd.f32 %v11483_v43, %v1554_v34  ;;  %v1556_v12 = vpop.f32.mrb[153].mxu1 }
 0x2a4   :  { %v1557_v36 = vpop.f32.mrb[154].mxu1 }
 0x2a5   :  { %16992 = vst [vmem:[#allocation145_spill] sm:$0xff] %v11528_v32  ;;  %v11533_v31 = vadd.f32 %v11483_v43, %v1557_v36  ;;  %v1559_v35 = vpop.f32.mrb[155].mxu1  ;;  %v9888_v32 = vpop.eup %9887 }
 0x2a6   :  { %v9890_v55 = vpop.eup %9889  ;;  %v2201_v50 = vmul.f32 %v11292_v51, %v9888_v32 }
 0x2aa   :  { %v1562_v24 = vpop.f32.mrb[156].mxu1 }
 0x2ab   :  { %v11536_v38 = vadd.f32 %v11483_v43, %v1562_v24  ;;  %v1564_v29 = vpop.f32.mrb[157].mxu1  ;;  %v2200_v24 = vmul.f32 %v11292_v51, %v9890_v55 }
 0x2ac   :  { %v1565_v52 = vpop.f32.mrb[158].mxu1 }
 0x2ad   :  { %v11539_v34 = vadd.f32 %v11483_v43, %v1565_v52  ;;  %v1567_v12 = vpop.f32.mrb[159].mxu1 }
 0x2ae   :  { %v11552_v12 = vrot.slane %v1690_v56, %v10620_v4 }
 0x2af   :  { %16993 = vst [vmem:[#allocation146_spill] sm:$0xff] %v11539_v34 }
 0x2b2   :  { %v1570_v37 = vpop.f32.mrb[160].mxu1 }
 0x2b3   :  { %v11542_v42 = vadd.f32 %v11483_v43, %v1570_v37  ;;  %v1572_v36 = vpop.f32.mrb[161].mxu1 }
 0x2b4   :  { %v1573_v35 = vpop.f32.mrb[162].mxu1 }
 0x2b5   :  { %16994 = vst [vmem:[#allocation147_spill] sm:$0xff] %v11542_v42  ;;  %v11548_v29 = vadd.f32 %v11483_v43, %v1573_v35  ;;  %v1575_v52 = vpop.f32.mrb[163].mxu1  ;;  %2401 = vadd.xlane.f32.xlu0 %v2201_v50  ;;  %2399 = vadd.xlane.f32.xlu1 %v2200_v24  ;;  %v2330_v35 = vpop.xlane.xlu0 %2329 }
 0x2ba   :  { %v1578_v37 = vpop.f32.mrb[164].mxu1 }
 0x2bb   :  { %v11555_v36 = vadd.f32 %v11552_v12, %v1578_v37  ;;  %v1580_v42 = vpop.f32.mrb[165].mxu1  ;;  %v11567_v37 = vadd.f32 %v10894_v46, %v2330_v35 }
 0x2bc   :  { %v1581_v32 = vpop.f32.mrb[166].mxu1  ;;  %v2332_v42 = vpop.xlane.xlu1 %2331 }
 0x2bd   :  { %v11558_v34 = vadd.f32 %v11552_v12, %v1581_v32  ;;  %v1583_v61 = vpop.f32.mrb[167].mxu1  ;;  %16996 = vst [vmem:[#allocation149_spill] sm:$0xff] %v11567_v37  ;;  %v11571_v32 = vadd.f32 %v10903_v59, %v2332_v42 }
 0x2bf   :  { %16997 = vst [vmem:[#allocation150_spill] sm:$0xff] %v11571_v32 }
 0x2c2   :  { %v1586_v43 = vpop.f32.mrb[168].mxu1 }
 0x2c3   :  { %v11561_v55 = vadd.f32 %v11552_v12, %v1586_v43  ;;  %v1588_v50 = vpop.f32.mrb[169].mxu1 }
 0x2c4   :  { %v1589_v24 = vpop.f32.mrb[170].mxu1 }
 0x2c5   :  { %v11564_v56 = vadd.f32 %v11552_v12, %v1589_v24  ;;  %v1591_v52 = vpop.f32.mrb[171].mxu1 }
 0x2c6   :  { %3544 = vperm.xlu1 %9527, %v11567_v37  }
 0x2c7   :  { %16995 = vst [vmem:[#allocation148_spill] sm:$0xff] %v11564_v56 }
 0x2ca   :  { %v1594_v61 = vpop.f32.mrb[172].mxu1 }
 0x2cb   :  { %v11574_v4 = vadd.f32 %v11552_v12, %v1594_v61  ;;  %v1596_v43 = vpop.f32.mrb[173].mxu1  ;;  %3547 = vperm.xlu0 %9528, %v11571_v32   ;;  %v1940_v61 = vadd.f32 %v11272_v62, %v11382_v45 }
 0x2cc   :  { %v1597_v50 = vpop.f32.mrb[174].mxu1  ;;  %v1939_v43 = vadd.f32 %v11272_v62, %v11374_v57 }
 0x2cd   :  { %v11578_v24 = vadd.f32 %v11552_v12, %v1597_v50  ;;  %v1599_v52 = vpop.f32.mrb[175].mxu1  ;;  %9891 = vtanh.f32 %v1940_v61 }
 0x2ce   :  { %9893 = vtanh.f32 %v1939_v43 }
 0x2cf   :  { %16998 = vst [vmem:[#allocation151_spill] sm:$0xff] %v11578_v24 }
 0x2d2   :  { %v1602_v46 = vpop.f32.mrb[176].mxu1 }
 0x2d3   :  { %v11581_v35 = vadd.f32 %v11552_v12, %v1602_v46  ;;  %v1604_v37 = vpop.f32.mrb[177].mxu1 }
 0x2d4   :  { %v1605_v56 = vpop.f32.mrb[178].mxu1 }
 0x2d5   :  { %16999 = vst [vmem:[#allocation152_spill] sm:$0xff] %v11581_v35  ;;  %v11584_v59 = vadd.f32 %v11552_v12, %v1605_v56  ;;  %v1607_v42 = vpop.f32.mrb[179].mxu1 }
 0x2d7   :  { %17000 = vst [vmem:[#allocation153_spill] sm:$0xff] %v11584_v59 }
 0x2da   :  { %v1610_v32 = vpop.f32.mrb[180].mxu1 }
 0x2db   :  { %v11591_v50 = vadd.f32 %v11552_v12, %v1610_v32  ;;  %v1612_v52 = vpop.f32.mrb[181].mxu1  ;;  %v9892_v32 = vpop.eup %9891 }
 0x2dc   :  { %v1613_v46 = vpop.f32.mrb[182].mxu1  ;;  %v2203_v61 = vmul.f32 %v11292_v51, %v9892_v32 }
 0x2dd   :  { %17001 = vst [vmem:[#allocation154_spill] sm:$0xff] %v11591_v50  ;;  %v11594_v37 = vadd.f32 %v11552_v12, %v1613_v46  ;;  %v1615_v56 = vpop.f32.mrb[183].mxu1  ;;  %v9894_v50 = vpop.eup %9893 }
 0x2de   :  { %v2202_v43 = vmul.f32 %v11292_v51, %v9894_v50 }
 0x2df   :  { %17002 = vst [vmem:[#allocation155_spill] sm:$0xff] %v11594_v37 }
 0x2e2   :  { %v1618_v59 = vpop.f32.mrb[184].mxu1 }
 0x2e3   :  { %v11597_v42 = vadd.f32 %v11552_v12, %v1618_v59  ;;  %v1620_v45 = vpop.f32.mrb[185].mxu1 }
 0x2e4   :  { %v1621_v35 = vpop.f32.mrb[186].mxu1 }
 0x2e5   :  { %17003 = vst [vmem:[#allocation156_spill] sm:$0xff] %v11597_v42  ;;  %v11600_v57 = vadd.f32 %v11552_v12, %v1621_v35  ;;  %v1623_v24 = vpop.f32.mrb[187].mxu1 }
 0x2e7   :  { %17004 = vst [vmem:[#allocation157_spill] sm:$0xff] %v11600_v57  ;;  %v2258_v57 = vpop.xlane.xlu0 %2257 }
 0x2ea   :  { %v1626_v52 = vpop.f32.mrb[188].mxu1  ;;  %2405 = vadd.xlane.f32.xlu0 %v2203_v61  ;;  %2403 = vadd.xlane.f32.xlu1 %v2202_v43  ;;  %v11621_v43 = vadd.f32 %v10771_v8, %v2258_v57 }
 0x2eb   :  { %v11605_v46 = vadd.f32 %v11552_v12, %v1626_v52  ;;  %v1628_v56 = vpop.f32.mrb[189].mxu1 }
 0x2ec   :  { %v1629_v59 = vpop.f32.mrb[190].mxu1  ;;  %17007 = vst [vmem:[#allocation160_spill] sm:$0xff] %v11621_v43  ;;  %v2336_v56 = vpop.xlane.xlu1 %2335 }
 0x2ed   :  { %17005 = vst [vmem:[#allocation158_spill] sm:$0xff] %v11605_v46  ;;  %v11608_v45 = vadd.f32 %v11552_v12, %v1629_v59  ;;  %v1631_v35 = vpop.f32.mrb[191].mxu1  ;;  %v2334_v46 = vpop.xlane.xlu0 %2333  ;;  %v11625_v59 = vadd.f32 %v10908_v19, %v2336_v56 }
 0x2ee   :  { %v11617_v61 = vadd.f32 %v10901_v58, %v2334_v46  ;;  %v1942_v58 = vadd.f32 %v11272_v62, %v11394_v13 }
 0x2ef   :  { %17008 = vst [vmem:[#allocation161_spill] sm:$0xff] %v11625_v59 }
 0x2f0   :  { %17006 = vst [vmem:[#allocation159_spill] sm:$0xff] %v11617_v61  ;;  %v2262_v35 = vpop.xlane.xlu1 %2261 }
 0x2f1   :  { %v2260_v19 = vpop.xlane.xlu0 %2259  ;;  %v11639_v13 = vadd.f32 %v10775_v10, %v2262_v35  ;;  %v1944_v10 = vadd.f32 %v11272_v62, %v11403_v15 }
 0x2f2   :  { %v1634_v24 = vpop.f32.mrb[192].mxu1 }
 0x2f3   :  { %v11611_v42 = vadd.f32 %v11552_v12, %v1634_v24  ;;  %v1636_v32 = vpop.f32.mrb[193].mxu1  ;;  %v11635_v24 = vadd.f32 %v10768_v6, %v2260_v19  ;;  %17010 = vst [vmem:[#allocation163_spill] sm:$0xff] %v11639_v13 }
 0x2f4   :  { %v1637_v37 = vpop.f32.mrb[194].mxu1 }
 0x2f5   :  { %v11614_v50 = vadd.f32 %v11552_v12, %v1637_v37  ;;  %v1639_v52 = vpop.f32.mrb[195].mxu1  ;;  %v1941_v12 = vadd.f32 %v11272_v62, %v11387_v60  ;;  %17009 = vst [vmem:[#allocation162_spill] sm:$0xff] %v11635_v24  ;;  %v2264_v60 = vpop.xlane.xlu1 %2263 }
 0x2f6   :  { %v2338_v32 = vpop.xlane.xlu0 %2337  ;;  %v11646_v56 = vadd.f32 %v10785_v17, %v2264_v60 }
 0x2f7   :  { %9895 = vtanh.f32 %v1941_v12  ;;  %v11643_v52 = vadd.f32 %v10906_v9, %v2338_v32  ;;  %v1943_v9 = vadd.f32 %v11272_v62, %v11397_v54 }
 0x2f8   :  { %9897 = vtanh.f32 %v1942_v58  ;;  %17012 = vst [vmem:[#allocation165_spill] sm:$0xff] %v11646_v56 }
 0x2f9   :  { %17011 = vst [vmem:[#allocation164_spill] sm:$0xff] %v11643_v52  ;;  %v2340_v12 = vpop.xlane.xlu1 %2339  ;;  %9899 = vtanh.f32 %v1944_v10 }
 0x2fa   :  { %v11651_v6 = vadd.f32 %v10912_v25, %v2340_v12  ;;  %9901 = vtanh.f32 %v1943_v9  ;;  %v2266_v25 = vpop.xlane.xlu0 %2265 }
 0x2fb   :  { %3550 = vperm.xlu1 %9527, %v11617_v61  }
 0x2fc   :  { %17013 = vst [vmem:[#allocation166_spill] sm:$0xff] %v11651_v6 }
 0x2fe   :  { %v2342_v19 = vpop.xlane.xlu0 %2341 }
 0x2ff   :  { %v11665_v15 = vadd.f32 %v10910_v22, %v2342_v19  ;;  %v1945_v22 = vadd.f32 %v11272_v62, %v11406_v0 }
 0x300   :  { %3436 = vperm.xlu0 %9528, %v11621_v43  }
 0x301   :  { %v9896_v37 = vpop.eup %9895  ;;  %17015 = vst [vmem:[#allocation168_spill] sm:$0xff] %v11665_v15 }
 0x302   :  { %v9898_v46 = vpop.eup %9897  ;;  %v2204_v8 = vmul.f32 %v11292_v51, %v9896_v37 }
 0x303   :  { %v2205_v57 = vmul.f32 %v11292_v51, %v9898_v46  ;;  %v9900_v17 = vpop.eup %9899 }
 0x304   :  { %3553 = vperm.xlu0 %9528, %v11625_v59   ;;  %v9902_v58 = vpop.eup %9901  ;;  %v2207_v37 = vmul.f32 %v11292_v51, %v9900_v17 }
 0x305   :  { %v2206_v46 = vmul.f32 %v11292_v51, %v9902_v58 }
 0x31f   :  { %2407 = vadd.xlane.f32.xlu1 %v2204_v8  ;;  %v2268_v8 = vpop.xlane.xlu1 %2267 }
 0x320   :  { %v11668_v54 = vadd.f32 %v10796_v20, %v2268_v8 }
 0x322   :  { %17016 = vst [vmem:[#allocation169_spill] sm:$0xff] %v11668_v54 }
 0x323   :  { %2409 = vadd.xlane.f32.xlu0 %v2205_v57  ;;  %v11661_v57 = vadd.f32 %v10778_v11, %v2266_v25  ;;  %v2344_v35 = vpop.xlane.xlu1 %2343  ;;  %v1946_v11 = vadd.f32 %v11272_v62, %v11418_v5 }
 0x324   :  { %v11673_v60 = vadd.f32 %v10916_v49, %v2344_v35  ;;  %v2270_v49 = vpop.xlane.xlu0 %2269 }
 0x325   :  { %17014 = vst [vmem:[#allocation167_spill] sm:$0xff] %v11661_v57  ;;  %9903 = vtanh.f32 %v1946_v11  ;;  %v11683_v17 = vadd.f32 %v10788_v18, %v2270_v49  ;;  %v1948_v18 = vadd.f32 %v11272_v62, %v11424_v41 }
 0x326   :  { %17017 = vst [vmem:[#allocation170_spill] sm:$0xff] %v11673_v60  ;;  %9905 = vtanh.f32 %v1945_v22 }
 0x327   :  { %v2272_v9 = vpop.xlane.xlu1 %2271  ;;  %17018 = vst [vmem:[#allocation171_spill] sm:$0xff] %v11683_v17  ;;  %9907 = vtanh.f32 %v1948_v18 }
 0x328   :  { %v2346_v58 = vpop.xlane.xlu0 %2345  ;;  %v11690_v5 = vadd.f32 %v10802_v26, %v2272_v9 }
 0x329   :  { %v11687_v0 = vadd.f32 %v10914_v39, %v2346_v58  ;;  %v1947_v39 = vadd.f32 %v11272_v62, %v11421_v7 }
 0x32a   :  { %17020 = vst [vmem:[#allocation173_spill] sm:$0xff] %v11690_v5 }
 0x32b   :  { %17019 = vst [vmem:[#allocation172_spill] sm:$0xff] %v11687_v0  ;;  %9909 = vtanh.f32 %v1947_v39 }
 0x32f   :  { %v9904_v20 = vpop.eup %9903 }
 0x330   :  { %3439 = vperm.xlu1 %9527, %v11635_v24   ;;  %v9906_v32 = vpop.eup %9905  ;;  %v2209_v12 = vmul.f32 %v11292_v51, %v9904_v20  ;;  %v17158_v24 = vld [vmem:[#allocation73_spill] sm:$0xff] }
 0x331   :  { %v2208_v10 = vmul.f32 %v11292_v51, %v9906_v32  ;;  %v9908_v26 = vpop.eup %9907 }
 0x332   :  { %v2211_v8 = vmul.f32 %v11292_v51, %v9908_v26  ;;  %v17030_v26 = vld [vmem:[#allocation47_spill] sm:$0xff] }
 0x334   :  { %3442 = vperm.xlu1 %9527, %v11639_v13  }
 0x335   :  { %v9910_v25 = vpop.eup %9909 }
 0x336   :  { %v2210_v19 = vmul.f32 %v11292_v51, %v9910_v25 }
 0x338   :  { %3556 = vperm.xlu1 %9527, %v11643_v52   ;;  %v17076_v52 = vld [vmem:[#allocation38_spill] sm:$0xff] }
 0x339   :  { %3445 = vperm.xlu0 %9528, %v11646_v56  }
 0x33d   :  { %3559 = vperm.xlu0 %9528, %v11651_v6  }
 0x35c   :  { %2413 = vadd.xlane.f32.xlu0 %v2207_v37  ;;  %2411 = vadd.xlane.f32.xlu1 %v2206_v46  ;;  %v2348_v37 = vpop.xlane.xlu1 %2347 }
 0x35d   :  { %v11695_v46 = vadd.f32 %v10922_v2, %v2348_v37  ;;  %v2274_v2 = vpop.xlane.xlu0 %2273 }
 0x35e   :  { %v11705_v11 = vadd.f32 %v10799_v21, %v2274_v2  ;;  %v11723_v21 = vld [vmem:[%s16465_s5] ss:$0 sm:$0xff] }
 0x35f   :  { %17021 = vst [vmem:[#allocation174_spill] sm:$0xff] %v11695_v46 }
 0x360   :  { %v2276_v35 = vpop.xlane.xlu1 %2275  ;;  %17022 = vst [vmem:[#allocation175_spill] sm:$0xff] %v11705_v11 }
 0x361   :  { %v2350_v22 = vpop.xlane.xlu0 %2349  ;;  %v11712_v41 = vadd.f32 %v10808_v28, %v2276_v35  ;;  %v1949_v28 = vadd.f32 %v11723_v21, %v11427_v47 }
 0x362   :  { %v11709_v62 = vadd.f32 %v10918_v63, %v2350_v22  ;;  %v1950_v63 = vadd.f32 %v11723_v21, %v11432_v14  ;;  %v17028_v14 = vld [vmem:[#allocation26_spill] sm:$0xff] }
 0x363   :  { %17024 = vst [vmem:[#allocation177_spill] sm:$0xff] %v11712_v41 }
 0x364   :  { %17023 = vst [vmem:[#allocation176_spill] sm:$0xff] %v11709_v62  ;;  %v2352_v7 = vpop.xlane.xlu1 %2351  ;;  %9911 = vtanh.f32 %v1950_v63  ;;  %v17032_v63 = vld [vmem:[#allocation25_spill] sm:$0xff] }
 0x365   :  { %v11717_v20 = vadd.f32 %v10926_v40, %v2352_v7  ;;  %9913 = vtanh.f32 %v1949_v28  ;;  %v2278_v49 = vpop.xlane.xlu0 %2277 }
 0x366   :  { %v11732_v58 = vadd.f32 %v10805_v27, %v2278_v49  ;;  %v1952_v27 = vadd.f32 %v11723_v21, %v11439_v48  ;;  %v17034_v48 = vld [vmem:[#allocation46_spill] sm:$0xff] }
 0x367   :  { %17025 = vst [vmem:[#allocation178_spill] sm:$0xff] %v11717_v20 }
 0x368   :  { %v2280_v9 = vpop.xlane.xlu1 %2279  ;;  %17026 = vst [vmem:[#allocation179_spill] sm:$0xff] %v11732_v58  ;;  %9915 = vtanh.f32 %v1952_v27  ;;  %v11776_v27 = vld [vmem:[%s16466_s6] ss:$0 sm:$0xff]  ;;  %s10497_s6 = smov [#allocation12]  }
 0x369   :  { %v2354_v37 = vpop.xlane.xlu0 %2353  ;;  %v11739_v18 = vadd.f32 %v17028_v14, %v2280_v9  ;;  %v1954_v9 = vadd.f32 %v11723_v21, %v11445_v44  ;;  %s9050_s30 = sshll.u32 %s10497_s6, 4  ;;  %s9051_s30 = int_to_ptr.vmem [resolvable:$true] %s9050_s30 }
 0x36a   :  { %v11736_v47 = vadd.f32 %v10924_v16, %v2354_v37  ;;  %v1951_v16 = vadd.f32 %v11723_v21, %v11436_v3  ;;  %v17040_v37 = vld [vmem:[#allocation128_spill] sm:$0xff]  ;;  %s10430_s9 = scalar_lea.vmem %s9051_s30, 128  ;;  %p10435_p13 = scmp.lt.s32.totalorder %s9051_s30, %s9051_s30 }
 0x36b   :  { %17029 = vst [vmem:[#allocation26_spill] sm:$0xff] %v11739_v18  ;;  %v1953_v14 = vadd.f32 %v11723_v21, %v17040_v37  ;;  %v17049_v37 = vld [vmem:[#allocation130_spill] sm:$0xff]  ;;  %p10431_p12 = scmp.ne.s32.totalorder %s9051_s30, %s10430_s9  ;;  %p10436_p0 = scmp.lt.s32.totalorder %s10430_s9, %s10430_s9 }
 0x36c   :  { %17027 = vst [vmem:[#allocation180_spill] sm:$0xff] %v11736_v47  ;;  %v2356_v39 = vpop.xlane.xlu1 %2355  ;;  %9917 = vtanh.f32 %v1951_v16 }
 0x36d   :  { %3448 = vperm.xlu1 %9527, %v11661_v57   ;;  %v11744_v25 = vadd.f32 %v17030_v26, %v2356_v39  ;;  %v2282_v22 = vpop.xlane.xlu0 %2281  ;;  %9919 = vtanh.f32 %v1954_v9  ;;  %v1956_v9 = vadd.f32 %v11723_v21, %v11459_v33  ;;  %v17052_v33 = vld [vmem:[#allocation51_spill] sm:$0xff]  ;;  %p10437_p1 = por %p10436_p0, %p10435_p13 }
 0x36e   :  { %v9912_v32 = vpop.eup %9911  ;;  %v11754_v28 = vadd.f32 %v17032_v63, %v2282_v22  ;;  %9921 = vtanh.f32 %v1953_v14  ;;  %v1955_v14 = vadd.f32 %v11723_v21, %v17049_v37  ;;  %v17056_v37 = vld [vmem:[#allocation54_spill] sm:$0xff] }
 0x36f   :  { %v2213_v40 = vmul.f32 %v11292_v51, %v9912_v32  ;;  %17031 = vst [vmem:[#allocation47_spill] sm:$0xff] %v11744_v25  ;;  %9923 = vtanh.f32 %v1956_v9  ;;  %p10438_p2 = pnand %p10437_p1, %p10431_p12 }
 0x370   :  { %v2284_v7 = vpop.xlane.xlu1 %2283  ;;  %17033 = vst [vmem:[#allocation25_spill] sm:$0xff] %v11754_v28  ;;  %9925 = vtanh.f32 %v1955_v14 }
 0x371   :  { %3562 = vperm.xlu1 %9527, %v11665_v15   ;;  %v2358_v32 = vpop.xlane.xlu0 %2357 }
 0x372   :  { %3451 = vperm.xlu0 %9528, %v11668_v54   ;;  %v11758_v3 = vadd.f32 %v17034_v48, %v2358_v32  ;;  %v17045_v32 = vld [vmem:[#allocation30_spill] sm:$0xff] }
 0x374   :  { %17035 = vst [vmem:[#allocation46_spill] sm:$0xff] %v11758_v3 }
 0x376   :  { %3565 = vperm.xlu0 %9528, %v11673_v60  }
 0x395   :  { %2417 = vadd.xlane.f32.xlu0 %v2209_v12  ;;  %2415 = vadd.xlane.f32.xlu1 %v2208_v10  ;;  %v9914_v12 = vpop.eup %9913 }
 0x396   :  { %v2212_v10 = vmul.f32 %v11292_v51, %v9914_v12  ;;  %v17036_v12 = vld [vmem:[#allocation28_spill] sm:$0xff] }
 0x3a6   :  { %3454 = vperm.xlu1 %9527, %v11683_v17   ;;  %v17152_v17 = vld [vmem:[#allocation157_spill] sm:$0xff] }
 0x3aa   :  { %3568 = vperm.xlu1 %9527, %v11687_v0  }
 0x3ab   :  { %3457 = vperm.xlu0 %9528, %v11690_v5  }
 0x3af   :  { %3571 = vperm.xlu0 %9528, %v11695_v46  }
 0x3ce   :  { %2421 = vadd.xlane.f32.xlu0 %v2211_v8  ;;  %2419 = vadd.xlane.f32.xlu1 %v2210_v19  ;;  %v9916_v8 = vpop.eup %9915 }
 0x3cf   :  { %v9918_v19 = vpop.eup %9917  ;;  %v2215_v2 = vmul.f32 %v11292_v51, %v9916_v8 }
 0x3d0   :  { %v2214_v35 = vmul.f32 %v11292_v51, %v9918_v19  ;;  %v17038_v51 = vld [vmem:[#allocation50_spill] sm:$0xff]  ;;  %v9920_v39 = vpop.eup %9919  ;;  %v2286_v19 = vpop.xlane.xlu0 %2285 }
 0x3d1   :  { %v9922_v26 = vpop.eup %9921  ;;  %v2217_v16 = vmul.f32 %v11776_v27, %v9920_v39 }
 0x3d2   :  { %v2216_v8 = vmul.f32 %v11776_v27, %v9922_v26  ;;  %v9924_v39 = vpop.eup %9923 }
 0x3d3   :  { %v9926_v26 = vpop.eup %9925 }
 0x3d4   :  { %v2362_v22 = vpop.xlane.xlu0 %2361 }
 0x3df   :  { %3460 = vperm.xlu1 %9527, %v11705_v11  }
 0x3e3   :  { %3574 = vperm.xlu1 %9527, %v11709_v62   ;;  %v17071_v62 = vld [vmem:[#allocation36_spill] sm:$0xff] }
 0x3e4   :  { %3463 = vperm.xlu0 %9528, %v11712_v41  }
 0x3e8   :  { %3577 = vperm.xlu0 %9528, %v11717_v20  }
 0x407   :  { %2425 = vadd.xlane.f32.xlu0 %v2213_v40  ;;  %2423 = vadd.xlane.f32.xlu1 %v2212_v10  ;;  %v11761_v40 = vadd.f32 %v17036_v12, %v2284_v7  ;;  %v2360_v10 = vpop.xlane.xlu1 %2359  ;;  %v17043_v7 = vld [vmem:[#allocation49_spill] sm:$0xff] }
 0x408   :  { %v11766_v49 = vadd.f32 %v17038_v51, %v2360_v10  ;;  %v11785_v63 = vadd.f32 %v17043_v7, %v2362_v22  ;;  %v17047_v10 = vld [vmem:[#allocation52_spill] sm:$0xff] }
 0x409   :  { %17037 = vst [vmem:[#allocation28_spill] sm:$0xff] %v11761_v40 }
 0x40a   :  { %17039 = vst [vmem:[#allocation50_spill] sm:$0xff] %v11766_v49 }
 0x40b   :  { %v2288_v44 = vpop.xlane.xlu1 %2287 }
 0x40c   :  { %v11788_v48 = vadd.f32 %v17045_v32, %v2288_v44 }
 0x40e   :  { %17046 = vst [vmem:[#allocation49_spill] sm:$0xff] %v11788_v48 }
 0x40f   :  { %v2364_v12 = vpop.xlane.xlu1 %2363 }
 0x410   :  { %v11793_v51 = vadd.f32 %v17047_v10, %v2364_v12  ;;  %v17054_v12 = vld [vmem:[#allocation32_spill] sm:$0xff] }
 0x412   :  { %17048 = vst [vmem:[#allocation30_spill] sm:$0xff] %v11793_v51 }
 0x413   :  { %v2292_v44 = vpop.xlane.xlu1 %2291 }
 0x414   :  { %v11810_v10 = vadd.f32 %v17054_v12, %v2292_v44 }
 0x417   :  { %v2368_v9 = vpop.xlane.xlu1 %2367 }
 0x418   :  { %3466 = vperm.xlu1 %9527, %v11732_v58   ;;  %v11815_v14 = vadd.f32 %v17056_v37, %v2368_v9 }
 0x41a   :  { %17057 = vst [vmem:[#allocation51_spill] sm:$0xff] %v11815_v14 }
 0x41b   :  { %v2296_v9 = vpop.xlane.xlu1 %2295 }
 0x41c   :  { %3580 = vperm.xlu1 %9527, %v11736_v47  }
 0x41d   :  { %3469 = vperm.xlu0 %9528, %v11739_v18  }
 0x421   :  { %3583 = vperm.xlu0 %9528, %v11744_v25  }
 0x440   :  { %2429 = vadd.xlane.f32.xlu0 %v2215_v2  ;;  %2427 = vadd.xlane.f32.xlu1 %v2214_v35  ;;  %v17041_v2 = vld [vmem:[#allocation27_spill] sm:$0xff] }
 0x441   :  { %v11781_v35 = vadd.f32 %v17041_v2, %v2286_v19  ;;  %17044 = vst [vmem:[#allocation27_spill] sm:$0xff] %v11785_v63  ;;  %v2290_v19 = vpop.xlane.xlu0 %2289  ;;  %v17050_v2 = vld [vmem:[#allocation29_spill] sm:$0xff] }
 0x442   :  { %v11803_v22 = vadd.f32 %v17050_v2, %v2290_v19  ;;  %17055 = vst [vmem:[#allocation29_spill] sm:$0xff] %v11810_v10 }
 0x443   :  { %17042 = vst [vmem:[#allocation128_spill] sm:$0xff] %v11781_v35 }
 0x444   :  { %17051 = vst [vmem:[#allocation52_spill] sm:$0xff] %v11803_v22 }
 0x445   :  { %v2366_v7 = vpop.xlane.xlu0 %2365 }
 0x446   :  { %v11807_v32 = vadd.f32 %v17052_v33, %v2366_v7  ;;  %v17059_v33 = vld [vmem:[#allocation31_spill] sm:$0xff] }
 0x448   :  { %17053 = vst [vmem:[#allocation130_spill] sm:$0xff] %v11807_v32 }
 0x449   :  { %v2294_v7 = vpop.xlane.xlu0 %2293 }
 0x44a   :  { %v11825_v12 = vadd.f32 %v17059_v33, %v2294_v7 }
 0x44c   :  { %17060 = vst [vmem:[#allocation32_spill] sm:$0xff] %v11825_v12 }
 0x44d   :  { %v11838_v33 = vpop.xlane.xlu0 %2369 }
 0x451   :  { %3472 = vperm.xlu1 %9527, %v11754_v28  }
 0x455   :  { %3586 = vperm.xlu1 %9527, %v11758_v3  }
 0x456   :  { %3475 = vperm.xlu0 %9528, %v11761_v40  }
 0x45a   :  { %3589 = vperm.xlu0 %9528, %v11766_v49  }
 0x479   :  { %2433 = vadd.xlane.f32.xlu0 %v2217_v16  ;;  %2431 = vadd.xlane.f32.xlu1 %v2216_v8  ;;  %v2219_v16 = vmul.f32 %v11776_v27, %v9924_v39  ;;  %v2218_v8 = vmul.f32 %v11776_v27, %v9926_v26  ;;  %v1958_v39 = vadd.f32 %v11723_v21, %v11465_v1  ;;  %v17058_v26 = vld [vmem:[#allocation132_spill] sm:$0xff]  ;;  %v17061_v1 = vld [vmem:[#allocation35_spill] sm:$0xff] }
 0x47a   :  { %v11829_v37 = vadd.f32 %v17061_v1, %v2296_v9  ;;  %v11840_v9 = vpop.xlane.xlu1 %2371  ;;  %v2298_v1 = vpop.xlane.xlu0 %2297 }
 0x47b   :  { %9927 = vtanh.f32 %v1958_v39  ;;  %v17063_v39 = vld [vmem:[#allocation134_spill] sm:$0xff] }
 0x47c   :  { %17062 = vst [vmem:[#allocation54_spill] sm:$0xff] %v11829_v37 }
 0x48a   :  { %3478 = vperm.xlu1 %9527, %v11781_v35   ;;  %v17140_v35 = vld [vmem:[#allocation155_spill] sm:$0xff] }
 0x48b   :  { %v1987_v59 = vadd.f32 %v11723_v21, %v17140_v35 }
 0x48e   :  { %3592 = vperm.xlu1 %9527, %v11785_v63   ;;  %v2300_v63 = vpop.xlane.xlu1 %2299 }
 0x48f   :  { %3481 = vperm.xlu0 %9528, %v11788_v48  }
 0x493   :  { %3595 = vperm.xlu0 %9528, %v11793_v51  }
 0x4b2   :  { %2437 = vadd.xlane.f32.xlu0 %v2219_v16  ;;  %2435 = vadd.xlane.f32.xlu1 %v2218_v8  ;;  %v1957_v16 = vadd.f32 %v11723_v21, %v17058_v26  ;;  %v9928_v8 = vpop.eup %9927  ;;  %v1960_v26 = vadd.f32 %v11723_v21, %v17063_v39 }
 0x4b3   :  { %v2221_v44 = vmul.f32 %v11776_v27, %v9928_v8 }
 0x4b4   :  { %9929 = vtanh.f32 %v1957_v16  ;;  %v17064_v16 = vld [vmem:[#allocation133_spill] sm:$0xff] }
 0x4b5   :  { %v1959_v8 = vadd.f32 %v11723_v21, %v17064_v16  ;;  %9931 = vtanh.f32 %v1960_v26  ;;  %v17067_v26 = vld [vmem:[#allocation37_spill] sm:$0xff] }
 0x4b6   :  { %v11847_v16 = vadd.f32 %v17067_v26, %v2300_v63  ;;  %v11856_v63 = vpop.xlane.xlu0 %2373  ;;  %v11858_v26 = vpop.xlane.xlu1 %2375 }
 0x4b7   :  { %9933 = vtanh.f32 %v1959_v8  ;;  %v17069_v8 = vld [vmem:[#allocation136_spill] sm:$0xff] }
 0x4b8   :  { %17068 = vst [vmem:[#allocation31_spill] sm:$0xff] %v11847_v16 }
 0x4ba   :  { %v2302_v47 = vpop.xlane.xlu0 %2301  ;;  %v2304_v0 = vpop.xlane.xlu1 %2303 }
 0x4be   :  { %v9930_v19 = vpop.eup %9929 }
 0x4bf   :  { %v2220_v2 = vmul.f32 %v11776_v27, %v9930_v19  ;;  %v9932_v19 = vpop.eup %9931 }
 0x4c3   :  { %3484 = vperm.xlu1 %9527, %v11803_v22  }
 0x4c7   :  { %3598 = vperm.xlu1 %9527, %v11807_v32   ;;  %v17065_v32 = vld [vmem:[#allocation33_spill] sm:$0xff] }
 0x4c8   :  { %3487 = vperm.xlu0 %9528, %v11810_v10   ;;  %v11843_v39 = vadd.f32 %v17065_v32, %v2298_v1 }
 0x4ca   :  { %17066 = vst [vmem:[#allocation132_spill] sm:$0xff] %v11843_v39 }
 0x4cc   :  { %3601 = vperm.xlu0 %9528, %v11815_v14   ;;  %v17080_v14 = vld [vmem:[#allocation40_spill] sm:$0xff] }
 0x4eb   :  { %2441 = vadd.xlane.f32.xlu0 %v2221_v44  ;;  %2439 = vadd.xlane.f32.xlu1 %v2220_v2  ;;  %v9934_v44 = vpop.eup %9933  ;;  %v2223_v2 = vmul.f32 %v11776_v27, %v9932_v19  ;;  %v1962_v19 = vadd.f32 %v11723_v21, %v17069_v8  ;;  %v11861_v8 = vadd.f32 %v17071_v62, %v2302_v47 }
 0x4ec   :  { %v2222_v7 = vmul.f32 %v11776_v27, %v9934_v44  ;;  %v17070_v44 = vld [vmem:[#allocation135_spill] sm:$0xff] }
 0x4ed   :  { %9935 = vtanh.f32 %v1962_v19  ;;  %17072 = vst [vmem:[#allocation35_spill] sm:$0xff] %v11861_v8  ;;  %v17073_v19 = vld [vmem:[#allocation39_spill] sm:$0xff] }
 0x4fc   :  { %3490 = vperm.xlu1 %9527, %v11825_v12  }
 0x501   :  { %3493 = vperm.xlu0 %9528, %v11829_v37  }
 0x520   :  { %2445 = vadd.xlane.f32.xlu0 %v2223_v2  ;;  %2443 = vadd.xlane.f32.xlu1 %v2222_v7  ;;  %v1961_v2 = vadd.f32 %v11723_v21, %v17070_v44  ;;  %v9936_v7 = vpop.eup %9935  ;;  %v11865_v44 = vadd.f32 %v17073_v19, %v2304_v0  ;;  %v11874_v0 = vpop.xlane.xlu0 %2377 }
 0x521   :  { %v2225_v32 = vmul.f32 %v11776_v27, %v9936_v7  ;;  %v11876_v19 = vpop.xlane.xlu1 %2379 }
 0x522   :  { %9937 = vtanh.f32 %v1961_v2  ;;  %17074 = vst [vmem:[#allocation134_spill] sm:$0xff] %v11865_v44  ;;  %v17075_v2 = vld [vmem:[#allocation137_spill] sm:$0xff] }
 0x523   :  { %v1963_v7 = vadd.f32 %v11723_v21, %v17075_v2 }
 0x524   :  { %v2306_v15 = vpop.xlane.xlu0 %2305 }
 0x525   :  { %v2308_v61 = vpop.xlane.xlu1 %2307 }
 0x52c   :  { %v9938_v3 = vpop.eup %9937 }
 0x52d   :  { %v2224_v1 = vmul.f32 %v11776_v27, %v9938_v3  ;;  %v1964_v3 = vadd.f32 %v11723_v21, %v11494_v53  ;;  %v11879_v53 = vadd.f32 %v17076_v52, %v2306_v15 }
 0x52f   :  { %9939 = vtanh.f32 %v1964_v3  ;;  %17077 = vst [vmem:[#allocation133_spill] sm:$0xff] %v11879_v53  ;;  %v17078_v3 = vld [vmem:[#allocation41_spill] sm:$0xff] }
 0x530   :  { %9941 = vtanh.f32 %v1963_v7  ;;  %v11883_v2 = vadd.f32 %v17078_v3, %v2308_v61  ;;  %v1966_v7 = vadd.f32 %v11723_v21, %v11500_v23  ;;  %v11892_v61 = vpop.xlane.xlu0 %2381 }
 0x531   :  { %3496 = vperm.xlu1 %9527, %v11843_v39  }
 0x532   :  { %17079 = vst [vmem:[#allocation33_spill] sm:$0xff] %v11883_v2  ;;  %9943 = vtanh.f32 %v1966_v7 }
 0x534   :  { %v2310_v3 = vpop.xlane.xlu0 %2309 }
 0x535   :  { %v11897_v23 = vadd.f32 %v17080_v14, %v2310_v3 }
 0x536   :  { %3499 = vperm.xlu0 %9528, %v11847_v16  }
 0x537   :  { %17081 = vst [vmem:[#allocation37_spill] sm:$0xff] %v11897_v23 }
 0x555   :  { %2449 = vadd.xlane.f32.xlu0 %v2225_v32  ;;  %2447 = vadd.xlane.f32.xlu1 %v2224_v1  ;;  %v9940_v32 = vpop.eup %9939 }
 0x556   :  { %v9942_v1 = vpop.eup %9941  ;;  %v2227_v62 = vmul.f32 %v11776_v27, %v9940_v32  ;;  %v1965_v32 = vadd.f32 %v11723_v21, %v11497_v30  ;;  %v17082_v30 = vld [vmem:[#allocation43_spill] sm:$0xff] }
 0x557   :  { %v2226_v47 = vmul.f32 %v11776_v27, %v9942_v1  ;;  %v9944_v1 = vpop.eup %9943 }
 0x558   :  { %9945 = vtanh.f32 %v1965_v32  ;;  %v2229_v52 = vmul.f32 %v11776_v27, %v9944_v1  ;;  %v17084_v32 = vld [vmem:[#allocation140_spill] sm:$0xff] }
 0x559   :  { %v1968_v1 = vadd.f32 %v11723_v21, %v17084_v32  ;;  %v17086_v32 = vld [vmem:[#allocation42_spill] sm:$0xff] }
 0x55b   :  { %9947 = vtanh.f32 %v1968_v1 }
 0x566   :  { %3502 = vperm.xlu1 %9527, %v11861_v8   ;;  %v17093_v8 = vld [vmem:[#allocation143_spill] sm:$0xff] }
 0x56b   :  { %3505 = vperm.xlu0 %9528, %v11865_v44  }
 0x58a   :  { %2453 = vadd.xlane.f32.xlu0 %v2227_v62  ;;  %2451 = vadd.xlane.f32.xlu1 %v2226_v47  ;;  %v9946_v62 = vpop.eup %9945  ;;  %v11894_v47 = vpop.xlane.xlu1 %2383 }
 0x58b   :  { %v2228_v15 = vmul.f32 %v11776_v27, %v9946_v62  ;;  %v17085_v62 = vld [vmem:[#allocation138_spill] sm:$0xff] }
 0x58e   :  { %v2312_v51 = vpop.xlane.xlu1 %2311 }
 0x58f   :  { %v11901_v7 = vadd.f32 %v17082_v30, %v2312_v51  ;;  %v11910_v51 = vpop.xlane.xlu0 %2385 }
 0x591   :  { %17083 = vst [vmem:[#allocation136_spill] sm:$0xff] %v11901_v7 }
 0x592   :  { %v11912_v30 = vpop.xlane.xlu1 %2387 }
 0x59b   :  { %3508 = vperm.xlu1 %9527, %v11879_v53   ;;  %v11914_v53 = vpop.permute.xlu1 %3526 }
 0x59f   :  { %v2316_v1 = vpop.xlane.xlu1 %2315 }
 0x5a0   :  { %3511 = vperm.xlu0 %9528, %v11883_v2   ;;  %v1989_v2 = vadd.f32 %v11723_v21, %v17152_v17 }
 0x5bf   :  { %2457 = vadd.xlane.f32.xlu0 %v2229_v52  ;;  %2455 = vadd.xlane.f32.xlu1 %v2228_v15  ;;  %v1967_v52 = vadd.f32 %v11723_v21, %v17085_v62  ;;  %v9948_v15 = vpop.eup %9947  ;;  %v17088_v62 = vld [vmem:[#allocation44_spill] sm:$0xff] }
 0x5c0   :  { %v2231_v14 = vmul.f32 %v11776_v27, %v9948_v15 }
 0x5c1   :  { %9949 = vtanh.f32 %v1967_v52  ;;  %v11921_v52 = vadd.f32 %v17088_v62, %v2316_v1 }
 0x5c3   :  { %17089 = vst [vmem:[#allocation36_spill] sm:$0xff] %v11921_v52 }
 0x5cb   :  { %v9950_v49 = vpop.eup %9949 }
 0x5cc   :  { %v2230_v3 = vmul.f32 %v11776_v27, %v9950_v49  ;;  %v17090_v49 = vld [vmem:[#allocation56_spill] sm:$0xff] }
 0x5cd   :  { %v11926_v15 = vadd.f32 %v17090_v49, %v11840_v9  ;;  %v17094_v9 = vld [vmem:[#allocation53_spill] sm:$0xff] }
 0x5ce   :  { %v11937_v49 = vadd.f32 %v17094_v9, %v11838_v33 }
 0x5cf   :  { %17091 = vst [vmem:[#allocation39_spill] sm:$0xff] %v11926_v15 }
 0x5d0   :  { %3514 = vperm.xlu1 %9527, %v11897_v23   ;;  %v2314_v23 = vpop.xlane.xlu0 %2313  ;;  %17095 = vst [vmem:[#allocation137_spill] sm:$0xff] %v11937_v49 }
 0x5d1   :  { %v11917_v25 = vadd.f32 %v17086_v32, %v2314_v23  ;;  %v1970_v23 = vadd.f32 %v11723_v21, %v17093_v8 }
 0x5d3   :  { %17087 = vst [vmem:[#allocation135_spill] sm:$0xff] %v11917_v25 }
 0x5d4   :  { %v11944_v8 = vpop.xlane.xlu0 %2389 }
 0x5d5   :  { %3517 = vperm.xlu0 %9528, %v11901_v7  }
 0x5d8   :  { %v11953_v9 = vpop.permute.xlu0 %3529 }
 0x5d9   :  { %17100 = vst [vmem:[#allocation41_spill] sm:$0xff] %v11953_v9 }
 0x5f4   :  { %2461 = vadd.xlane.f32.xlu0 %v2231_v14  ;;  %2459 = vadd.xlane.f32.xlu1 %v2230_v3  ;;  %v17092_v14 = vld [vmem:[#allocation142_spill] sm:$0xff] }
 0x5f5   :  { %v1969_v3 = vadd.f32 %v11723_v21, %v17092_v14  ;;  %v17096_v14 = vld [vmem:[#allocation58_spill] sm:$0xff] }
 0x5f7   :  { %9951 = vtanh.f32 %v1969_v3  ;;  %v17098_v3 = vld [vmem:[#allocation144_spill] sm:$0xff] }
 0x5f8   :  { %9953 = vtanh.f32 %v1970_v23  ;;  %v1971_v23 = vadd.f32 %v11723_v21, %v17098_v3  ;;  %v17103_v3 = vld [vmem:[#allocation60_spill] sm:$0xff] }
 0x5fa   :  { %9955 = vtanh.f32 %v1971_v23  ;;  %v11962_v23 = vadd.f32 %v17103_v3, %v11876_v19  ;;  %v17105_v3 = vld [vmem:[#allocation57_spill] sm:$0xff] }
 0x5fc   :  { %17104 = vst [vmem:[#allocation43_spill] sm:$0xff] %v11962_v23 }
 0x601   :  { %v9952_v32 = vpop.eup %9951 }
 0x602   :  { %v2232_v1 = vmul.f32 %v11776_v27, %v9952_v32  ;;  %v17099_v32 = vld [vmem:[#allocation145_spill] sm:$0xff] }
 0x605   :  { %3520 = vperm.xlu1 %9527, %v11917_v25   ;;  %v9954_v25 = vpop.eup %9953 }
 0x606   :  { %v2233_v62 = vmul.f32 %v11776_v27, %v9954_v25  ;;  %v1972_v25 = vadd.f32 %v11723_v21, %v17099_v32  ;;  %v9956_v33 = vpop.eup %9955  ;;  %v11964_v32 = vpop.xlane.xlu0 %2393 }
 0x608   :  { %9957 = vtanh.f32 %v1972_v25  ;;  %v1973_v25 = vadd.f32 %v11723_v21, %v11533_v31 }
 0x60a   :  { %3523 = vperm.xlu0 %9528, %v11921_v52   ;;  %9959 = vtanh.f32 %v1973_v25 }
 0x60e   :  { %3607 = vperm.xlu0 %9528, %v11926_v15   ;;  %v11942_v15 = vadd.f32 %v17096_v14, %v11858_v26  ;;  %v17101_v14 = vld [vmem:[#allocation55_spill] sm:$0xff] }
 0x610   :  { %17097 = vst [vmem:[#allocation38_spill] sm:$0xff] %v11942_v15 }
 0x629   :  { %2463 = vadd.xlane.f32.xlu1 %v2232_v1  ;;  %v9958_v1 = vpop.eup %9957 }
 0x62a   :  { %v2235_v26 = vmul.f32 %v11776_v27, %v9958_v1 }
 0x62d   :  { %2465 = vadd.xlane.f32.xlu0 %v2233_v62  ;;  %v2234_v62 = vmul.f32 %v11776_v27, %v9956_v33  ;;  %v1974_v33 = vadd.f32 %v11723_v21, %v11536_v38  ;;  %v17107_v38 = vld [vmem:[#allocation62_spill] sm:$0xff] }
 0x62e   :  { %v11984_v25 = vadd.f32 %v17107_v38, %v11894_v47 }
 0x62f   :  { %9961 = vtanh.f32 %v1974_v33 }
 0x630   :  { %17108 = vst [vmem:[#allocation138_spill] sm:$0xff] %v11984_v25 }
 0x63a   :  { %3604 = vperm.xlu1 %9527, %v11937_v49   ;;  %v11957_v49 = vadd.f32 %v17101_v14, %v11856_v63  ;;  %v9960_v63 = vpop.eup %9959  ;;  %v11973_v14 = vpop.permute.xlu0 %3535 }
 0x63b   :  { %v9962_v1 = vpop.eup %9961 }
 0x63c   :  { %17102 = vst [vmem:[#allocation40_spill] sm:$0xff] %v11957_v49  ;;  %v2237_v19 = vmul.f32 %v11776_v27, %v9962_v1 }
 0x63e   :  { %v11986_v33 = vpop.xlane.xlu0 %2397 }
 0x642   :  { %v11995_v38 = vpop.permute.xlu0 %3541 }
 0x643   :  { %3613 = vperm.xlu0 %9528, %v11942_v15  }
 0x65e   :  { %2467 = vadd.xlane.f32.xlu1 %v2234_v62  ;;  %v2236_v62 = vmul.f32 %v11776_v27, %v9960_v63  ;;  %v17109_v63 = vld [vmem:[#allocation146_spill] sm:$0xff] }
 0x65f   :  { %v1975_v1 = vadd.f32 %v11723_v21, %v17109_v63 }
 0x661   :  { %9963 = vtanh.f32 %v1975_v1  ;;  %v17113_v1 = vld [vmem:[#allocation64_spill] sm:$0xff] }
 0x662   :  { %2469 = vadd.xlane.f32.xlu0 %v2235_v26  ;;  %v2392_v26 = vpop.xlane.xlu1 %2391 }
 0x666   :  { %v11979_v31 = vpop.permute.xlu1 %3532 }
 0x66f   :  { %3610 = vperm.xlu1 %9527, %v11957_v49   ;;  %v11977_v49 = vadd.f32 %v17105_v3, %v11874_v0  ;;  %v9964_v0 = vpop.eup %9963 }
 0x671   :  { %17106 = vst [vmem:[#allocation140_spill] sm:$0xff] %v11977_v49 }
 0x678   :  { %3619 = vperm.xlu0 %9528, %v11962_v23   ;;  %v2396_v23 = vpop.xlane.xlu1 %2395 }
 0x67c   :  { %v12001_v63 = vpop.permute.xlu1 %3538 }
 0x693   :  { %2471 = vadd.xlane.f32.xlu1 %v2236_v62  ;;  %v17110_v62 = vld [vmem:[#allocation147_spill] sm:$0xff] }
 0x697   :  { %2473 = vadd.xlane.f32.xlu0 %v2237_v19  ;;  %v1976_v19 = vadd.f32 %v11723_v21, %v17110_v62  ;;  %v12006_v62 = vadd.f32 %v17113_v1, %v11912_v30 }
 0x699   :  { %9965 = vtanh.f32 %v1976_v19  ;;  %17114 = vst [vmem:[#allocation44_spill] sm:$0xff] %v12006_v62  ;;  %v12008_v19 = vpop.xlane.xlu0 %2401 }
 0x69d   :  { %v12017_v1 = vpop.permute.xlu0 %3547 }
 0x6a3   :  { %v9966_v3 = vpop.eup %9965 }
 0x6a4   :  { %3616 = vperm.xlu1 %9527, %v11977_v49   ;;  %v2238_v49 = vmul.f32 %v11776_v27, %v9964_v0  ;;  %v2239_v47 = vmul.f32 %v11776_v27, %v9966_v3  ;;  %v1978_v0 = vadd.f32 %v11723_v21, %v11555_v36  ;;  %v17117_v36 = vld [vmem:[#allocation66_spill] sm:$0xff] }
 0x6ad   :  { %3625 = vperm.xlu0 %9528, %v11984_v25   ;;  %v17111_v25 = vld [vmem:[#allocation59_spill] sm:$0xff] }
 0x6ae   :  { %v11999_v15 = vadd.f32 %v17111_v25, %v11892_v61 }
 0x6b0   :  { %17112 = vst [vmem:[#allocation42_spill] sm:$0xff] %v11999_v15 }
 0x6c8   :  { %2475 = vadd.xlane.f32.xlu1 %v2238_v49  ;;  %v1977_v49 = vadd.f32 %v11723_v21, %v11548_v29 }
 0x6ca   :  { %9967 = vtanh.f32 %v1977_v49  ;;  %v12027_v49 = vadd.f32 %v17117_v36, %v2392_v26 }
 0x6cb   :  { %9969 = vtanh.f32 %v1978_v0  ;;  %v12029_v0 = vpop.xlane.xlu0 %2405 }
 0x6cc   :  { %2477 = vadd.xlane.f32.xlu0 %v2239_v47  ;;  %v2400_v47 = vpop.xlane.xlu1 %2399  ;;  %17118 = vst [vmem:[#allocation142_spill] sm:$0xff] %v12027_v49 }
 0x6cf   :  { %v12038_v36 = vpop.permute.xlu0 %3436 }
 0x6d0   :  { %v12023_v29 = vpop.permute.xlu1 %3544 }
 0x6d4   :  { %v9968_v61 = vpop.eup %9967 }
 0x6d5   :  { %v9970_v25 = vpop.eup %9969  ;;  %v2240_v3 = vmul.f32 %v11776_v27, %v9968_v61  ;;  %v1979_v61 = vadd.f32 %v11723_v21, %v11558_v34 }
 0x6d6   :  { %v2241_v30 = vmul.f32 %v11776_v27, %v9970_v25  ;;  %v1980_v25 = vadd.f32 %v11723_v21, %v11561_v55  ;;  %v17121_v55 = vld [vmem:[#allocation68_spill] sm:$0xff] }
 0x6d7   :  { %9971 = vtanh.f32 %v1979_v61  ;;  %v12048_v61 = vadd.f32 %v17121_v55, %v2396_v23 }
 0x6d8   :  { %9973 = vtanh.f32 %v1980_v25  ;;  %v12050_v25 = vpop.permute.xlu0 %3553 }
 0x6d9   :  { %3622 = vperm.xlu1 %9527, %v11999_v15   ;;  %v17115_v15 = vld [vmem:[#allocation61_spill] sm:$0xff]  ;;  %17122 = vst [vmem:[#allocation53_spill] sm:$0xff] %v12048_v61 }
 0x6dc   :  { %v12059_v55 = vpop.xlane.xlu0 %2409 }
 0x6dd   :  { %v12201_v48 = vadd.f32 %v17158_v24, %v12059_v55 }
 0x6e2   :  { %3631 = vperm.xlu0 %9528, %v12006_v62   ;;  %v12021_v62 = vadd.f32 %v17115_v15, %v11910_v51  ;;  %v9972_v51 = vpop.eup %9971 }
 0x6e3   :  { %v9974_v15 = vpop.eup %9973 }
 0x6e4   :  { %17116 = vst [vmem:[#allocation56_spill] sm:$0xff] %v12021_v62  ;;  %v2243_v26 = vmul.f32 %v11776_v27, %v9974_v15 }
 0x6fd   :  { %2479 = vadd.xlane.f32.xlu1 %v2240_v3  ;;  %v2242_v3 = vmul.f32 %v11776_v27, %v9972_v51  ;;  %v17123_v51 = vld [vmem:[#allocation148_spill] sm:$0xff] }
 0x6fe   :  { %v1981_v15 = vadd.f32 %v11723_v21, %v17123_v51 }
 0x700   :  { %9975 = vtanh.f32 %v1981_v15 }
 0x701   :  { %2481 = vadd.xlane.f32.xlu0 %v2241_v30  ;;  %v2404_v30 = vpop.xlane.xlu1 %2403 }
 0x705   :  { %v12044_v34 = vpop.permute.xlu1 %3550 }
 0x70e   :  { %3628 = vperm.xlu1 %9527, %v12021_v62   ;;  %v17119_v62 = vld [vmem:[#allocation63_spill] sm:$0xff] }
 0x717   :  { %3637 = vperm.xlu0 %9528, %v12027_v49   ;;  %v12042_v49 = vadd.f32 %v17119_v62, %v11944_v8  ;;  %v9976_v8 = vpop.eup %9975 }
 0x719   :  { %17120 = vst [vmem:[#allocation143_spill] sm:$0xff] %v12042_v49 }
 0x732   :  { %2483 = vadd.xlane.f32.xlu1 %v2242_v3  ;;  %v1982_v3 = vadd.f32 %v11723_v21, %v11574_v4  ;;  %v17126_v4 = vld [vmem:[#allocation70_spill] sm:$0xff] }
 0x733   :  { %v12069_v15 = vadd.f32 %v17126_v4, %v2400_v47 }
 0x734   :  { %9977 = vtanh.f32 %v1982_v3  ;;  %v12071_v3 = vpop.permute.xlu0 %3445 }
 0x735   :  { %17127 = vst [vmem:[#allocation144_spill] sm:$0xff] %v12069_v15 }
 0x736   :  { %2485 = vadd.xlane.f32.xlu0 %v2243_v26  ;;  %v2244_v26 = vmul.f32 %v11776_v27, %v9976_v8  ;;  %v17128_v8 = vld [vmem:[#allocation151_spill] sm:$0xff] }
 0x737   :  { %17159 = vst [vmem:[#allocation151_spill] sm:$0xff] %v12201_v48 }
 0x738   :  { %v12082_v4 = vpop.permute.xlu0 %3559 }
 0x73e   :  { %v9978_v62 = vpop.eup %9977 }
 0x73f   :  { %v2245_v23 = vmul.f32 %v11776_v27, %v9978_v62  ;;  %v1983_v62 = vadd.f32 %v11723_v21, %v17128_v8 }
 0x741   :  { %9979 = vtanh.f32 %v1983_v62  ;;  %v17132_v62 = vld [vmem:[#allocation72_spill] sm:$0xff] }
 0x743   :  { %3634 = vperm.xlu1 %9527, %v12042_v49   ;;  %v2408_v49 = vpop.xlane.xlu1 %2407 }
 0x747   :  { %v12065_v51 = vpop.permute.xlu1 %3439 }
 0x74c   :  { %3643 = vperm.xlu0 %9528, %v12048_v61   ;;  %v17124_v61 = vld [vmem:[#allocation65_spill] sm:$0xff] }
 0x74d   :  { %v12063_v20 = vadd.f32 %v17124_v61, %v11964_v32  ;;  %v9980_v32 = vpop.eup %9979 }
 0x74e   :  { %v2246_v39 = vmul.f32 %v11776_v27, %v9980_v32 }
 0x74f   :  { %17125 = vst [vmem:[#allocation58_spill] sm:$0xff] %v12063_v20 }
 0x767   :  { %2487 = vadd.xlane.f32.xlu1 %v2244_v26  ;;  %v17129_v26 = vld [vmem:[#allocation152_spill] sm:$0xff] }
 0x76b   :  { %2489 = vadd.xlane.f32.xlu0 %v2245_v23  ;;  %v1984_v23 = vadd.f32 %v11723_v21, %v17129_v26  ;;  %v12092_v26 = vadd.f32 %v17132_v62, %v2404_v30 }
 0x76d   :  { %9981 = vtanh.f32 %v1984_v23  ;;  %17133 = vst [vmem:[#allocation55_spill] sm:$0xff] %v12092_v26  ;;  %v12094_v23 = vpop.xlane.xlu0 %2413 }
 0x771   :  { %v12105_v60 = vpop.permute.xlu0 %3451 }
 0x775   :  { %v12125_v6 = vpop.permute.xlu0 %3565 }
 0x777   :  { %v9982_v61 = vpop.eup %9981 }
 0x778   :  { %3640 = vperm.xlu1 %9527, %v12063_v20   ;;  %v12079_v20 = vpop.permute.xlu1 %3442  ;;  %v2247_v47 = vmul.f32 %v11776_v27, %v9982_v61  ;;  %v17135_v61 = vld [vmem:[#allocation154_spill] sm:$0xff] }
 0x779   :  { %v12146_v11 = vpop.xlane.xlu0 %2417 }
 0x77c   :  { %v12088_v46 = vpop.permute.xlu1 %3556 }
 0x77d   :  { %v12164_v7 = vpop.permute.xlu0 %3457 }
 0x781   :  { %3649 = vperm.xlu0 %9528, %v12069_v15   ;;  %v17130_v15 = vld [vmem:[#allocation67_spill] sm:$0xff] }
 0x782   :  { %v12086_v8 = vadd.f32 %v17130_v15, %v11986_v33  ;;  %v2412_v33 = vpop.xlane.xlu1 %2411 }
 0x784   :  { %17131 = vst [vmem:[#allocation145_spill] sm:$0xff] %v12086_v8 }
 0x786   :  { %v12101_v12 = vpop.permute.xlu1 %3448 }
 0x79c   :  { %2491 = vadd.xlane.f32.xlu1 %v2246_v39  ;;  %v17134_v39 = vld [vmem:[#allocation153_spill] sm:$0xff] }
 0x79d   :  { %v1985_v32 = vadd.f32 %v11723_v21, %v17134_v39 }
 0x79f   :  { %9983 = vtanh.f32 %v1985_v32  ;;  %v17136_v32 = vld [vmem:[#allocation69_spill] sm:$0xff] }
 0x7a0   :  { %2493 = vadd.xlane.f32.xlu0 %v2247_v47  ;;  %v1986_v47 = vadd.f32 %v11723_v21, %v17135_v61 }
 0x7a2   :  { %9985 = vtanh.f32 %v1986_v47  ;;  %v12115_v47 = vadd.f32 %v17136_v32, %v12008_v19  ;;  %v17142_v32 = vld [vmem:[#allocation156_spill] sm:$0xff] }
 0x7a3   :  { %9987 = vtanh.f32 %v1987_v59 }
 0x7a4   :  { %17137 = vst [vmem:[#allocation60_spill] sm:$0xff] %v12115_v47 }
 0x7a9   :  { %v9984_v15 = vpop.eup %9983 }
 0x7aa   :  { %v2248_v30 = vmul.f32 %v11776_v27, %v9984_v15  ;;  %v17138_v15 = vld [vmem:[#allocation74_spill] sm:$0xff] }
 0x7ad   :  { %3646 = vperm.xlu1 %9527, %v12086_v8   ;;  %v9986_v8 = vpop.eup %9985 }
 0x7ae   :  { %v2249_v62 = vmul.f32 %v11776_v27, %v9986_v8 }
 0x7b6   :  { %3655 = vperm.xlu0 %9528, %v12092_v26   ;;  %v12107_v26 = vpop.permute.xlu1 %3562 }
 0x7ba   :  { %v12109_v39 = vpop.xlane.xlu1 %2415 }
 0x7be   :  { %v12111_v61 = vpop.permute.xlu1 %3454 }
 0x7c2   :  { %v12118_v22 = vpop.permute.xlu1 %3568 }
 0x7c6   :  { %v12123_v8 = vpop.xlane.xlu1 %2419 }
 0x7d1   :  { %2495 = vadd.xlane.f32.xlu1 %v2248_v30  ;;  %v12121_v30 = vadd.f32 %v17138_v15, %v2408_v49  ;;  %v9988_v15 = vpop.eup %9987 }
 0x7d3   :  { %17139 = vst [vmem:[#allocation57_spill] sm:$0xff] %v12121_v30 }
 0x7d5   :  { %2497 = vadd.xlane.f32.xlu0 %v2249_v62  ;;  %v12128_v62 = vpop.permute.xlu1 %3460 }
 0x7d9   :  { %v12132_v19 = vpop.permute.xlu1 %3574 }
 0x7da   :  { %17141 = vst [vmem:[#allocation62_spill] sm:$0xff] %v12132_v19 }
 0x7dd   :  { %v12136_v40 = vpop.xlane.xlu1 %2423 }
 0x7e1   :  { %v12138_v49 = vpop.permute.xlu1 %3466 }
 0x7e2   :  { %3652 = vperm.xlu1 %9527, %v12115_v47   ;;  %v1988_v47 = vadd.f32 %v11723_v21, %v17142_v32  ;;  %17143 = vst [vmem:[#allocation146_spill] sm:$0xff] %v12138_v49 }
 0x7e4   :  { %9989 = vtanh.f32 %v1988_v47  ;;  %v17146_v47 = vld [vmem:[#allocation71_spill] sm:$0xff] }
 0x7e5   :  { %v12140_v18 = vpop.permute.xlu1 %3580  ;;  %v12154_v52 = vadd.f32 %v17146_v47, %v12029_v0  ;;  %v17153_v47 = vld [vmem:[#allocation158_spill] sm:$0xff]  ;;  %9991 = vtanh.f32 %v1989_v2 }
 0x7e6   :  { %17144 = vst [vmem:[#allocation147_spill] sm:$0xff] %v12140_v18 }
 0x7e7   :  { %17147 = vst [vmem:[#allocation64_spill] sm:$0xff] %v12154_v52 }
 0x7e9   :  { %v12144_v58 = vpop.xlane.xlu1 %2427 }
 0x7eb   :  { %3661 = vperm.xlu0 %9528, %v12121_v30   ;;  %v2250_v30 = vmul.f32 %v11776_v27, %v9988_v15 }
 0x7ed   :  { %v12148_v59 = vpop.permute.xlu1 %3472 }
 0x7ee   :  { %v9990_v28 = vpop.eup %9989  ;;  %17145 = vst [vmem:[#allocation59_spill] sm:$0xff] %v12148_v59 }
 0x7ef   :  { %v2251_v35 = vmul.f32 %v11776_v27, %v9990_v28  ;;  %v9992_v44 = vpop.eup %9991 }
 0x7f0   :  { %v2252_v17 = vmul.f32 %v11776_v27, %v9992_v44 }
 0x7f1   :  { %v12150_v32 = vpop.permute.xlu1 %3586 }
 0x7f5   :  { %v12157_v5 = vpop.xlane.xlu1 %2431 }
 0x7f9   :  { %v12162_v28 = vpop.permute.xlu1 %3478 }
 0x7fa   :  { %17150 = vst [vmem:[#allocation66_spill] sm:$0xff] %v12162_v28 }
 0x806   :  { %2499 = vadd.xlane.f32.xlu1 %v2250_v30  ;;  %v17148_v30 = vld [vmem:[#allocation76_spill] sm:$0xff] }
 0x807   :  { %v12160_v15 = vadd.f32 %v17148_v30, %v2412_v33  ;;  %v12179_v30 = vpop.permute.xlu0 %3571 }
 0x808   :  { %17155 = vst [vmem:[#allocation148_spill] sm:$0xff] %v12179_v30 }
 0x809   :  { %17149 = vst [vmem:[#allocation61_spill] sm:$0xff] %v12160_v15 }
 0x80a   :  { %2501 = vadd.xlane.f32.xlu0 %v2251_v35  ;;  %v12167_v35 = vpop.permute.xlu1 %3592 }
 0x80b   :  { %17151 = vst [vmem:[#allocation63_spill] sm:$0xff] %v12167_v35  ;;  %v12183_v16 = vpop.xlane.xlu0 %2421 }
 0x80e   :  { %v12171_v0 = vpop.xlane.xlu1 %2435 }
 0x812   :  { %v12175_v54 = vpop.permute.xlu1 %3484 }
 0x816   :  { %v12177_v33 = vpop.permute.xlu1 %3598 }
 0x817   :  { %3658 = vperm.xlu1 %9527, %v12154_v52   ;;  %v1990_v52 = vadd.f32 %v11723_v21, %v17153_v47  ;;  %17154 = vst [vmem:[#allocation68_spill] sm:$0xff] %v12177_v33  ;;  %v12187_v47 = vpop.permute.xlu0 %3463 }
 0x818   :  { %17156 = vst [vmem:[#allocation65_spill] sm:$0xff] %v12187_v47 }
 0x819   :  { %9993 = vtanh.f32 %v1990_v52 }
 0x81b   :  { %v12193_v37 = vpop.permute.xlu0 %3577 }
 0x81c   :  { %17157 = vst [vmem:[#allocation70_spill] sm:$0xff] %v12193_v37 }
 0x81f   :  { %v12195_v13 = vpop.xlane.xlu0 %2425 }
 0x820   :  { %3667 = vperm.xlu0 %9528, %v12160_v15   ;;  %v12181_v15 = vpop.xlane.xlu1 %2439 }
 0x823   :  { %v9994_v57 = vpop.eup %9993  ;;  %v12203_v44 = vpop.permute.xlu0 %3469 }
 0x824   :  { %v2253_v56 = vmul.f32 %v11776_v27, %v9994_v57  ;;  %v12189_v2 = vpop.permute.xlu1 %3490  ;;  %17160 = vst [vmem:[#allocation152_spill] sm:$0xff] %v12203_v44 }
 0x828   :  { %v12191_v52 = vpop.xlane.xlu1 %2443 }
 0x82c   :  { %v12197_v10 = vpop.permute.xlu1 %3496 }
 0x830   :  { %v12205_v57 = vpop.xlane.xlu1 %2447 }
 0x834   :  { %v12214_v41 = vpop.permute.xlu1 %3502 }
 0x835   :  { %17163 = vst [vmem:[#allocation72_spill] sm:$0xff] %v12214_v41 }
 0x838   :  { %v12219_v24 = vpop.xlane.xlu1 %2451 }
 0x83b   :  { %2503 = vadd.xlane.f32.xlu1 %v2252_v17  ;;  %v12208_v17 = vpop.permute.xlu0 %3583 }
 0x83c   :  { %v12223_v9 = vpop.permute.xlu1 %3508 }
 0x83d   :  { %17165 = vst [vmem:[#allocation154_spill] sm:$0xff] %v12223_v9 }
 0x83f   :  { %2505 = vadd.xlane.f32.xlu0 %v2253_v56  ;;  %v17161_v56 = vld [vmem:[#allocation78_spill] sm:$0xff]  ;;  %v12217_v37 = vpop.xlane.xlu0 %2429 }
 0x840   :  { %v12212_v43 = vadd.f32 %v17161_v56, %v12109_v39  ;;  %v1992_v39 = vadd.f32 %v11723_v21, %v11611_v42  ;;  %v12231_v56 = vpop.xlane.xlu1 %2455 }
 0x842   :  { %17162 = vst [vmem:[#allocation67_spill] sm:$0xff] %v12212_v43 }
 0x843   :  { %v12221_v55 = vpop.permute.xlu0 %3475 }
 0x844   :  { %17164 = vst [vmem:[#allocation153_spill] sm:$0xff] %v12221_v55  ;;  %v12235_v19 = vpop.permute.xlu1 %3514 }
 0x845   :  { %17167 = vst [vmem:[#allocation74_spill] sm:$0xff] %v12235_v19 }
 0x847   :  { %v12227_v28 = vpop.permute.xlu0 %3589 }
 0x848   :  { %17166 = vst [vmem:[#allocation69_spill] sm:$0xff] %v12227_v28  ;;  %v12239_v55 = vpop.xlane.xlu1 %2459 }
 0x84c   :  { %3664 = vperm.xlu1 %9527, %v12201_v48   ;;  %v1991_v48 = vadd.f32 %v11723_v21, %v11608_v45  ;;  %v12244_v33 = vpop.permute.xlu1 %3520 }
 0x84d   :  { %17170 = vst [vmem:[#allocation71_spill] sm:$0xff] %v12244_v33 }
 0x84e   :  { %9995 = vtanh.f32 %v1991_v48 }
 0x84f   :  { %9997 = vtanh.f32 %v1992_v39 }
 0x850   :  { %v2464_v39 = vpop.xlane.xlu1 %2463 }
 0x855   :  { %3673 = vperm.xlu0 %9528, %v12212_v43   ;;  %v12233_v43 = vpop.xlane.xlu0 %2433 }
 0x858   :  { %v9996_v44 = vpop.eup %9995 }
 0x859   :  { %v12237_v59 = vpop.permute.xlu0 %3481  ;;  %v9998_v45 = vpop.eup %9997  ;;  %v2254_v49 = vmul.f32 %v11776_v27, %v9996_v44 }
 0x85a   :  { %17168 = vst [vmem:[#allocation155_spill] sm:$0xff] %v12237_v59  ;;  %v2255_v48 = vmul.f32 %v11776_v27, %v9998_v45  ;;  %v12251_v59 = vpop.permute.xlu1 %3604 }
 0x85b   :  { %17171 = vst [vmem:[#allocation76_spill] sm:$0xff] %v12251_v59 }
 0x85d   :  { %v12241_v30 = vpop.permute.xlu0 %3595 }
 0x85e   :  { %17169 = vst [vmem:[#allocation156_spill] sm:$0xff] %v12241_v30  ;;  %v2468_v35 = vpop.xlane.xlu1 %2467  ;;  %v17173_v30 = vld [vmem:[#allocation75_spill] sm:$0xff] }
 0x85f   :  { %v12257_v47 = vadd.f32 %v17173_v30, %v12094_v23  ;;  %v17178_v23 = vld [vmem:[#allocation82_spill] sm:$0xff] }
 0x860   :  { %v12275_v30 = vadd.f32 %v17178_v23, %v12136_v40  ;;  %v17183_v40 = vld [vmem:[#allocation86_spill] sm:$0xff] }
 0x861   :  { %v12246_v42 = vpop.xlane.xlu0 %2437  ;;  %17174 = vst [vmem:[#allocation158_spill] sm:$0xff] %v12257_v47  ;;  %v12293_v23 = vadd.f32 %v17183_v40, %v12157_v5 }
 0x862   :  { %v12264_v45 = vpop.permute.xlu1 %3610  ;;  %17179 = vst [vmem:[#allocation75_spill] sm:$0xff] %v12275_v30 }
 0x863   :  { %17175 = vst [vmem:[#allocation73_spill] sm:$0xff] %v12264_v45  ;;  %v17181_v45 = vld [vmem:[#allocation84_spill] sm:$0xff] }
 0x864   :  { %v12284_v18 = vadd.f32 %v17181_v45, %v12144_v58  ;;  %17184 = vst [vmem:[#allocation84_spill] sm:$0xff] %v12293_v23  ;;  %v17185_v58 = vld [vmem:[#allocation88_spill] sm:$0xff] }
 0x865   :  { %v12249_v19 = vpop.permute.xlu0 %3487  ;;  %v12300_v45 = vadd.f32 %v17185_v58, %v12171_v0 }
 0x866   :  { %17182 = vst [vmem:[#allocation82_spill] sm:$0xff] %v12284_v18 }
 0x867   :  { %17186 = vst [vmem:[#allocation86_spill] sm:$0xff] %v12300_v45 }
 0x869   :  { %v12253_v9 = vpop.permute.xlu0 %3601 }
 0x86a   :  { %17172 = vst [vmem:[#allocation157_spill] sm:$0xff] %v12253_v9  ;;  %v2472_v9 = vpop.xlane.xlu1 %2471 }
 0x86d   :  { %v12259_v44 = vpop.xlane.xlu0 %2441 }
 0x870   :  { %2507 = vadd.xlane.f32.xlu1 %v2254_v49 }
 0x871   :  { %v12262_v49 = vpop.permute.xlu0 %3493 }
 0x874   :  { %2509 = vadd.xlane.f32.xlu0 %v2255_v48  ;;  %v17176_v48 = vld [vmem:[#allocation80_spill] sm:$0xff] }
 0x875   :  { %v12268_v33 = vadd.f32 %v17176_v48, %v12123_v8  ;;  %v12270_v59 = vpop.xlane.xlu0 %2445  ;;  %v1993_v48 = vadd.f32 %v11723_v21, %v11614_v50  ;;  %v17188_v50 = vld [vmem:[#allocation90_spill] sm:$0xff] }
 0x876   :  { %v12309_v21 = vadd.f32 %v17188_v50, %v12181_v15 }
 0x877   :  { %17177 = vst [vmem:[#allocation78_spill] sm:$0xff] %v12268_v33  ;;  %9999 = vtanh.f32 %v1993_v48  ;;  %v17191_v48 = vld [vmem:[#allocation92_spill] sm:$0xff] }
 0x878   :  { %17189 = vst [vmem:[#allocation90_spill] sm:$0xff] %v12309_v21 }
 0x879   :  { %v12277_v28 = vpop.permute.xlu0 %3499 }
 0x87d   :  { %v12286_v8 = vpop.xlane.xlu0 %2449 }
 0x881   :  { %3670 = vperm.xlu1 %9527, %v12257_v47   ;;  %v12280_v47 = vpop.permute.xlu1 %3616  ;;  %v12295_v41 = vpop.permute.xlu0 %3505 }
 0x882   :  { %17180 = vst [vmem:[#allocation80_spill] sm:$0xff] %v12280_v47  ;;  %v10000_v58 = vpop.eup %9999 }
 0x883   :  { %v2256_v47 = vmul.f32 %v11776_v27, %v10000_v58  ;;  %v17201_v27 = vld [vmem:[#allocation99_spill] sm:$0xff] }
 0x88a   :  { %3679 = vperm.xlu0 %9528, %v12268_v33   ;;  %v2476_v33 = vpop.xlane.xlu1 %2475 }
 0x88e   :  { %3685 = vperm.xlu0 %9528, %v12275_v30   ;;  %v12302_v30 = vpop.xlane.xlu0 %2453 }
 0x892   :  { %3691 = vperm.xlu0 %9528, %v12284_v18   ;;  %v12304_v18 = vpop.permute.xlu1 %3622  ;;  %v12311_v5 = vpop.permute.xlu0 %3511 }
 0x893   :  { %17187 = vst [vmem:[#allocation88_spill] sm:$0xff] %v12304_v18  ;;  %17190 = vst [vmem:[#allocation181_spill] sm:$0xff] %v12311_v5 }
 0x896   :  { %3697 = vperm.xlu0 %9528, %v12293_v23   ;;  %v2480_v40 = vpop.xlane.xlu1 %2479  ;;  %v12316_v23 = vadd.f32 %v17191_v48, %v12191_v52  ;;  %v12318_v0 = vpop.xlane.xlu0 %2457  ;;  %v17196_v48 = vld [vmem:[#allocation95_spill] sm:$0xff] }
 0x898   :  { %17192 = vst [vmem:[#allocation92_spill] sm:$0xff] %v12316_v23 }
 0x89a   :  { %3703 = vperm.xlu0 %9528, %v12300_v45   ;;  %v12321_v18 = vpop.permute.xlu1 %3628  ;;  %v17194_v45 = vld [vmem:[#allocation93_spill] sm:$0xff]  ;;  %v12327_v50 = vpop.permute.xlu0 %3517 }
 0x89b   :  { %17193 = vst [vmem:[#allocation182_spill] sm:$0xff] %v12321_v18  ;;  %v12325_v15 = vadd.f32 %v17194_v45, %v12205_v57 }
 0x89d   :  { %17195 = vst [vmem:[#allocation93_spill] sm:$0xff] %v12325_v15 }
 0x89e   :  { %3709 = vperm.xlu0 %9528, %v12309_v21   ;;  %v2484_v52 = vpop.xlane.xlu1 %2483  ;;  %v12333_v21 = vadd.f32 %v17196_v48, %v12219_v24  ;;  %v12335_v5 = vpop.xlane.xlu0 %2461  ;;  %v17203_v48 = vld [vmem:[#allocation101_spill] sm:$0xff] }
 0x8a0   :  { %17197 = vst [vmem:[#allocation95_spill] sm:$0xff] %v12333_v21 }
 0x8a2   :  { %3715 = vperm.xlu0 %9528, %v12316_v23   ;;  %v17198_v23 = vld [vmem:[#allocation97_spill] sm:$0xff]  ;;  %v12342_v45 = vpop.permute.xlu0 %3523  ;;  %v12344_v18 = vpop.permute.xlu1 %3634 }
 0x8a3   :  { %v12340_v57 = vadd.f32 %v17198_v23, %v12231_v56  ;;  %17200 = vst [vmem:[#allocation183_spill] sm:$0xff] %v12344_v18  ;;  %v17205_v56 = vld [vmem:[#allocation77_spill] sm:$0xff] }
 0x8a4   :  { %v12359_v23 = vadd.f32 %v17205_v56, %v12146_v11 }
 0x8a5   :  { %2511 = vadd.xlane.f32.xlu1 %v2256_v47  ;;  %17199 = vst [vmem:[#allocation97_spill] sm:$0xff] %v12340_v57  ;;  %v12349_v47 = vadd.f32 %v17201_v27, %v12239_v55  ;;  %v17208_v55 = vld [vmem:[#allocation104_spill] sm:$0xff] }
 0x8a6   :  { %3721 = vperm.xlu0 %9528, %v12325_v15   ;;  %v2488_v24 = vpop.xlane.xlu1 %2487  ;;  %v12351_v58 = vpop.permute.xlu0 %3607  ;;  %17206 = vst [vmem:[#allocation77_spill] sm:$0xff] %v12359_v23  ;;  %v12368_v27 = vadd.f32 %v17208_v55, %v2468_v35  ;;  %v17218_v55 = vld [vmem:[#allocation83_spill] sm:$0xff] }
 0x8a7   :  { %17202 = vst [vmem:[#allocation99_spill] sm:$0xff] %v12349_v47 }
 0x8a8   :  { %17209 = vst [vmem:[#allocation104_spill] sm:$0xff] %v12368_v27 }
 0x8aa   :  { %3727 = vperm.xlu0 %9528, %v12333_v21   ;;  %v12355_v21 = vadd.f32 %v17203_v48, %v2464_v39  ;;  %v12361_v15 = vpop.xlane.xlu0 %2465  ;;  %v17212_v48 = vld [vmem:[#allocation106_spill] sm:$0xff] }
 0x8ab   :  { %v12379_v56 = vadd.f32 %v17212_v48, %v2472_v9  ;;  %v17223_v48 = vld [vmem:[#allocation85_spill] sm:$0xff] }
 0x8ac   :  { %17204 = vst [vmem:[#allocation101_spill] sm:$0xff] %v12355_v21 }
 0x8ad   :  { %17213 = vst [vmem:[#allocation106_spill] sm:$0xff] %v12379_v56 }
 0x8ae   :  { %3733 = vperm.xlu0 %9528, %v12340_v57   ;;  %v12364_v57 = vpop.permute.xlu1 %3640  ;;  %v12374_v39 = vpop.permute.xlu0 %3613 }
 0x8af   :  { %17207 = vst [vmem:[#allocation184_spill] sm:$0xff] %v12364_v57 }
 0x8b2   :  { %3739 = vperm.xlu0 %9528, %v12349_v47   ;;  %v17210_v47 = vld [vmem:[#allocation79_spill] sm:$0xff]  ;;  %v2492_v11 = vpop.xlane.xlu1 %2491  ;;  %v2470_v35 = vpop.xlane.xlu0 %2469 }
 0x8b3   :  { %v12372_v18 = vadd.f32 %v17210_v47, %v12183_v16  ;;  %v17216_v16 = vld [vmem:[#allocation108_spill] sm:$0xff] }
 0x8b4   :  { %v12388_v47 = vadd.f32 %v17216_v16, %v2476_v33 }
 0x8b5   :  { %17211 = vst [vmem:[#allocation79_spill] sm:$0xff] %v12372_v18 }
 0x8b6   :  { %3745 = vperm.xlu0 %9528, %v12355_v21   ;;  %3676 = vperm.xlu1 %9527, %v12359_v23   ;;  %v17214_v21 = vld [vmem:[#allocation81_spill] sm:$0xff]  ;;  %17217 = vst [vmem:[#allocation108_spill] sm:$0xff] %v12388_v47  ;;  %v12396_v9 = vpop.permute.xlu0 %3619 }
 0x8b7   :  { %v12383_v23 = vadd.f32 %v17214_v21, %v12195_v13  ;;  %v17221_v13 = vld [vmem:[#allocation110_spill] sm:$0xff] }
 0x8b8   :  { %v12401_v21 = vadd.f32 %v17221_v13, %v2480_v40 }
 0x8b9   :  { %17215 = vst [vmem:[#allocation81_spill] sm:$0xff] %v12383_v23 }
 0x8ba   :  { %3751 = vperm.xlu0 %9528, %v12368_v27   ;;  %3682 = vperm.xlu1 %9527, %v12372_v18   ;;  %v12392_v27 = vadd.f32 %v17218_v55, %v12217_v37  ;;  %v12394_v18 = vpop.permute.xlu1 %3646  ;;  %17222 = vst [vmem:[#allocation110_spill] sm:$0xff] %v12401_v21  ;;  %v2474_v16 = vpop.xlane.xlu0 %2473  ;;  %v17225_v37 = vld [vmem:[#allocation112_spill] sm:$0xff] }
 0x8bb   :  { %17220 = vst [vmem:[#allocation185_spill] sm:$0xff] %v12394_v18  ;;  %v12410_v55 = vadd.f32 %v17225_v37, %v2484_v52 }
 0x8bc   :  { %17219 = vst [vmem:[#allocation83_spill] sm:$0xff] %v12392_v27 }
 0x8bd   :  { %17226 = vst [vmem:[#allocation112_spill] sm:$0xff] %v12410_v55 }
 0x8be   :  { %3757 = vperm.xlu0 %9528, %v12379_v56   ;;  %3688 = vperm.xlu1 %9527, %v12383_v23   ;;  %v12405_v23 = vadd.f32 %v17223_v48, %v12233_v43  ;;  %v2496_v33 = vpop.xlane.xlu1 %2495  ;;  %v17231_v43 = vld [vmem:[#allocation114_spill] sm:$0xff]  ;;  %v17233_v48 = vld [vmem:[#allocation89_spill] sm:$0xff] }
 0x8bf   :  { %v12423_v13 = vadd.f32 %v17231_v43, %v2488_v24  ;;  %v17241_v43 = vld [vmem:[#allocation94_spill] sm:$0xff] }
 0x8c0   :  { %17224 = vst [vmem:[#allocation85_spill] sm:$0xff] %v12405_v23 }
 0x8c1   :  { %17232 = vst [vmem:[#allocation114_spill] sm:$0xff] %v12423_v13 }
 0x8c2   :  { %3763 = vperm.xlu0 %9528, %v12388_v47   ;;  %3694 = vperm.xlu1 %9527, %v12392_v27   ;;  %v17227_v47 = vld [vmem:[#allocation87_spill] sm:$0xff]  ;;  %v12416_v27 = vpop.permute.xlu0 %3625  ;;  %v12419_v40 = vpop.permute.xlu1 %3652 }
 0x8c3   :  { %v12414_v56 = vadd.f32 %v17227_v47, %v12246_v42  ;;  %17229 = vst [vmem:[#allocation186_spill] sm:$0xff] %v12416_v27  ;;  %17230 = vst [vmem:[#allocation187_spill] sm:$0xff] %v12419_v40  ;;  %v17235_v47 = vld [vmem:[#allocation116_spill] sm:$0xff]  ;;  %v17310_v40 = vld [vmem:[#allocation19_spill] sm:$0xff] }
 0x8c4   :  { %v12432_v37 = vadd.f32 %v17235_v47, %v2492_v11  ;;  %v17246_v47 = vld [vmem:[#allocation96_spill] sm:$0xff] }
 0x8c5   :  { %17228 = vst [vmem:[#allocation87_spill] sm:$0xff] %v12414_v56 }
 0x8c6   :  { %3769 = vperm.xlu0 %9528, %v12401_v21   ;;  %3700 = vperm.xlu1 %9527, %v12405_v23   ;;  %v12427_v23 = vadd.f32 %v17233_v48, %v12259_v44  ;;  %v2478_v52 = vpop.xlane.xlu0 %2477  ;;  %v2500_v42 = vpop.xlane.xlu1 %2499  ;;  %17236 = vst [vmem:[#allocation116_spill] sm:$0xff] %v12432_v37  ;;  %v17239_v44 = vld [vmem:[#allocation118_spill] sm:$0xff]  ;;  %v12447_v48 = vadd.f32 %v17241_v43, %v12286_v8 }
 0x8c7   :  { %v12443_v24 = vadd.f32 %v17239_v44, %v2496_v33  ;;  %v17249_v8 = vld [vmem:[#allocation122_spill] sm:$0xff] }
 0x8c8   :  { %17234 = vst [vmem:[#allocation89_spill] sm:$0xff] %v12427_v23  ;;  %17242 = vst [vmem:[#allocation94_spill] sm:$0xff] %v12447_v48 }
 0x8c9   :  { %17240 = vst [vmem:[#allocation118_spill] sm:$0xff] %v12443_v24 }
 0x8ca   :  { %3775 = vperm.xlu0 %9528, %v12410_v55   ;;  %3706 = vperm.xlu1 %9527, %v12414_v56   ;;  %v17237_v55 = vld [vmem:[#allocation91_spill] sm:$0xff]  ;;  %v12438_v56 = vpop.permute.xlu0 %3631 }
 0x8cb   :  { %v12436_v21 = vadd.f32 %v17237_v55, %v12270_v59  ;;  %v17244_v59 = vld [vmem:[#allocation120_spill] sm:$0xff] }
 0x8cc   :  { %v12454_v55 = vadd.f32 %v17244_v59, %v2500_v42 }
 0x8cd   :  { %17238 = vst [vmem:[#allocation91_spill] sm:$0xff] %v12436_v21 }
 0x8ce   :  { %3781 = vperm.xlu0 %9528, %v12423_v13   ;;  %3712 = vperm.xlu1 %9527, %v12427_v23   ;;  %v12449_v23 = vpop.permute.xlu1 %3658  ;;  %v2482_v11 = vpop.xlane.xlu0 %2481  ;;  %17245 = vst [vmem:[#allocation120_spill] sm:$0xff] %v12454_v55 }
 0x8cf   :  { %17243 = vst [vmem:[#allocation188_spill] sm:$0xff] %v12449_v23 }
 0x8d2   :  { %3787 = vperm.xlu0 %9528, %v12432_v37   ;;  %3718 = vperm.xlu1 %9527, %v12436_v21   ;;  %v12458_v21 = vadd.f32 %v17246_v47, %v12302_v30  ;;  %v2504_v33 = vpop.xlane.xlu1 %2503  ;;  %v12460_v44 = vpop.permute.xlu0 %3637  ;;  %v17253_v30 = vld [vmem:[#allocation100_spill] sm:$0xff] }
 0x8d3   :  { %17248 = vst [vmem:[#allocation189_spill] sm:$0xff] %v12460_v44  ;;  %v12465_v43 = vadd.f32 %v17249_v8, %v2504_v33  ;;  %v12475_v59 = vadd.f32 %v17253_v30, %v12335_v5  ;;  %v17256_v33 = vld [vmem:[#allocation102_spill] sm:$0xff]  ;;  %v17261_v5 = vld [vmem:[#allocation105_spill] sm:$0xff]  ;;  %v17274_v37 = vld [vmem:[#allocation124_spill] sm:$0xff] }
 0x8d4   :  { %17247 = vst [vmem:[#allocation96_spill] sm:$0xff] %v12458_v21  ;;  %v12482_v8 = vadd.f32 %v17256_v33, %v12361_v15  ;;  %v12492_v30 = vadd.f32 %v17261_v5, %v2474_v16  ;;  %v17266_v33 = vld [vmem:[#allocation109_spill] sm:$0xff] }
 0x8d5   :  { %17250 = vst [vmem:[#allocation122_spill] sm:$0xff] %v12465_v43  ;;  %17254 = vst [vmem:[#allocation100_spill] sm:$0xff] %v12475_v59 }
 0x8d6   :  { %3793 = vperm.xlu0 %9528, %v12443_v24   ;;  %3724 = vperm.xlu1 %9527, %v12447_v48   ;;  %v17251_v24 = vld [vmem:[#allocation98_spill] sm:$0xff]  ;;  %v2486_v42 = vpop.xlane.xlu0 %2485  ;;  %17257 = vst [vmem:[#allocation102_spill] sm:$0xff] %v12482_v8  ;;  %17262 = vst [vmem:[#allocation105_spill] sm:$0xff] %v12492_v30  ;;  %v12510_v5 = vpop.permute.xlu1 %3664 }
 0x8d7   :  { %v12469_v48 = vadd.f32 %v17251_v24, %v12318_v0  ;;  %v17258_v0 = vld [vmem:[#allocation103_spill] sm:$0xff]  ;;  %17271 = vst [vmem:[#allocation194_spill] sm:$0xff] %v12510_v5 }
 0x8d8   :  { %v12486_v24 = vadd.f32 %v17258_v0, %v2470_v35  ;;  %v12502_v35 = vadd.f32 %v17266_v33, %v2482_v11  ;;  %v17276_v33 = vld [vmem:[#allocation115_spill] sm:$0xff] }
 0x8d9   :  { %17252 = vst [vmem:[#allocation98_spill] sm:$0xff] %v12469_v48 }
 0x8da   :  { %3799 = vperm.xlu0 %9528, %v12454_v55   ;;  %3730 = vperm.xlu1 %9527, %v12458_v21   ;;  %v12477_v47 = vpop.permute.xlu0 %3643  ;;  %17259 = vst [vmem:[#allocation103_spill] sm:$0xff] %v12486_v24  ;;  %17267 = vst [vmem:[#allocation109_spill] sm:$0xff] %v12502_v35 }
 0x8db   :  { %17255 = vst [vmem:[#allocation190_spill] sm:$0xff] %v12477_v47 }
 0x8de   :  { %3805 = vperm.xlu0 %9528, %v12465_v43   ;;  %3736 = vperm.xlu1 %9527, %v12469_v48   ;;  %v2490_v21 = vpop.xlane.xlu0 %2489 }
 0x8e2   :  { %3742 = vperm.xlu1 %9527, %v12475_v59   ;;  %v12488_v43 = vpop.permute.xlu0 %3649  ;;  %v17263_v59 = vld [vmem:[#allocation107_spill] sm:$0xff] }
 0x8e3   :  { %17260 = vst [vmem:[#allocation191_spill] sm:$0xff] %v12488_v43  ;;  %v12496_v55 = vadd.f32 %v17263_v59, %v2478_v52  ;;  %v17272_v52 = vld [vmem:[#allocation113_spill] sm:$0xff] }
 0x8e4   :  { %v12514_v59 = vadd.f32 %v17272_v52, %v2490_v21  ;;  %v17281_v52 = vld [vmem:[#allocation119_spill] sm:$0xff] }
 0x8e5   :  { %17264 = vst [vmem:[#allocation107_spill] sm:$0xff] %v12496_v55 }
 0x8e6   :  { %3748 = vperm.xlu1 %9527, %v12482_v8   ;;  %v2494_v48 = vpop.xlane.xlu0 %2493  ;;  %17273 = vst [vmem:[#allocation113_spill] sm:$0xff] %v12514_v59 }
 0x8ea   :  { %3754 = vperm.xlu1 %9527, %v12486_v24   ;;  %v12498_v15 = vpop.permute.xlu0 %3655  ;;  %v17268_v24 = vld [vmem:[#allocation111_spill] sm:$0xff] }
 0x8eb   :  { %17265 = vst [vmem:[#allocation192_spill] sm:$0xff] %v12498_v15  ;;  %v12506_v8 = vadd.f32 %v17268_v24, %v2486_v42  ;;  %v17279_v24 = vld [vmem:[#allocation117_spill] sm:$0xff] }
 0x8ed   :  { %17269 = vst [vmem:[#allocation111_spill] sm:$0xff] %v12506_v8 }
 0x8ee   :  { %3760 = vperm.xlu1 %9527, %v12492_v30   ;;  %v2498_v0 = vpop.xlane.xlu0 %2497 }
 0x8f2   :  { %3766 = vperm.xlu1 %9527, %v12496_v55   ;;  %v12508_v16 = vpop.permute.xlu0 %3661 }
 0x8f3   :  { %17270 = vst [vmem:[#allocation193_spill] sm:$0xff] %v12508_v16 }
 0x8f6   :  { %3772 = vperm.xlu1 %9527, %v12502_v35   ;;  %v2502_v30 = vpop.xlane.xlu0 %2501  ;;  %v12521_v35 = vadd.f32 %v17276_v33, %v2494_v48  ;;  %v17284_v48 = vld [vmem:[#allocation121_spill] sm:$0xff] }
 0x8f8   :  { %17277 = vst [vmem:[#allocation115_spill] sm:$0xff] %v12521_v35 }
 0x8fa   :  { %3778 = vperm.xlu1 %9527, %v12506_v8   ;;  %v12524_v42 = vpop.permute.xlu0 %3667  ;;  %v12528_v8 = vadd.f32 %v17279_v24, %v2498_v0 }
 0x8fb   :  { %17278 = vst [vmem:[#allocation195_spill] sm:$0xff] %v12524_v42 }
 0x8fc   :  { %17280 = vst [vmem:[#allocation117_spill] sm:$0xff] %v12528_v8 }
 0x8fd   :  { %v2508_v55 = vpop.xlane.xlu1 %2507 }
 0x8fe   :  { %v12517_v11 = vadd.f32 %v17274_v37, %v2508_v55  ;;  %3784 = vperm.xlu1 %9527, %v12514_v59   ;;  %v2506_v21 = vpop.xlane.xlu0 %2505  ;;  %v12532_v37 = vadd.f32 %v17281_v52, %v2502_v30  ;;  %v17289_v52 = vld [vmem:[#allocation126_spill] sm:$0xff] }
 0x8ff   :  { %v12538_v33 = vadd.f32 %v17284_v48, %v2506_v21 }
 0x900   :  { %17275 = vst [vmem:[#allocation124_spill] sm:$0xff] %v12517_v11  ;;  %3811 = vperm.xlu0 %9528, %v12517_v11   ;;  %17282 = vst [vmem:[#allocation119_spill] sm:$0xff] %v12532_v37 }
 0x901   :  { %17285 = vst [vmem:[#allocation121_spill] sm:$0xff] %v12538_v33  ;;  %v12545_v0 = vpop.permute.xlu1 %3670 }
 0x902   :  { %3790 = vperm.xlu1 %9527, %v12521_v35   ;;  %v12534_v55 = vpop.permute.xlu0 %3673  ;;  %v17286_v35 = vld [vmem:[#allocation123_spill] sm:$0xff]  ;;  %17288 = vst [vmem:[#allocation197_spill] sm:$0xff] %v12545_v0 }
 0x903   :  { %17283 = vst [vmem:[#allocation196_spill] sm:$0xff] %v12534_v55 }
 0x906   :  { %3796 = vperm.xlu1 %9527, %v12528_v8   ;;  %v2510_v59 = vpop.xlane.xlu0 %2509 }
 0x907   :  { %v12542_v11 = vadd.f32 %v17286_v35, %v2510_v59 }
 0x909   :  { %17287 = vst [vmem:[#allocation123_spill] sm:$0xff] %v12542_v11 }
 0x90a   :  { %3802 = vperm.xlu1 %9527, %v12532_v37   ;;  %v12547_v24 = vpop.permute.xlu0 %3679 }
 0x90e   :  { %3808 = vperm.xlu1 %9527, %v12538_v33   ;;  %v12552_v37 = vpop.permute.xlu0 %3685 }
 0x90f   :  { %17291 = vst [vmem:[#allocation198_spill] sm:$0xff] %v12552_v37 }
 0x912   :  { %3814 = vperm.xlu1 %9527, %v12542_v11   ;;  %v12557_v48 = vpop.permute.xlu0 %3691 }
 0x913   :  { %17292 = vst [vmem:[#allocation199_spill] sm:$0xff] %v12557_v48 }
 0x916   :  { %v12563_v11 = vpop.permute.xlu0 %3697 }
 0x917   :  { %17294 = vst [vmem:[#allocation201_spill] sm:$0xff] %v12563_v11  ;;  %v17307_v11 = vlaneseq }
 0x91a   :  { %v12567_v13 = vpop.permute.xlu0 %3703 }
 0x91b   :  { %17296 = vst [vmem:[#allocation203_spill] sm:$0xff] %v12567_v13 }
 0x91e   :  { %v12573_v55 = vpop.permute.xlu0 %3709 }
 0x91f   :  { %17299 = vst [vmem:[#allocation206_spill] sm:$0xff] %v12573_v55 }
 0x922   :  { %v12577_v42 = vpop.permute.xlu0 %3715 }
 0x923   :  { %17301 = vst [vmem:[#allocation208_spill] sm:$0xff] %v12577_v42 }
 0x926   :  { %v12583_v5 = vpop.permute.xlu0 %3721 }
 0x927   :  { %17303 = vst [vmem:[#allocation210_spill] sm:$0xff] %v12583_v5 }
 0x92a   :  { %v12587_v23 = vpop.permute.xlu0 %3727 }
 0x92b   :  { %17305 = vst [vmem:[#allocation212_spill] sm:$0xff] %v12587_v23 }
 0x92e   :  { %v12594_v55 = vpop.permute.xlu0 %3733 }
 0x92f   :  { %17308 = vst [vmem:[#allocation214_spill] sm:$0xff] %v12594_v55 }
 0x932   :  { %v2512_v30 = vpop.xlane.xlu1 %2511 }
 0x933   :  { %v12550_v8 = vadd.f32 %v17289_v52, %v2512_v30 }
 0x935   :  { %17290 = vst [vmem:[#allocation126_spill] sm:$0xff] %v12550_v8  ;;  %3817 = vperm.xlu0 %9528, %v12550_v8  }
 0x936   :  { %v12555_v21 = vpop.permute.xlu1 %3676 }
 0x93a   :  { %v12559_v35 = vpop.permute.xlu1 %3682 }
 0x93e   :  { %v12561_v59 = vpop.permute.xlu1 %3688 }
 0x93f   :  { %17293 = vst [vmem:[#allocation200_spill] sm:$0xff] %v12561_v59 }
 0x942   :  { %v12565_v33 = vpop.permute.xlu1 %3694 }
 0x943   :  { %17295 = vst [vmem:[#allocation202_spill] sm:$0xff] %v12565_v33  ;;  %v12607_v33 = vpop.permute.xlu0 %3739 }
 0x944   :  { %17312 = vst [vmem:[#allocation216_spill] sm:$0xff] %v12607_v33 }
 0x946   :  { %v12569_v30 = vpop.permute.xlu1 %3700 }
 0x947   :  { %17297 = vst [vmem:[#allocation204_spill] sm:$0xff] %v12569_v30  ;;  %v12645_v44 = vpop.permute.xlu0 %3745 }
 0x948   :  { %17321 = vst [vmem:[#allocation225_spill] sm:$0xff] %v12645_v44 }
 0x94a   :  { %v12571_v52 = vpop.permute.xlu1 %3706 }
 0x94b   :  { %17298 = vst [vmem:[#allocation205_spill] sm:$0xff] %v12571_v52  ;;  %v12592_v52 = vand.u32 127, %v17307_v11 }
 0x94d   :  { %v3832_v42 = vadd.s32 4294967280, %v12592_v52  ;;  %v3839_v30 = vadd.s32 4294967272, %v12592_v52  ;;  %v3916_v5 = vadd.s32 4294967184, %v12592_v52  ;;  %v3923_v43 = vadd.s32 4294967176, %v12592_v52 }
 0x94e   :  { %v12575_v8 = vpop.permute.xlu1 %3712  ;;  %v3846_v11 = vadd.s32 4294967264, %v12592_v52  ;;  %v3853_v18 = vadd.s32 4294967256, %v12592_v52  ;;  %v3860_v59 = vadd.s32 4294967248, %v12592_v52 }
 0x94f   :  { %17300 = vst [vmem:[#allocation207_spill] sm:$0xff] %v12575_v8  ;;  %v3825_v8 = vadd.s32 4294967288, %v12592_v52  ;;  %v12610_v47 = vsub.s32 %v3832_v42, %v17310_v40  ;;  %v12618_v55 = vsub.s32 %v3839_v30, %v17310_v40  ;;  %v12626_v37 = vsub.s32 %v3923_v43, %v17310_v40 }
 0x950   :  { %v12631_v33 = vsub.s32 %v3846_v11, %v17310_v40  ;;  %v3874_v11 = vadd.s32 4294967232, %v12592_v52  ;;  %v12654_v27 = vsub.s32 %v3860_v59, %v17310_v40 }
 0x951   :  { %v12604_v48 = vsub.s32 %v3825_v8, %v17310_v40  ;;  %17313 = vst [vmem:[#allocation217_spill] sm:$0xff] %v12610_v47  ;;  %17315 = vst [vmem:[#allocation219_spill] sm:$0xff] %v12618_v55  ;;  %v4021_v30 = vrot.slane %v12001_v63, %v12610_v47 }
 0x952   :  { %v12579_v0 = vpop.permute.xlu1 %3718  ;;  %17318 = vst [vmem:[#allocation222_spill] sm:$0xff] %v12626_v37  ;;  %17319 = vst [vmem:[#allocation223_spill] sm:$0xff] %v12631_v33 }
 0x953   :  { %17302 = vst [vmem:[#allocation209_spill] sm:$0xff] %v12579_v0  ;;  %17311 = vst [vmem:[#allocation19_spill] sm:$0xff] %v12604_v48  ;;  %v4016_v42 = vrot.slane %v11973_v14, %v12604_v48  ;;  %v4026_v14 = vrot.slane %v11995_v38, %v12618_v55  ;;  %v3888_v38 = vadd.s32 4294967216, %v12592_v52 }
 0x954   :  { %17322 = vst [vmem:[#allocation226_spill] sm:$0xff] %v12654_v27 }
 0x956   :  { %v12581_v16 = vpop.permute.xlu1 %3724 }
 0x95a   :  { %v12585_v15 = vpop.permute.xlu1 %3730 }
 0x95b   :  { %17304 = vst [vmem:[#allocation211_spill] sm:$0xff] %v12585_v15 }
 0x95e   :  { %v12589_v13 = vpop.permute.xlu1 %3736 }
 0x95f   :  { %17306 = vst [vmem:[#allocation213_spill] sm:$0xff] %v12589_v13  ;;  %v12621_v13 = vsub.s32 %v3916_v5, %v17310_v40  ;;  %v12637_v5 = vsub.s32 %v3853_v18, %v17310_v40  ;;  %v3881_v18 = vadd.s32 4294967224, %v12592_v52 }
 0x961   :  { %17316 = vst [vmem:[#allocation220_spill] sm:$0xff] %v12621_v13  ;;  %17320 = vst [vmem:[#allocation224_spill] sm:$0xff] %v12637_v5  ;;  %v4036_v57 = vrot.slane %v12017_v1, %v12637_v5  ;;  %v12670_v59 = vsub.s32 %v3881_v18, %v17310_v40 }
 0x962   :  { %v12598_v0 = vpop.permute.xlu1 %3742 }
 0x963   :  { %17309 = vst [vmem:[#allocation215_spill] sm:$0xff] %v12598_v0  ;;  %v12615_v0 = vsub.s32 %v12592_v52, %v17310_v40  ;;  %17325 = vst [vmem:[#allocation229_spill] sm:$0xff] %v12670_v59 }
 0x965   :  { %17314 = vst [vmem:[#allocation218_spill] sm:$0xff] %v12615_v0  ;;  %v4012_v43 = vrot.slane %v11979_v31, %v12615_v0  ;;  %v4031_v31 = vrot.slane %v12023_v29, %v12631_v33  ;;  %v12667_v29 = vsub.s32 %v3874_v11, %v17310_v40 }
 0x966   :  { %v12623_v8 = vpop.permute.xlu1 %3748 }
 0x967   :  { %17317 = vst [vmem:[#allocation221_spill] sm:$0xff] %v12623_v8  ;;  %v3867_v8 = vadd.s32 4294967240, %v12592_v52  ;;  %v4017_v63 = vsel %vm3830_vm1, %v4016_v42, %v4012_v43  ;;  %17324 = vst [vmem:[#allocation228_spill] sm:$0xff] %v12667_v29  ;;  %v12679_v43 = vsub.s32 %v3888_v38, %v17310_v40  ;;  %v4051_v38 = vrot.slane %v12088_v46, %v12667_v29 }
 0x968   :  { %v4022_v23 = vsel %vm3837_vm2, %v4021_v30, %v4017_v63  ;;  %v3895_v30 = vadd.s32 4294967208, %v12592_v52  ;;  %v3836_v63 = vrot.slane %v12079_v20, %v12610_v47  ;;  %v3857_v46 = vrot.slane %v12105_v60, %v12637_v5 }
 0x969   :  { %v12661_v44 = vsub.s32 %v3867_v8, %v17310_v40  ;;  %v4027_v42 = vsel %vm3844_vm3, %v4026_v14, %v4022_v23  ;;  %v4041_v8 = vrot.slane %v12044_v34, %v12654_v27  ;;  %v3829_v23 = vrot.slane %v12065_v51, %v12604_v48  ;;  %17326 = vst [vmem:[#allocation230_spill] sm:$0xff] %v12679_v43  ;;  %v12681_v14 = vpop.permute.xlu0 %3751 }
 0x96a   :  { %v12663_v15 = vpop.permute.xlu1 %3754  ;;  %v4032_v1 = vsel %vm3851_vm4, %v4031_v31, %v4027_v42  ;;  %17327 = vst [vmem:[#allocation231_spill] sm:$0xff] %v12681_v14  ;;  %v3902_v31 = vadd.s32 4294967200, %v12592_v52  ;;  %v3824_v34 = vrot.slane %v12038_v36, %v12615_v0  ;;  %v3843_v51 = vrot.slane %v12071_v3, %v12618_v55 }
 0x96b   :  { %17323 = vst [vmem:[#allocation227_spill] sm:$0xff] %v12661_v44  ;;  %v4037_v11 = vsel %vm3858_vm5, %v4036_v57, %v4032_v1  ;;  %v4046_v18 = vrot.slane %v12050_v25, %v12661_v44  ;;  %v4056_v57 = vrot.slane %v12082_v4, %v12670_v59  ;;  %v3850_v25 = vrot.slane %v12101_v12, %v12631_v33 }
 0x96c   :  { %v12700_v20 = vsub.s32 %v3895_v30, %v17310_v40  ;;  %v3909_v42 = vadd.s32 4294967192, %v12592_v52  ;;  %v4042_v36 = vsel %vm3865_vm6, %v4041_v8, %v4037_v11  ;;  %v3831_v3 = vsel %vm3830_vm1, %v3829_v23, %v3824_v34 }
 0x96d   :  { %v4061_v4 = vrot.slane %v12107_v26, %v12679_v43  ;;  %v4047_v14 = vsel %vm16770_vm7, %v4046_v18, %v4042_v36  ;;  %v3838_v12 = vsel %vm3837_vm2, %v3836_v63, %v3831_v3  ;;  %v3864_v30 = vrot.slane %v12111_v61, %v12654_v27  ;;  %v12724_v11 = vpop.permute.xlu0 %3757 }
 0x96e   :  { %17328 = vst [vmem:[#allocation232_spill] sm:$0xff] %v12700_v20  ;;  %v12703_v1 = vpop.permute.xlu1 %3760  ;;  %v12716_v52 = vsub.s32 %v3902_v31, %v17310_v40  ;;  %v3845_v8 = vsel %vm3844_vm3, %v3843_v51, %v3838_v12  ;;  %v4052_v23 = vsel %vm16622_vm8, %v4051_v38, %v4047_v14  ;;  %v3871_v60 = vrot.slane %v12164_v7, %v12661_v44 }
 0x96f   :  { %v3937_v26 = vrot.slane %v12249_v19, %v12604_v48  ;;  %v4057_v18 = vsel %vm16624_vm9, %v4056_v57, %v4052_v23  ;;  %v3852_v63 = vsel %vm3851_vm4, %v3850_v25, %v3845_v8  ;;  %v12729_v61 = vsub.s32 %v3909_v42, %v17310_v40 }
 0x970   :  { %17329 = vst [vmem:[#allocation233_spill] sm:$0xff] %v12716_v52  ;;  %v3942_v31 = vrot.slane %v12189_v2, %v12610_v47  ;;  %v3859_v14 = vsel %vm3858_vm5, %v3857_v46, %v3852_v63  ;;  %v12735_v34 = vsel %vm16623_vm10, %v4061_v4, %v4057_v18  ;;  %v3933_v7 = vrot.slane %v12175_v54, %v12615_v0  ;;  %v17331_v46 = vld [vmem:[#allocation72_spill] sm:$0xff] }
 0x971   :  { %17330 = vst [vmem:[#allocation234_spill] sm:$0xff] %v12729_v61  ;;  %v3947_v19 = vrot.slane %v12262_v49, %v12618_v55  ;;  %v4066_v51 = vrot.slane %v12125_v6, %v12700_v20  ;;  %v3866_v40 = vsel %vm3865_vm6, %v3864_v30, %v3859_v14  ;;  %v4071_v38 = vrot.slane %v12118_v22, %v12716_v52  ;;  %v17333_v30 = vld [vmem:[#allocation69_spill] sm:$0xff]  ;;  %v12770_v23 = vpop.permute.xlu0 %3763  ;;  %v17354_v22 = vld [vmem:[#allocation80_spill] sm:$0xff] }
 0x972   :  { %v3952_v2 = vrot.slane %v12197_v10, %v12631_v33  ;;  %v12748_v57 = vpop.permute.xlu1 %3766  ;;  %v3873_v25 = vsel %vm16770_vm7, %v3871_v60, %v3866_v40  ;;  %v4095_v54 = vrot.slane %v12208_v17, %v12604_v48  ;;  %v3938_v49 = vsel %vm3830_vm1, %v3937_v26, %v3933_v7  ;;  %v17332_v17 = vld [vmem:[#allocation147_spill] sm:$0xff] }
 0x973   :  { %v3957_v42 = vrot.slane %v12277_v28, %v12637_v5  ;;  %v3878_v36 = vrot.slane %v12128_v62, %v12667_v29  ;;  %v4100_v3 = vrot.slane %v12150_v32, %v12610_v47  ;;  %v3943_v10 = vsel %vm3837_vm2, %v3942_v31, %v3938_v49  ;;  %v17334_v32 = vld [vmem:[#allocation65_spill] sm:$0xff]  ;;  %v17335_v26 = vld [vmem:[#allocation63_spill] sm:$0xff]  ;;  %v17336_v31 = vld [vmem:[#allocation154_spill] sm:$0xff] }
 0x974   :  { %v3962_v4 = vrot.slane %v17331_v46, %v12654_v27  ;;  %v4091_v12 = vrot.slane %v17332_v17, %v12615_v0  ;;  %v4105_v8 = vrot.slane %v17333_v30, %v12618_v55  ;;  %v3948_v28 = vsel %vm3844_vm3, %v3947_v19, %v3943_v10  ;;  %v17337_v19 = vld [vmem:[#allocation156_spill] sm:$0xff]  ;;  %v17338_v49 = vld [vmem:[#allocation181_spill] sm:$0xff] }
 0x975   :  { %v3967_v62 = vrot.slane %v12295_v41, %v12661_v44  ;;  %v3885_v60 = vrot.slane %v17334_v32, %v12670_v59  ;;  %v4110_v18 = vrot.slane %v17335_v26, %v12631_v33  ;;  %v3953_v63 = vsel %vm3851_vm4, %v3952_v2, %v3948_v28  ;;  %v17339_v17 = vld [vmem:[#allocation68_spill] sm:$0xff]  ;;  %v17340_v28 = vld [vmem:[#allocation74_spill] sm:$0xff] }
 0x976   :  { %v3972_v14 = vrot.slane %v17336_v31, %v12667_v29  ;;  %v4096_v7 = vsel %vm3830_vm1, %v4095_v54, %v4091_v12  ;;  %v4115_v40 = vrot.slane %v17337_v19, %v12637_v5  ;;  %v3958_v41 = vsel %vm3858_vm5, %v3957_v42, %v3953_v63  ;;  %v12791_v26 = vpop.permute.xlu1 %3772  ;;  %v17341_v12 = vld [vmem:[#allocation157_spill] sm:$0xff] }
 0x977   :  { %v3977_v10 = vrot.slane %v17338_v49, %v12670_v59  ;;  %v4101_v46 = vsel %vm3837_vm2, %v4100_v3, %v4096_v7  ;;  %v4120_v30 = vrot.slane %v17339_v17, %v12654_v27  ;;  %v3963_v2 = vsel %vm3865_vm6, %v3962_v4, %v3958_v41  ;;  %v17342_v4 = vld [vmem:[#allocation71_spill] sm:$0xff]  ;;  %v17343_v41 = vld [vmem:[#allocation76_spill] sm:$0xff] }
 0x978   :  { %v3982_v32 = vrot.slane %v17340_v28, %v12679_v43  ;;  %v4106_v54 = vsel %vm3844_vm3, %v4105_v8, %v4101_v46  ;;  %v4125_v42 = vrot.slane %v17341_v12, %v12661_v44  ;;  %v3968_v63 = vsel %vm16770_vm7, %v3967_v62, %v3963_v2  ;;  %v17344_v8 = vld [vmem:[#allocation146_spill] sm:$0xff]  ;;  %v12811_v2 = vpop.permute.xlu0 %3769  ;;  %v17346_v28 = vld [vmem:[#allocation152_spill] sm:$0xff] }
 0x979   :  { %v3987_v3 = vrot.slane %v12327_v50, %v12700_v20  ;;  %v4111_v31 = vsel %vm3851_vm4, %v4110_v18, %v4106_v54  ;;  %v3973_v7 = vsel %vm16622_vm8, %v3972_v14, %v3968_v63  ;;  %v3992_v19 = vrot.slane %v17342_v4, %v12716_v52  ;;  %v17345_v18 = vld [vmem:[#allocation148_spill] sm:$0xff] }
 0x97a   :  { %v4130_v49 = vrot.slane %v17343_v41, %v12667_v29  ;;  %v3892_v46 = vrot.slane %v17344_v8, %v12679_v43  ;;  %v4116_v17 = vsel %vm3858_vm5, %v4115_v40, %v4111_v31  ;;  %v3978_v62 = vsel %vm16624_vm9, %v3977_v10, %v3973_v7  ;;  %v17347_v40 = vld [vmem:[#allocation59_spill] sm:$0xff] }
 0x97b   :  { %v3997_v50 = vrot.slane %v12342_v45, %v12729_v61  ;;  %v4076_v14 = vrot.slane %v17345_v18, %v12729_v61  ;;  %v3899_v54 = vrot.slane %v17346_v28, %v12700_v20  ;;  %v4121_v12 = vsel %vm3865_vm6, %v4120_v30, %v4116_v17  ;;  %v17348_v18 = vld [vmem:[#allocation73_spill] sm:$0xff]  ;;  %v12829_v17 = vpop.permute.xlu1 %3778 }
 0x97c   :  { %v3983_v63 = vsel %vm16623_vm10, %v3982_v32, %v3978_v62  ;;  %v3880_v4 = vsel %vm16622_vm8, %v3878_v36, %v3873_v25  ;;  %v3906_v10 = vrot.slane %v17347_v40, %v12716_v52  ;;  %v4126_v31 = vsel %vm16770_vm7, %v4125_v42, %v4121_v12  ;;  %v17349_v36 = vld [vmem:[#allocation153_spill] sm:$0xff]  ;;  %v12853_v12 = vpop.permute.xlu0 %3775 }
 0x97d   :  { %v3988_v45 = vsel %vm16625_vm11, %v3987_v3, %v3983_v63  ;;  %v3887_v7 = vsel %vm16624_vm9, %v3885_v60, %v3880_v4  ;;  %v4131_v8 = vsel %vm16622_vm8, %v4130_v49, %v4126_v31  ;;  %v4140_v30 = vrot.slane %v17348_v18, %v12679_v43  ;;  %v17355_v40 = vld [vmem:[#allocation41_spill] sm:$0xff] }
 0x97e   :  { %v3993_v41 = vsel %vm16626_vm12, %v3992_v19, %v3988_v45  ;;  %v3894_v25 = vsel %vm16623_vm10, %v3892_v46, %v3887_v7  ;;  %v3913_v32 = vrot.slane %v17349_v36, %v12729_v61  ;;  %v4135_v3 = vrot.slane %v12351_v58, %v12670_v59  ;;  %v17350_v19 = vld [vmem:[#allocation62_spill] sm:$0xff] }
 0x97f   :  { %v3998_v42 = vsel %vm3914_vm13, %v3997_v50, %v3993_v41  ;;  %v4067_v60 = vsel %vm16625_vm11, %v4066_v51, %v12735_v34  ;;  %v4081_v49 = vrot.slane %v17350_v19, %v12621_v13  ;;  %v3901_v62 = vsel %vm16625_vm11, %v3899_v54, %v3894_v25  ;;  %v17351_v46 = vld [vmem:[#allocation66_spill] sm:$0xff]  ;;  %v17352_v34 = vld [vmem:[#allocation155_spill] sm:$0xff] }
 0x980   :  { %v3920_v28 = vrot.slane %v17351_v46, %v12621_v13  ;;  %v4072_v50 = vsel %vm16626_vm12, %v4071_v38, %v4067_v60  ;;  %v3908_v58 = vsel %vm16626_vm12, %v3906_v10, %v3901_v62  ;;  %v4136_v6 = vsel %vm16624_vm9, %v4135_v3, %v4131_v8  ;;  %v17357_v36 = vld [vmem:[#allocation182_spill] sm:$0xff]  ;;  %v17358_v3 = vld [vmem:[#allocation183_spill] sm:$0xff] }
 0x981   :  { %v3927_v51 = vrot.slane %v17352_v34, %v12626_v37  ;;  %v17353_v54 = vrot.slane %v11914_v53, %v12621_v13  ;;  %v4141_v4 = vsel %vm16623_vm10, %v4140_v30, %v4136_v6  ;;  %v4150_v38 = vrot.slane %v17354_v22, %v12716_v52  ;;  %v17356_v53 = vld [vmem:[#allocation70_spill] sm:$0xff]  ;;  %v12874_v30 = vpop.permute.xlu1 %3784 }
 0x982   :  { %v4007_v10 = vrot.slane %v17355_v40, %v12626_v37  ;;  %v4077_v31 = vsel %vm3914_vm13, %v4076_v14, %v4072_v50  ;;  %v3915_v45 = vsel %vm3914_vm13, %v3913_v32, %v3908_v58  ;;  %v4145_v7 = vrot.slane %v12374_v39, %v12700_v20 }
 0x983   :  { %v4003_v63 = vsel %vm3921_vm14, %v17353_v54, %v3998_v42  ;;  %v4082_v41 = vsel %vm3921_vm14, %v4081_v49, %v4077_v31  ;;  %v4086_v8 = vrot.slane %v17356_v53, %v12626_v37  ;;  %v3922_v18 = vsel %vm3921_vm14, %v3920_v28, %v3915_v45  ;;  %v3782_v28 = vpop.permute.xlu0 %3781  ;;  %v17364_v45 = vld [vmem:[#allocation189_spill] sm:$0xff]  ;;  %v17365_v53 = vld [vmem:[#allocation200_spill] sm:$0xff] }
 0x984   :  { %v4008_v25 = vsel %vm3928_vm15, %v4007_v10, %v4003_v63  ;;  %v4146_v14 = vsel %vm16625_vm11, %v4145_v7, %v4141_v4  ;;  %v4170_v32 = vrot.slane %v17357_v36, %v12615_v0  ;;  %v3929_v39 = vsel %vm3928_vm15, %v3927_v51, %v3922_v18  ;;  %v17362_v4 = vld [vmem:[#allocation186_spill] sm:$0xff] }
 0x985   :  { %v4151_v42 = vsel %vm16626_vm12, %v4150_v38, %v4146_v14  ;;  %v4179_v60 = vrot.slane %v17358_v3, %v12610_v47  ;;  %v4249_v19 = vrot.slane %v12555_v21, %v12615_v0  ;;  %v4155_v49 = vrot.slane %v12396_v9, %v12729_v61  ;;  %v17359_v9 = vld [vmem:[#allocation211_spill] sm:$0xff]  ;;  %v12916_v31 = vpop.permute.xlu1 %3790 }
 0x986   :  { %v4174_v62 = vrot.slane %v12438_v56, %v12604_v48  ;;  %v4258_v46 = vrot.slane %v12559_v35, %v12610_v47  ;;  %v4328_v50 = vrot.slane %v12581_v16, %v12615_v0  ;;  %v12895_v58 = vsel %vm3928_vm15, %v4086_v8, %v4082_v41  ;;  %v17360_v35 = vld [vmem:[#allocation88_spill] sm:$0xff] }
 0x987   :  { %v12898_v6 = vsel %vm16621_vm0, %v4008_v25, %v3929_v39  ;;  %v4253_v21 = vrot.slane %v12547_v24, %v12604_v48  ;;  %v4337_v34 = vrot.slane %v17359_v9, %v12610_v47  ;;  %v4156_v56 = vsel %vm3914_vm13, %v4155_v49, %v4151_v42  ;;  %v17361_v16 = vld [vmem:[#allocation212_spill] sm:$0xff]  ;;  %v17366_v25 = vld [vmem:[#allocation198_spill] sm:$0xff] }
 0x988   :  { %v4160_v51 = vrot.slane %v17360_v35, %v12621_v13  ;;  %v4175_v54 = vsel %vm3830_vm1, %v4174_v62, %v4170_v32  ;;  %v4332_v63 = vrot.slane %v17361_v16, %v12604_v48  ;;  %v4165_v22 = vrot.slane %v17362_v4, %v12626_v37  ;;  %v17363_v24 = vld [vmem:[#allocation184_spill] sm:$0xff]  ;;  %v17367_v32 = vld [vmem:[#allocation213_spill] sm:$0xff]  ;;  %v3788_v62 = vpop.permute.xlu0 %3787 }
 0x989   :  { %v4180_v38 = vsel %vm3837_vm2, %v4179_v60, %v4175_v54  ;;  %v4189_v40 = vrot.slane %v17363_v24, %v12631_v33  ;;  %v4254_v10 = vsel %vm3830_vm1, %v4253_v21, %v4249_v19  ;;  %v4184_v7 = vrot.slane %v17364_v45, %v12618_v55  ;;  %v17368_v19 = vld [vmem:[#allocation214_spill] sm:$0xff]  ;;  %v17369_v21 = vld [vmem:[#allocation185_spill] sm:$0xff]  ;;  %v3797_v45 = vpop.permute.xlu1 %3796 }
 0x98a   :  { %v4259_v41 = vsel %vm3837_vm2, %v4258_v46, %v4254_v10  ;;  %v4268_v8 = vrot.slane %v17365_v53, %v12631_v33  ;;  %v4333_v18 = vsel %vm3830_vm1, %v4332_v63, %v4328_v50  ;;  %v4263_v14 = vrot.slane %v17366_v25, %v12618_v55  ;;  %v17371_v54 = vld [vmem:[#allocation202_spill] sm:$0xff]  ;;  %v17372_v63 = vld [vmem:[#allocation199_spill] sm:$0xff] }
 0x98b   :  { %v4338_v36 = vsel %vm3837_vm2, %v4337_v34, %v4333_v18  ;;  %v4347_v39 = vrot.slane %v17367_v32, %v12631_v33  ;;  %v4407_v42 = vrot.slane %v12791_v26, %v12615_v0  ;;  %v12932_v3 = vsel %vm3921_vm14, %v4160_v51, %v4156_v56  ;;  %v17370_v56 = vld [vmem:[#allocation190_spill] sm:$0xff] }
 0x98c   :  { %v4185_v60 = vsel %vm3844_vm3, %v4184_v7, %v4180_v38  ;;  %v4342_v49 = vrot.slane %v17368_v19, %v12618_v55  ;;  %v4416_v46 = vrot.slane %v12829_v17, %v12610_v47  ;;  %v4199_v9 = vrot.slane %v17369_v21, %v12654_v27  ;;  %v17378_v21 = vld [vmem:[#allocation201_spill] sm:$0xff] }
 0x98d   :  { %v4190_v50 = vsel %vm3851_vm4, %v4189_v40, %v4185_v60  ;;  %v4264_v34 = vsel %vm3844_vm3, %v4263_v14, %v4259_v41  ;;  %v4411_v26 = vrot.slane %v12853_v12, %v12604_v48  ;;  %v4194_v35 = vrot.slane %v17370_v56, %v12637_v5  ;;  %v17373_v40 = vld [vmem:[#allocation215_spill] sm:$0xff]  ;;  %v17374_v41 = vld [vmem:[#allocation216_spill] sm:$0xff] }
 0x98e   :  { %v4269_v51 = vsel %vm3851_vm4, %v4268_v8, %v4264_v34  ;;  %v4278_v16 = vrot.slane %v17371_v54, %v12654_v27  ;;  %v4343_v17 = vsel %vm3844_vm3, %v4342_v49, %v4338_v36  ;;  %v4273_v38 = vrot.slane %v17372_v63, %v12637_v5  ;;  %v17375_v14 = vld [vmem:[#allocation187_spill] sm:$0xff]  ;;  %v17377_v49 = vld [vmem:[#allocation204_spill] sm:$0xff] }
 0x98f   :  { %v4348_v24 = vsel %vm3851_vm4, %v4347_v39, %v4343_v17  ;;  %v4357_v10 = vrot.slane %v17373_v40, %v12654_v27  ;;  %v4412_v12 = vsel %vm3830_vm1, %v4411_v26, %v4407_v42  ;;  %v4195_v7 = vsel %vm3858_vm5, %v4194_v35, %v4190_v50  ;;  %v17376_v42 = vld [vmem:[#allocation191_spill] sm:$0xff]  ;;  %v3794_v50 = vpop.permute.xlu0 %3793  ;;  %v17379_v26 = vld [vmem:[#allocation221_spill] sm:$0xff] }
 0x990   :  { %v4352_v53 = vrot.slane %v17374_v41, %v12637_v5  ;;  %v4417_v8 = vsel %vm3837_vm2, %v4416_v46, %v4412_v12  ;;  %v4426_v18 = vrot.slane %v12874_v30, %v12631_v33  ;;  %v4200_v25 = vsel %vm3865_vm6, %v4199_v9, %v4195_v7  ;;  %v3803_v12 = vpop.permute.xlu1 %3802  ;;  %v17382_v7 = vld [vmem:[#allocation192_spill] sm:$0xff] }
 0x991   :  { %v4209_v36 = vrot.slane %v17375_v14, %v12667_v29  ;;  %v4274_v32 = vsel %vm3858_vm5, %v4273_v38, %v4269_v51  ;;  %v4421_v39 = vrot.slane %v3782_v28, %v12618_v55  ;;  %v4204_v60 = vrot.slane %v17376_v42, %v12661_v44  ;;  %v17380_v51 = vld [vmem:[#allocation225_spill] sm:$0xff]  ;;  %v17381_v38 = vld [vmem:[#allocation188_spill] sm:$0xff]  ;;  %v17385_v42 = vld [vmem:[#allocation231_spill] sm:$0xff] }
 0x992   :  { %v4279_v19 = vsel %vm3865_vm6, %v4278_v16, %v4274_v32  ;;  %v4288_v46 = vrot.slane %v17377_v49, %v12667_v29  ;;  %v4353_v30 = vsel %vm3858_vm5, %v4352_v53, %v4348_v24  ;;  %v4283_v9 = vrot.slane %v17378_v21, %v12661_v44  ;;  %v17386_v21 = vld [vmem:[#allocation194_spill] sm:$0xff] }
 0x993   :  { %v4358_v34 = vsel %vm3865_vm6, %v4357_v10, %v4353_v30  ;;  %v4367_v56 = vrot.slane %v17379_v26, %v12667_v29  ;;  %v4422_v28 = vsel %vm3844_vm3, %v4421_v39, %v4417_v8  ;;  %v4205_v35 = vsel %vm16770_vm7, %v4204_v60, %v4200_v25  ;;  %v17383_v8 = vld [vmem:[#allocation205_spill] sm:$0xff]  ;;  %v17384_v25 = vld [vmem:[#allocation203_spill] sm:$0xff] }
 0x994   :  { %v4362_v54 = vrot.slane %v17380_v51, %v12661_v44  ;;  %v4427_v16 = vsel %vm3851_vm4, %v4426_v18, %v4422_v28  ;;  %v4436_v17 = vrot.slane %v12916_v31, %v12654_v27  ;;  %v4210_v63 = vsel %vm16622_vm8, %v4209_v36, %v4205_v35  ;;  %v17387_v26 = vld [vmem:[#allocation193_spill] sm:$0xff]  ;;  %v17388_v35 = vld [vmem:[#allocation207_spill] sm:$0xff] }
 0x995   :  { %v4219_v24 = vrot.slane %v17381_v38, %v12679_v43  ;;  %v4284_v40 = vsel %vm16770_vm7, %v4283_v9, %v4279_v19  ;;  %v4431_v10 = vrot.slane %v3788_v62, %v12637_v5  ;;  %v4214_v41 = vrot.slane %v17382_v7, %v12670_v59  ;;  %v3800_v19 = vpop.permute.xlu0 %3799  ;;  %v3809_v38 = vpop.permute.xlu1 %3808 }
 0x996   :  { %v4289_v53 = vsel %vm16622_vm8, %v4288_v46, %v4284_v40  ;;  %v4298_v18 = vrot.slane %v17383_v8, %v12679_v43  ;;  %v4363_v31 = vsel %vm16770_vm7, %v4362_v54, %v4358_v34  ;;  %v4293_v14 = vrot.slane %v17384_v25, %v12670_v59 }
 0x997   :  { %v4368_v36 = vsel %vm16622_vm8, %v4367_v56, %v4363_v31  ;;  %v4377_v32 = vrot.slane %v12663_v15, %v12679_v43  ;;  %v4432_v62 = vsel %vm3858_vm5, %v4431_v10, %v4427_v16  ;;  %v4215_v39 = vsel %vm16624_vm9, %v4214_v41, %v4210_v63  ;;  %v17391_v31 = vld [vmem:[#allocation195_spill] sm:$0xff] }
 0x998   :  { %v4372_v60 = vrot.slane %v17385_v42, %v12670_v59  ;;  %v4437_v49 = vsel %vm3865_vm6, %v4436_v17, %v4432_v62  ;;  %v4446_v46 = vrot.slane %v3797_v45, %v12667_v29  ;;  %v4220_v30 = vsel %vm16623_vm10, %v4219_v24, %v4215_v39  ;;  %v17389_v45 = vld [vmem:[#allocation206_spill] sm:$0xff]  ;;  %v17393_v62 = vld [vmem:[#allocation208_spill] sm:$0xff] }
 0x999   :  { %v4229_v9 = vrot.slane %v17386_v21, %v12716_v52  ;;  %v4294_v34 = vsel %vm16624_vm9, %v4293_v14, %v4289_v53  ;;  %v4441_v15 = vrot.slane %v3794_v50, %v12661_v44  ;;  %v4224_v56 = vrot.slane %v17387_v26, %v12700_v20  ;;  %v17390_v53 = vld [vmem:[#allocation197_spill] sm:$0xff]  ;;  %v3815_v26 = vpop.permute.xlu1 %3814 }
 0x99a   :  { %v4299_v28 = vsel %vm16623_vm10, %v4298_v18, %v4294_v34  ;;  %v4308_v51 = vrot.slane %v17388_v35, %v12716_v52  ;;  %v4373_v54 = vsel %vm16624_vm9, %v4372_v60, %v4368_v36  ;;  %vm4485_vm0 = vcmask 1042434  }
 0x99b   :  { %v4303_v16 = vrot.slane %v17389_v45, %v12700_v20  ;;  %v4378_v17 = vsel %vm16623_vm10, %v4377_v32, %v4373_v54  ;;  %v4387_v63 = vrot.slane %v12703_v1, %v12716_v52  ;;  %v4442_v50 = vsel %vm16770_vm7, %v4441_v15, %v4437_v49  ;;  %v3806_v32 = vpop.permute.xlu0 %3805  ;;  %v17395_v54 = vld [vmem:[#allocation210_spill] sm:$0xff] }
 0x99c   :  { %v4225_v24 = vsel %vm16625_vm11, %v4224_v56, %v4220_v30  ;;  %v4382_v40 = vrot.slane %v12724_v11, %v12700_v20  ;;  %v4447_v10 = vsel %vm16622_vm8, %v4446_v46, %v4442_v50  ;;  %v4456_v7 = vrot.slane %v3803_v12, %v12679_v43  ;;  %v17392_v11 = vld [vmem:[#allocation209_spill] sm:$0xff] }
 0x99d   :  { %v4230_v41 = vsel %vm16626_vm12, %v4229_v9, %v4225_v24  ;;  %v4239_v8 = vrot.slane %v17390_v53, %v12621_v13  ;;  %v4304_v18 = vsel %vm16625_vm11, %v4303_v16, %v4299_v28  ;;  %v4451_v1 = vrot.slane %v3800_v19, %v12670_v59 }
 0x99e   :  { %v4234_v25 = vrot.slane %v17391_v31, %v12729_v61  ;;  %v4309_v14 = vsel %vm16626_vm12, %v4308_v51, %v4304_v18  ;;  %v4318_v36 = vrot.slane %v17392_v11, %v12621_v13  ;;  %v4383_v12 = vsel %vm16625_vm11, %v4382_v40, %v4378_v17  ;;  %v17397_v11 = vld [vmem:[#allocation21_spill] sm:$0xff] }
 0x99f   :  { %v4313_v39 = vrot.slane %v17393_v62, %v12729_v61  ;;  %v4388_v42 = vsel %vm16626_vm12, %v4387_v63, %v4383_v12  ;;  %v4397_v60 = vrot.slane %v12748_v57, %v12621_v13  ;;  %v4452_v19 = vsel %vm16624_vm9, %v4451_v1, %v4447_v10  ;;  %v3812_v51 = vpop.permute.xlu0 %3811  ;;  %v17399_v62 = vld [vmem:[#allocation160_spill] sm:$0xff] }
 0x9a0   :  { %v4235_v49 = vsel %vm3914_vm13, %v4234_v25, %v4230_v41  ;;  %v4392_v46 = vrot.slane %v12770_v23, %v12729_v61  ;;  %v4457_v30 = vsel %vm16623_vm10, %v4456_v7, %v4452_v19  ;;  %v4466_v21 = vrot.slane %v3809_v38, %v12716_v52  ;;  %v17394_v23 = vld [vmem:[#allocation196_spill] sm:$0xff]  ;;  %v17401_v19 = vld [vmem:[#allocation162_spill] sm:$0xff] }
 0x9a1   :  { %v4240_v9 = vsel %vm3921_vm14, %v4239_v8, %v4235_v49  ;;  %v4314_v34 = vsel %vm3914_vm13, %v4313_v39, %v4309_v14  ;;  %v4461_v15 = vrot.slane %v3806_v32, %v12700_v20  ;;  %vm16865_vm8 = vcmask 1043459   ;;  %v17396_v25 = vld [vmem:[#allocation20_spill] sm:$0xff]  ;;  %v17398_v32 = vld [vmem:[#allocation177_spill] sm:$0xff] }
 0x9a2   :  { %v4166_v57 = vsel %vm3928_vm15, %v4165_v22, %v12932_v3  ;;  %v4244_v56 = vrot.slane %v17394_v23, %v12626_v37  ;;  %v4319_v28 = vsel %vm3921_vm14, %v4318_v36, %v4314_v34  ;;  %v4393_v35 = vsel %vm3914_vm13, %v4392_v46, %v4388_v42  ;;  %v17400_v42 = vld [vmem:[#allocation49_spill] sm:$0xff] }
 0x9a3   :  { %v4323_v45 = vrot.slane %v17395_v54, %v12626_v37  ;;  %v4398_v16 = vsel %vm3921_vm14, %v4397_v60, %v4393_v35  ;;  %v4462_v17 = vsel %vm16625_vm11, %v4461_v15, %v4457_v30  ;;  %vm16769_vm10 = vcmask 1044484  }
 0x9a4   :  { %v4245_v4 = vsel %vm3928_vm15, %v4244_v56, %v4240_v9  ;;  %v4402_v22 = vrot.slane %v12811_v2, %v12626_v37  ;;  %v4467_v3 = vsel %vm16626_vm12, %v4466_v21, %v4462_v17  ;;  %v4476_v63 = vrot.slane %v3815_v26, %v12621_v13  ;;  %v17402_v9 = vld [vmem:[#allocation29_spill] sm:$0xff]  ;;  %v17403_v26 = vld [vmem:[#allocation163_spill] sm:$0xff]  ;;  %v17404_v56 = vld [vmem:[#allocation54_spill] sm:$0xff] }
 0x9a5   :  { %v4471_v50 = vrot.slane %v3812_v51, %v12729_v61  ;;  %v4324_v38 = vsel %vm3928_vm15, %v4323_v45, %v4319_v28  ;;  %v4486_v24 = vsel %vm4485_vm0, %v12895_v58, %v12898_v6  ;;  %vm16768_vm9 = vcmask 1045509   ;;  %v17405_v51 = vld [vmem:[#allocation165_spill] sm:$0xff] }
 0x9a6   :  { %v4403_v10 = vsel %vm3928_vm15, %v4402_v22, %v4398_v16  ;;  %v4488_v7 = vsel %vm16865_vm8, %v4166_v57, %v4486_v24  ;;  %vm16767_vm11 = vcmask 1046534   ;;  %vm16766_vm12 = vcmask 1047559   ;;  %v17406_v16 = vld [vmem:[#allocation31_spill] sm:$0xff]  ;;  %v17410_v24 = vld [vmem:[#allocation134_spill] sm:$0xff] }
 0x9a7   :  { %v4472_v41 = vsel %vm3914_vm13, %v4471_v50, %v4467_v3  ;;  %v4490_v53 = vsel %vm16769_vm10, %v4245_v4, %v4488_v7  ;;  %v17407_v22 = vld [vmem:[#allocation167_spill] sm:$0xff]  ;;  %v17411_v7 = vld [vmem:[#allocation169_spill] sm:$0xff] }
 0x9a8   :  { %v4477_v8 = vsel %vm3921_vm14, %v4476_v63, %v4472_v41  ;;  %v4492_v18 = vsel %vm16768_vm9, %v4324_v38, %v4490_v53  ;;  %vm17723_vm9 = vcmask 720512  }
 0x9a9   :  { %v4494_v6 = vsel %vm16767_vm11, %v4403_v10, %v4492_v18  ;;  %v17414_v18 = vld [vmem:[#allocation33_spill] sm:$0xff] }
 0x9b4   :  { %v3818_v40 = vpop.permute.xlu0 %3817 }
 0x9b5   :  { %v4481_v2 = vrot.slane %v3818_v40, %v12626_v37 }
 0x9b7   :  { %v4482_v58 = vsel %vm3928_vm15, %v4481_v2, %v4477_v8 }
 0x9b8   :  { %v4496_v1 = vsel %vm16766_vm12, %v4482_v58, %v4494_v6  ;;  %vm17718_vm12 = vcmask 589312  }
 0x9b9   :  { %4498 = vmax.xlane.f32.xlu1 %v4496_v1  ;;  %v17415_v1 = vld [vmem:[#allocation171_spill] sm:$0xff]  ;;  %vm17719_vm11 = vmmov %vm17718_vm12 }
 0xa46   :  { %v13088_v31 = vpop.xlane.xlu1 %4498 }
 0xa47   :  { %v13092_v14 = vrot.slane %v13088_v31, %v17396_v25  ;;  %v13096_v36 = vrot.slane %v13088_v31, %v17397_v11 }
 0xa49   :  { %v4550_v12 = vsub.f32 %v17398_v32, %v13092_v14  ;;  %v4541_v39 = vsub.f32 %v17399_v62, %v13092_v14  ;;  %v4556_v60 = vsub.f32 %v17400_v42, %v13092_v14  ;;  %v4542_v49 = vsub.f32 %v17401_v19, %v13092_v14  ;;  %v17418_v42 = vld [vmem:[#allocation136_spill] sm:$0xff] }
 0xa4a   :  { %v4558_v34 = vsub.f32 %v17402_v9, %v13096_v36  ;;  %v4543_v57 = vsub.f32 %v17403_v26, %v13092_v14  ;;  %v4560_v28 = vsub.f32 %v17404_v56, %v13096_v36  ;;  %v4544_v54 = vsub.f32 %v17405_v51, %v13092_v14 }
 0xa4b   :  { %v4687_v46 = vmul.f32 1.442695, %v4550_v12  ;;  %v4669_v30 = vmul.f32 1.442695, %v4541_v39  ;;  %v4699_v21 = vmul.f32 1.442695, %v4556_v60  ;;  %v4562_v17 = vsub.f32 %v17406_v16, %v13096_v36 }
 0xa4c   :  { %v4671_v15 = vmul.f32 1.442695, %v4542_v49  ;;  %v4703_v23 = vmul.f32 1.442695, %v4558_v34  ;;  %v4673_v35 = vmul.f32 1.442695, %v4543_v57  ;;  %v4545_v3 = vsub.f32 %v17407_v22, %v13092_v14 }
 0xa4d   :  { %10001 = vpow2.f32 %v4687_v46  ;;  %v4707_v45 = vmul.f32 1.442695, %v4560_v28  ;;  %v4675_v4 = vmul.f32 1.442695, %v4544_v54  ;;  %v4711_v38 = vmul.f32 1.442695, %v4562_v17 }
 0xa4e   :  { %10003 = vpow2.f32 %v4669_v30  ;;  %v4564_v40 = vsub.f32 %v17410_v24, %v13096_v36  ;;  %v4677_v10 = vmul.f32 1.442695, %v4545_v3  ;;  %v4546_v2 = vsub.f32 %v17411_v7, %v13092_v14  ;;  %v17419_v49 = vld [vmem:[#allocation173_spill] sm:$0xff]  ;;  %v17422_v34 = vld [vmem:[#allocation36_spill] sm:$0xff]  ;;  %v17423_v57 = vld [vmem:[#allocation175_spill] sm:$0xff] }
 0xa4f   :  { %10005 = vpow2.f32 %v4699_v21  ;;  %v4566_v58 = vsub.f32 %v17414_v18, %v13096_v36  ;;  %v4547_v32 = vsub.f32 %v17415_v1, %v13092_v14  ;;  %v4568_v60 = vsub.f32 %v17418_v42, %v13096_v36  ;;  %v17435_v1 = vld [vmem:[#allocation141_spill] sm:$0xff] }
 0xa50   :  { %10007 = vpow2.f32 %v4671_v15  ;;  %v4715_v8 = vmul.f32 1.442695, %v4564_v40  ;;  %v4679_v6 = vmul.f32 1.442695, %v4546_v2  ;;  %v4548_v46 = vsub.f32 %v17419_v49, %v13092_v14  ;;  %v17431_v40 = vld [vmem:[#allocation131_spill] sm:$0xff]  ;;  %v17432_v2 = vld [vmem:[#allocation26_spill] sm:$0xff] }
 0xa51   :  { %10009 = vpow2.f32 %v4703_v23  ;;  %v4719_v39 = vmul.f32 1.442695, %v4566_v58  ;;  %v4681_v19 = vmul.f32 1.442695, %v4547_v32  ;;  %v4723_v9 = vmul.f32 1.442695, %v4568_v60 }
 0xa52   :  { %10011 = vpow2.f32 %v4673_v35  ;;  %v4570_v15 = vsub.f32 %v17422_v34, %v13096_v36  ;;  %v4683_v26 = vmul.f32 1.442695, %v4548_v46  ;;  %v4549_v23 = vsub.f32 %v17423_v57, %v13092_v14  ;;  %v17426_v35 = vld [vmem:[#allocation22_spill] sm:$0xff]  ;;  %v17436_v42 = vld [vmem:[#allocation25_spill] sm:$0xff] }
 0xa53   :  { %10013 = vpow2.f32 %v4707_v45  ;;  %v13165_v51 = vrot.slane %v13088_v31, %v17426_v35  ;;  %v17427_v45 = vld [vmem:[#allocation127_spill] sm:$0xff]  ;;  %v4553_v60 = vsub.f32 %v17436_v42, %v13092_v14 }
 0xa54   :  { %10015 = vpow2.f32 %v4675_v4  ;;  %v4727_v54 = vmul.f32 1.442695, %v4570_v15  ;;  %v4572_v16 = vsub.f32 %v17427_v45, %v13096_v36  ;;  %v4685_v17 = vmul.f32 1.442695, %v4549_v23  ;;  %v17428_v4 = vld [vmem:[#allocation179_spill] sm:$0xff] }
 0xa55   :  { %10017 = vpow2.f32 %v4711_v38  ;;  %v4551_v22 = vsub.f32 %v17428_v4, %v13092_v14  ;;  %v4576_v32 = vsub.f32 %v17435_v1, %v13165_v51  ;;  %v4693_v15 = vmul.f32 1.442695, %v4553_v60  ;;  %v17448_v1 = vld [vmem:[#allocation52_spill] sm:$0xff]  ;;  %v17451_v60 = vld [vmem:[#allocation170_spill] sm:$0xff] }
 0xa56   :  { %10019 = vpow2.f32 %v4677_v10  ;;  %v4731_v24 = vmul.f32 1.442695, %v4572_v16  ;;  %v4574_v10 = vsub.f32 %v17431_v40, %v13165_v51  ;;  %v17443_v16 = vld [vmem:[#allocation161_spill] sm:$0xff] }
 0xa57   :  { %v13118_v63 = vpop.eup %10001  ;;  %10021 = vpow2.f32 %v4715_v8  ;;  %v4689_v7 = vmul.f32 1.442695, %v4551_v22  ;;  %v4552_v8 = vsub.f32 %v17432_v2, %v13092_v14  ;;  %v4739_v46 = vmul.f32 1.442695, %v4576_v32  ;;  %v17444_v22 = vld [vmem:[#allocation128_spill] sm:$0xff]  ;;  %v17447_v2 = vld [vmem:[#allocation166_spill] sm:$0xff] }
 0xa58   :  { %17408 = vst [vmem:[#allocation72_spill] sm:$0xff] %v13118_v63  ;;  %v13120_v50 = vpop.eup %10003  ;;  %5081 = vperm.xlu1 %9527, %v13118_v63   ;;  %10023 = vpow2.f32 %v4679_v6  ;;  %v4735_v6 = vmul.f32 1.442695, %v4574_v10  ;;  %v4557_v32 = vsub.f32 %v17448_v1, %v13096_v36 }
 0xa59   :  { %17409 = vst [vmem:[#allocation147_spill] sm:$0xff] %v13120_v50  ;;  %5054 = vperm.xlu0 %9528, %v13120_v50   ;;  %v13128_v41 = vpop.eup %10005  ;;  %10025 = vpow2.f32 %v4719_v39  ;;  %v4691_v39 = vmul.f32 1.442695, %v4552_v8  ;;  %v4582_v8 = vsub.f32 %v17447_v2, %v13165_v51 }
 0xa5a   :  { %17412 = vst [vmem:[#allocation69_spill] sm:$0xff] %v13128_v41  ;;  %v13130_v53 = vpop.eup %10007  ;;  %10027 = vpow2.f32 %v4681_v19 }
 0xa5b   :  { %17413 = vst [vmem:[#allocation65_spill] sm:$0xff] %v13130_v53  ;;  %v13138_v12 = vpop.eup %10009  ;;  %10029 = vpow2.f32 %v4723_v9  ;;  %v17439_v9 = vld [vmem:[#allocation150_spill] sm:$0xff]  ;;  %v4751_v42 = vmul.f32 1.442695, %v4582_v8  ;;  %v17459_v8 = vld [vmem:[#allocation23_spill] sm:$0xff] }
 0xa5c   :  { %5099 = vperm.xlu1 %9527, %v13128_v41   ;;  %17416 = vst [vmem:[#allocation63_spill] sm:$0xff] %v13138_v12  ;;  %v13140_v62 = vpop.eup %10011  ;;  %10031 = vpow2.f32 %v4683_v26  ;;  %v4578_v34 = vsub.f32 %v17439_v9, %v13165_v51  ;;  %v17440_v26 = vld [vmem:[#allocation28_spill] sm:$0xff]  ;;  %v4701_v9 = vmul.f32 1.442695, %v4557_v32  ;;  %v17460_v32 = vld [vmem:[#allocation178_spill] sm:$0xff] }
 0xa5d   :  { %5057 = vperm.xlu0 %9528, %v13130_v53   ;;  %17417 = vst [vmem:[#allocation154_spill] sm:$0xff] %v13140_v62  ;;  %v13148_v30 = vpop.eup %10013  ;;  %10033 = vpow2.f32 %v4727_v54  ;;  %v4554_v57 = vsub.f32 %v17440_v26, %v13092_v14 }
 0xa5e   :  { %17420 = vst [vmem:[#allocation156_spill] sm:$0xff] %v13148_v30  ;;  %v13150_v21 = vpop.eup %10015  ;;  %10035 = vpow2.f32 %v4685_v17  ;;  %v4743_v45 = vmul.f32 1.442695, %v4578_v34  ;;  %v4580_v17 = vsub.f32 %v17443_v16, %v13165_v51  ;;  %v17452_v34 = vld [vmem:[#allocation32_spill] sm:$0xff]  ;;  %v17455_v16 = vld [vmem:[#allocation174_spill] sm:$0xff] }
 0xa5f   :  { %17421 = vst [vmem:[#allocation181_spill] sm:$0xff] %v13150_v21  ;;  %v13158_v56 = vpop.eup %10017  ;;  %10037 = vpow2.f32 %v4731_v24  ;;  %v4695_v4 = vmul.f32 1.442695, %v4554_v57  ;;  %v4555_v24 = vsub.f32 %v17444_v22, %v13092_v14  ;;  %v17456_v22 = vld [vmem:[#allocation132_spill] sm:$0xff] }
 0xa60   :  { %5105 = vperm.xlu1 %9527, %v13138_v12   ;;  %17424 = vst [vmem:[#allocation68_spill] sm:$0xff] %v13158_v56  ;;  %v13160_v28 = vpop.eup %10019  ;;  %10039 = vpow2.f32 %v4689_v7  ;;  %v4747_v7 = vmul.f32 1.442695, %v4580_v17  ;;  %v4586_v17 = vsub.f32 %v17455_v16, %v13165_v51 }
 0xa61   :  { %5060 = vperm.xlu0 %9528, %v13140_v62   ;;  %17425 = vst [vmem:[#allocation74_spill] sm:$0xff] %v13160_v28  ;;  %v13172_v3 = vpop.eup %10021  ;;  %10041 = vpow2.f32 %v4735_v6  ;;  %v4697_v6 = vmul.f32 1.442695, %v4555_v24  ;;  %v4561_v24 = vsub.f32 %v17456_v22, %v13096_v36 }
 0xa62   :  { %17429 = vst [vmem:[#allocation157_spill] sm:$0xff] %v13172_v3  ;;  %v13174_v38 = vpop.eup %10023  ;;  %10043 = vpow2.f32 %v4691_v39  ;;  %v4759_v1 = vmul.f32 1.442695, %v4586_v17 }
 0xa63   :  { %17430 = vst [vmem:[#allocation71_spill] sm:$0xff] %v13174_v38  ;;  %v13182_v18 = vpop.eup %10025  ;;  %10045 = vpow2.f32 %v4739_v46  ;;  %v4584_v46 = vsub.f32 %v17451_v60, %v13165_v51  ;;  %v4709_v60 = vmul.f32 1.442695, %v4561_v24 }
 0xa64   :  { %5111 = vperm.xlu1 %9527, %v13148_v30   ;;  %17433 = vst [vmem:[#allocation76_spill] sm:$0xff] %v13182_v18  ;;  %v13184_v58 = vpop.eup %10027  ;;  %10047 = vpow2.f32 %v4693_v15  ;;  %v4559_v15 = vsub.f32 %v17452_v34, %v13096_v36 }
 0xa65   :  { %5063 = vperm.xlu0 %9528, %v13150_v21   ;;  %17434 = vst [vmem:[#allocation146_spill] sm:$0xff] %v13184_v58  ;;  %v13192_v19 = vpop.eup %10029  ;;  %10049 = vpow2.f32 %v4743_v45  ;;  %v4755_v45 = vmul.f32 1.442695, %v4584_v46  ;;  %v17461_v46 = vld [vmem:[#allocation35_spill] sm:$0xff] }
 0xa66   :  { %17437 = vst [vmem:[#allocation148_spill] sm:$0xff] %v13192_v19  ;;  %v13194_v49 = vpop.eup %10031  ;;  %10051 = vpow2.f32 %v4695_v4  ;;  %v4705_v4 = vmul.f32 1.442695, %v4559_v15 }
 0xa67   :  { %17438 = vst [vmem:[#allocation152_spill] sm:$0xff] %v13194_v49  ;;  %v13202_v23 = vpop.eup %10033  ;;  %10053 = vpow2.f32 %v4747_v7 }
 0xa68   :  { %5117 = vperm.xlu1 %9527, %v13158_v56   ;;  %17441 = vst [vmem:[#allocation59_spill] sm:$0xff] %v13202_v23  ;;  %v13204_v54 = vpop.eup %10035  ;;  %10055 = vpow2.f32 %v4697_v6  ;;  %v13249_v6 = vrot.slane %v13088_v31, %v17459_v8 }
 0xa69   :  { %5066 = vperm.xlu0 %9528, %v13160_v28   ;;  %17442 = vst [vmem:[#allocation73_spill] sm:$0xff] %v13204_v54  ;;  %v13212_v40 = vpop.eup %10037  ;;  %10057 = vpow2.f32 %v4751_v42  ;;  %v4588_v42 = vsub.f32 %v17460_v32, %v13165_v51 }
 0xa6a   :  { %17445 = vst [vmem:[#allocation153_spill] sm:$0xff] %v13212_v40  ;;  %v13214_v10 = vpop.eup %10039  ;;  %10059 = vpow2.f32 %v4701_v9  ;;  %v4563_v9 = vsub.f32 %v17461_v46, %v13096_v36 }
 0xa6b   :  { %17446 = vst [vmem:[#allocation62_spill] sm:$0xff] %v13214_v10  ;;  %v13222_v39 = vpop.eup %10041  ;;  %10061 = vpow2.f32 %v4755_v45  ;;  %v4763_v16 = vmul.f32 1.442695, %v4588_v42  ;;  %v17464_v45 = vld [vmem:[#allocation47_spill] sm:$0xff] }
 0xa6c   :  { %5123 = vperm.xlu1 %9527, %v13172_v3   ;;  %17449 = vst [vmem:[#allocation66_spill] sm:$0xff] %v13222_v39  ;;  %v13224_v14 = vpop.eup %10043  ;;  %10063 = vpow2.f32 %v4705_v4  ;;  %v4590_v17 = vsub.f32 %v17464_v45, %v13249_v6  ;;  %v4713_v22 = vmul.f32 1.442695, %v4563_v9  ;;  %v17465_v4 = vld [vmem:[#allocation133_spill] sm:$0xff] }
 0xa6d   :  { %5069 = vperm.xlu0 %9528, %v13174_v38   ;;  %17450 = vst [vmem:[#allocation155_spill] sm:$0xff] %v13224_v14  ;;  %v13232_v26 = vpop.eup %10045  ;;  %10065 = vpow2.f32 %v4759_v1  ;;  %v4565_v24 = vsub.f32 %v17465_v4, %v13096_v36  ;;  %v17468_v1 = vld [vmem:[#allocation50_spill] sm:$0xff] }
 0xa6e   :  { %17453 = vst [vmem:[#allocation80_spill] sm:$0xff] %v13232_v26  ;;  %v13234_v57 = vpop.eup %10047  ;;  %10067 = vpow2.f32 %v4709_v60  ;;  %v4767_v8 = vmul.f32 1.442695, %v4590_v17  ;;  %v4592_v42 = vsub.f32 %v17468_v1, %v13249_v6  ;;  %v17469_v60 = vld [vmem:[#allocation37_spill] sm:$0xff] }
 0xa6f   :  { %17454 = vst [vmem:[#allocation41_spill] sm:$0xff] %v13234_v57  ;;  %v13242_v7 = vpop.eup %10049  ;;  %10069 = vpow2.f32 %v4763_v16  ;;  %v4717_v45 = vmul.f32 1.442695, %v4565_v24  ;;  %v4567_v9 = vsub.f32 %v17469_v60, %v13096_v36  ;;  %v17472_v16 = vld [vmem:[#allocation30_spill] sm:$0xff] }
 0xa70   :  { %5129 = vperm.xlu1 %9527, %v13182_v18   ;;  %17457 = vst [vmem:[#allocation70_spill] sm:$0xff] %v13242_v7  ;;  %v13244_v2 = vpop.eup %10051  ;;  %10071 = vpow2.f32 %v4713_v22  ;;  %v4594_v17 = vsub.f32 %v17472_v16, %v13249_v6  ;;  %v17473_v22 = vld [vmem:[#allocation135_spill] sm:$0xff] }
 0xa71   :  { %5072 = vperm.xlu0 %9528, %v13184_v58   ;;  %17458 = vst [vmem:[#allocation182_spill] sm:$0xff] %v13244_v2  ;;  %v13256_v34 = vpop.eup %10053  ;;  %10073 = vpow2.f32 %v4767_v8  ;;  %v4721_v1 = vmul.f32 1.442695, %v4567_v9  ;;  %v4569_v24 = vsub.f32 %v17473_v22, %v13096_v36  ;;  %v17476_v8 = vld [vmem:[#allocation51_spill] sm:$0xff] }
 0xa72   :  { %17462 = vst [vmem:[#allocation183_spill] sm:$0xff] %v13256_v34  ;;  %v13258_v15 = vpop.eup %10055  ;;  %10075 = vpow2.f32 %v4717_v45  ;;  %v17477_v45 = vld [vmem:[#allocation125_spill] sm:$0xff] }
 0xa73   :  { %17463 = vst [vmem:[#allocation211_spill] sm:$0xff] %v13258_v15  ;;  %v13266_v32 = vpop.eup %10057  ;;  %v4725_v16 = vmul.f32 1.442695, %v4569_v24  ;;  %v4571_v9 = vsub.f32 %v17477_v45, %v13096_v36 }
 0xa74   :  { %5135 = vperm.xlu1 %9527, %v13192_v19   ;;  %17466 = vst [vmem:[#allocation88_spill] sm:$0xff] %v13266_v32  ;;  %v13268_v46 = vpop.eup %10059 }
 0xa75   :  { %5075 = vperm.xlu0 %9528, %v13194_v49   ;;  %17467 = vst [vmem:[#allocation212_spill] sm:$0xff] %v13268_v46 }
 0xa78   :  { %5141 = vperm.xlu1 %9527, %v13202_v23  }
 0xa79   :  { %5078 = vperm.xlu0 %9528, %v13204_v54  }
 0xa7c   :  { %5147 = vperm.xlu1 %9527, %v13212_v40  }
 0xa7d   :  { %5084 = vperm.xlu0 %9528, %v13214_v10  }
 0xa80   :  { %5153 = vperm.xlu1 %9527, %v13222_v39  }
 0xa81   :  { %5087 = vperm.xlu0 %9528, %v13224_v14  }
 0xa84   :  { %5159 = vperm.xlu1 %9527, %v13232_v26  }
 0xa85   :  { %5090 = vperm.xlu0 %9528, %v13234_v57  }
 0xa88   :  { %5165 = vperm.xlu1 %9527, %v13242_v7  }
 0xa89   :  { %5093 = vperm.xlu0 %9528, %v13244_v2  }
 0xa8c   :  { %5171 = vperm.xlu1 %9527, %v13256_v34   ;;  %v13276_v34 = vpop.eup %10061 }
 0xa8d   :  { %5096 = vperm.xlu0 %9528, %v13258_v15   ;;  %17470 = vst [vmem:[#allocation186_spill] sm:$0xff] %v13276_v34  ;;  %v13278_v4 = vpop.eup %10063 }
 0xa8e   :  { %17471 = vst [vmem:[#allocation184_spill] sm:$0xff] %v13278_v4  ;;  %v13286_v7 = vpop.eup %10065 }
 0xa8f   :  { %17474 = vst [vmem:[#allocation189_spill] sm:$0xff] %v13286_v7  ;;  %v13288_v60 = vpop.eup %10067 }
 0xa90   :  { %5177 = vperm.xlu1 %9527, %v13266_v32   ;;  %v4771_v32 = vmul.f32 1.442695, %v4592_v42  ;;  %17475 = vst [vmem:[#allocation200_spill] sm:$0xff] %v13288_v60  ;;  %v4596_v42 = vsub.f32 %v17476_v8, %v13249_v6  ;;  %v13296_v26 = vpop.eup %10069  ;;  %v4729_v8 = vmul.f32 1.442695, %v4571_v9 }
 0xa91   :  { %5102 = vperm.xlu0 %9528, %v13268_v46   ;;  %17478 = vst [vmem:[#allocation198_spill] sm:$0xff] %v13296_v26  ;;  %v13298_v22 = vpop.eup %10071 }
 0xa92   :  { %10077 = vpow2.f32 %v4771_v32  ;;  %17479 = vst [vmem:[#allocation213_spill] sm:$0xff] %v13298_v22  ;;  %v17480_v32 = vld [vmem:[#allocation39_spill] sm:$0xff]  ;;  %v13306_v39 = vpop.eup %10073 }
 0xa93   :  { %10079 = vpow2.f32 %v4721_v1  ;;  %v17481_v1 = vld [vmem:[#allocation129_spill] sm:$0xff]  ;;  %17482 = vst [vmem:[#allocation214_spill] sm:$0xff] %v13306_v39  ;;  %v13308_v36 = vpop.eup %10075 }
 0xa94   :  { %5183 = vperm.xlu1 %9527, %v13276_v34   ;;  %v4775_v34 = vmul.f32 1.442695, %v4594_v17  ;;  %v4598_v17 = vsub.f32 %v17480_v32, %v13249_v6  ;;  %v4573_v24 = vsub.f32 %v17481_v1, %v13165_v51  ;;  %17483 = vst [vmem:[#allocation185_spill] sm:$0xff] %v13308_v36 }
 0xa95   :  { %5108 = vperm.xlu0 %9528, %v13278_v4  }
 0xa96   :  { %10081 = vpow2.f32 %v4775_v34  ;;  %v4783_v45 = vmul.f32 1.442695, %v4598_v17  ;;  %v17484_v34 = vld [vmem:[#allocation38_spill] sm:$0xff]  ;;  %v4733_v32 = vmul.f32 1.442695, %v4573_v24 }
 0xa97   :  { %10083 = vpow2.f32 %v4725_v16  ;;  %v17485_v16 = vld [vmem:[#allocation139_spill] sm:$0xff] }
 0xa98   :  { %5189 = vperm.xlu1 %9527, %v13286_v7   ;;  %v4779_v7 = vmul.f32 1.442695, %v4596_v42  ;;  %v4600_v42 = vsub.f32 %v17484_v34, %v13249_v6  ;;  %v4575_v9 = vsub.f32 %v17485_v16, %v13165_v51 }
 0xa99   :  { %5114 = vperm.xlu0 %9528, %v13288_v60  }
 0xa9a   :  { %10085 = vpow2.f32 %v4779_v7  ;;  %v17488_v7 = vld [vmem:[#allocation43_spill] sm:$0xff]  ;;  %v4737_v34 = vmul.f32 1.442695, %v4575_v9 }
 0xa9b   :  { %10087 = vpow2.f32 %v4729_v8  ;;  %v4602_v17 = vsub.f32 %v17488_v7, %v13249_v6  ;;  %v17489_v8 = vld [vmem:[#allocation149_spill] sm:$0xff]  ;;  %v17494_v7 = vld [vmem:[#allocation159_spill] sm:$0xff] }
 0xa9c   :  { %5195 = vperm.xlu1 %9527, %v13296_v26   ;;  %v13316_v26 = vpop.eup %10077  ;;  %10089 = vpow2.f32 %v4783_v45  ;;  %v4577_v24 = vsub.f32 %v17489_v8, %v13165_v51  ;;  %v4579_v8 = vsub.f32 %v17494_v7, %v13165_v51 }
 0xa9d   :  { %5120 = vperm.xlu0 %9528, %v13298_v22   ;;  %17486 = vst [vmem:[#allocation190_spill] sm:$0xff] %v13316_v26  ;;  %v13318_v1 = vpop.eup %10079  ;;  %10091 = vpow2.f32 %v4733_v32  ;;  %v4791_v45 = vmul.f32 1.442695, %v4602_v17 }
 0xa9e   :  { %17487 = vst [vmem:[#allocation202_spill] sm:$0xff] %v13318_v1  ;;  %v4741_v9 = vmul.f32 1.442695, %v4577_v24 }
 0xaa0   :  { %5201 = vperm.xlu1 %9527, %v13306_v39   ;;  %v4787_v39 = vmul.f32 1.442695, %v4600_v42  ;;  %v13326_v40 = vpop.eup %10081  ;;  %v17493_v42 = vld [vmem:[#allocation138_spill] sm:$0xff] }
 0xaa1   :  { %5126 = vperm.xlu0 %9528, %v13308_v36   ;;  %17490 = vst [vmem:[#allocation199_spill] sm:$0xff] %v13326_v40  ;;  %v13328_v16 = vpop.eup %10083  ;;  %v17492_v36 = vld [vmem:[#allocation24_spill] sm:$0xff]  ;;  %v4604_v32 = vsub.f32 %v17493_v42, %v13249_v6  ;;  %v4745_v42 = vmul.f32 1.442695, %v4579_v8 }
 0xaa2   :  { %17491 = vst [vmem:[#allocation215_spill] sm:$0xff] %v13328_v16  ;;  %10093 = vpow2.f32 %v4787_v39  ;;  %v17497_v39 = vld [vmem:[#allocation44_spill] sm:$0xff] }
 0xaa3   :  { %10095 = vpow2.f32 %v4737_v34  ;;  %v17498_v34 = vld [vmem:[#allocation164_spill] sm:$0xff] }
 0xaa4   :  { %5207 = vperm.xlu1 %9527, %v13316_v26   ;;  %v13333_v26 = vrot.slane %v13088_v31, %v17492_v36  ;;  %10097 = vpow2.f32 %v4791_v45  ;;  %v4795_v36 = vmul.f32 1.442695, %v4604_v32  ;;  %v4581_v24 = vsub.f32 %v17498_v34, %v13165_v51  ;;  %v17501_v45 = vld [vmem:[#allocation142_spill] sm:$0xff] }
 0xaa5   :  { %5132 = vperm.xlu0 %9528, %v13318_v1   ;;  %v13340_v1 = vpop.eup %10085  ;;  %10099 = vpow2.f32 %v4741_v9  ;;  %v17502_v9 = vld [vmem:[#allocation168_spill] sm:$0xff] }
 0xaa6   :  { %17495 = vst [vmem:[#allocation216_spill] sm:$0xff] %v13340_v1  ;;  %v13342_v22 = vpop.eup %10087  ;;  %v4606_v17 = vsub.f32 %v17497_v39, %v13333_v26  ;;  %10101 = vpow2.f32 %v4795_v36  ;;  %v4608_v32 = vsub.f32 %v17501_v45, %v13333_v26  ;;  %v4749_v39 = vmul.f32 1.442695, %v4581_v24  ;;  %v17505_v36 = vld [vmem:[#allocation53_spill] sm:$0xff] }
 0xaa7   :  { %17496 = vst [vmem:[#allocation187_spill] sm:$0xff] %v13342_v22  ;;  %10103 = vpow2.f32 %v4745_v42  ;;  %v4583_v8 = vsub.f32 %v17502_v9, %v13165_v51  ;;  %v17506_v42 = vld [vmem:[#allocation172_spill] sm:$0xff] }
 0xaa8   :  { %5213 = vperm.xlu1 %9527, %v13326_v40   ;;  %v13350_v40 = vpop.eup %10089  ;;  %v4585_v24 = vsub.f32 %v17506_v42, %v13165_v51 }
 0xaa9   :  { %5138 = vperm.xlu0 %9528, %v13328_v16   ;;  %17499 = vst [vmem:[#allocation191_spill] sm:$0xff] %v13350_v40  ;;  %v13352_v7 = vpop.eup %10091  ;;  %v4753_v45 = vmul.f32 1.442695, %v4583_v8 }
 0xaaa   :  { %17500 = vst [vmem:[#allocation204_spill] sm:$0xff] %v13352_v7 }
 0xaac   :  { %5219 = vperm.xlu1 %9527, %v13340_v1   ;;  %v4799_v1 = vmul.f32 1.442695, %v4606_v17  ;;  %v4610_v17 = vsub.f32 %v17505_v36, %v13333_v26  ;;  %v4757_v36 = vmul.f32 1.442695, %v4585_v24 }
 0xaad   :  { %5144 = vperm.xlu0 %9528, %v13342_v22   ;;  %v13360_v22 = vpop.eup %10093 }
 0xaae   :  { %17503 = vst [vmem:[#allocation201_spill] sm:$0xff] %v13360_v22  ;;  %v13362_v34 = vpop.eup %10095  ;;  %10105 = vpow2.f32 %v4799_v1  ;;  %v17509_v1 = vld [vmem:[#allocation144_spill] sm:$0xff] }
 0xaaf   :  { %17504 = vst [vmem:[#allocation221_spill] sm:$0xff] %v13362_v34  ;;  %10107 = vpow2.f32 %v4749_v39  ;;  %v17510_v39 = vld [vmem:[#allocation176_spill] sm:$0xff] }
 0xab0   :  { %5225 = vperm.xlu1 %9527, %v13350_v40   ;;  %v4803_v40 = vmul.f32 1.442695, %v4608_v32  ;;  %v4612_v32 = vsub.f32 %v17509_v1, %v13333_v26  ;;  %v4587_v8 = vsub.f32 %v17510_v39, %v13165_v51 }
 0xab1   :  { %5150 = vperm.xlu0 %9528, %v13352_v7   ;;  %v13370_v7 = vpop.eup %10097 }
 0xab2   :  { %17507 = vst [vmem:[#allocation225_spill] sm:$0xff] %v13370_v7  ;;  %v13372_v9 = vpop.eup %10099  ;;  %10109 = vpow2.f32 %v4803_v40  ;;  %v17513_v40 = vld [vmem:[#allocation55_spill] sm:$0xff]  ;;  %v4761_v1 = vmul.f32 1.442695, %v4587_v8 }
 0xab3   :  { %17508 = vst [vmem:[#allocation188_spill] sm:$0xff] %v13372_v9  ;;  %10111 = vpow2.f32 %v4753_v45  ;;  %v17514_v45 = vld [vmem:[#allocation180_spill] sm:$0xff] }
 0xab4   :  { %5231 = vperm.xlu1 %9527, %v13360_v22   ;;  %v4807_v22 = vmul.f32 1.442695, %v4610_v17  ;;  %v4614_v17 = vsub.f32 %v17513_v40, %v13333_v26  ;;  %v4589_v24 = vsub.f32 %v17514_v45, %v13249_v6 }
 0xab5   :  { %5156 = vperm.xlu0 %9528, %v13362_v34   ;;  %v13380_v34 = vpop.eup %10101 }
 0xab6   :  { %17511 = vst [vmem:[#allocation192_spill] sm:$0xff] %v13380_v34  ;;  %v13382_v42 = vpop.eup %10103  ;;  %10113 = vpow2.f32 %v4807_v22  ;;  %v4815_v39 = vmul.f32 1.442695, %v4614_v17  ;;  %v17517_v22 = vld [vmem:[#allocation57_spill] sm:$0xff]  ;;  %v4765_v40 = vmul.f32 1.442695, %v4589_v24 }
 0xab7   :  { %17512 = vst [vmem:[#allocation205_spill] sm:$0xff] %v13382_v42  ;;  %10115 = vpow2.f32 %v4757_v36  ;;  %v17518_v36 = vld [vmem:[#allocation46_spill] sm:$0xff] }
 0xab8   :  { %5237 = vperm.xlu1 %9527, %v13370_v7   ;;  %v4811_v7 = vmul.f32 1.442695, %v4612_v32  ;;  %v4616_v32 = vsub.f32 %v17517_v22, %v13333_v26  ;;  %v4591_v8 = vsub.f32 %v17518_v36, %v13249_v6 }
 0xab9   :  { %5162 = vperm.xlu0 %9528, %v13372_v9   ;;  %v13390_v9 = vpop.eup %10105 }
 0xaba   :  { %17515 = vst [vmem:[#allocation203_spill] sm:$0xff] %v13390_v9  ;;  %v13392_v51 = vpop.eup %10107  ;;  %10117 = vpow2.f32 %v4811_v7  ;;  %v17521_v7 = vld [vmem:[#allocation61_spill] sm:$0xff]  ;;  %v4769_v22 = vmul.f32 1.442695, %v4591_v8 }
 0xabb   :  { %17516 = vst [vmem:[#allocation231_spill] sm:$0xff] %v13392_v51  ;;  %10119 = vpow2.f32 %v4761_v1  ;;  %v4618_v17 = vsub.f32 %v17521_v7, %v13333_v26  ;;  %v17522_v1 = vld [vmem:[#allocation27_spill] sm:$0xff]  ;;  %v17527_v7 = vld [vmem:[#allocation130_spill] sm:$0xff] }
 0xabc   :  { %5243 = vperm.xlu1 %9527, %v13380_v34   ;;  %v13400_v34 = vpop.eup %10109  ;;  %10121 = vpow2.f32 %v4815_v39  ;;  %v4593_v24 = vsub.f32 %v17522_v1, %v13249_v6  ;;  %v4595_v1 = vsub.f32 %v17527_v7, %v13249_v6 }
 0xabd   :  { %5168 = vperm.xlu0 %9528, %v13382_v42   ;;  %17519 = vst [vmem:[#allocation194_spill] sm:$0xff] %v13400_v34  ;;  %v13402_v45 = vpop.eup %10111  ;;  %10123 = vpow2.f32 %v4765_v40  ;;  %v17525_v42 = vld [vmem:[#allocation34_spill] sm:$0xff]  ;;  %v4823_v39 = vmul.f32 1.442695, %v4618_v17 }
 0xabe   :  { %17520 = vst [vmem:[#allocation193_spill] sm:$0xff] %v13402_v45  ;;  %v4773_v8 = vmul.f32 1.442695, %v4593_v24 }
 0xac0   :  { %5249 = vperm.xlu1 %9527, %v13390_v9   ;;  %v4819_v9 = vmul.f32 1.442695, %v4616_v32  ;;  %v17526_v32 = vld [vmem:[#allocation67_spill] sm:$0xff] }
 0xac1   :  { %5174 = vperm.xlu0 %9528, %v13392_v51   ;;  %v13410_v51 = vpop.eup %10113  ;;  %v4620_v40 = vsub.f32 %v17526_v32, %v13333_v26  ;;  %v4777_v32 = vmul.f32 1.442695, %v4595_v1 }
 0xac2   :  { %17523 = vst [vmem:[#allocation207_spill] sm:$0xff] %v13410_v51  ;;  %v13412_v36 = vpop.eup %10115  ;;  %10125 = vpow2.f32 %v4819_v9  ;;  %v17530_v9 = vld [vmem:[#allocation78_spill] sm:$0xff] }
 0xac3   :  { %17524 = vst [vmem:[#allocation206_spill] sm:$0xff] %v13412_v36  ;;  %10127 = vpow2.f32 %v4769_v22  ;;  %v17531_v22 = vld [vmem:[#allocation137_spill] sm:$0xff] }
 0xac4   :  { %5255 = vperm.xlu1 %9527, %v13400_v34   ;;  %v13417_v34 = vrot.slane %v13088_v31, %v17525_v42  ;;  %10129 = vpow2.f32 %v4823_v39  ;;  %v4827_v42 = vmul.f32 1.442695, %v4620_v40  ;;  %v4597_v24 = vsub.f32 %v17531_v22, %v13249_v6  ;;  %v17534_v39 = vld [vmem:[#allocation75_spill] sm:$0xff] }
 0xac5   :  { %5180 = vperm.xlu0 %9528, %v13402_v45   ;;  %v13424_v45 = vpop.eup %10117  ;;  %10131 = vpow2.f32 %v4773_v8  ;;  %v17535_v8 = vld [vmem:[#allocation40_spill] sm:$0xff] }
 0xac6   :  { %17528 = vst [vmem:[#allocation197_spill] sm:$0xff] %v13424_v45  ;;  %v13426_v16 = vpop.eup %10119  ;;  %v4622_v17 = vsub.f32 %v17530_v9, %v13417_v34  ;;  %10133 = vpow2.f32 %v4827_v42  ;;  %v4624_v40 = vsub.f32 %v17534_v39, %v13417_v34  ;;  %v4781_v9 = vmul.f32 1.442695, %v4597_v24  ;;  %v17538_v42 = vld [vmem:[#allocation82_spill] sm:$0xff] }
 0xac7   :  { %17529 = vst [vmem:[#allocation195_spill] sm:$0xff] %v13426_v16  ;;  %10135 = vpow2.f32 %v4777_v32  ;;  %v4599_v1 = vsub.f32 %v17535_v8, %v13249_v6  ;;  %v17539_v32 = vld [vmem:[#allocation140_spill] sm:$0xff] }
 0xac8   :  { %5261 = vperm.xlu1 %9527, %v13410_v51   ;;  %v4601_v24 = vsub.f32 %v17539_v32, %v13249_v6 }
 0xac9   :  { %5186 = vperm.xlu0 %9528, %v13412_v36   ;;  %v13434_v36 = vpop.eup %10121  ;;  %v4785_v39 = vmul.f32 1.442695, %v4599_v1 }
 0xaca   :  { %17532 = vst [vmem:[#allocation209_spill] sm:$0xff] %v13434_v36  ;;  %v13436_v7 = vpop.eup %10123  ;;  %v4789_v1 = vmul.f32 1.442695, %v4601_v24 }
 0xacb   :  { %17533 = vst [vmem:[#allocation208_spill] sm:$0xff] %v13436_v7 }
 0xacc   :  { %5267 = vperm.xlu1 %9527, %v13424_v45   ;;  %v13444_v45 = vpop.eup %10125 }
 0xacd   :  { %5192 = vperm.xlu0 %9528, %v13426_v16   ;;  %v4831_v16 = vmul.f32 1.442695, %v4622_v17  ;;  %17536 = vst [vmem:[#allocation196_spill] sm:$0xff] %v13444_v45  ;;  %v13446_v22 = vpop.eup %10127  ;;  %v4626_v17 = vsub.f32 %v17538_v42, %v13417_v34  ;;  %v17543_v42 = vld [vmem:[#allocation42_spill] sm:$0xff] }
 0xace   :  { %17537 = vst [vmem:[#allocation210_spill] sm:$0xff] %v13446_v22  ;;  %v4603_v32 = vsub.f32 %v17543_v42, %v13249_v6  ;;  %v17548_v6 = vld [vmem:[#allocation56_spill] sm:$0xff] }
 0xacf   :  { %10137 = vpow2.f32 %v4831_v16  ;;  %v4839_v16 = vmul.f32 1.442695, %v4626_v17  ;;  %v17547_v17 = vld [vmem:[#allocation86_spill] sm:$0xff] }
 0xad0   :  { %5273 = vperm.xlu1 %9527, %v13434_v36   ;;  %10139 = vpow2.f32 %v4781_v9  ;;  %v13454_v36 = vpop.eup %10129  ;;  %v4793_v24 = vmul.f32 1.442695, %v4603_v32 }
 0xad1   :  { %5198 = vperm.xlu0 %9528, %v13436_v7   ;;  %v4835_v7 = vmul.f32 1.442695, %v4624_v40  ;;  %17540 = vst [vmem:[#allocation177_spill] sm:$0xff] %v13454_v36  ;;  %v13458_v51 = vpop.eup %10131  ;;  %v17542_v40 = vld [vmem:[#allocation84_spill] sm:$0xff] }
 0xad2   :  { %17541 = vst [vmem:[#allocation160_spill] sm:$0xff] %v13458_v51  ;;  %v4628_v9 = vsub.f32 %v17542_v40, %v13417_v34  ;;  %v4605_v40 = vsub.f32 %v17548_v6, %v13333_v26 }
 0xad3   :  { %10141 = vpow2.f32 %v4835_v7 }
 0xad4   :  { %5279 = vperm.xlu1 %9527, %v13444_v45   ;;  %10143 = vpow2.f32 %v4785_v39  ;;  %v4843_v7 = vmul.f32 1.442695, %v4628_v9  ;;  %v4630_v39 = vsub.f32 %v17547_v17, %v13417_v34  ;;  %v17551_v9 = vld [vmem:[#allocation90_spill] sm:$0xff]  ;;  %v4797_v32 = vmul.f32 1.442695, %v4605_v40  ;;  %v17552_v17 = vld [vmem:[#allocation143_spill] sm:$0xff] }
 0xad5   :  { %5204 = vperm.xlu0 %9528, %v13446_v22   ;;  %v13468_v22 = vpop.eup %10133  ;;  %10145 = vpow2.f32 %v4839_v16  ;;  %v4607_v6 = vsub.f32 %v17552_v17, %v13333_v26 }
 0xad6   :  { %17544 = vst [vmem:[#allocation49_spill] sm:$0xff] %v13468_v22  ;;  %v13472_v4 = vpop.eup %10135  ;;  %10147 = vpow2.f32 %v4789_v1  ;;  %v4847_v16 = vmul.f32 1.442695, %v4630_v39  ;;  %v4632_v1 = vsub.f32 %v17551_v9, %v13417_v34  ;;  %v17555_v39 = vld [vmem:[#allocation92_spill] sm:$0xff]  ;;  %v17556_v9 = vld [vmem:[#allocation58_spill] sm:$0xff] }
 0xad7   :  { %v13456_v8 = vpop.permute.xlu1 %5081  ;;  %17546 = vst [vmem:[#allocation29_spill] sm:$0xff] %v13472_v4  ;;  %10149 = vpow2.f32 %v4843_v7  ;;  %v4801_v40 = vmul.f32 1.442695, %v4607_v6  ;;  %v4609_v17 = vsub.f32 %v17556_v9, %v13333_v26  ;;  %v17560_v6 = vld [vmem:[#allocation93_spill] sm:$0xff] }
 0xad8   :  { %v13460_v60 = vpop.permute.xlu0 %5054  ;;  %5285 = vperm.xlu1 %9527, %v13454_v36   ;;  %10151 = vpow2.f32 %v4793_v24  ;;  %v4851_v7 = vmul.f32 1.442695, %v4632_v1  ;;  %v4634_v24 = vsub.f32 %v17555_v39, %v13417_v34  ;;  %v4636_v39 = vsub.f32 %v17560_v6, %v13417_v34 }
 0xad9   :  { %5210 = vperm.xlu0 %9528, %v13458_v51   ;;  %v13482_v42 = vpop.eup %10137  ;;  %10153 = vpow2.f32 %v4847_v16  ;;  %v17559_v16 = vld [vmem:[#allocation45_spill] sm:$0xff]  ;;  %v4805_v9 = vmul.f32 1.442695, %v4609_v17 }
 0xada   :  { %17549 = vst [vmem:[#allocation163_spill] sm:$0xff] %v13482_v42  ;;  %v13486_v36 = vpop.eup %10139  ;;  %10155 = vpow2.f32 %v4797_v32  ;;  %v13521_v1 = vrot.slane %v13088_v31, %v17559_v16  ;;  %v4855_v32 = vmul.f32 1.442695, %v4634_v24  ;;  %v17564_v24 = vld [vmem:[#allocation95_spill] sm:$0xff] }
 0xadb   :  { %v13470_v45 = vpop.permute.xlu1 %5099  ;;  %17550 = vst [vmem:[#allocation54_spill] sm:$0xff] %v13486_v36  ;;  %10157 = vpow2.f32 %v4851_v7  ;;  %v4859_v7 = vmul.f32 1.442695, %v4636_v39  ;;  %v17568_v39 = vld [vmem:[#allocation97_spill] sm:$0xff] }
 0xadc   :  { %17545 = vst [vmem:[#allocation162_spill] sm:$0xff] %v13470_v45  ;;  %v13474_v46 = vpop.permute.xlu0 %5057  ;;  %5291 = vperm.xlu1 %9527, %v13468_v22   ;;  %10159 = vpow2.f32 %v4801_v40  ;;  %v4638_v40 = vsub.f32 %v17564_v24, %v13521_v1  ;;  %v17569_v24 = vld [vmem:[#allocation64_spill] sm:$0xff] }
 0xadd   :  { %5216 = vperm.xlu0 %9528, %v13472_v4   ;;  %v13496_v4 = vpop.eup %10141  ;;  %10161 = vpow2.f32 %v4855_v32 }
 0xade   :  { %17553 = vst [vmem:[#allocation165_spill] sm:$0xff] %v13496_v4  ;;  %v13500_v23 = vpop.eup %10143  ;;  %10163 = vpow2.f32 %v4805_v9  ;;  %v4863_v32 = vmul.f32 1.442695, %v4638_v40  ;;  %v17572_v40 = vld [vmem:[#allocation99_spill] sm:$0xff] }
 0xadf   :  { %v13484_v51 = vpop.permute.xlu1 %5105  ;;  %17554 = vst [vmem:[#allocation31_spill] sm:$0xff] %v13500_v23  ;;  %10165 = vpow2.f32 %v4859_v7 }
 0xae0   :  { %v13488_v35 = vpop.permute.xlu0 %5060  ;;  %5297 = vperm.xlu1 %9527, %v13482_v42  }
 0xae1   :  { %5222 = vperm.xlu0 %9528, %v13486_v36   ;;  %v13510_v36 = vpop.eup %10145 }
 0xae2   :  { %17557 = vst [vmem:[#allocation167_spill] sm:$0xff] %v13510_v36  ;;  %v13514_v2 = vpop.eup %10147 }
 0xae3   :  { %v13498_v22 = vpop.permute.xlu1 %5111  ;;  %17558 = vst [vmem:[#allocation134_spill] sm:$0xff] %v13514_v2  ;;  %v13528_v14 = vpop.eup %10149 }
 0xae4   :  { %v13502_v15 = vpop.permute.xlu0 %5063  ;;  %5303 = vperm.xlu1 %9527, %v13496_v4   ;;  %17562 = vst [vmem:[#allocation169_spill] sm:$0xff] %v13528_v14 }
 0xae5   :  { %5228 = vperm.xlu0 %9528, %v13500_v23   ;;  %v17561_v23 = vld [vmem:[#allocation145_spill] sm:$0xff] }
 0xae6   :  { %v4611_v4 = vsub.f32 %v17561_v23, %v13333_v26  ;;  %v17565_v23 = vld [vmem:[#allocation60_spill] sm:$0xff] }
 0xae7   :  { %v13512_v42 = vpop.permute.xlu1 %5117  ;;  %v4613_v6 = vsub.f32 %v17565_v23, %v13333_v26  ;;  %v4615_v23 = vsub.f32 %v17569_v24, %v13333_v26 }
 0xae8   :  { %v13516_v57 = vpop.permute.xlu0 %5066  ;;  %5309 = vperm.xlu1 %9527, %v13510_v36   ;;  %v13532_v36 = vpop.eup %10151  ;;  %v4809_v17 = vmul.f32 1.442695, %v4611_v4  ;;  %v4640_v4 = vsub.f32 %v17568_v39, %v13521_v1  ;;  %v17573_v39 = vld [vmem:[#allocation151_spill] sm:$0xff] }
 0xae9   :  { %5234 = vperm.xlu0 %9528, %v13514_v2   ;;  %17563 = vst [vmem:[#allocation33_spill] sm:$0xff] %v13532_v36  ;;  %v13542_v2 = vpop.eup %10153  ;;  %v4813_v9 = vmul.f32 1.442695, %v4613_v6  ;;  %v4817_v6 = vmul.f32 1.442695, %v4615_v23  ;;  %v4617_v24 = vsub.f32 %v17573_v39, %v13333_v26 }
 0xaea   :  { %17566 = vst [vmem:[#allocation171_spill] sm:$0xff] %v13542_v2  ;;  %v13546_v49 = vpop.eup %10155  ;;  %10167 = vpow2.f32 %v4809_v17  ;;  %v4867_v7 = vmul.f32 1.442695, %v4640_v4  ;;  %v4642_v17 = vsub.f32 %v17572_v40, %v13521_v1  ;;  %v17577_v4 = vld [vmem:[#allocation101_spill] sm:$0xff]  ;;  %v17578_v40 = vld [vmem:[#allocation158_spill] sm:$0xff] }
 0xaeb   :  { %v13530_v10 = vpop.permute.xlu1 %5123  ;;  %17567 = vst [vmem:[#allocation136_spill] sm:$0xff] %v13546_v49  ;;  %10169 = vpow2.f32 %v4863_v32  ;;  %v4821_v23 = vmul.f32 1.442695, %v4617_v24  ;;  %v4619_v39 = vsub.f32 %v17578_v40, %v13333_v26  ;;  %v17583_v26 = vld [vmem:[#allocation77_spill] sm:$0xff] }
 0xaec   :  { %v13534_v16 = vpop.permute.xlu0 %5069  ;;  %5315 = vperm.xlu1 %9527, %v13528_v14   ;;  %10171 = vpow2.f32 %v4813_v9  ;;  %v4871_v32 = vmul.f32 1.442695, %v4642_v17  ;;  %v4644_v9 = vsub.f32 %v17577_v4, %v13521_v1  ;;  %v17582_v17 = vld [vmem:[#allocation104_spill] sm:$0xff]  ;;  %v4621_v4 = vsub.f32 %v17583_v26, %v13417_v34 }
 0xaed   :  { %5240 = vperm.xlu0 %9528, %v13532_v36   ;;  %v13556_v36 = vpop.eup %10157  ;;  %10173 = vpow2.f32 %v4867_v7  ;;  %v4825_v24 = vmul.f32 1.442695, %v4619_v39 }
 0xaee   :  { %17570 = vst [vmem:[#allocation173_spill] sm:$0xff] %v13556_v36  ;;  %v13560_v58 = vpop.eup %10159  ;;  %10175 = vpow2.f32 %v4817_v6  ;;  %v4875_v7 = vmul.f32 1.442695, %v4644_v9  ;;  %v4646_v6 = vsub.f32 %v17582_v17, %v13521_v1  ;;  %v17586_v9 = vld [vmem:[#allocation106_spill] sm:$0xff]  ;;  %v4829_v39 = vmul.f32 1.442695, %v4621_v4 }
 0xaef   :  { %v13544_v63 = vpop.permute.xlu1 %5129  ;;  %17571 = vst [vmem:[#allocation36_spill] sm:$0xff] %v13560_v58  ;;  %10177 = vpow2.f32 %v4871_v32  ;;  %v17587_v17 = vld [vmem:[#allocation79_spill] sm:$0xff] }
 0xaf0   :  { %v13548_v19 = vpop.permute.xlu0 %5072  ;;  %5321 = vperm.xlu1 %9527, %v13542_v2   ;;  %10179 = vpow2.f32 %v4821_v23  ;;  %v4879_v32 = vmul.f32 1.442695, %v4646_v6  ;;  %v4648_v23 = vsub.f32 %v17586_v9, %v13521_v1  ;;  %v4623_v26 = vsub.f32 %v17587_v17, %v13417_v34  ;;  %v17590_v6 = vld [vmem:[#allocation108_spill] sm:$0xff]  ;;  %v17591_v9 = vld [vmem:[#allocation81_spill] sm:$0xff] }
 0xaf1   :  { %5246 = vperm.xlu0 %9528, %v13546_v49   ;;  %v13570_v49 = vpop.eup %10161  ;;  %10181 = vpow2.f32 %v4875_v7  ;;  %v4625_v17 = vsub.f32 %v17591_v9, %v13417_v34 }
 0xaf2   :  { %17574 = vst [vmem:[#allocation175_spill] sm:$0xff] %v13570_v49  ;;  %v13574_v38 = vpop.eup %10163  ;;  %10183 = vpow2.f32 %v4825_v24  ;;  %v4883_v7 = vmul.f32 1.442695, %v4648_v23  ;;  %v4650_v24 = vsub.f32 %v17590_v6, %v13521_v1  ;;  %v4833_v4 = vmul.f32 1.442695, %v4623_v26  ;;  %v17595_v26 = vld [vmem:[#allocation110_spill] sm:$0xff] }
 0xaf3   :  { %v13558_v14 = vpop.permute.xlu1 %5135  ;;  %17576 = vst [vmem:[#allocation179_spill] sm:$0xff] %v13574_v38  ;;  %10185 = vpow2.f32 %v4879_v32  ;;  %v17594_v32 = vld [vmem:[#allocation48_spill] sm:$0xff]  ;;  %v4652_v6 = vsub.f32 %v17595_v26, %v13521_v1  ;;  %v4837_v9 = vmul.f32 1.442695, %v4625_v17 }
 0xaf4   :  { %v13562_v18 = vpop.permute.xlu0 %5075  ;;  %5327 = vperm.xlu1 %9527, %v13556_v36   ;;  %10187 = vpow2.f32 %v4829_v39  ;;  %v13637_v23 = vrot.slane %v13088_v31, %v17594_v32  ;;  %v4887_v39 = vmul.f32 1.442695, %v4650_v24  ;;  %v17600_v24 = vld [vmem:[#allocation112_spill] sm:$0xff] }
 0xaf5   :  { %5252 = vperm.xlu0 %9528, %v13560_v58   ;;  %v13584_v58 = vpop.eup %10165  ;;  %10189 = vpow2.f32 %v4883_v7  ;;  %v4891_v7 = vmul.f32 1.442695, %v4652_v6  ;;  %v17605_v6 = vld [vmem:[#allocation114_spill] sm:$0xff] }
 0xaf6   :  { %17579 = vst [vmem:[#allocation131_spill] sm:$0xff] %v13584_v58  ;;  %v13588_v28 = vpop.eup %10167  ;;  %10191 = vpow2.f32 %v4833_v4  ;;  %v4654_v4 = vsub.f32 %v17600_v24, %v13637_v23  ;;  %v17606_v24 = vld [vmem:[#allocation87_spill] sm:$0xff] }
 0xaf7   :  { %v13572_v2 = vpop.permute.xlu1 %5141  ;;  %17581 = vst [vmem:[#allocation141_spill] sm:$0xff] %v13588_v28  ;;  %v13598_v40 = vpop.eup %10169  ;;  %10193 = vpow2.f32 %v4887_v39 }
 0xaf8   :  { %17575 = vst [vmem:[#allocation127_spill] sm:$0xff] %v13572_v2  ;;  %v13576_v3 = vpop.permute.xlu0 %5078  ;;  %5333 = vperm.xlu1 %9527, %v13570_v49   ;;  %17584 = vst [vmem:[#allocation25_spill] sm:$0xff] %v13598_v40  ;;  %v13602_v49 = vpop.eup %10171  ;;  %10195 = vpow2.f32 %v4837_v9  ;;  %v4895_v39 = vmul.f32 1.442695, %v4654_v4  ;;  %v17610_v4 = vld [vmem:[#allocation116_spill] sm:$0xff] }
 0xaf9   :  { %5258 = vperm.xlu0 %9528, %v13574_v38   ;;  %17585 = vst [vmem:[#allocation150_spill] sm:$0xff] %v13602_v49  ;;  %10197 = vpow2.f32 %v4891_v7 }
 0xafb   :  { %v13586_v36 = vpop.permute.xlu1 %5147 }
 0xafc   :  { %17580 = vst [vmem:[#allocation26_spill] sm:$0xff] %v13586_v36  ;;  %v13590_v56 = vpop.permute.xlu0 %5084  ;;  %5339 = vperm.xlu1 %9527, %v13584_v58  }
 0xafd   :  { %5264 = vperm.xlu0 %9528, %v13588_v28   ;;  %v13612_v28 = vpop.eup %10173 }
 0xafe   :  { %17588 = vst [vmem:[#allocation28_spill] sm:$0xff] %v13612_v28  ;;  %v13616_v30 = vpop.eup %10175 }
 0xaff   :  { %v13600_v38 = vpop.permute.xlu1 %5153  ;;  %17589 = vst [vmem:[#allocation161_spill] sm:$0xff] %v13616_v30 }
 0xb00   :  { %v13604_v21 = vpop.permute.xlu0 %5087  ;;  %5345 = vperm.xlu1 %9527, %v13598_v40  }
 0xb01   :  { %5270 = vperm.xlu0 %9528, %v13602_v49   ;;  %v13626_v49 = vpop.eup %10177 }
 0xb02   :  { %17592 = vst [vmem:[#allocation128_spill] sm:$0xff] %v13626_v49  ;;  %v13630_v12 = vpop.eup %10179 }
 0xb03   :  { %v13614_v58 = vpop.permute.xlu1 %5159  ;;  %17593 = vst [vmem:[#allocation166_spill] sm:$0xff] %v13630_v12  ;;  %v13644_v53 = vpop.eup %10181 }
 0xb04   :  { %v13618_v62 = vpop.permute.xlu0 %5090  ;;  %5351 = vperm.xlu1 %9527, %v13612_v28   ;;  %17597 = vst [vmem:[#allocation52_spill] sm:$0xff] %v13644_v53 }
 0xb05   :  { %5276 = vperm.xlu0 %9528, %v13616_v30   ;;  %v17596_v30 = vld [vmem:[#allocation83_spill] sm:$0xff] }
 0xb06   :  { %v4627_v28 = vsub.f32 %v17596_v30, %v13417_v34  ;;  %v17601_v30 = vld [vmem:[#allocation85_spill] sm:$0xff] }
 0xb07   :  { %v13628_v40 = vpop.permute.xlu1 %5165  ;;  %v4629_v26 = vsub.f32 %v17601_v30, %v13417_v34  ;;  %v4631_v30 = vsub.f32 %v17606_v24, %v13417_v34 }
 0xb08   :  { %v13632_v11 = vpop.permute.xlu0 %5093  ;;  %5357 = vperm.xlu1 %9527, %v13626_v49   ;;  %v13648_v49 = vpop.eup %10183  ;;  %v4841_v17 = vmul.f32 1.442695, %v4627_v28  ;;  %v4656_v28 = vsub.f32 %v17605_v6, %v13637_v23  ;;  %v17611_v6 = vld [vmem:[#allocation89_spill] sm:$0xff] }
 0xb09   :  { %5282 = vperm.xlu0 %9528, %v13630_v12   ;;  %17598 = vst [vmem:[#allocation170_spill] sm:$0xff] %v13648_v49  ;;  %v13658_v32 = vpop.eup %10185  ;;  %v4845_v9 = vmul.f32 1.442695, %v4629_v26  ;;  %v4849_v26 = vmul.f32 1.442695, %v4631_v30  ;;  %v4633_v24 = vsub.f32 %v17611_v6, %v13417_v34 }
 0xb0a   :  { %17602 = vst [vmem:[#allocation174_spill] sm:$0xff] %v13658_v32  ;;  %v13662_v50 = vpop.eup %10187  ;;  %10199 = vpow2.f32 %v4841_v17  ;;  %v4899_v7 = vmul.f32 1.442695, %v4656_v28  ;;  %v4658_v17 = vsub.f32 %v17610_v4, %v13637_v23  ;;  %v17615_v28 = vld [vmem:[#allocation118_spill] sm:$0xff]  ;;  %v17616_v4 = vld [vmem:[#allocation91_spill] sm:$0xff] }
 0xb0b   :  { %v13646_v41 = vpop.permute.xlu1 %5171  ;;  %17604 = vst [vmem:[#allocation178_spill] sm:$0xff] %v13662_v50  ;;  %10201 = vpow2.f32 %v4895_v39  ;;  %v4853_v30 = vmul.f32 1.442695, %v4633_v24  ;;  %v4635_v6 = vsub.f32 %v17616_v4, %v13417_v34  ;;  %v17621_v34 = vld [vmem:[#allocation94_spill] sm:$0xff] }
 0xb0c   :  { %v13650_v31 = vpop.permute.xlu0 %5096  ;;  %5363 = vperm.xlu1 %9527, %v13644_v53   ;;  %10203 = vpow2.f32 %v4845_v9  ;;  %v4903_v39 = vmul.f32 1.442695, %v4658_v17  ;;  %v4660_v9 = vsub.f32 %v17615_v28, %v13637_v23  ;;  %v17620_v17 = vld [vmem:[#allocation120_spill] sm:$0xff]  ;;  %v4637_v28 = vsub.f32 %v17621_v34, %v13521_v1 }
 0xb0d   :  { %17599 = vst [vmem:[#allocation32_spill] sm:$0xff] %v13650_v31  ;;  %5288 = vperm.xlu0 %9528, %v13648_v49   ;;  %v13672_v49 = vpop.eup %10189  ;;  %10205 = vpow2.f32 %v4899_v7  ;;  %v4857_v24 = vmul.f32 1.442695, %v4635_v6 }
 0xb0e   :  { %17607 = vst [vmem:[#allocation35_spill] sm:$0xff] %v13672_v49  ;;  %v13676_v25 = vpop.eup %10191  ;;  %10207 = vpow2.f32 %v4849_v26  ;;  %v4907_v7 = vmul.f32 1.442695, %v4660_v9  ;;  %v4662_v26 = vsub.f32 %v17620_v17, %v13637_v23  ;;  %v17625_v9 = vld [vmem:[#allocation122_spill] sm:$0xff]  ;;  %v4861_v6 = vmul.f32 1.442695, %v4637_v28 }
 0xb0f   :  { %v13660_v12 = vpop.permute.xlu1 %5177  ;;  %17609 = vst [vmem:[#allocation133_spill] sm:$0xff] %v13676_v25  ;;  %10209 = vpow2.f32 %v4903_v39  ;;  %v17626_v17 = vld [vmem:[#allocation96_spill] sm:$0xff] }
 0xb10   :  { %17603 = vst [vmem:[#allocation132_spill] sm:$0xff] %v13660_v12  ;;  %v13664_v54 = vpop.permute.xlu0 %5102  ;;  %5369 = vperm.xlu1 %9527, %v13658_v32   ;;  %10211 = vpow2.f32 %v4853_v30  ;;  %v4911_v39 = vmul.f32 1.442695, %v4662_v26  ;;  %v4664_v30 = vsub.f32 %v17625_v9, %v13637_v23  ;;  %v4639_v34 = vsub.f32 %v17626_v17, %v13521_v1  ;;  %v17630_v26 = vld [vmem:[#allocation124_spill] sm:$0xff]  ;;  %v17631_v9 = vld [vmem:[#allocation98_spill] sm:$0xff] }
 0xb11   :  { %5294 = vperm.xlu0 %9528, %v13662_v50   ;;  %v13686_v50 = vpop.eup %10193  ;;  %10213 = vpow2.f32 %v4907_v7  ;;  %v4641_v17 = vsub.f32 %v17631_v9, %v13521_v1 }
 0xb12   :  { %17612 = vst [vmem:[#allocation50_spill] sm:$0xff] %v13686_v50  ;;  %10215 = vpow2.f32 %v4857_v24  ;;  %v4915_v7 = vmul.f32 1.442695, %v4664_v30  ;;  %v4666_v24 = vsub.f32 %v17630_v26, %v13637_v23  ;;  %v4865_v28 = vmul.f32 1.442695, %v4639_v34  ;;  %v17635_v30 = vld [vmem:[#allocation126_spill] sm:$0xff] }
 0xb13   :  { %v13674_v53 = vpop.permute.xlu1 %5183  ;;  %10217 = vpow2.f32 %v4911_v39  ;;  %v4869_v34 = vmul.f32 1.442695, %v4641_v17  ;;  %v17636_v26 = vld [vmem:[#allocation100_spill] sm:$0xff] }
 0xb14   :  { %17608 = vst [vmem:[#allocation47_spill] sm:$0xff] %v13674_v53  ;;  %v13678_v36 = vpop.permute.xlu0 %5108  ;;  %5375 = vperm.xlu1 %9527, %v13672_v49   ;;  %v13690_v53 = vpop.eup %10195  ;;  %10219 = vpow2.f32 %v4861_v6  ;;  %v4919_v39 = vmul.f32 1.442695, %v4666_v24  ;;  %v4668_v6 = vsub.f32 %v17635_v30, %v13637_v23  ;;  %v4643_v9 = vsub.f32 %v17636_v26, %v13521_v1 }
 0xb15   :  { %5300 = vperm.xlu0 %9528, %v13676_v25   ;;  %17614 = vst [vmem:[#allocation30_spill] sm:$0xff] %v13690_v53  ;;  %v13700_v25 = vpop.eup %10197  ;;  %10221 = vpow2.f32 %v4915_v7 }
 0xb16   :  { %17617 = vst [vmem:[#allocation135_spill] sm:$0xff] %v13700_v25  ;;  %10223 = vpow2.f32 %v4865_v28  ;;  %v4923_v7 = vmul.f32 1.442695, %v4668_v6  ;;  %v4873_v24 = vmul.f32 1.442695, %v4643_v9  ;;  %v17641_v28 = vld [vmem:[#allocation102_spill] sm:$0xff] }
 0xb17   :  { %v13688_v32 = vpop.permute.xlu1 %5189  ;;  %10225 = vpow2.f32 %v4919_v39  ;;  %v4645_v17 = vsub.f32 %v17641_v28, %v13521_v1  ;;  %v17645_v6 = vld [vmem:[#allocation103_spill] sm:$0xff] }
 0xb18   :  { %17613 = vst [vmem:[#allocation37_spill] sm:$0xff] %v13688_v32  ;;  %v13692_v45 = vpop.permute.xlu0 %5114  ;;  %5381 = vperm.xlu1 %9527, %v13686_v50   ;;  %v13704_v32 = vpop.eup %10199  ;;  %10227 = vpow2.f32 %v4869_v34  ;;  %v4647_v34 = vsub.f32 %v17645_v6, %v13521_v1 }
 0xb19   :  { %5306 = vperm.xlu0 %9528, %v13690_v53   ;;  %17619 = vst [vmem:[#allocation125_spill] sm:$0xff] %v13704_v32  ;;  %v13714_v4 = vpop.eup %10201  ;;  %10229 = vpow2.f32 %v4923_v7  ;;  %v4877_v39 = vmul.f32 1.442695, %v4645_v17  ;;  %v17649_v7 = vld [vmem:[#allocation105_spill] sm:$0xff] }
 0xb1a   :  { %17622 = vst [vmem:[#allocation39_spill] sm:$0xff] %v13714_v4  ;;  %v13718_v50 = vpop.eup %10203  ;;  %10231 = vpow2.f32 %v4873_v24  ;;  %v4649_v24 = vsub.f32 %v17649_v7, %v13521_v1 }
 0xb1b   :  { %v13702_v49 = vpop.permute.xlu1 %5195  ;;  %17624 = vst [vmem:[#allocation38_spill] sm:$0xff] %v13718_v50  ;;  %10233 = vpow2.f32 %v4877_v39  ;;  %v17653_v39 = vld [vmem:[#allocation107_spill] sm:$0xff] }
 0xb1c   :  { %17618 = vst [vmem:[#allocation51_spill] sm:$0xff] %v13702_v49  ;;  %v13706_v37 = vpop.permute.xlu0 %5120  ;;  %5387 = vperm.xlu1 %9527, %v13700_v25  }
 0xb1d   :  { %5312 = vperm.xlu0 %9528, %v13704_v32   ;;  %v13728_v32 = vpop.eup %10205 }
 0xb1e   :  { %17627 = vst [vmem:[#allocation139_spill] sm:$0xff] %v13728_v32  ;;  %v13732_v12 = vpop.eup %10207 }
 0xb1f   :  { %v13716_v53 = vpop.permute.xlu1 %5201  ;;  %17629 = vst [vmem:[#allocation149_spill] sm:$0xff] %v13732_v12 }
 0xb20   :  { %17623 = vst [vmem:[#allocation129_spill] sm:$0xff] %v13716_v53  ;;  %v13720_v49 = vpop.permute.xlu0 %5126  ;;  %5393 = vperm.xlu1 %9527, %v13714_v4  }
 0xb21   :  { %5318 = vperm.xlu0 %9528, %v13718_v50   ;;  %v13742_v50 = vpop.eup %10209 }
 0xb22   :  { %17632 = vst [vmem:[#allocation138_spill] sm:$0xff] %v13742_v50 }
 0xb23   :  { %v13730_v25 = vpop.permute.xlu1 %5207 }
 0xb24   :  { %17628 = vst [vmem:[#allocation43_spill] sm:$0xff] %v13730_v25  ;;  %v13734_v2 = vpop.permute.xlu0 %5132  ;;  %5399 = vperm.xlu1 %9527, %v13728_v32   ;;  %v13746_v25 = vpop.eup %10211 }
 0xb25   :  { %5324 = vperm.xlu0 %9528, %v13732_v12   ;;  %17634 = vst [vmem:[#allocation44_spill] sm:$0xff] %v13746_v25  ;;  %v13756_v12 = vpop.eup %10213 }
 0xb26   :  { %17637 = vst [vmem:[#allocation164_spill] sm:$0xff] %v13756_v12 }
 0xb27   :  { %v13744_v4 = vpop.permute.xlu1 %5213 }
 0xb28   :  { %17633 = vst [vmem:[#allocation159_spill] sm:$0xff] %v13744_v4  ;;  %v13748_v53 = vpop.permute.xlu0 %5138  ;;  %5405 = vperm.xlu1 %9527, %v13742_v50   ;;  %v13760_v4 = vpop.eup %10215 }
 0xb29   :  { %5330 = vperm.xlu0 %9528, %v13746_v25   ;;  %17639 = vst [vmem:[#allocation168_spill] sm:$0xff] %v13760_v4  ;;  %v13768_v30 = vpop.eup %10217 }
 0xb2a   :  { %17642 = vst [vmem:[#allocation172_spill] sm:$0xff] %v13768_v30  ;;  %v13772_v25 = vpop.eup %10219 }
 0xb2b   :  { %v13758_v32 = vpop.permute.xlu1 %5219  ;;  %17644 = vst [vmem:[#allocation176_spill] sm:$0xff] %v13772_v25  ;;  %v13780_v9 = vpop.eup %10221 }
 0xb2c   :  { %17638 = vst [vmem:[#allocation142_spill] sm:$0xff] %v13758_v32  ;;  %v13762_v31 = vpop.permute.xlu0 %5144  ;;  %5411 = vperm.xlu1 %9527, %v13756_v12   ;;  %17646 = vst [vmem:[#allocation55_spill] sm:$0xff] %v13780_v9  ;;  %v17660_v32 = vld [vmem:[#allocation111_spill] sm:$0xff] }
 0xb2d   :  { %17640 = vst [vmem:[#allocation53_spill] sm:$0xff] %v13762_v31  ;;  %5336 = vperm.xlu0 %9528, %v13760_v4   ;;  %v13784_v4 = vpop.eup %10223 }
 0xb2e   :  { %17648 = vst [vmem:[#allocation57_spill] sm:$0xff] %v13784_v4  ;;  %v13792_v17 = vpop.eup %10225 }
 0xb2f   :  { %v13770_v26 = vpop.permute.xlu1 %5225  ;;  %17650 = vst [vmem:[#allocation46_spill] sm:$0xff] %v13792_v17 }
 0xb30   :  { %17643 = vst [vmem:[#allocation144_spill] sm:$0xff] %v13770_v26  ;;  %v13774_v50 = vpop.permute.xlu0 %5150  ;;  %5417 = vperm.xlu1 %9527, %v13768_v30   ;;  %v13796_v30 = vpop.eup %10227 }
 0xb31   :  { %5342 = vperm.xlu0 %9528, %v13772_v25   ;;  %v4881_v25 = vmul.f32 1.442695, %v4647_v34  ;;  %17652 = vst [vmem:[#allocation27_spill] sm:$0xff] %v13796_v30  ;;  %v4651_v34 = vsub.f32 %v17653_v39, %v13521_v1 }
 0xb33   :  { %v13782_v28 = vpop.permute.xlu1 %5231  ;;  %10235 = vpow2.f32 %v4881_v25  ;;  %v17657_v25 = vld [vmem:[#allocation109_spill] sm:$0xff] }
 0xb34   :  { %17647 = vst [vmem:[#allocation180_spill] sm:$0xff] %v13782_v28  ;;  %v13786_v12 = vpop.permute.xlu0 %5156  ;;  %5423 = vperm.xlu1 %9527, %v13780_v9   ;;  %v4885_v9 = vmul.f32 1.442695, %v4649_v24  ;;  %v4653_v24 = vsub.f32 %v17657_v25, %v13637_v23 }
 0xb35   :  { %5348 = vperm.xlu0 %9528, %v13784_v4   ;;  %v13804_v4 = vpop.eup %10229 }
 0xb36   :  { %17654 = vst [vmem:[#allocation67_spill] sm:$0xff] %v13804_v4  ;;  %v13808_v26 = vpop.eup %10231  ;;  %10237 = vpow2.f32 %v4885_v9 }
 0xb37   :  { %v13794_v6 = vpop.permute.xlu1 %5237  ;;  %17656 = vst [vmem:[#allocation78_spill] sm:$0xff] %v13808_v26  ;;  %v13818_v1 = vpop.eup %10233 }
 0xb38   :  { %17651 = vst [vmem:[#allocation61_spill] sm:$0xff] %v13794_v6  ;;  %v13798_v28 = vpop.permute.xlu0 %5162  ;;  %5429 = vperm.xlu1 %9527, %v13792_v17   ;;  %v4889_v17 = vmul.f32 1.442695, %v4651_v34  ;;  %17659 = vst [vmem:[#allocation75_spill] sm:$0xff] %v13818_v1 }
 0xb39   :  { %5354 = vperm.xlu0 %9528, %v13796_v30  }
 0xb3a   :  { %10239 = vpow2.f32 %v4889_v17 }
 0xb3b   :  { %v13806_v7 = vpop.permute.xlu1 %5243 }
 0xb3c   :  { %17655 = vst [vmem:[#allocation130_spill] sm:$0xff] %v13806_v7  ;;  %v13810_v6 = vpop.permute.xlu0 %5168  ;;  %5435 = vperm.xlu1 %9527, %v13804_v4   ;;  %v4893_v7 = vmul.f32 1.442695, %v4653_v24  ;;  %v4655_v4 = vsub.f32 %v17660_v32, %v13637_v23 }
 0xb3d   :  { %5360 = vperm.xlu0 %9528, %v13808_v26   ;;  %v13827_v9 = vpop.eup %10235  ;;  %v17664_v26 = vld [vmem:[#allocation113_spill] sm:$0xff] }
 0xb3e   :  { %17662 = vst [vmem:[#allocation82_spill] sm:$0xff] %v13827_v9  ;;  %10241 = vpow2.f32 %v4893_v7  ;;  %v4897_v25 = vmul.f32 1.442695, %v4655_v4 }
 0xb3f   :  { %v13816_v30 = vpop.permute.xlu1 %5249 }
 0xb40   :  { %17658 = vst [vmem:[#allocation137_spill] sm:$0xff] %v13816_v30  ;;  %v13820_v39 = vpop.permute.xlu0 %5174  ;;  %v4657_v30 = vsub.f32 %v17664_v26, %v13637_v23  ;;  %v13836_v17 = vpop.eup %10237  ;;  %10243 = vpow2.f32 %v4897_v25 }
 0xb41   :  { %5366 = vperm.xlu0 %9528, %v13818_v1   ;;  %17666 = vst [vmem:[#allocation42_spill] sm:$0xff] %v13836_v17  ;;  %v17668_v1 = vld [vmem:[#allocation115_spill] sm:$0xff] }
 0xb42   :  { %v4901_v32 = vmul.f32 1.442695, %v4657_v30 }
 0xb43   :  { %v13825_v31 = vpop.permute.xlu1 %5255 }
 0xb44   :  { %17661 = vst [vmem:[#allocation40_spill] sm:$0xff] %v13825_v31  ;;  %v13829_v34 = vpop.permute.xlu0 %5180  ;;  %v4659_v31 = vsub.f32 %v17668_v1, %v13637_v23  ;;  %v13845_v7 = vpop.eup %10239  ;;  %10245 = vpow2.f32 %v4901_v32 }
 0xb45   :  { %17663 = vst [vmem:[#allocation140_spill] sm:$0xff] %v13829_v34  ;;  %5372 = vperm.xlu0 %9528, %v13827_v9   ;;  %17670 = vst [vmem:[#allocation90_spill] sm:$0xff] %v13845_v7  ;;  %v17672_v9 = vld [vmem:[#allocation117_spill] sm:$0xff] }
 0xb46   :  { %v4905_v26 = vmul.f32 1.442695, %v4659_v31 }
 0xb47   :  { %v13834_v13 = vpop.permute.xlu1 %5261 }
 0xb48   :  { %17665 = vst [vmem:[#allocation84_spill] sm:$0xff] %v13834_v13  ;;  %v13838_v24 = vpop.permute.xlu0 %5186  ;;  %v4661_v13 = vsub.f32 %v17672_v9, %v13637_v23  ;;  %v13854_v25 = vpop.eup %10241  ;;  %10247 = vpow2.f32 %v4905_v26 }
 0xb49   :  { %17667 = vst [vmem:[#allocation86_spill] sm:$0xff] %v13838_v24  ;;  %5378 = vperm.xlu0 %9528, %v13836_v17   ;;  %17674 = vst [vmem:[#allocation58_spill] sm:$0xff] %v13854_v25  ;;  %v17676_v17 = vld [vmem:[#allocation119_spill] sm:$0xff] }
 0xb4a   :  { %v4909_v1 = vmul.f32 1.442695, %v4661_v13  ;;  %v13863_v32 = vpop.eup %10243 }
 0xb4b   :  { %v13843_v34 = vpop.permute.xlu1 %5267  ;;  %17678 = vst [vmem:[#allocation95_spill] sm:$0xff] %v13863_v32 }
 0xb4c   :  { %17669 = vst [vmem:[#allocation56_spill] sm:$0xff] %v13843_v34  ;;  %v13847_v4 = vpop.permute.xlu0 %5192  ;;  %v4663_v34 = vsub.f32 %v17676_v17, %v13637_v23  ;;  %10249 = vpow2.f32 %v4909_v1 }
 0xb4d   :  { %17671 = vst [vmem:[#allocation143_spill] sm:$0xff] %v13847_v4  ;;  %5384 = vperm.xlu0 %9528, %v13845_v7   ;;  %v17680_v7 = vld [vmem:[#allocation121_spill] sm:$0xff] }
 0xb4e   :  { %v4913_v9 = vmul.f32 1.442695, %v4663_v34  ;;  %v13872_v26 = vpop.eup %10245 }
 0xb4f   :  { %v13852_v24 = vpop.permute.xlu1 %5273  ;;  %17682 = vst [vmem:[#allocation64_spill] sm:$0xff] %v13872_v26 }
 0xb50   :  { %17673 = vst [vmem:[#allocation92_spill] sm:$0xff] %v13852_v24  ;;  %v13856_v30 = vpop.permute.xlu0 %5198  ;;  %v4665_v24 = vsub.f32 %v17680_v7, %v13637_v23  ;;  %10251 = vpow2.f32 %v4913_v9 }
 0xb51   :  { %17675 = vst [vmem:[#allocation93_spill] sm:$0xff] %v13856_v30  ;;  %5390 = vperm.xlu0 %9528, %v13854_v25   ;;  %v17683_v25 = vld [vmem:[#allocation123_spill] sm:$0xff] }
 0xb52   :  { %v4917_v17 = vmul.f32 1.442695, %v4665_v24  ;;  %v13881_v1 = vpop.eup %10247 }
 0xb53   :  { %v13861_v4 = vpop.permute.xlu1 %5279  ;;  %17685 = vst [vmem:[#allocation151_spill] sm:$0xff] %v13881_v1 }
 0xb54   :  { %17677 = vst [vmem:[#allocation145_spill] sm:$0xff] %v13861_v4  ;;  %v13865_v31 = vpop.permute.xlu0 %5204  ;;  %v4667_v4 = vsub.f32 %v17683_v25, %v13637_v23  ;;  %10253 = vpow2.f32 %v4917_v17 }
 0xb55   :  { %17679 = vst [vmem:[#allocation60_spill] sm:$0xff] %v13865_v31  ;;  %5396 = vperm.xlu0 %9528, %v13863_v32  }
 0xb56   :  { %v4921_v7 = vmul.f32 1.442695, %v4667_v4  ;;  %v13886_v32 = vpop.eup %10249 }
 0xb57   :  { %v13870_v30 = vpop.permute.xlu1 %5285  ;;  %17686 = vst [vmem:[#allocation101_spill] sm:$0xff] %v13886_v32 }
 0xb58   :  { %17681 = vst [vmem:[#allocation97_spill] sm:$0xff] %v13870_v30  ;;  %v13874_v13 = vpop.permute.xlu0 %5210  ;;  %10255 = vpow2.f32 %v4921_v7 }
 0xb59   :  { %5402 = vperm.xlu0 %9528, %v13872_v26  }
 0xb5a   :  { %v13893_v23 = vpop.eup %10251 }
 0xb5b   :  { %v13879_v31 = vpop.permute.xlu1 %5291  ;;  %17688 = vst [vmem:[#allocation104_spill] sm:$0xff] %v13893_v23 }
 0xb5c   :  { %17684 = vst [vmem:[#allocation99_spill] sm:$0xff] %v13879_v31  ;;  %v13883_v34 = vpop.permute.xlu0 %5216 }
 0xb5d   :  { %5408 = vperm.xlu0 %9528, %v13881_v1  }
 0xb5e   :  { %v13900_v9 = vpop.eup %10253 }
 0xb5f   :  { %v13890_v26 = vpop.permute.xlu1 %5297  ;;  %17691 = vst [vmem:[#allocation79_spill] sm:$0xff] %v13900_v9 }
 0xb60   :  { %v13888_v30 = vpop.permute.xlu0 %5222  ;;  %17687 = vst [vmem:[#allocation158_spill] sm:$0xff] %v13890_v26 }
 0xb61   :  { %5414 = vperm.xlu0 %9528, %v13886_v32  }
 0xb62   :  { %v13905_v17 = vpop.eup %10255 }
 0xb63   :  { %v13898_v25 = vpop.permute.xlu1 %5303  ;;  %17693 = vst [vmem:[#allocation81_spill] sm:$0xff] %v13905_v17 }
 0xb64   :  { %v13895_v24 = vpop.permute.xlu0 %5228  ;;  %17690 = vst [vmem:[#allocation106_spill] sm:$0xff] %v13898_v25 }
 0xb65   :  { %17689 = vst [vmem:[#allocation77_spill] sm:$0xff] %v13895_v24  ;;  %5420 = vperm.xlu0 %9528, %v13893_v23  }
 0xb67   :  { %v13909_v32 = vpop.permute.xlu1 %5309 }
 0xb68   :  { %v13902_v4 = vpop.permute.xlu0 %5234  ;;  %17695 = vst [vmem:[#allocation83_spill] sm:$0xff] %v13909_v32 }
 0xb69   :  { %17692 = vst [vmem:[#allocation108_spill] sm:$0xff] %v13902_v4  ;;  %5426 = vperm.xlu0 %9528, %v13900_v9  }
 0xb6b   :  { %v13914_v31 = vpop.permute.xlu1 %5315 }
 0xb6c   :  { %v13907_v1 = vpop.permute.xlu0 %5240  ;;  %17697 = vst [vmem:[#allocation85_spill] sm:$0xff] %v13914_v31 }
 0xb6d   :  { %17694 = vst [vmem:[#allocation110_spill] sm:$0xff] %v13907_v1  ;;  %5432 = vperm.xlu0 %9528, %v13905_v17  }
 0xb6f   :  { %v13920_v24 = vpop.permute.xlu1 %5321 }
 0xb70   :  { %v13912_v7 = vpop.permute.xlu0 %5246  ;;  %17700 = vst [vmem:[#allocation116_spill] sm:$0xff] %v13920_v24 }
 0xb71   :  { %17696 = vst [vmem:[#allocation112_spill] sm:$0xff] %v13912_v7 }
 0xb73   :  { %v13924_v9 = vpop.permute.xlu1 %5327 }
 0xb74   :  { %v13916_v23 = vpop.permute.xlu0 %5252  ;;  %17702 = vst [vmem:[#allocation118_spill] sm:$0xff] %v13924_v9 }
 0xb75   :  { %17698 = vst [vmem:[#allocation114_spill] sm:$0xff] %v13916_v23 }
 0xb77   :  { %v13930_v32 = vpop.permute.xlu1 %5333 }
 0xb78   :  { %v13918_v25 = vpop.permute.xlu0 %5258  ;;  %17705 = vst [vmem:[#allocation94_spill] sm:$0xff] %v13930_v32 }
 0xb79   :  { %17699 = vst [vmem:[#allocation87_spill] sm:$0xff] %v13918_v25 }
 0xb7b   :  { %v13934_v7 = vpop.permute.xlu1 %5339 }
 0xb7c   :  { %v13922_v4 = vpop.permute.xlu0 %5264  ;;  %17707 = vst [vmem:[#allocation96_spill] sm:$0xff] %v13934_v7 }
 0xb7d   :  { %17701 = vst [vmem:[#allocation89_spill] sm:$0xff] %v13922_v4 }
 0xb7f   :  { %v13940_v25 = vpop.permute.xlu1 %5345 }
 0xb80   :  { %v13926_v26 = vpop.permute.xlu0 %5270  ;;  %17709 = vst [vmem:[#allocation98_spill] sm:$0xff] %v13940_v25 }
 0xb81   :  { %17703 = vst [vmem:[#allocation91_spill] sm:$0xff] %v13926_v26 }
 0xb83   :  { %v13944_v4 = vpop.permute.xlu1 %5351 }
 0xb84   :  { %v13928_v1 = vpop.permute.xlu0 %5276  ;;  %17711 = vst [vmem:[#allocation100_spill] sm:$0xff] %v13944_v4  ;;  %v5528_v4 = vrot.slane %v13678_v36, %v12610_v47  ;;  %v5538_v36 = vrot.slane %v13692_v45, %v12631_v33 }
 0xb85   :  { %17704 = vst [vmem:[#allocation120_spill] sm:$0xff] %v13928_v1 }
 0xb87   :  { %v13950_v1 = vpop.permute.xlu1 %5357 }
 0xb88   :  { %v13932_v17 = vpop.permute.xlu0 %5282  ;;  %17713 = vst [vmem:[#allocation103_spill] sm:$0xff] %v13950_v1 }
 0xb89   :  { %17706 = vst [vmem:[#allocation122_spill] sm:$0xff] %v13932_v17 }
 0xb8b   :  { %v13954_v17 = vpop.permute.xlu1 %5363 }
 0xb8c   :  { %v13936_v31 = vpop.permute.xlu0 %5288  ;;  %17715 = vst [vmem:[#allocation107_spill] sm:$0xff] %v13954_v17 }
 0xb8d   :  { %17708 = vst [vmem:[#allocation124_spill] sm:$0xff] %v13936_v31  ;;  %v5519_v31 = vrot.slane %v13664_v54, %v12615_v0  ;;  %v5449_v54 = vrot.slane %v13488_v35, %v12610_v47 }
 0xb90   :  { %v13938_v23 = vpop.permute.xlu0 %5294 }
 0xb94   :  { %v13942_v24 = vpop.permute.xlu0 %5300 }
 0xb95   :  { %17710 = vst [vmem:[#allocation126_spill] sm:$0xff] %v13942_v24  ;;  %v13964_v24 = vpop.permute.xlu1 %5369 }
 0xb96   :  { %17717 = vst [vmem:[#allocation111_spill] sm:$0xff] %v13964_v24  ;;  %v5440_v24 = vrot.slane %v13460_v60, %v12615_v0  ;;  %v5598_v60 = vrot.slane %v13774_v50, %v12615_v0  ;;  %v5469_v50 = vrot.slane %v13548_v19, %v12654_v27 }
 0xb98   :  { %v13946_v9 = vpop.permute.xlu0 %5306 }
 0xb9c   :  { %v13948_v26 = vpop.permute.xlu0 %5312 }
 0xb9d   :  { %17712 = vst [vmem:[#allocation102_spill] sm:$0xff] %v13948_v26  ;;  %v5523_v26 = vrot.slane %v13484_v51, %v12604_v48  ;;  %v5533_v51 = vrot.slane %v13498_v22, %v12618_v55 }
 0xb9f   :  { %v5524_v17 = vsel %vm3830_vm1, %v5523_v26, %v5519_v31  ;;  %v5459_v31 = vrot.slane %v13516_v57, %v12631_v33  ;;  %v13986_v26 = vpop.permute.xlu1 %5375  ;;  %v5548_v57 = vrot.slane %v13706_v37, %v12654_v27 }
 0xba0   :  { %v13952_v32 = vpop.permute.xlu0 %5318 }
 0xba1   :  { %17714 = vst [vmem:[#allocation105_spill] sm:$0xff] %v13952_v32  ;;  %v5444_v32 = vrot.slane %v13474_v46, %v12604_v48  ;;  %v5454_v46 = vrot.slane %v13502_v15, %v12618_v55 }
 0xba3   :  { %v5445_v35 = vsel %vm3830_vm1, %v5444_v32, %v5440_v24  ;;  %v5607_v32 = vrot.slane %v13786_v12, %v12610_v47  ;;  %v5479_v12 = vrot.slane %v13576_v3, %v12667_v29  ;;  %v5553_v3 = vrot.slane %v13530_v10, %v12661_v44 }
 0xba4   :  { %v13956_v7 = vpop.permute.xlu0 %5324  ;;  %v5450_v22 = vsel %vm3837_vm2, %v5449_v54, %v5445_v35  ;;  %v14025_v35 = vpop.permute.xlu1 %5381  ;;  %v5568_v10 = vrot.slane %v13734_v2, %v12679_v43  ;;  %v5573_v2 = vrot.slane %v13558_v14, %v12700_v20  ;;  %v5578_v14 = vrot.slane %v13748_v53, %v12716_v52  ;;  %v17728_v53 = vld [vmem:[#allocation32_spill] sm:$0xff] }
 0xba5   :  { %v5455_v24 = vsel %vm3844_vm3, %v5454_v46, %v5450_v22 }
 0xba6   :  { %v5460_v54 = vsel %vm3851_vm4, %v5459_v31, %v5455_v24  ;;  %v5484_v24 = vrot.slane %v13456_v8, %v12670_v59  ;;  %v5499_v8 = vrot.slane %v13618_v62, %v12716_v52  ;;  %v5504_v62 = vrot.slane %v13632_v11, %v12729_v61 }
 0xba8   :  { %v13960_v25 = vpop.permute.xlu0 %5330 }
 0xba9   :  { %17716 = vst [vmem:[#allocation109_spill] sm:$0xff] %v13960_v25  ;;  %v5529_v25 = vsel %vm3837_vm2, %v5528_v4, %v5524_v17  ;;  %v5464_v4 = vrot.slane %v13534_v16, %v12637_v5  ;;  %v5543_v16 = vrot.slane %v13512_v42, %v12637_v5 }
 0xbaa   :  { %v5534_v45 = vsel %vm3844_vm3, %v5533_v51, %v5529_v25  ;;  %v5602_v25 = vrot.slane %v13600_v38, %v12604_v48  ;;  %v5558_v38 = vrot.slane %v13720_v49, %v12667_v29 }
 0xbab   :  { %v5539_v15 = vsel %vm3851_vm4, %v5538_v36, %v5534_v45  ;;  %v5474_v36 = vrot.slane %v13562_v18, %v12661_v44  ;;  %v5465_v37 = vsel %vm3858_vm5, %v5464_v4, %v5460_v54  ;;  %v5617_v18 = vrot.slane %v13798_v28, %v12631_v33 }
 0xbac   :  { %v13971_v1 = vpop.permute.xlu0 %5336  ;;  %v5544_v51 = vsel %vm3858_vm5, %v5543_v16, %v5539_v15  ;;  %v5603_v42 = vsel %vm3830_vm1, %v5602_v25, %v5598_v60  ;;  %v5470_v4 = vsel %vm3865_vm6, %v5469_v50, %v5465_v37  ;;  %v5612_v45 = vrot.slane %v13614_v58, %v12618_v55 }
 0xbad   :  { %v5549_v19 = vsel %vm3865_vm6, %v5548_v57, %v5544_v51  ;;  %v5608_v31 = vsel %vm3837_vm2, %v5607_v32, %v5603_v42  ;;  %v5475_v60 = vsel %vm16770_vm7, %v5474_v36, %v5470_v4  ;;  %v5627_v58 = vrot.slane %v13810_v6, %v12654_v27  ;;  %v14056_v36 = vpop.permute.xlu1 %5387  ;;  %v17729_v4 = vld [vmem:[#allocation60_spill] sm:$0xff] }
 0xbae   :  { %v5480_v22 = vsel %vm17718_vm12, %v5479_v12, %v5475_v60  ;;  %v5554_v49 = vsel %vm16770_vm7, %v5553_v3, %v5549_v19  ;;  %v5613_v15 = vsel %vm3844_vm3, %v5612_v45, %v5608_v31  ;;  %v5563_v16 = vrot.slane %v13544_v63, %v12670_v59  ;;  %17720 = vst [vmem:[#allocation113_spill] sm:$0xff] %v14056_v36  ;;  %v17725_v19 = vld [vmem:[#allocation93_spill] sm:$0xff] }
 0xbaf   :  { %v5559_v28 = vsel %vm17719_vm11, %v5558_v38, %v5554_v49  ;;  %v5618_v32 = vsel %vm3851_vm4, %v5617_v18, %v5613_v15  ;;  %v5489_v50 = vrot.slane %v13590_v56, %v12679_v43  ;;  %v5622_v25 = vrot.slane %v13628_v40, %v12637_v5  ;;  %v17727_v18 = vld [vmem:[#allocation220_spill] sm:$0xff]  ;;  %v17731_v60 = vld [vmem:[#allocation129_spill] sm:$0xff] }
 0xbb0   :  { %v13994_v17 = vpop.permute.xlu0 %5342  ;;  %v5494_v54 = vrot.slane %v13604_v21, %v12700_v20  ;;  %vm17721_vm11 = vcmask 654912   ;;  %v5637_v12 = vrot.slane %v13820_v39, %v12667_v29  ;;  %v5632_v42 = vrot.slane %v13646_v41, %v12661_v44 }
 0xbb1   :  { %v5485_v6 = vsel %vm17721_vm11, %v5484_v24, %v5480_v22  ;;  %vm17722_vm12 = vmmov %vm17721_vm11  ;;  %v5623_v56 = vsel %vm3858_vm5, %v5622_v25, %v5618_v32  ;;  %v5677_v38 = vrot.slane %v17725_v19, %v12615_v0  ;;  %v5509_v3 = vrot.slane %v17728_v53, %v17727_v18 }
 0xbb2   :  { %v5564_v63 = vsel %vm17722_vm12, %v5563_v16, %v5559_v28  ;;  %v5628_v21 = vsel %vm3865_vm6, %v5627_v58, %v5623_v56  ;;  %vm17724_vm11 = vmmov %vm17723_vm9  ;;  %v5686_v45 = vrot.slane %v17729_v4, %v12610_v47  ;;  %vm17730_vm12 = vcmask 851712   ;;  %v17734_v28 = vld [vmem:[#allocation53_spill] sm:$0xff]  ;;  %v17736_v58 = vld [vmem:[#allocation140_spill] sm:$0xff]  ;;  %v14096_v16 = vpop.permute.xlu1 %5393 }
 0xbb3   :  { %v5569_v40 = vsel %vm17723_vm9, %v5568_v10, %v5564_v63  ;;  %v5490_v51 = vsel %vm17724_vm11, %v5489_v50, %v5485_v6  ;;  %vm17726_vm9 = vcmask 786112   ;;  %v5681_v22 = vrot.slane %v17731_v60, %v12604_v48  ;;  %vm17733_vm10 = vmmov %vm17730_vm12  ;;  %v17737_v50 = vld [vmem:[#allocation127_spill] sm:$0xff] }
 0xbb4   :  { %v14017_v46 = vpop.permute.xlu0 %5348  ;;  %v5495_v31 = vsel %vm17726_vm9, %v5494_v54, %v5490_v51  ;;  %vm17732_vm11 = vmmov %vm17726_vm9  ;;  %v5633_v41 = vsel %vm16770_vm7, %v5632_v42, %v5628_v21  ;;  %v5588_v10 = vrot.slane %v17734_v28, %v17727_v18  ;;  %vm17735_vm9 = vcmask 589312   ;;  %v17738_v54 = vld [vmem:[#allocation132_spill] sm:$0xff]  ;;  %v17740_v21 = vld [vmem:[#allocation162_spill] sm:$0xff] }
 0xbb5   :  { %v5500_v39 = vsel %vm17730_vm12, %v5499_v8, %v5495_v31  ;;  %v5574_v11 = vsel %vm17732_vm11, %v5573_v2, %v5569_v40  ;;  %v5638_v32 = vsel %vm17735_vm9, %v5637_v12, %v5633_v41  ;;  %v5647_v24 = vrot.slane %v17736_v58, %v12679_v43  ;;  %v17741_v51 = vld [vmem:[#allocation43_spill] sm:$0xff] }
 0xbb6   :  { %v5579_v15 = vsel %vm17733_vm10, %v5578_v14, %v5574_v11  ;;  %v5583_v25 = vrot.slane %v17737_v50, %v12729_v61  ;;  %v5505_v2 = vsel %vm3914_vm13, %v5504_v62, %v5500_v39  ;;  %v5642_v6 = vrot.slane %v17738_v54, %v12670_v59  ;;  %v17739_v14 = vld [vmem:[#allocation222_spill] sm:$0xff]  ;;  %v17747_v60 = vld [vmem:[#allocation47_spill] sm:$0xff]  ;;  %v17748_v11 = vld [vmem:[#allocation37_spill] sm:$0xff] }
 0xbb7   :  { %v5682_v8 = vsel %vm3830_vm1, %v5681_v22, %v5677_v38  ;;  %v5510_v63 = vsel %vm3921_vm14, %v5509_v3, %v5505_v2  ;;  %v5696_v40 = vrot.slane %v13874_v13, %v12631_v33  ;;  %v5514_v12 = vrot.slane %v17740_v21, %v17739_v14  ;;  %v17743_v38 = vld [vmem:[#allocation26_spill] sm:$0xff]  ;;  %v17749_v28 = vld [vmem:[#allocation51_spill] sm:$0xff] }
 0xbb8   :  { %v14036_v57 = vpop.permute.xlu0 %5354  ;;  %v5687_v56 = vsel %vm3837_vm2, %v5686_v45, %v5682_v8  ;;  %v5691_v42 = vrot.slane %v17741_v51, %v12618_v55  ;;  %v5584_v62 = vsel %vm3914_vm13, %v5583_v25, %v5579_v15  ;;  %vm17742_vm10 = vcmask 654912   ;;  %v17745_v13 = vld [vmem:[#allocation86_spill] sm:$0xff]  ;;  %v14137_v25 = vpop.permute.xlu1 %5399  ;;  %v17753_v8 = vld [vmem:[#allocation144_spill] sm:$0xff] }
 0xbb9   :  { %v5643_v19 = vsel %vm17742_vm10, %v5642_v6, %v5638_v32  ;;  %v5593_v53 = vrot.slane %v17743_v38, %v17739_v14  ;;  %v5589_v3 = vsel %vm3921_vm14, %v5588_v10, %v5584_v62  ;;  %vm17744_vm12 = vcmask 720512   ;;  %v17750_v10 = vld [vmem:[#allocation159_spill] sm:$0xff]  ;;  %v17751_v2 = vld [vmem:[#allocation142_spill] sm:$0xff] }
 0xbba   :  { %v5648_v4 = vsel %vm17744_vm12, %v5647_v24, %v5643_v19  ;;  %v5657_v45 = vrot.slane %v17745_v13, %v12716_v52  ;;  %v14123_v39 = vsel %vm3928_vm15, %v5514_v12, %v5510_v63  ;;  %v5652_v22 = vrot.slane %v17747_v60, %v12700_v20  ;;  %v17757_v62 = vld [vmem:[#allocation143_spill] sm:$0xff]  ;;  %v17758_v38 = vld [vmem:[#allocation130_spill] sm:$0xff] }
 0xbbb   :  { %17746 = vst [vmem:[#allocation115_spill] sm:$0xff] %v14123_v39  ;;  %v5662_v41 = vrot.slane %v17748_v11, %v12729_v61  ;;  %v5692_v15 = vsel %vm3844_vm3, %v5691_v42, %v5687_v56  ;;  %v5701_v58 = vrot.slane %v17750_v10, %v12637_v5  ;;  %v5706_v50 = vrot.slane %v13883_v34, %v12654_v27  ;;  %v17755_v34 = vld [vmem:[#allocation61_spill] sm:$0xff]  ;;  %v17761_v11 = vld [vmem:[#allocation84_spill] sm:$0xff] }
 0xbbc   :  { %v14063_v37 = vpop.permute.xlu0 %5360  ;;  %v5697_v24 = vsel %vm3851_vm4, %v5696_v40, %v5692_v15  ;;  %v5711_v54 = vrot.slane %v17751_v2, %v12661_v44  ;;  %v14142_v6 = vsel %vm3928_vm15, %v5593_v53, %v5589_v3  ;;  %v5721_v63 = vrot.slane %v17753_v8, %v12670_v59  ;;  %v17754_v40 = vld [vmem:[#allocation180_spill] sm:$0xff]  ;;  %v17759_v3 = vld [vmem:[#allocation137_spill] sm:$0xff]  ;;  %v14186_v53 = vpop.permute.xlu1 %5405 }
 0xbbd   :  { %17752 = vst [vmem:[#allocation117_spill] sm:$0xff] %v14142_v6  ;;  %v5653_v56 = vsel %vm17732_vm11, %v5652_v22, %v5648_v4  ;;  %v5731_v12 = vrot.slane %v17754_v40, %v12700_v20  ;;  %vm17756_vm9 = vcmask 851712   ;;  %v5667_v19 = vrot.slane %v17757_v62, %v17727_v18  ;;  %v17760_v4 = vld [vmem:[#allocation40_spill] sm:$0xff] }
 0xbbe   :  { %v5658_v42 = vsel %vm17756_vm9, %v5657_v45, %v5653_v56  ;;  %v5760_v13 = vrot.slane %v17759_v3, %v12604_v48  ;;  %v5770_v60 = vrot.slane %v17760_v4, %v12618_v55  ;;  %v5702_v22 = vsel %vm3858_vm5, %v5701_v58, %v5697_v24  ;;  %v17762_v2 = vld [vmem:[#allocation112_spill] sm:$0xff]  ;;  %v17764_v3 = vld [vmem:[#allocation114_spill] sm:$0xff] }
 0xbbf   :  { %v5780_v15 = vrot.slane %v17761_v11, %v12637_v5  ;;  %v5707_v10 = vsel %vm3865_vm6, %v5706_v50, %v5702_v22  ;;  %v5716_v45 = vrot.slane %v13888_v30, %v12667_v29  ;;  %v5756_v8 = vrot.slane %v17762_v2, %v12615_v0  ;;  %v17763_v56 = vld [vmem:[#allocation56_spill] sm:$0xff]  ;;  %v17766_v11 = vld [vmem:[#allocation126_spill] sm:$0xff] }
 0xbc0   :  { %v14088_v49 = vpop.permute.xlu0 %5366  ;;  %v5663_v62 = vsel %vm3914_vm13, %v5662_v41, %v5658_v42  ;;  %v5765_v4 = vrot.slane %v17764_v3, %v12610_v47  ;;  %v5835_v58 = vrot.slane %v13938_v23, %v12615_v0  ;;  %v17765_v30 = vld [vmem:[#allocation92_spill] sm:$0xff]  ;;  %v5844_v2 = vrot.slane %v17766_v11, %v12610_v47  ;;  %v17767_v42 = vld [vmem:[#allocation145_spill] sm:$0xff]  ;;  %v17768_v23 = vld [vmem:[#allocation158_spill] sm:$0xff] }
 0xbc1   :  { %v14180_v50 = vsel %vm3921_vm14, %v5667_v19, %v5663_v62  ;;  %v5914_v41 = vrot.slane %v13994_v17, %v12615_v0  ;;  %v5839_v32 = vrot.slane %v17768_v23, %v12604_v48  ;;  %v5712_v19 = vsel %vm16770_vm7, %v5711_v54, %v5707_v10  ;;  %v17770_v11 = vld [vmem:[#allocation77_spill] sm:$0xff]  ;;  %v17771_v17 = vld [vmem:[#allocation98_spill] sm:$0xff]  ;;  %v17773_v54 = vld [vmem:[#allocation87_spill] sm:$0xff] }
 0xbc2   :  { %v5923_v62 = vrot.slane %v14017_v46, %v12610_v47  ;;  %vm17769_vm10 = vcmask 589312   ;;  %v5726_v51 = vrot.slane %v17770_v11, %v12679_v43  ;;  %v5761_v40 = vsel %vm3830_vm1, %v5760_v13, %v5756_v8  ;;  %v17772_v3 = vld [vmem:[#allocation97_spill] sm:$0xff] }
 0xbc3   :  { %v5717_v22 = vsel %vm17769_vm10, %v5716_v45, %v5712_v19  ;;  %v5918_v36 = vrot.slane %v17771_v17, %v12604_v48  ;;  %v5820_v6 = vrot.slane %v17772_v3, %v12729_v61  ;;  %v5766_v23 = vsel %vm3837_vm2, %v5765_v4, %v5761_v40  ;;  %v17774_v45 = vld [vmem:[#allocation106_spill] sm:$0xff] }
 0xbc4   :  { %v14114_v31 = vpop.permute.xlu0 %5372  ;;  %v5775_v10 = vrot.slane %v17773_v54, %v12631_v33  ;;  %v5840_v46 = vsel %vm3830_vm1, %v5839_v32, %v5835_v58  ;;  %v5849_v19 = vrot.slane %v17774_v45, %v12618_v55  ;;  %v5854_v13 = vrot.slane %v13946_v9, %v12631_v33  ;;  %v17777_v54 = vld [vmem:[#allocation83_spill] sm:$0xff]  ;;  %v17778_v9 = vld [vmem:[#allocation100_spill] sm:$0xff] }
 0xbc5   :  { %v5845_v11 = vsel %vm3837_vm2, %v5844_v2, %v5840_v46  ;;  %v5919_v8 = vsel %vm3830_vm1, %v5918_v36, %v5914_v41  ;;  %vm17775_vm12 = vcmask 654912   ;;  %v5933_v4 = vrot.slane %v14036_v57, %v12631_v33  ;;  %v14226_v36 = vpop.permute.xlu1 %5411 }
 0xbc6   :  { %v5722_v17 = vsel %vm17775_vm12, %v5721_v63, %v5717_v22  ;;  %v5924_v40 = vsel %vm3837_vm2, %v5923_v62, %v5919_v8  ;;  %vm17776_vm11 = vcmask 720512   ;;  %v5859_v45 = vrot.slane %v17777_v54, %v12637_v5  ;;  %v17779_v22 = vld [vmem:[#allocation89_spill] sm:$0xff] }
 0xbc7   :  { %v5727_v58 = vsel %vm17776_vm11, %v5726_v51, %v5722_v17  ;;  %v5771_v2 = vsel %vm3844_vm3, %v5770_v60, %v5766_v23  ;;  %v5928_v46 = vrot.slane %v17778_v9, %v12618_v55  ;;  %v5785_v41 = vrot.slane %v17779_v22, %v12654_v27  ;;  %v17780_v60 = vld [vmem:[#allocation102_spill] sm:$0xff]  ;;  %v17783_v9 = vld [vmem:[#allocation103_spill] sm:$0xff] }
 0xbc8   :  { %v14147_v21 = vpop.permute.xlu0 %5378  ;;  %v5776_v63 = vsel %vm3851_vm4, %v5775_v10, %v5771_v2  ;;  %v5850_v57 = vsel %vm3844_vm3, %v5849_v19, %v5845_v11  ;;  %v5864_v23 = vrot.slane %v17780_v60, %v12654_v27  ;;  %vm17781_vm9 = vcmask 786112  }
 0xbc9   :  { %v5855_v62 = vsel %vm3851_vm4, %v5854_v13, %v5850_v57  ;;  %v5929_v8 = vsel %vm3844_vm3, %v5928_v46, %v5924_v40  ;;  %v5732_v10 = vsel %vm17781_vm9, %v5731_v12, %v5727_v58  ;;  %v5943_v19 = vrot.slane %v14063_v37, %v12654_v27  ;;  %v17784_v12 = vld [vmem:[#allocation91_spill] sm:$0xff] }
 0xbca   :  { %v5934_v54 = vsel %vm3851_vm4, %v5933_v4, %v5929_v8  ;;  %v5781_v13 = vsel %vm3858_vm5, %v5780_v15, %v5776_v63  ;;  %v5938_v22 = vrot.slane %v17783_v9, %v12637_v5  ;;  %v5795_v4 = vrot.slane %v17784_v12, %v12667_v29  ;;  %v17785_v15 = vld [vmem:[#allocation105_spill] sm:$0xff] }
 0xbcb   :  { %v5786_v46 = vsel %vm3865_vm6, %v5785_v41, %v5781_v13  ;;  %v5860_v58 = vsel %vm3858_vm5, %v5859_v45, %v5855_v62  ;;  %v6007_v37 = vrot.slane %v14137_v25, %v12618_v55  ;;  %v5874_v63 = vrot.slane %v17785_v15, %v12667_v29  ;;  %v17786_v41 = vld [vmem:[#allocation85_spill] sm:$0xff] }
 0xbcc   :  { %v14177_v24 = vpop.permute.xlu0 %5384  ;;  %v5865_v57 = vsel %vm3865_vm6, %v5864_v23, %v5860_v58  ;;  %v5869_v8 = vrot.slane %v17786_v41, %v12661_v44  ;;  %v5953_v45 = vrot.slane %v14088_v49, %v12667_v29  ;;  %vm17787_vm10 = vcmask 851712  }
 0xbcd   :  { %v17788_v23 = vrot.slane %v17763_v56, %v12661_v44  ;;  %vm17790_vm12 = vcmask 589312  }
 0xbce   :  { %v5870_v49 = vsel %vm16770_vm7, %v5869_v8, %v5865_v57  ;;  %vm17792_vm11 = vmmov %vm17790_vm12  ;;  %v17795_v57 = vrot.slane %v17755_v34, %v12729_v61 }
 0xbcf   :  { %v5875_v56 = vsel %vm17792_vm11, %v5874_v63, %v5870_v49  ;;  %vm17794_vm9 = vmmov %vm17792_vm11  ;;  %v17806_v49 = vld [vmem:[#allocation110_spill] sm:$0xff] }
 0xbd0   :  { %v5391_v39 = vpop.permute.xlu0 %5390 }
 0xbd1   :  { %v5993_v32 = vrot.slane %v5391_v39, %v12615_v0  ;;  %v5997_v39 = vrot.slane %v14096_v16, %v12604_v48  ;;  %v17782_v16 = vld [vmem:[#allocation108_spill] sm:$0xff]  ;;  %v17931_v0 = vld [vmem:[#allocation33_spill] sm:$0xff] }
 0xbd2   :  { %v5736_v2 = vrot.slane %v17782_v16, %v12716_v52 }
 0xbd3   :  { %v5998_v11 = vsel %vm3830_vm1, %v5997_v39, %v5993_v32  ;;  %v5418_v39 = vpop.permute.xlu1 %5417 }
 0xbd4   :  { %v5397_v51 = vpop.permute.xlu0 %5396  ;;  %v5737_v62 = vsel %vm17787_vm10, %v5736_v2, %v5732_v10  ;;  %v6017_v10 = vrot.slane %v14186_v53, %v12637_v5  ;;  %vm17797_vm10 = vcmask 654912  }
 0xbd5   :  { %v6002_v17 = vrot.slane %v5397_v51, %v12610_v47  ;;  %v5939_v51 = vsel %vm3858_vm5, %v5938_v22, %v5934_v54  ;;  %v17789_v54 = vld [vmem:[#allocation107_spill] sm:$0xff]  ;;  %v5742_v15 = vsel %vm3914_vm13, %v17795_v57, %v5737_v62  ;;  %vm17801_vm11 = vmmov %vm17797_vm10  ;;  %v17926_v47 = vld [vmem:[#allocation134_spill] sm:$0xff] }
 0xbd6   :  { %v5948_v16 = vrot.slane %v17789_v54, %v12661_v44 }
 0xbd7   :  { %v6003_v40 = vsel %vm3837_vm2, %v6002_v17, %v5998_v11  ;;  %v5944_v17 = vsel %vm3865_vm6, %v5943_v19, %v5939_v51  ;;  %v5791_v11 = vsel %vm16770_vm7, %v17788_v23, %v5786_v46  ;;  %v17791_v19 = vld [vmem:[#allocation120_spill] sm:$0xff]  ;;  %v17798_v51 = vld [vmem:[#allocation111_spill] sm:$0xff]  ;;  %v5424_v41 = vpop.permute.xlu1 %5423  ;;  %v17803_v23 = vld [vmem:[#allocation109_spill] sm:$0xff] }
 0xbd8   :  { %v5403_v32 = vpop.permute.xlu0 %5402  ;;  %v6008_v25 = vsel %vm3844_vm3, %v6007_v37, %v6003_v40  ;;  %v5796_v9 = vsel %vm17790_vm12, %v5795_v4, %v5791_v11  ;;  %v5805_v22 = vrot.slane %v17791_v19, %v12679_v43  ;;  %v5884_v40 = vrot.slane %v13956_v7, %v12679_v43  ;;  %v17793_v4 = vld [vmem:[#allocation116_spill] sm:$0xff] }
 0xbd9   :  { %v6012_v60 = vrot.slane %v5403_v32, %v12631_v33  ;;  %v5949_v46 = vsel %vm16770_vm7, %v5948_v16, %v5944_v17  ;;  %v5879_v58 = vrot.slane %v17793_v4, %v12670_v59  ;;  %v5963_v32 = vrot.slane %v14114_v31, %v12679_v43  ;;  %v17800_v17 = vld [vmem:[#allocation122_spill] sm:$0xff]  ;;  %v17811_v4 = vld [vmem:[#allocation124_spill] sm:$0xff]  ;;  %v17921_v33 = vld [vmem:[#allocation31_spill] sm:$0xff] }
 0xbda   :  { %v5954_v37 = vsel %vm17794_vm9, %v5953_v45, %v5949_v46  ;;  %v17796_v7 = vrot.slane %v17765_v30, %v12670_v59  ;;  %vm17799_vm12 = vcmask 720512   ;;  %v5815_v45 = vrot.slane %v17800_v17, %v12716_v52 }
 0xbdb   :  { %v6013_v13 = vsel %vm3851_vm4, %v6012_v60, %v6008_v25  ;;  %v5958_v60 = vrot.slane %v17798_v51, %v12670_v59  ;;  %v5880_v34 = vsel %vm17801_vm11, %v5879_v58, %v5875_v56  ;;  %v6027_v25 = vrot.slane %v14226_v36, %v12661_v44  ;;  %vm17802_vm9 = vmmov %vm17799_vm12  ;;  %v5430_v57 = vpop.permute.xlu1 %5429 }
 0xbdc   :  { %v5409_v2 = vpop.permute.xlu0 %5408  ;;  %v6018_v53 = vsel %vm3858_vm5, %v6017_v10, %v6013_v13  ;;  %v5801_v63 = vsel %vm17797_vm10, %v17796_v7, %v5796_v9  ;;  %v5885_v30 = vsel %vm17802_vm9, %v5884_v40, %v5880_v34  ;;  %v5894_v11 = vrot.slane %v17803_v23, %v12716_v52  ;;  %v17804_v13 = vld [vmem:[#allocation118_spill] sm:$0xff] }
 0xbdd   :  { %v6022_v12 = vrot.slane %v5409_v2, %v12654_v27  ;;  %v5806_v31 = vsel %vm17799_vm12, %v5805_v22, %v5801_v63  ;;  %v5959_v54 = vsel %vm17797_vm10, %v5958_v60, %v5954_v37  ;;  %v5889_v9 = vrot.slane %v17804_v13, %v12700_v20  ;;  %vm17805_vm12 = vmmov %vm17802_vm9  ;;  %v17814_v63 = vld [vmem:[#allocation94_spill] sm:$0xff] }
 0xbde   :  { %v5964_v19 = vsel %vm17805_vm12, %v5963_v32, %v5959_v54  ;;  %v5973_v22 = vrot.slane %v14147_v21, %v12716_v52  ;;  %v5746_v10 = vrot.slane %v17806_v49, %v17727_v18  ;;  %v17807_v2 = vrot.slane %v17767_v42, %v12700_v20  ;;  %v17821_v54 = vld [vmem:[#allocation96_spill] sm:$0xff]  ;;  %v17826_v49 = vld [vmem:[#allocation113_spill] sm:$0xff]  ;;  %v17916_v27 = vld [vmem:[#allocation54_spill] sm:$0xff] }
 0xbdf   :  { %v6023_v8 = vsel %vm3865_vm6, %v6022_v12, %v6018_v53  ;;  %vm17808_vm11 = vcmask 786112   ;;  %v5968_v40 = vrot.slane %v13986_v26, %v12700_v20  ;;  %vm17809_vm9 = vcmask 589312  }
 0xbe0   :  { %v5415_v62 = vpop.permute.xlu0 %5414  ;;  %v6028_v36 = vsel %vm16770_vm7, %v6027_v25, %v6023_v8  ;;  %v5811_v56 = vsel %vm17808_vm11, %v17807_v2, %v5806_v31  ;;  %vm17810_vm10 = vcmask 851712   ;;  %v5825_v21 = vrot.slane %v17811_v4, %v17727_v18  ;;  %vm17812_vm12 = vmmov %vm17808_vm11  ;;  %v5436_v2 = vpop.permute.xlu1 %5435 }
 0xbe1   :  { %v6032_v16 = vrot.slane %v5415_v62, %v12667_v29  ;;  %v5816_v12 = vsel %vm17810_vm10, %v5815_v45, %v5811_v56  ;;  %v5890_v58 = vsel %vm17812_vm12, %v5889_v9, %v5885_v30  ;;  %v6037_v37 = vrot.slane %v5418_v39, %v12670_v59  ;;  %vm17813_vm7 = vmmov %vm17810_vm10  ;;  %v17823_v9 = vld [vmem:[#allocation115_spill] sm:$0xff]  ;;  %v17910_v59 = vld [vmem:[#allocation29_spill] sm:$0xff] }
 0xbe2   :  { %v5895_v53 = vsel %vm17813_vm7, %v5894_v11, %v5890_v58  ;;  %v5904_v42 = vrot.slane %v13971_v1, %v17727_v18  ;;  %v5969_v26 = vsel %vm17808_vm11, %v5968_v40, %v5964_v19  ;;  %v5899_v51 = vrot.slane %v17814_v63, %v12729_v61  ;;  %vm17822_vm12 = vmmov %vm17808_vm11  ;;  %v17824_v19 = vld [vmem:[#allocation117_spill] sm:$0xff]  ;;  %v17911_v29 = vld [vmem:[#allocation34_spill] sm:$0xff] }
 0xbe3   :  { %v6033_v46 = vsel %vm17809_vm9, %v6032_v16, %v6028_v36  ;;  %vm17815_vm9 = vmmov %vm17813_vm7  ;;  %v5983_v8 = vrot.slane %v14177_v24, %v17727_v18  ;;  %vm17816_vm10 = vcmask 654912   ;;  %v5747_v31 = vsel %vm3921_vm14, %v5746_v10, %v5742_v15 }
 0xbe4   :  { %v5421_v32 = vpop.permute.xlu0 %5420  ;;  %v5974_v60 = vsel %vm17815_vm9, %v5973_v22, %v5969_v26  ;;  %v6038_v39 = vsel %vm17816_vm10, %v6037_v37, %v6033_v46  ;;  %v5821_v1 = vsel %vm3914_vm13, %v5820_v6, %v5816_v12  ;;  %v5978_v17 = vrot.slane %v14025_v35, %v12729_v61  ;;  %v17819_v6 = vld [vmem:[#allocation99_spill] sm:$0xff] }
 0xbe5   :  { %v6042_v7 = vrot.slane %v5421_v32, %v12679_v43  ;;  %vm17817_vm7 = vcmask 720512   ;;  %v17818_v34 = vrot.slane %v17749_v28, %v17739_v14  ;;  %v5826_v25 = vsel %vm3921_vm14, %v5825_v21, %v5821_v1 }
 0xbe6   :  { %v5900_v15 = vsel %vm3914_vm13, %v5899_v51, %v5895_v53  ;;  %v6047_v62 = vrot.slane %v5424_v41, %v12700_v20  ;;  %v5830_v30 = vrot.slane %v17819_v6, %v17739_v14  ;;  %v5979_v23 = vsel %vm3914_vm13, %v5978_v17, %v5974_v60  ;;  %v17833_v17 = vld [vmem:[#allocation147_spill] sm:$0xff] }
 0xbe7   :  { %v6043_v45 = vsel %vm17817_vm7, %v6042_v7, %v6038_v39  ;;  %v5673_v24 = vsel %vm3928_vm15, %v17818_v34, %v14180_v50  ;;  %v5905_v35 = vsel %vm3921_vm14, %v5904_v42, %v5900_v15  ;;  %v17820_v28 = vrot.slane %v17758_v38, %v17739_v14  ;;  %v17834_v34 = vld [vmem:[#allocation69_spill] sm:$0xff]  ;;  %v17837_v6 = vld [vmem:[#allocation63_spill] sm:$0xff] }
 0xbe8   :  { %v5427_v3 = vpop.permute.xlu0 %5426  ;;  %v5909_v16 = vrot.slane %v17821_v54, %v17739_v14  ;;  %v5984_v41 = vsel %vm3921_vm14, %v5983_v8, %v5979_v23  ;;  %v6048_v13 = vsel %vm17822_vm12, %v6047_v62, %v6043_v45  ;;  %vm17825_vm11 = vcmask 1041409   ;;  %v17831_v8 = vld [vmem:[#allocation20_spill] sm:$0xff]  ;;  %v17836_v62 = vld [vmem:[#allocation21_spill] sm:$0xff] }
 0xbe9   :  { %v6052_v11 = vrot.slane %v5427_v3, %v12716_v52  ;;  %v5752_v50 = vsel %vm3928_vm15, %v17820_v28, %v5747_v31  ;;  %v6069_v22 = vsel %vm17825_vm11, %v17824_v19, %v17823_v9  ;;  %v5831_v36 = vsel %vm3928_vm15, %v5830_v30, %v5826_v25  ;;  %v17832_v31 = vld [vmem:[#allocation73_spill] sm:$0xff] }
 0xbea   :  { %v5988_v10 = vrot.slane %v17826_v49, %v17739_v14  ;;  %v6070_v56 = vsel %vm4485_vm0, %v5673_v24, %v6069_v22  ;;  %v6057_v40 = vrot.slane %v5430_v57, %v12729_v61  ;;  %v5910_v12 = vsel %vm3928_vm15, %v5909_v16, %v5905_v35  ;;  %v17835_v25 = vld [vmem:[#allocation65_spill] sm:$0xff]  ;;  %v17838_v35 = vld [vmem:[#allocation154_spill] sm:$0xff]  ;;  %v17841_v16 = vld [vmem:[#allocation68_spill] sm:$0xff] }
 0xbeb   :  { %v6053_v38 = vsel %vm17815_vm9, %v6052_v11, %v6048_v13  ;;  %v6071_v58 = vsel %vm16865_vm8, %v5752_v50, %v6070_v56  ;;  %v6067_v37 = vrot.slane %v5436_v2, %v17739_v14  ;;  %vm17827_vm10 = vcmask 1044484   ;;  %v17839_v11 = vld [vmem:[#allocation156_spill] sm:$0xff]  ;;  %v17840_v50 = vld [vmem:[#allocation181_spill] sm:$0xff]  ;;  %v17842_v13 = vld [vmem:[#allocation74_spill] sm:$0xff] }
 0xbec   :  { %v5433_v46 = vpop.permute.xlu0 %5432  ;;  %v5989_v21 = vsel %vm3928_vm15, %v5988_v10, %v5984_v41  ;;  %v6058_v32 = vsel %vm3914_vm13, %v6057_v40, %v6053_v38  ;;  %v6072_v53 = vsel %vm17827_vm10, %v5831_v36, %v6071_v58  ;;  %vm17828_vm7 = vcmask 1045509   ;;  %v17843_v19 = vld [vmem:[#allocation157_spill] sm:$0xff]  ;;  %v17844_v36 = vld [vmem:[#allocation71_spill] sm:$0xff]  ;;  %v17845_v10 = vld [vmem:[#allocation76_spill] sm:$0xff] }
 0xbed   :  { %v6062_v4 = vrot.slane %v5433_v46, %v17727_v18  ;;  %v6073_v26 = vsel %vm17828_vm7, %v5910_v12, %v6072_v53  ;;  %vm17829_vm12 = vcmask 1046534   ;;  %vm17830_vm11 = vcmask 1047559   ;;  %v17846_v38 = vld [vmem:[#allocation146_spill] sm:$0xff]  ;;  %v17847_v40 = vld [vmem:[#allocation148_spill] sm:$0xff]  ;;  %v17851_v53 = vld [vmem:[#allocation155_spill] sm:$0xff] }
 0xbee   :  { %v6074_v7 = vsel %vm17829_vm12, %v5989_v21, %v6073_v26  ;;  %v17848_v12 = vld [vmem:[#allocation152_spill] sm:$0xff]  ;;  %v17852_v26 = vld [vmem:[#allocation41_spill] sm:$0xff]  ;;  %vm18174_vm9 = vcmask 523712   ;;  %vm18175_vm10 = vcmask 589312   ;;  %vm18180_vm7 = vcmask 654912  }
 0xbef   :  { %v6063_v42 = vsel %vm3921_vm14, %v6062_v4, %v6058_v32  ;;  %v17849_v21 = vld [vmem:[#allocation72_spill] sm:$0xff]  ;;  %vm18181_vm12 = vcmask 720512   ;;  %vm18275_vm8 = vcmask 720512  }
 0xbf0   :  { %v6068_v57 = vsel %vm3928_vm15, %v6067_v37, %v6063_v42  ;;  %v17850_v37 = vld [vmem:[#allocation62_spill] sm:$0xff]  ;;  %v17905_v61 = vld [vmem:[#allocation160_spill] sm:$0xff] }
 0xbf1   :  { %v6075_v63 = vsel %vm17830_vm11, %v6068_v57, %v6074_v7  ;;  %v17853_v7 = vld [vmem:[#allocation182_spill] sm:$0xff]  ;;  %vm18186_vm11 = vcmask 786112  }
 0xbf2   :  { %6077 = vadd.xlane.f32.xlu0 %v6075_v63 }
 0xc7f   :  { %v6078_v51 = vpop.xlane.xlu0 %6077 }
 0xc80   :  { %10257 = vrcp.f32 %v6078_v51 }
 0xc8a   :  { %v14395_v60 = vpop.eup %10257 }
 0xc8b   :  { %v6084_v39 = vrot.slane %v14395_v60, %v17831_v8  ;;  %v6088_v3 = vrot.slane %v14395_v60, %v17836_v62  ;;  %v17854_v8 = vld [vmem:[#allocation211_spill] sm:$0xff] }
 0xc8d   :  { %v6129_v1 = vmul.f32 %v17832_v31, %v6084_v39  ;;  %v6121_v45 = vmul.f32 %v17833_v17, %v6084_v39  ;;  %v6136_v24 = vmul.f32 %v17834_v34, %v6084_v39  ;;  %v6122_v15 = vmul.f32 %v17835_v25, %v6084_v39  ;;  %v17855_v25 = vld [vmem:[#allocation59_spill] sm:$0xff] }
 0xc8e   :  { %v6138_v30 = vmul.f32 %v17837_v6, %v6088_v3  ;;  %v6123_v23 = vmul.f32 %v17838_v35, %v6084_v39  ;;  %v6140_v28 = vmul.f32 %v17839_v11, %v6088_v3  ;;  %v6124_v54 = vmul.f32 %v17840_v50, %v6084_v39  ;;  %v17856_v6 = vld [vmem:[#allocation22_spill] sm:$0xff]  ;;  %v17857_v11 = vld [vmem:[#allocation212_spill] sm:$0xff] }
 0xc8f   :  { %6402 = vperm.xlu0 %9528, %v6129_v1   ;;  %6378 = vperm.xlu1 %9527, %v6121_v45   ;;  %v6142_v41 = vmul.f32 %v17841_v16, %v6088_v3  ;;  %v6125_v9 = vmul.f32 %v17842_v13, %v6084_v39  ;;  %v6144_v22 = vmul.f32 %v17843_v19, %v6088_v3  ;;  %v17858_v13 = vld [vmem:[#allocation184_spill] sm:$0xff] }
 0xc90   :  { %v6126_v49 = vmul.f32 %v17844_v36, %v6084_v39  ;;  %v6146_v2 = vmul.f32 %v17845_v10, %v6088_v3  ;;  %v6127_v56 = vmul.f32 %v17846_v38, %v6084_v39  ;;  %v6148_v46 = vmul.f32 %v17847_v40, %v6088_v3  ;;  %v17860_v36 = vld [vmem:[#allocation213_spill] sm:$0xff] }
 0xc91   :  { %v6128_v4 = vmul.f32 %v17848_v12, %v6084_v39  ;;  %v6130_v58 = vmul.f32 %v17849_v21, %v6084_v39  ;;  %v6131_v32 = vmul.f32 %v17850_v37, %v6084_v39  ;;  %v6132_v42 = vmul.f32 %v17851_v53, %v6084_v39  ;;  %v17862_v38 = vld [vmem:[#allocation153_spill] sm:$0xff]  ;;  %v17864_v21 = vld [vmem:[#allocation66_spill] sm:$0xff] }
 0xc92   :  { %v6133_v57 = vmul.f32 %v17852_v26, %v6084_v39  ;;  %v6134_v63 = vmul.f32 %v17853_v7, %v6084_v39  ;;  %v14422_v51 = vpack.c.bf16 %v6122_v15, %v6121_v45  ;;  %v6135_v31 = vmul.f32 %v17854_v8, %v6084_v39  ;;  %v17859_v45 = vld [vmem:[#allocation200_spill] sm:$0xff]  ;;  %v17866_v26 = vld [vmem:[#allocation215_spill] sm:$0xff] }
 0xc93   :  { %6423 = vperm.xlu0 %9528, %v6136_v24   ;;  %6381 = vperm.xlu1 %9527, %v6122_v15   ;;  %v14425_v17 = vpack.c.bf16 %v6124_v54, %v6123_v23  ;;  %v14427_v34 = vpack.c.bf16 %v6126_v49, %v6125_v9  ;;  %v6150_v62 = vmul.f32 %v17855_v25, %v6088_v3  ;;  %v17867_v8 = vld [vmem:[#allocation187_spill] sm:$0xff] }
 0xc94   :  { %v14432_v35 = vrot.slane %v14395_v60, %v17856_v6  ;;  %v6137_v50 = vmul.f32 %v17857_v11, %v6088_v3  ;;  %v14435_v16 = vpack.c.bf16 %v6128_v4, %v6127_v56  ;;  %v6139_v19 = vmul.f32 %v17858_v13, %v6088_v3  ;;  %v17868_v6 = vld [vmem:[#allocation204_spill] sm:$0xff] }
 0xc95   :  { %v6141_v15 = vmul.f32 %v17859_v45, %v6088_v3  ;;  %v6143_v39 = vmul.f32 %v17860_v36, %v6088_v3  ;;  %v14445_v10 = vpack.c.bf16 %v6134_v63, %v6133_v57  ;;  %v6152_v40 = vmul.f32 %v17862_v38, %v6088_v3 }
 0xc96   :  { %v6154_v37 = vmul.f32 %v17864_v21, %v14432_v35  ;;  %v14456_v7 = vpack.c.bf16 %v6138_v30, %v6137_v50  ;;  %v6151_v25 = vmul.f32 %v17867_v8, %v6088_v3  ;;  %v6153_v11 = vmul.f32 %v17868_v6, %v14432_v35  ;;  %v17875_v6 = vld [vmem:[#allocation231_spill] sm:$0xff] }
 0xc97   :  { %6429 = vperm.xlu0 %9528, %v6138_v30   ;;  %6384 = vperm.xlu1 %9527, %v6123_v23   ;;  %v14440_v23 = vpack.c.bf16 %v6130_v58, %v6129_v1  ;;  %v17865_v1 = vld [vmem:[#allocation80_spill] sm:$0xff]  ;;  %v14461_v13 = vpack.c.bf16 %v6140_v28, %v6139_v19  ;;  %v14463_v45 = vpack.c.bf16 %v6142_v41, %v6141_v15  ;;  %v17870_v30 = vld [vmem:[#allocation70_spill] sm:$0xff] }
 0xc98   :  { %v6156_v53 = vmul.f32 %v17865_v1, %v14432_v35 }
 0xc9b   :  { %6435 = vperm.xlu0 %9528, %v6140_v28   ;;  %6387 = vperm.xlu1 %9527, %v6124_v54   ;;  %v17861_v54 = vld [vmem:[#allocation185_spill] sm:$0xff]  ;;  %v17872_v28 = vld [vmem:[#allocation183_spill] sm:$0xff] }
 0xc9f   :  { %6441 = vperm.xlu0 %9528, %v6142_v41   ;;  %6390 = vperm.xlu1 %9527, %v6125_v9   ;;  %v6145_v9 = vmul.f32 %v17861_v54, %v6088_v3  ;;  %v14467_v54 = vpack.c.bf16 %v6144_v22, %v6143_v39  ;;  %v6160_v41 = vmul.f32 %v17872_v28, %v14432_v35 }
 0xca1   :  { %v14469_v38 = vpack.c.bf16 %v6146_v2, %v6145_v9 }
 0xca3   :  { %6447 = vperm.xlu0 %9528, %v6144_v22   ;;  %6393 = vperm.xlu1 %9527, %v6126_v49   ;;  %v14443_v49 = vpack.c.bf16 %v6132_v42, %v6131_v32  ;;  %v17874_v22 = vld [vmem:[#allocation88_spill] sm:$0xff] }
 0xca7   :  { %6453 = vperm.xlu0 %9528, %v6146_v2   ;;  %6396 = vperm.xlu1 %9527, %v6127_v56   ;;  %v17863_v56 = vld [vmem:[#allocation202_spill] sm:$0xff]  ;;  %v6162_v2 = vmul.f32 %v17874_v22, %v14432_v35 }
 0xca8   :  { %v6147_v12 = vmul.f32 %v17863_v56, %v6088_v3  ;;  %v6158_v56 = vmul.f32 %v17870_v30, %v14432_v35  ;;  %v14487_v30 = vpack.c.bf16 %v6152_v40, %v6151_v25 }
 0xcaa   :  { %v14475_v1 = vpack.c.bf16 %v6148_v46, %v6147_v12 }
 0xcab   :  { %6459 = vperm.xlu0 %9528, %v6148_v46   ;;  %6399 = vperm.xlu1 %9527, %v6128_v4   ;;  %v14449_v4 = vpack.c.bf16 %v6136_v24, %v6135_v31  ;;  %v17869_v24 = vld [vmem:[#allocation221_spill] sm:$0xff]  ;;  %v14489_v46 = vpack.c.bf16 %v6154_v37, %v6153_v11 }
 0xcac   :  { %v6155_v36 = vmul.f32 %v17869_v24, %v14432_v35  ;;  %v6161_v24 = vmul.f32 %v17875_v6, %v14432_v35 }
 0xcaf   :  { %6465 = vperm.xlu0 %9528, %v6150_v62   ;;  %6405 = vperm.xlu1 %9527, %v6130_v58   ;;  %v6149_v58 = vmul.f32 %v17866_v26, %v6088_v3  ;;  %v17871_v3 = vld [vmem:[#allocation188_spill] sm:$0xff] }
 0xcb0   :  { %v6157_v21 = vmul.f32 %v17871_v3, %v14432_v35  ;;  %v14491_v3 = vpack.c.bf16 %v6156_v53, %v6155_v36 }
 0xcb1   :  { %v14481_v8 = vpack.c.bf16 %v6150_v62, %v6149_v58  ;;  %v14497_v62 = vpack.c.bf16 %v6162_v2, %v6161_v24 }
 0xcb2   :  { %v14493_v28 = vpack.c.bf16 %v6158_v56, %v6157_v21 }
 0xcb3   :  { %6471 = vperm.xlu0 %9528, %v6152_v40   ;;  %6408 = vperm.xlu1 %9527, %v6131_v32   ;;  %v17873_v32 = vld [vmem:[#allocation205_spill] sm:$0xff] }
 0xcb4   :  { %v6159_v26 = vmul.f32 %v17873_v32, %v14432_v35 }
 0xcb6   :  { %v14495_v14 = vpack.c.bf16 %v6160_v41, %v6159_v26 }
 0xcb7   :  { %6477 = vperm.xlu0 %9528, %v6154_v37   ;;  %6411 = vperm.xlu1 %9527, %v6132_v42   ;;  %v17876_v42 = vld [vmem:[#allocation186_spill] sm:$0xff]  ;;  %v17877_v37 = vld [vmem:[#allocation189_spill] sm:$0xff] }
 0xcb8   :  { %v14501_v40 = vmul.f32 %v17876_v42, %v14432_v35  ;;  %v14506_v32 = vmul.f32 %v17877_v37, %v14432_v35 }
 0xcbb   :  { %6483 = vperm.xlu0 %9528, %v6156_v53   ;;  %6414 = vperm.xlu1 %9527, %v6133_v57   ;;  %v17878_v57 = vld [vmem:[#allocation198_spill] sm:$0xff] }
 0xcbf   :  { %6489 = vperm.xlu0 %9528, %v6158_v56   ;;  %6417 = vperm.xlu1 %9527, %v6134_v63   ;;  %v14511_v63 = vmul.f32 %v17878_v57, %v14432_v35 }
 0xcc3   :  { %6495 = vperm.xlu0 %9528, %v6160_v41   ;;  %6420 = vperm.xlu1 %9527, %v6135_v31   ;;  %v17879_v31 = vld [vmem:[#allocation23_spill] sm:$0xff] }
 0xcc4   :  { %v17882_v41 = vld [vmem:[#allocation199_spill] sm:$0xff] }
 0xcc7   :  { %6501 = vperm.xlu0 %9528, %v6162_v2   ;;  %6426 = vperm.xlu1 %9527, %v6137_v50   ;;  %v14515_v50 = vrot.slane %v14395_v60, %v17879_v31  ;;  %v17888_v31 = vld [vmem:[#allocation24_spill] sm:$0xff] }
 0xcc9   :  { %v14530_v22 = vmul.f32 %v17882_v41, %v14515_v50  ;;  %v17891_v41 = vld [vmem:[#allocation193_spill] sm:$0xff]  ;;  %v14623_v52 = vmul.f32 %v17905_v61, %v14515_v50  ;;  %v14641_v61 = vrot.slane %v14395_v60, %v17911_v29 }
 0xccb   :  { %6507 = vperm.xlu0 %9528, %v14501_v40   ;;  %6432 = vperm.xlu1 %9527, %v6139_v19   ;;  %v17880_v19 = vld [vmem:[#allocation214_spill] sm:$0xff] }
 0xccc   :  { %v14520_v53 = vmul.f32 %v17880_v19, %v14515_v50 }
 0xccf   :  { %6513 = vperm.xlu0 %9528, %v14506_v32   ;;  %6438 = vperm.xlu1 %9527, %v6141_v15   ;;  %v17881_v15 = vld [vmem:[#allocation190_spill] sm:$0xff] }
 0xcd0   :  { %v14525_v56 = vmul.f32 %v17881_v15, %v14515_v50 }
 0xcd3   :  { %6519 = vperm.xlu0 %9528, %v14511_v63   ;;  %6444 = vperm.xlu1 %9527, %v6143_v39   ;;  %v17883_v39 = vld [vmem:[#allocation216_spill] sm:$0xff] }
 0xcd4   :  { %v14535_v2 = vmul.f32 %v17883_v39, %v14515_v50  ;;  %v14573_v39 = vmul.f32 %v17891_v41, %v14432_v35 }
 0xcd7   :  { %6525 = vperm.xlu0 %9528, %v14520_v53   ;;  %6450 = vperm.xlu1 %9527, %v6145_v9   ;;  %v17884_v9 = vld [vmem:[#allocation191_spill] sm:$0xff] }
 0xcd8   :  { %v14540_v6 = vmul.f32 %v17884_v9, %v14515_v50 }
 0xcdb   :  { %6531 = vperm.xlu0 %9528, %v14525_v56   ;;  %6456 = vperm.xlu1 %9527, %v6147_v12   ;;  %v17885_v12 = vld [vmem:[#allocation201_spill] sm:$0xff] }
 0xcdc   :  { %v14545_v42 = vmul.f32 %v17885_v12, %v14515_v50  ;;  %v17893_v12 = vld [vmem:[#allocation206_spill] sm:$0xff] }
 0xcdf   :  { %6537 = vperm.xlu0 %9528, %v14530_v22   ;;  %6462 = vperm.xlu1 %9527, %v6149_v58   ;;  %v17886_v58 = vld [vmem:[#allocation225_spill] sm:$0xff] }
 0xce0   :  { %v14550_v37 = vmul.f32 %v17886_v58, %v14515_v50  ;;  %v14583_v58 = vmul.f32 %v17893_v12, %v14432_v35 }
 0xce3   :  { %6543 = vperm.xlu0 %9528, %v14535_v2   ;;  %6468 = vperm.xlu1 %9527, %v6151_v25   ;;  %v17887_v25 = vld [vmem:[#allocation192_spill] sm:$0xff] }
 0xce4   :  { %v14555_v57 = vmul.f32 %v17887_v25, %v14515_v50 }
 0xce7   :  { %6549 = vperm.xlu0 %9528, %v14540_v6   ;;  %6474 = vperm.xlu1 %9527, %v6153_v11   ;;  %v14559_v11 = vrot.slane %v14395_v60, %v17888_v31  ;;  %v17896_v31 = vld [vmem:[#allocation195_spill] sm:$0xff] }
 0xceb   :  { %6555 = vperm.xlu0 %9528, %v14545_v42   ;;  %6480 = vperm.xlu1 %9527, %v6155_v36   ;;  %v17889_v36 = vld [vmem:[#allocation203_spill] sm:$0xff] }
 0xcec   :  { %v14564_v19 = vmul.f32 %v17889_v36, %v14559_v11  ;;  %v14593_v36 = vmul.f32 %v17896_v31, %v14432_v35  ;;  %v17902_v31 = vld [vmem:[#allocation210_spill] sm:$0xff] }
 0xced   :  { %v14613_v18 = vmul.f32 %v17902_v31, %v14515_v50  ;;  %v17908_v31 = vld [vmem:[#allocation49_spill] sm:$0xff] }
 0xcee   :  { %v14633_v43 = vmul.f32 %v17908_v31, %v14559_v11 }
 0xcef   :  { %6561 = vperm.xlu0 %9528, %v14550_v37   ;;  %6486 = vperm.xlu1 %9527, %v6157_v21   ;;  %v17890_v21 = vld [vmem:[#allocation194_spill] sm:$0xff] }
 0xcf0   :  { %v14569_v15 = vmul.f32 %v17890_v21, %v14559_v11  ;;  %v17897_v21 = vld [vmem:[#allocation209_spill] sm:$0xff]  ;;  %17909 = vst [vmem:[#allocation129_spill] sm:$0xff] %v14633_v43 }
 0xcf1   :  { %v14599_v41 = vmul.f32 %v17897_v21, %v14559_v11  ;;  %v17903_v21 = vld [vmem:[#allocation177_spill] sm:$0xff] }
 0xcf3   :  { %6567 = vperm.xlu0 %9528, %v14555_v57   ;;  %6492 = vperm.xlu1 %9527, %v6159_v26   ;;  %v17892_v26 = vld [vmem:[#allocation207_spill] sm:$0xff]  ;;  %17898 = vst [vmem:[#allocation121_spill] sm:$0xff] %v14599_v41 }
 0xcf4   :  { %v14579_v9 = vmul.f32 %v17892_v26, %v14559_v11  ;;  %v17899_v26 = vld [vmem:[#allocation208_spill] sm:$0xff] }
 0xcf5   :  { %v14603_v12 = vmul.f32 %v17899_v26, %v14515_v50  ;;  %v14619_v26 = vmul.f32 %v17903_v21, %v14559_v11  ;;  %v14637_v21 = vmul.f32 %v17910_v59, %v14515_v50  ;;  %v14655_v59 = vmul.f32 %v17916_v27, %v14515_v50 }
 0xcf7   :  { %6573 = vperm.xlu0 %9528, %v14564_v19   ;;  %6498 = vperm.xlu1 %9527, %v6161_v24   ;;  %v17894_v24 = vld [vmem:[#allocation197_spill] sm:$0xff]  ;;  %17904 = vst [vmem:[#allocation93_spill] sm:$0xff] %v14619_v26 }
 0xcf8   :  { %v14589_v25 = vmul.f32 %v17894_v24, %v14559_v11  ;;  %v17900_v24 = vld [vmem:[#allocation196_spill] sm:$0xff] }
 0xcf9   :  { %v14609_v35 = vmul.f32 %v17900_v24, %v14559_v11 }
 0xcfa   :  { %17895 = vst [vmem:[#allocation119_spill] sm:$0xff] %v14589_v25 }
 0xcfb   :  { %6579 = vperm.xlu0 %9528, %v14569_v15   ;;  %6504 = vperm.xlu1 %9527, %v14573_v39   ;;  %17901 = vst [vmem:[#allocation123_spill] sm:$0xff] %v14609_v35 }
 0xcff   :  { %6585 = vperm.xlu0 %9528, %v14579_v9   ;;  %6510 = vperm.xlu1 %9527, %v14583_v58  }
 0xd03   :  { %6591 = vperm.xlu0 %9528, %v14589_v25   ;;  %6516 = vperm.xlu1 %9527, %v14593_v36  }
 0xd07   :  { %6597 = vperm.xlu0 %9528, %v14599_v41   ;;  %6522 = vperm.xlu1 %9527, %v14603_v12  }
 0xd0b   :  { %6603 = vperm.xlu0 %9528, %v14609_v35   ;;  %6528 = vperm.xlu1 %9527, %v14613_v18  }
 0xd0e   :  { %v14625_v20 = vpop.permute.xlu0 %6402  ;;  %v14627_v24 = vpop.permute.xlu1 %6378 }
 0xd0f   :  { %17906 = vst [vmem:[#allocation32_spill] sm:$0xff] %v14625_v20  ;;  %17907 = vst [vmem:[#allocation60_spill] sm:$0xff] %v14627_v24  ;;  %6609 = vperm.xlu0 %9528, %v14619_v26   ;;  %6534 = vperm.xlu1 %9527, %v14623_v52   ;;  %v17914_v24 = vld [vmem:[#allocation163_spill] sm:$0xff]  ;;  %v17952_v26 = vld [vmem:[#allocation45_spill] sm:$0xff] }
 0xd10   :  { %v14651_v31 = vmul.f32 %v17914_v24, %v14641_v61  ;;  %v14669_v24 = vmul.f32 %v17921_v33, %v14515_v50 }
 0xd12   :  { %v14643_v44 = vpop.permute.xlu0 %6423  ;;  %v14645_v20 = vpop.permute.xlu1 %6381  ;;  %17915 = vst [vmem:[#allocation127_spill] sm:$0xff] %v14651_v31 }
 0xd13   :  { %17912 = vst [vmem:[#allocation53_spill] sm:$0xff] %v14643_v44  ;;  %17913 = vst [vmem:[#allocation140_spill] sm:$0xff] %v14645_v20  ;;  %6615 = vperm.xlu0 %9528, %v14633_v43   ;;  %6540 = vperm.xlu1 %9527, %v14637_v21   ;;  %v17919_v44 = vld [vmem:[#allocation165_spill] sm:$0xff] }
 0xd14   :  { %v14665_v20 = vmul.f32 %v17919_v44, %v14641_v61  ;;  %v14683_v44 = vmul.f32 %v17926_v47, %v14515_v50 }
 0xd16   :  { %v14657_v5 = vpop.permute.xlu0 %6429  ;;  %v14659_v29 = vpop.permute.xlu1 %6384  ;;  %17920 = vst [vmem:[#allocation43_spill] sm:$0xff] %v14665_v20 }
 0xd17   :  { %17917 = vst [vmem:[#allocation132_spill] sm:$0xff] %v14657_v5  ;;  %17918 = vst [vmem:[#allocation162_spill] sm:$0xff] %v14659_v29  ;;  %6621 = vperm.xlu0 %9528, %v14651_v31   ;;  %6546 = vperm.xlu1 %9527, %v14655_v59   ;;  %v17924_v5 = vld [vmem:[#allocation167_spill] sm:$0xff] }
 0xd18   :  { %v14679_v29 = vmul.f32 %v17924_v5, %v14641_v61  ;;  %v14697_v5 = vmul.f32 %v17931_v0, %v14515_v50  ;;  %v17939_v50 = vld [vmem:[#allocation173_spill] sm:$0xff] }
 0xd1a   :  { %v14671_v55 = vpop.permute.xlu0 %6435  ;;  %v14673_v27 = vpop.permute.xlu1 %6387  ;;  %17925 = vst [vmem:[#allocation47_spill] sm:$0xff] %v14679_v29 }
 0xd1b   :  { %17922 = vst [vmem:[#allocation26_spill] sm:$0xff] %v14671_v55  ;;  %17923 = vst [vmem:[#allocation86_spill] sm:$0xff] %v14673_v27  ;;  %6627 = vperm.xlu0 %9528, %v14665_v20   ;;  %6552 = vperm.xlu1 %9527, %v14669_v24   ;;  %v17929_v55 = vld [vmem:[#allocation169_spill] sm:$0xff] }
 0xd1c   :  { %v14693_v27 = vmul.f32 %v17929_v55, %v14641_v61 }
 0xd1e   :  { %v14685_v48 = vpop.permute.xlu0 %6441  ;;  %v14687_v33 = vpop.permute.xlu1 %6390  ;;  %17930 = vst [vmem:[#allocation159_spill] sm:$0xff] %v14693_v27 }
 0xd1f   :  { %17927 = vst [vmem:[#allocation37_spill] sm:$0xff] %v14685_v48  ;;  %17928 = vst [vmem:[#allocation51_spill] sm:$0xff] %v14687_v33  ;;  %6633 = vperm.xlu0 %9528, %v14679_v29   ;;  %6558 = vperm.xlu1 %9527, %v14683_v44   ;;  %v17934_v48 = vld [vmem:[#allocation171_spill] sm:$0xff]  ;;  %v17936_v29 = vld [vmem:[#allocation136_spill] sm:$0xff] }
 0xd20   :  { %v14707_v33 = vmul.f32 %v17934_v48, %v14641_v61  ;;  %v14711_v55 = vmul.f32 %v17936_v29, %v14559_v11 }
 0xd22   :  { %v14699_v20 = vpop.permute.xlu0 %6447  ;;  %v14701_v47 = vpop.permute.xlu1 %6393  ;;  %17935 = vst [vmem:[#allocation180_spill] sm:$0xff] %v14707_v33 }
 0xd23   :  { %17932 = vst [vmem:[#allocation142_spill] sm:$0xff] %v14699_v20  ;;  %17933 = vst [vmem:[#allocation144_spill] sm:$0xff] %v14701_v47  ;;  %6639 = vperm.xlu0 %9528, %v14693_v27   ;;  %6564 = vperm.xlu1 %9527, %v14697_v5   ;;  %v14721_v20 = vmul.f32 %v17939_v50, %v14641_v61  ;;  %v17941_v47 = vld [vmem:[#allocation36_spill] sm:$0xff] }
 0xd24   :  { %v14725_v48 = vmul.f32 %v17941_v47, %v14559_v11 }
 0xd25   :  { %17940 = vst [vmem:[#allocation130_spill] sm:$0xff] %v14721_v20 }
 0xd26   :  { %v14713_v31 = vpop.permute.xlu0 %6453  ;;  %v14715_v0 = vpop.permute.xlu1 %6396 }
 0xd27   :  { %17937 = vst [vmem:[#allocation61_spill] sm:$0xff] %v14713_v31  ;;  %17938 = vst [vmem:[#allocation143_spill] sm:$0xff] %v14715_v0  ;;  %6645 = vperm.xlu0 %9528, %v14707_v33   ;;  %6570 = vperm.xlu1 %9527, %v14711_v55   ;;  %v17944_v31 = vld [vmem:[#allocation175_spill] sm:$0xff] }
 0xd28   :  { %v14735_v0 = vmul.f32 %v17944_v31, %v14641_v61  ;;  %v17946_v33 = vld [vmem:[#allocation179_spill] sm:$0xff] }
 0xd29   :  { %v14739_v50 = vmul.f32 %v17946_v33, %v14559_v11  ;;  %v14757_v33 = vrot.slane %v14395_v60, %v17952_v26 }
 0xd2a   :  { %v14727_v27 = vpop.permute.xlu0 %6459  ;;  %v14729_v29 = vpop.permute.xlu1 %6399  ;;  %17945 = vst [vmem:[#allocation84_spill] sm:$0xff] %v14735_v0 }
 0xd2b   :  { %17942 = vst [vmem:[#allocation137_spill] sm:$0xff] %v14727_v27  ;;  %17943 = vst [vmem:[#allocation40_spill] sm:$0xff] %v14729_v29  ;;  %6651 = vperm.xlu0 %9528, %v14721_v20   ;;  %6576 = vperm.xlu1 %9527, %v14725_v48   ;;  %v17949_v27 = vld [vmem:[#allocation131_spill] sm:$0xff]  ;;  %v17951_v20 = vld [vmem:[#allocation141_spill] sm:$0xff] }
 0xd2c   :  { %v14749_v29 = vmul.f32 %v17949_v27, %v14641_v61  ;;  %v14753_v31 = vmul.f32 %v17951_v20, %v14559_v11 }
 0xd2e   :  { %v14741_v43 = vpop.permute.xlu0 %6465  ;;  %v14743_v47 = vpop.permute.xlu1 %6405  ;;  %17950 = vst [vmem:[#allocation114_spill] sm:$0xff] %v14749_v29 }
 0xd2f   :  { %17947 = vst [vmem:[#allocation112_spill] sm:$0xff] %v14741_v43  ;;  %17948 = vst [vmem:[#allocation56_spill] sm:$0xff] %v14743_v47  ;;  %6657 = vperm.xlu0 %9528, %v14735_v0   ;;  %6582 = vperm.xlu1 %9527, %v14739_v50   ;;  %v17955_v47 = vld [vmem:[#allocation25_spill] sm:$0xff]  ;;  %v17957_v0 = vld [vmem:[#allocation150_spill] sm:$0xff] }
 0xd30   :  { %v14767_v27 = vmul.f32 %v17955_v47, %v14757_v33  ;;  %v14771_v20 = vmul.f32 %v17957_v0, %v14559_v11 }
 0xd32   :  { %v14759_v35 = vpop.permute.xlu0 %6471  ;;  %v14761_v43 = vpop.permute.xlu1 %6408  ;;  %17956 = vst [vmem:[#allocation145_spill] sm:$0xff] %v14767_v27  ;;  %17958 = vst [vmem:[#allocation158_spill] sm:$0xff] %v14771_v20 }
 0xd33   :  { %17953 = vst [vmem:[#allocation92_spill] sm:$0xff] %v14759_v35  ;;  %17954 = vst [vmem:[#allocation126_spill] sm:$0xff] %v14761_v43  ;;  %6663 = vperm.xlu0 %9528, %v14749_v29   ;;  %6588 = vperm.xlu1 %9527, %v14753_v31   ;;  %v17961_v35 = vld [vmem:[#allocation28_spill] sm:$0xff]  ;;  %v17963_v29 = vld [vmem:[#allocation161_spill] sm:$0xff] }
 0xd34   :  { %v14781_v43 = vmul.f32 %v17961_v35, %v14757_v33  ;;  %v14785_v47 = vmul.f32 %v17963_v29, %v14559_v11 }
 0xd36   :  { %v14773_v41 = vpop.permute.xlu0 %6477  ;;  %v14775_v26 = vpop.permute.xlu1 %6411  ;;  %17962 = vst [vmem:[#allocation97_spill] sm:$0xff] %v14781_v43  ;;  %17964 = vst [vmem:[#allocation87_spill] sm:$0xff] %v14785_v47 }
 0xd37   :  { %17959 = vst [vmem:[#allocation77_spill] sm:$0xff] %v14773_v41  ;;  %17960 = vst [vmem:[#allocation98_spill] sm:$0xff] %v14775_v26  ;;  %6669 = vperm.xlu0 %9528, %v14767_v27   ;;  %6594 = vperm.xlu1 %9527, %v14771_v20   ;;  %v17967_v26 = vld [vmem:[#allocation128_spill] sm:$0xff]  ;;  %v17969_v27 = vld [vmem:[#allocation166_spill] sm:$0xff] }
 0xd38   :  { %v14795_v41 = vmul.f32 %v17967_v26, %v14757_v33  ;;  %v14799_v35 = vmul.f32 %v17969_v27, %v14559_v11 }
 0xd3a   :  { %v14787_v25 = vpop.permute.xlu0 %6483  ;;  %v14789_v0 = vpop.permute.xlu1 %6414  ;;  %17968 = vst [vmem:[#allocation100_spill] sm:$0xff] %v14795_v41  ;;  %17970 = vst [vmem:[#allocation89_spill] sm:$0xff] %v14799_v35 }
 0xd3b   :  { %17965 = vst [vmem:[#allocation106_spill] sm:$0xff] %v14787_v25  ;;  %17966 = vst [vmem:[#allocation83_spill] sm:$0xff] %v14789_v0  ;;  %6675 = vperm.xlu0 %9528, %v14781_v43   ;;  %6600 = vperm.xlu1 %9527, %v14785_v47   ;;  %v17973_v25 = vld [vmem:[#allocation52_spill] sm:$0xff]  ;;  %v17975_v43 = vld [vmem:[#allocation170_spill] sm:$0xff] }
 0xd3c   :  { %v14809_v0 = vmul.f32 %v17973_v25, %v14757_v33  ;;  %v14813_v26 = vmul.f32 %v17975_v43, %v14559_v11  ;;  %v17985_v11 = vld [vmem:[#allocation35_spill] sm:$0xff] }
 0xd3e   :  { %v14801_v20 = vpop.permute.xlu0 %6489  ;;  %v14803_v29 = vpop.permute.xlu1 %6417  ;;  %17974 = vst [vmem:[#allocation103_spill] sm:$0xff] %v14809_v0  ;;  %17976 = vst [vmem:[#allocation91_spill] sm:$0xff] %v14813_v26 }
 0xd3f   :  { %17971 = vst [vmem:[#allocation102_spill] sm:$0xff] %v14801_v20  ;;  %17972 = vst [vmem:[#allocation108_spill] sm:$0xff] %v14803_v29  ;;  %6681 = vperm.xlu0 %9528, %v14795_v41   ;;  %6606 = vperm.xlu1 %9527, %v14799_v35   ;;  %v17979_v20 = vld [vmem:[#allocation174_spill] sm:$0xff] }
 0xd40   :  { %v14823_v29 = vmul.f32 %v17979_v20, %v14757_v33  ;;  %v17981_v41 = vld [vmem:[#allocation178_spill] sm:$0xff] }
 0xd41   :  { %v14827_v25 = vmul.f32 %v17981_v41, %v14641_v61 }
 0xd42   :  { %v14815_v47 = vpop.permute.xlu0 %6495  ;;  %v14817_v27 = vpop.permute.xlu1 %6420  ;;  %17980 = vst [vmem:[#allocation107_spill] sm:$0xff] %v14823_v29 }
 0xd43   :  { %17977 = vst [vmem:[#allocation105_spill] sm:$0xff] %v14815_v47  ;;  %17978 = vst [vmem:[#allocation85_spill] sm:$0xff] %v14817_v27  ;;  %6687 = vperm.xlu0 %9528, %v14809_v0   ;;  %6612 = vperm.xlu1 %9527, %v14813_v26   ;;  %v14837_v47 = vmul.f32 %v17985_v11, %v14757_v33  ;;  %v17987_v27 = vld [vmem:[#allocation133_spill] sm:$0xff] }
 0xd44   :  { %17982 = vst [vmem:[#allocation120_spill] sm:$0xff] %v14827_v25  ;;  %v14841_v20 = vmul.f32 %v17987_v27, %v14641_v61 }
 0xd45   :  { %17986 = vst [vmem:[#allocation122_spill] sm:$0xff] %v14837_v47 }
 0xd46   :  { %v14829_v35 = vpop.permute.xlu0 %6501  ;;  %v14831_v43 = vpop.permute.xlu1 %6426  ;;  %17988 = vst [vmem:[#allocation109_spill] sm:$0xff] %v14841_v20 }
 0xd47   :  { %17983 = vst [vmem:[#allocation116_spill] sm:$0xff] %v14829_v35  ;;  %17984 = vst [vmem:[#allocation111_spill] sm:$0xff] %v14831_v43  ;;  %6693 = vperm.xlu0 %9528, %v14823_v29   ;;  %6618 = vperm.xlu1 %9527, %v14827_v25   ;;  %v17991_v35 = vld [vmem:[#allocation50_spill] sm:$0xff] }
 0xd48   :  { %v14851_v43 = vmul.f32 %v17991_v35, %v14757_v33  ;;  %v17993_v29 = vld [vmem:[#allocation30_spill] sm:$0xff] }
 0xd49   :  { %v14855_v11 = vmul.f32 %v17993_v29, %v14641_v61 }
 0xd4a   :  { %v14843_v0 = vpop.permute.xlu0 %6507  ;;  %v14845_v41 = vpop.permute.xlu1 %6432  ;;  %17992 = vst [vmem:[#allocation124_spill] sm:$0xff] %v14851_v43 }
 0xd4b   :  { %17989 = vst [vmem:[#allocation118_spill] sm:$0xff] %v14843_v0  ;;  %17990 = vst [vmem:[#allocation110_spill] sm:$0xff] %v14845_v41  ;;  %6699 = vperm.xlu0 %9528, %v14837_v47   ;;  %6624 = vperm.xlu1 %9527, %v14841_v20   ;;  %v17997_v0 = vld [vmem:[#allocation135_spill] sm:$0xff]  ;;  %v17999_v47 = vld [vmem:[#allocation125_spill] sm:$0xff] }
 0xd4c   :  { %17994 = vst [vmem:[#allocation94_spill] sm:$0xff] %v14855_v11  ;;  %v14865_v41 = vmul.f32 %v17997_v0, %v14757_v33  ;;  %v14869_v35 = vmul.f32 %v17999_v47, %v14641_v61  ;;  %v18000_v20 = vld [vmem:[#allocation48_spill] sm:$0xff] }
 0xd4d   :  { %v14873_v29 = vrot.slane %v14395_v60, %v18000_v20  ;;  %v18010_v20 = vld [vmem:[#allocation139_spill] sm:$0xff] }
 0xd4e   :  { %v14857_v25 = vpop.permute.xlu0 %6513  ;;  %v14859_v27 = vpop.permute.xlu1 %6438  ;;  %17998 = vst [vmem:[#allocation115_spill] sm:$0xff] %v14865_v41 }
 0xd4f   :  { %17995 = vst [vmem:[#allocation99_spill] sm:$0xff] %v14857_v25  ;;  %17996 = vst [vmem:[#allocation96_spill] sm:$0xff] %v14859_v27  ;;  %6705 = vperm.xlu0 %9528, %v14851_v43   ;;  %6630 = vperm.xlu1 %9527, %v14855_v11   ;;  %v18004_v27 = vld [vmem:[#allocation39_spill] sm:$0xff]  ;;  %v18006_v43 = vld [vmem:[#allocation38_spill] sm:$0xff] }
 0xd50   :  { %18001 = vst [vmem:[#allocation117_spill] sm:$0xff] %v14873_v29  ;;  %v14883_v0 = vmul.f32 %v18004_v27, %v14873_v29  ;;  %v14887_v47 = vmul.f32 %v18006_v43, %v14641_v61 }
 0xd52   :  { %v14875_v26 = vpop.permute.xlu0 %6519  ;;  %v14877_v25 = vpop.permute.xlu1 %6444  ;;  %18005 = vst [vmem:[#allocation73_spill] sm:$0xff] %v14883_v0  ;;  %18007 = vst [vmem:[#allocation147_spill] sm:$0xff] %v14887_v47 }
 0xd53   :  { %18002 = vst [vmem:[#allocation113_spill] sm:$0xff] %v14875_v26  ;;  %18003 = vst [vmem:[#allocation20_spill] sm:$0xff] %v14877_v25  ;;  %6711 = vperm.xlu0 %9528, %v14865_v41   ;;  %6636 = vperm.xlu1 %9527, %v14869_v35   ;;  %v14897_v26 = vmul.f32 %v18010_v20, %v14873_v29  ;;  %v18012_v25 = vld [vmem:[#allocation149_spill] sm:$0xff] }
 0xd54   :  { %v14901_v27 = vmul.f32 %v18012_v25, %v14641_v61 }
 0xd55   :  { %18011 = vst [vmem:[#allocation21_spill] sm:$0xff] %v14897_v26 }
 0xd56   :  { %v14889_v11 = vpop.permute.xlu0 %6525  ;;  %v14891_v60 = vpop.permute.xlu1 %6450  ;;  %18013 = vst [vmem:[#allocation63_spill] sm:$0xff] %v14901_v27 }
 0xd57   :  { %18008 = vst [vmem:[#allocation69_spill] sm:$0xff] %v14889_v11  ;;  %18009 = vst [vmem:[#allocation65_spill] sm:$0xff] %v14891_v60  ;;  %6717 = vperm.xlu0 %9528, %v14883_v0   ;;  %6642 = vperm.xlu1 %9527, %v14887_v47   ;;  %v18016_v11 = vld [vmem:[#allocation138_spill] sm:$0xff]  ;;  %v18018_v0 = vld [vmem:[#allocation44_spill] sm:$0xff] }
 0xd58   :  { %v14911_v60 = vmul.f32 %v18016_v11, %v14873_v29  ;;  %v14915_v20 = vmul.f32 %v18018_v0, %v14641_v61 }
 0xd5a   :  { %v14903_v41 = vpop.permute.xlu0 %6531  ;;  %v14905_v43 = vpop.permute.xlu1 %6456  ;;  %18017 = vst [vmem:[#allocation181_spill] sm:$0xff] %v14911_v60  ;;  %18019 = vst [vmem:[#allocation68_spill] sm:$0xff] %v14915_v20 }
 0xd5b   :  { %18014 = vst [vmem:[#allocation154_spill] sm:$0xff] %v14903_v41  ;;  %18015 = vst [vmem:[#allocation156_spill] sm:$0xff] %v14905_v43  ;;  %6723 = vperm.xlu0 %9528, %v14897_v26   ;;  %6648 = vperm.xlu1 %9527, %v14901_v27   ;;  %v18022_v41 = vld [vmem:[#allocation164_spill] sm:$0xff] }
 0xd5c   :  { %v14925_v43 = vmul.f32 %v18022_v41, %v14873_v29  ;;  %v18024_v26 = vld [vmem:[#allocation168_spill] sm:$0xff] }
 0xd5d   :  { %v14929_v11 = vmul.f32 %v18024_v26, %v14641_v61  ;;  %v18033_v26 = vld [vmem:[#allocation55_spill] sm:$0xff] }
 0xd5e   :  { %v14917_v47 = vpop.permute.xlu0 %6537  ;;  %v14919_v25 = vpop.permute.xlu1 %6462  ;;  %18023 = vst [vmem:[#allocation71_spill] sm:$0xff] %v14925_v43 }
 0xd5f   :  { %18020 = vst [vmem:[#allocation74_spill] sm:$0xff] %v14917_v47  ;;  %18021 = vst [vmem:[#allocation157_spill] sm:$0xff] %v14919_v25  ;;  %6729 = vperm.xlu0 %9528, %v14911_v60   ;;  %6654 = vperm.xlu1 %9527, %v14915_v20   ;;  %v18027_v47 = vld [vmem:[#allocation172_spill] sm:$0xff] }
 0xd60   :  { %v14939_v25 = vmul.f32 %v18027_v47, %v14873_v29  ;;  %v18029_v60 = vld [vmem:[#allocation176_spill] sm:$0xff] }
 0xd61   :  { %v14943_v41 = vmul.f32 %v18029_v60, %v14757_v33 }
 0xd62   :  { %v14931_v27 = vpop.permute.xlu0 %6543  ;;  %v14933_v0 = vpop.permute.xlu1 %6468  ;;  %18028 = vst [vmem:[#allocation148_spill] sm:$0xff] %v14939_v25 }
 0xd63   :  { %18025 = vst [vmem:[#allocation76_spill] sm:$0xff] %v14931_v27  ;;  %18026 = vst [vmem:[#allocation146_spill] sm:$0xff] %v14933_v0  ;;  %6735 = vperm.xlu0 %9528, %v14925_v43   ;;  %6660 = vperm.xlu1 %9527, %v14929_v11   ;;  %v14953_v27 = vmul.f32 %v18033_v26, %v14873_v29  ;;  %v18035_v0 = vld [vmem:[#allocation57_spill] sm:$0xff] }
 0xd64   :  { %18030 = vst [vmem:[#allocation152_spill] sm:$0xff] %v14943_v41  ;;  %v14957_v47 = vmul.f32 %v18035_v0, %v14757_v33 }
 0xd65   :  { %18034 = vst [vmem:[#allocation155_spill] sm:$0xff] %v14953_v27 }
 0xd66   :  { %v14945_v20 = vpop.permute.xlu0 %6549  ;;  %v14947_v61 = vpop.permute.xlu1 %6474  ;;  %18036 = vst [vmem:[#allocation41_spill] sm:$0xff] %v14957_v47 }
 0xd67   :  { %18031 = vst [vmem:[#allocation72_spill] sm:$0xff] %v14945_v20  ;;  %18032 = vst [vmem:[#allocation62_spill] sm:$0xff] %v14947_v61  ;;  %6741 = vperm.xlu0 %9528, %v14939_v25   ;;  %6666 = vperm.xlu1 %9527, %v14943_v41   ;;  %v18039_v20 = vld [vmem:[#allocation46_spill] sm:$0xff]  ;;  %v18041_v25 = vld [vmem:[#allocation27_spill] sm:$0xff] }
 0xd68   :  { %v14967_v61 = vmul.f32 %v18039_v20, %v14873_v29  ;;  %v14971_v26 = vmul.f32 %v18041_v25, %v14757_v33  ;;  %v18049_v25 = vld [vmem:[#allocation75_spill] sm:$0xff] }
 0xd6a   :  { %v14959_v43 = vpop.permute.xlu0 %6555  ;;  %v14961_v60 = vpop.permute.xlu1 %6480  ;;  %18040 = vst [vmem:[#allocation59_spill] sm:$0xff] %v14967_v61  ;;  %18042 = vst [vmem:[#allocation22_spill] sm:$0xff] %v14971_v26 }
 0xd6b   :  { %18037 = vst [vmem:[#allocation182_spill] sm:$0xff] %v14959_v43  ;;  %18038 = vst [vmem:[#allocation211_spill] sm:$0xff] %v14961_v60  ;;  %6747 = vperm.xlu0 %9528, %v14953_v27   ;;  %6672 = vperm.xlu1 %9527, %v14957_v47   ;;  %v18045_v43 = vld [vmem:[#allocation78_spill] sm:$0xff]  ;;  %v7475_v27 = vunpack.c.h.b16 %v14422_v51 }
 0xd6c   :  { %v14981_v60 = vmul.f32 %v18045_v43, %v14757_v33  ;;  %v18053_v43 = vld [vmem:[#allocation82_spill] sm:$0xff] }
 0xd6e   :  { %v14973_v41 = vpop.permute.xlu0 %6561  ;;  %v14975_v0 = vpop.permute.xlu1 %6486  ;;  %18046 = vst [vmem:[#allocation200_spill] sm:$0xff] %v14981_v60 }
 0xd6f   :  { %18043 = vst [vmem:[#allocation212_spill] sm:$0xff] %v14973_v41  ;;  %18044 = vst [vmem:[#allocation184_spill] sm:$0xff] %v14975_v0  ;;  %6753 = vperm.xlu0 %9528, %v14967_v61   ;;  %6678 = vperm.xlu1 %9527, %v14971_v26   ;;  %v14991_v41 = vmul.f32 %v18049_v25, %v14757_v33  ;;  %v7477_v0 = vunpack.c.h.b16 %v14425_v17  ;;  %v18057_v25 = vld [vmem:[#allocation42_spill] sm:$0xff] }
 0xd71   :  { %18050 = vst [vmem:[#allocation153_spill] sm:$0xff] %v14991_v41 }
 0xd72   :  { %v14984_v20 = vpop.permute.xlu0 %6567  ;;  %v14986_v47 = vpop.permute.xlu1 %6492 }
 0xd73   :  { %18047 = vst [vmem:[#allocation213_spill] sm:$0xff] %v14984_v20  ;;  %18048 = vst [vmem:[#allocation185_spill] sm:$0xff] %v14986_v47  ;;  %6684 = vperm.xlu1 %9527, %v14981_v60   ;;  %7494 = vperm.xlu0 %9528, %v7475_v27   ;;  %v15001_v20 = vmul.f32 %v18053_v43, %v14757_v33  ;;  %v7479_v47 = vunpack.c.h.b16 %v14427_v34  ;;  %v18061_v43 = vld [vmem:[#allocation90_spill] sm:$0xff] }
 0xd75   :  { %18054 = vst [vmem:[#allocation80_spill] sm:$0xff] %v15001_v20 }
 0xd76   :  { %v14994_v61 = vpop.permute.xlu0 %6573  ;;  %v14996_v26 = vpop.permute.xlu1 %6498 }
 0xd77   :  { %18051 = vst [vmem:[#allocation202_spill] sm:$0xff] %v14994_v61  ;;  %18052 = vst [vmem:[#allocation66_spill] sm:$0xff] %v14996_v26  ;;  %6690 = vperm.xlu1 %9527, %v14991_v41   ;;  %7500 = vperm.xlu0 %9528, %v7477_v0   ;;  %v15011_v61 = vmul.f32 %v18057_v25, %v14757_v33  ;;  %v7481_v26 = vunpack.c.h.b16 %v14435_v16  ;;  %v18064_v25 = vld [vmem:[#allocation58_spill] sm:$0xff] }
 0xd79   :  { %18058 = vst [vmem:[#allocation204_spill] sm:$0xff] %v15011_v61 }
 0xd7a   :  { %v15004_v27 = vpop.permute.xlu0 %6579  ;;  %v15006_v60 = vpop.permute.xlu1 %6504 }
 0xd7b   :  { %18055 = vst [vmem:[#allocation215_spill] sm:$0xff] %v15004_v27  ;;  %18056 = vst [vmem:[#allocation187_spill] sm:$0xff] %v15006_v60  ;;  %6696 = vperm.xlu1 %9527, %v15001_v20   ;;  %7506 = vperm.xlu0 %9528, %v7479_v47   ;;  %v15021_v27 = vmul.f32 %v18061_v43, %v14757_v33  ;;  %v7483_v60 = vunpack.c.h.b16 %v14440_v23  ;;  %v18068_v33 = vld [vmem:[#allocation95_spill] sm:$0xff] }
 0xd7c   :  { %v15041_v43 = vmul.f32 %v18068_v33, %v14873_v29  ;;  %v18076_v33 = vld [vmem:[#allocation151_spill] sm:$0xff] }
 0xd7e   :  { %v15014_v0 = vpop.permute.xlu0 %6585  ;;  %v15016_v41 = vpop.permute.xlu1 %6510  ;;  %18069 = vst [vmem:[#allocation186_spill] sm:$0xff] %v15041_v43 }
 0xd7f   :  { %18059 = vst [vmem:[#allocation221_spill] sm:$0xff] %v15014_v0  ;;  %18060 = vst [vmem:[#allocation70_spill] sm:$0xff] %v15016_v41  ;;  %6702 = vperm.xlu1 %9527, %v15011_v61   ;;  %7512 = vperm.xlu0 %9528, %v7481_v26   ;;  %v15031_v0 = vmul.f32 %v18064_v25, %v14873_v29  ;;  %v7485_v41 = vunpack.c.h.b16 %v14443_v49  ;;  %v18072_v25 = vld [vmem:[#allocation64_spill] sm:$0xff] }
 0xd81   :  { %18065 = vst [vmem:[#allocation205_spill] sm:$0xff] %v15031_v0 }
 0xd82   :  { %v15024_v47 = vpop.permute.xlu0 %6591  ;;  %v15026_v20 = vpop.permute.xlu1 %6516 }
 0xd83   :  { %18062 = vst [vmem:[#allocation188_spill] sm:$0xff] %v15024_v47  ;;  %18063 = vst [vmem:[#allocation183_spill] sm:$0xff] %v15026_v20  ;;  %6708 = vperm.xlu1 %9527, %v15021_v27   ;;  %7518 = vperm.xlu0 %9528, %v7483_v60   ;;  %v7487_v47 = vunpack.c.h.b16 %v14445_v10 }
 0xd86   :  { %v15034_v26 = vpop.permute.xlu0 %6597  ;;  %v15036_v61 = vpop.permute.xlu1 %6522 }
 0xd87   :  { %18066 = vst [vmem:[#allocation88_spill] sm:$0xff] %v15034_v26  ;;  %18067 = vst [vmem:[#allocation231_spill] sm:$0xff] %v15036_v61  ;;  %6714 = vperm.xlu1 %9527, %v15031_v0   ;;  %7524 = vperm.xlu0 %9528, %v7485_v41   ;;  %v15051_v26 = vmul.f32 %v18072_v25, %v14873_v29  ;;  %v7489_v61 = vunpack.c.h.b16 %v14449_v4  ;;  %v18080_v25 = vld [vmem:[#allocation101_spill] sm:$0xff] }
 0xd89   :  { %18073 = vst [vmem:[#allocation23_spill] sm:$0xff] %v15051_v26 }
 0xd8a   :  { %v15044_v60 = vpop.permute.xlu0 %6603  ;;  %v15046_v20 = vpop.permute.xlu1 %6528 }
 0xd8b   :  { %18070 = vst [vmem:[#allocation189_spill] sm:$0xff] %v15044_v60  ;;  %18071 = vst [vmem:[#allocation198_spill] sm:$0xff] %v15046_v20  ;;  %6720 = vperm.xlu1 %9527, %v15041_v43   ;;  %7530 = vperm.xlu0 %9528, %v7487_v47   ;;  %v15061_v60 = vmul.f32 %v18076_v33, %v14873_v29  ;;  %v7668_v20 = vunpack.c.h.b16 %v14456_v7  ;;  %v18084_v33 = vld [vmem:[#allocation104_spill] sm:$0xff] }
 0xd8d   :  { %18077 = vst [vmem:[#allocation199_spill] sm:$0xff] %v15061_v60 }
 0xd8e   :  { %v15054_v41 = vpop.permute.xlu0 %6609  ;;  %v15056_v0 = vpop.permute.xlu1 %6534 }
 0xd8f   :  { %18074 = vst [vmem:[#allocation214_spill] sm:$0xff] %v15054_v41  ;;  %18075 = vst [vmem:[#allocation190_spill] sm:$0xff] %v15056_v0  ;;  %6726 = vperm.xlu1 %9527, %v15051_v26   ;;  %7536 = vperm.xlu0 %9528, %v7489_v61   ;;  %v15071_v41 = vmul.f32 %v18080_v25, %v14873_v29  ;;  %v7670_v0 = vunpack.c.h.b16 %v14461_v13  ;;  %v18087_v25 = vld [vmem:[#allocation79_spill] sm:$0xff] }
 0xd91   :  { %18081 = vst [vmem:[#allocation201_spill] sm:$0xff] %v15071_v41 }
 0xd92   :  { %v15064_v47 = vpop.permute.xlu0 %6615  ;;  %v15066_v43 = vpop.permute.xlu1 %6540 }
 0xd93   :  { %18078 = vst [vmem:[#allocation216_spill] sm:$0xff] %v15064_v47  ;;  %18079 = vst [vmem:[#allocation191_spill] sm:$0xff] %v15066_v43  ;;  %6732 = vperm.xlu1 %9527, %v15061_v60   ;;  %7687 = vperm.xlu0 %9528, %v7668_v20   ;;  %v15081_v47 = vmul.f32 %v18084_v33, %v14873_v29  ;;  %v7672_v43 = vunpack.c.h.b16 %v14463_v45  ;;  %v7676_v33 = vunpack.c.h.b16 %v14469_v38 }
 0xd96   :  { %v15074_v61 = vpop.permute.xlu0 %6621  ;;  %v15076_v26 = vpop.permute.xlu1 %6546 }
 0xd97   :  { %18082 = vst [vmem:[#allocation225_spill] sm:$0xff] %v15074_v61  ;;  %18083 = vst [vmem:[#allocation192_spill] sm:$0xff] %v15076_v26  ;;  %6738 = vperm.xlu1 %9527, %v15071_v41   ;;  %7693 = vperm.xlu0 %9528, %v7670_v0   ;;  %v15091_v61 = vmul.f32 %v18087_v25, %v14873_v29  ;;  %v7674_v26 = vunpack.c.h.b16 %v14467_v54  ;;  %v7678_v25 = vunpack.c.h.b16 %v14475_v1  ;;  %v7476_v29 = vunpack.c.l.b16 %v14425_v17 }
 0xd98   :  { %v7480_v17 = vunpack.c.l.b16 %v14435_v16  ;;  %v7484_v16 = vunpack.c.l.b16 %v14443_v49  ;;  %v7488_v49 = vunpack.c.l.b16 %v14449_v4 }
 0xd99   :  { %18088 = vst [vmem:[#allocation194_spill] sm:$0xff] %v15091_v61 }
 0xd9a   :  { %v15084_v20 = vpop.permute.xlu0 %6627  ;;  %v15086_v60 = vpop.permute.xlu1 %6552 }
 0xd9b   :  { %18085 = vst [vmem:[#allocation24_spill] sm:$0xff] %v15084_v20  ;;  %18086 = vst [vmem:[#allocation203_spill] sm:$0xff] %v15086_v60  ;;  %6744 = vperm.xlu1 %9527, %v15081_v47   ;;  %7699 = vperm.xlu0 %9528, %v7672_v43   ;;  %v7474_v20 = vunpack.c.l.b16 %v14422_v51  ;;  %v7478_v51 = vunpack.c.l.b16 %v14427_v34  ;;  %v7482_v34 = vunpack.c.l.b16 %v14440_v23  ;;  %v7486_v23 = vunpack.c.l.b16 %v14445_v10 }
 0xd9c   :  { %v7667_v10 = vunpack.c.l.b16 %v14456_v7 }
 0xd9e   :  { %v15094_v0 = vpop.permute.xlu0 %6633  ;;  %v15096_v41 = vpop.permute.xlu1 %6558 }
 0xd9f   :  { %18089 = vst [vmem:[#allocation193_spill] sm:$0xff] %v15094_v0  ;;  %18090 = vst [vmem:[#allocation207_spill] sm:$0xff] %v15096_v41  ;;  %6750 = vperm.xlu1 %9527, %v15091_v61   ;;  %7705 = vperm.xlu0 %9528, %v7674_v26   ;;  %v7680_v26 = vunpack.c.h.b16 %v14481_v8 }
 0xda2   :  { %v15101_v60 = vpop.permute.xlu0 %6639  ;;  %v15103_v43 = vpop.permute.xlu1 %6564 }
 0xda3   :  { %18091 = vst [vmem:[#allocation206_spill] sm:$0xff] %v15101_v60  ;;  %7711 = vperm.xlu0 %9528, %v7676_v33   ;;  %7491 = vperm.xlu1 %9527, %v7474_v20   ;;  %v7682_v20 = vunpack.c.h.b16 %v14487_v30 }
 0xda6   :  { %v15107_v0 = vpop.permute.xlu0 %6645  ;;  %v15109_v41 = vpop.permute.xlu1 %6570 }
 0xda7   :  { %18092 = vst [vmem:[#allocation197_spill] sm:$0xff] %v15107_v0  ;;  %7717 = vperm.xlu0 %9528, %v7678_v25   ;;  %7497 = vperm.xlu1 %9527, %v7476_v29   ;;  %v7861_v29 = vunpack.c.h.b16 %v14489_v46 }
 0xdaa   :  { %v15113_v61 = vpop.permute.xlu0 %6651  ;;  %v15115_v60 = vpop.permute.xlu1 %6576 }
 0xdab   :  { %18093 = vst [vmem:[#allocation195_spill] sm:$0xff] %v15113_v61  ;;  %7723 = vperm.xlu0 %9528, %v7680_v26   ;;  %7503 = vperm.xlu1 %9527, %v7478_v51   ;;  %v7863_v26 = vunpack.c.h.b16 %v14491_v3 }
 0xdae   :  { %v15119_v33 = vpop.permute.xlu0 %6657  ;;  %v15121_v0 = vpop.permute.xlu1 %6582 }
 0xdaf   :  { %18094 = vst [vmem:[#allocation209_spill] sm:$0xff] %v15119_v33  ;;  %7729 = vperm.xlu0 %9528, %v7682_v20   ;;  %7509 = vperm.xlu1 %9527, %v7480_v17   ;;  %v7865_v20 = vunpack.c.h.b16 %v14493_v28 }
 0xdb2   :  { %v15125_v25 = vpop.permute.xlu0 %6663  ;;  %v15127_v61 = vpop.permute.xlu1 %6588 }
 0xdb3   :  { %18095 = vst [vmem:[#allocation208_spill] sm:$0xff] %v15125_v25  ;;  %7880 = vperm.xlu0 %9528, %v7861_v29   ;;  %7515 = vperm.xlu1 %9527, %v7482_v34   ;;  %v7867_v29 = vunpack.c.h.b16 %v14495_v14 }
 0xdb6   :  { %v15131_v51 = vpop.permute.xlu0 %6669  ;;  %v15133_v33 = vpop.permute.xlu1 %6594 }
 0xdb7   :  { %18096 = vst [vmem:[#allocation196_spill] sm:$0xff] %v15131_v51  ;;  %18097 = vst [vmem:[#allocation210_spill] sm:$0xff] %v15133_v33  ;;  %7886 = vperm.xlu0 %9528, %v7863_v26   ;;  %7521 = vperm.xlu1 %9527, %v7484_v16   ;;  %v7869_v26 = vunpack.c.h.b16 %v14497_v62  ;;  %v15151_v16 = vpack.c.bf16 %v14501_v40, %v14573_v39  ;;  %v7671_v39 = vunpack.c.l.b16 %v14463_v45 }
 0xdb9   :  { %v7871_v4 = vunpack.c.h.b16 %v15151_v16 }
 0xdba   :  { %v15137_v17 = vpop.permute.xlu0 %6675  ;;  %v15139_v25 = vpop.permute.xlu1 %6600 }
 0xdbb   :  { %18098 = vst [vmem:[#allocation177_spill] sm:$0xff] %v15137_v17  ;;  %18099 = vst [vmem:[#allocation160_spill] sm:$0xff] %v15139_v25  ;;  %7892 = vperm.xlu0 %9528, %v7865_v20   ;;  %7527 = vperm.xlu1 %9527, %v7486_v23  }
 0xdbe   :  { %v15143_v34 = vpop.permute.xlu0 %6681  ;;  %v15145_v51 = vpop.permute.xlu1 %6606 }
 0xdbf   :  { %18100 = vst [vmem:[#allocation49_spill] sm:$0xff] %v15143_v34  ;;  %18101 = vst [vmem:[#allocation29_spill] sm:$0xff] %v15145_v51  ;;  %7898 = vperm.xlu0 %9528, %v7867_v29   ;;  %7533 = vperm.xlu1 %9527, %v7488_v49   ;;  %v7669_v51 = vunpack.c.l.b16 %v14461_v13  ;;  %v15161_v29 = vpack.c.bf16 %v14506_v32, %v14583_v58  ;;  %v7673_v58 = vunpack.c.l.b16 %v14467_v54 }
 0xdc1   :  { %v7873_v40 = vunpack.c.h.b16 %v15161_v29 }
 0xdc2   :  { %v15153_v20 = vpop.permute.xlu0 %6687  ;;  %v15155_v23 = vpop.permute.xlu1 %6612 }
 0xdc3   :  { %18102 = vst [vmem:[#allocation34_spill] sm:$0xff] %v15153_v20  ;;  %18103 = vst [vmem:[#allocation163_spill] sm:$0xff] %v15155_v23  ;;  %7904 = vperm.xlu0 %9528, %v7869_v26   ;;  %7684 = vperm.xlu1 %9527, %v7667_v10   ;;  %v15171_v26 = vpack.c.bf16 %v14511_v63, %v14593_v36  ;;  %v7675_v36 = vunpack.c.l.b16 %v14469_v38 }
 0xdc5   :  { %v7875_v32 = vunpack.c.h.b16 %v15171_v26 }
 0xdc6   :  { %v15163_v49 = vpop.permute.xlu0 %6693  ;;  %v15165_v7 = vpop.permute.xlu1 %6618 }
 0xdc7   :  { %18104 = vst [vmem:[#allocation54_spill] sm:$0xff] %v15163_v49  ;;  %18105 = vst [vmem:[#allocation165_spill] sm:$0xff] %v15165_v7  ;;  %7910 = vperm.xlu0 %9528, %v7871_v4   ;;  %7690 = vperm.xlu1 %9527, %v7669_v51   ;;  %v15181_v51 = vpack.c.bf16 %v14520_v53, %v14603_v12  ;;  %v7677_v12 = vunpack.c.l.b16 %v14475_v1 }
 0xdc9   :  { %v8054_v63 = vunpack.c.h.b16 %v15181_v51 }
 0xdca   :  { %v15173_v10 = vpop.permute.xlu0 %6699  ;;  %v15175_v13 = vpop.permute.xlu1 %6624 }
 0xdcb   :  { %18106 = vst [vmem:[#allocation31_spill] sm:$0xff] %v15173_v10  ;;  %18107 = vst [vmem:[#allocation167_spill] sm:$0xff] %v15175_v13  ;;  %7916 = vperm.xlu0 %9528, %v7873_v40   ;;  %7696 = vperm.xlu1 %9527, %v7671_v39   ;;  %v15191_v40 = vpack.c.bf16 %v14525_v56, %v14613_v18  ;;  %v7679_v56 = vunpack.c.l.b16 %v14481_v8 }
 0xdcd   :  { %v8056_v53 = vunpack.c.h.b16 %v15191_v40 }
 0xdce   :  { %v15183_v4 = vpop.permute.xlu0 %6705  ;;  %v15185_v45 = vpop.permute.xlu1 %6630 }
 0xdcf   :  { %18108 = vst [vmem:[#allocation134_spill] sm:$0xff] %v15183_v4  ;;  %18109 = vst [vmem:[#allocation169_spill] sm:$0xff] %v15185_v45  ;;  %7922 = vperm.xlu0 %9528, %v7875_v32   ;;  %7702 = vperm.xlu1 %9527, %v7673_v58   ;;  %v15201_v32 = vpack.c.bf16 %v14530_v22, %v14623_v52  ;;  %v7681_v22 = vunpack.c.l.b16 %v14487_v30 }
 0xdd1   :  { %v8058_v18 = vunpack.c.h.b16 %v15201_v32 }
 0xdd2   :  { %v15193_v39 = vpop.permute.xlu0 %6711  ;;  %v15195_v54 = vpop.permute.xlu1 %6636 }
 0xdd3   :  { %18110 = vst [vmem:[#allocation33_spill] sm:$0xff] %v15193_v39  ;;  %18111 = vst [vmem:[#allocation171_spill] sm:$0xff] %v15195_v54  ;;  %8073 = vperm.xlu0 %9528, %v8054_v63   ;;  %7708 = vperm.xlu1 %9527, %v7675_v36   ;;  %v15211_v63 = vpack.c.bf16 %v14535_v2, %v14637_v21  ;;  %v7860_v21 = vunpack.c.l.b16 %v14489_v46 }
 0xdd5   :  { %v8060_v52 = vunpack.c.h.b16 %v15211_v63 }
 0xdd6   :  { %v15203_v58 = vpop.permute.xlu0 %6717  ;;  %v15205_v38 = vpop.permute.xlu1 %6642 }
 0xdd7   :  { %18112 = vst [vmem:[#allocation136_spill] sm:$0xff] %v15203_v58  ;;  %18113 = vst [vmem:[#allocation173_spill] sm:$0xff] %v15205_v38  ;;  %8079 = vperm.xlu0 %9528, %v8056_v53   ;;  %7714 = vperm.xlu1 %9527, %v7677_v12   ;;  %v15221_v53 = vpack.c.bf16 %v14540_v6, %v14655_v59  ;;  %v7862_v59 = vunpack.c.l.b16 %v14491_v3 }
 0xdd9   :  { %v8062_v2 = vunpack.c.h.b16 %v15221_v53 }
 0xdda   :  { %v15213_v36 = vpop.permute.xlu0 %6723  ;;  %v15215_v1 = vpop.permute.xlu1 %6648 }
 0xddb   :  { %18114 = vst [vmem:[#allocation36_spill] sm:$0xff] %v15213_v36  ;;  %18115 = vst [vmem:[#allocation175_spill] sm:$0xff] %v15215_v1  ;;  %8085 = vperm.xlu0 %9528, %v8058_v18   ;;  %7720 = vperm.xlu1 %9527, %v7679_v56   ;;  %v15231_v18 = vpack.c.bf16 %v14545_v42, %v14669_v24  ;;  %v7864_v24 = vunpack.c.l.b16 %v14493_v28 }
 0xddd   :  { %v8064_v6 = vunpack.c.h.b16 %v15231_v18 }
 0xdde   :  { %v15223_v12 = vpop.permute.xlu0 %6729  ;;  %v15225_v8 = vpop.permute.xlu1 %6654 }
 0xddf   :  { %18116 = vst [vmem:[#allocation179_spill] sm:$0xff] %v15223_v12  ;;  %18117 = vst [vmem:[#allocation131_spill] sm:$0xff] %v15225_v8  ;;  %8091 = vperm.xlu0 %9528, %v8060_v52   ;;  %7726 = vperm.xlu1 %9527, %v7681_v22   ;;  %v15241_v52 = vpack.c.bf16 %v14550_v37, %v14683_v44  ;;  %v7866_v44 = vunpack.c.l.b16 %v14495_v14 }
 0xde1   :  { %v8066_v42 = vunpack.c.h.b16 %v15241_v52 }
 0xde2   :  { %v15233_v56 = vpop.permute.xlu0 %6735  ;;  %v15235_v30 = vpop.permute.xlu1 %6660 }
 0xde3   :  { %18118 = vst [vmem:[#allocation141_spill] sm:$0xff] %v15233_v56  ;;  %18119 = vst [vmem:[#allocation45_spill] sm:$0xff] %v15235_v30  ;;  %8097 = vperm.xlu0 %9528, %v8062_v2   ;;  %7877 = vperm.xlu1 %9527, %v7860_v21   ;;  %v15251_v2 = vpack.c.bf16 %v14555_v57, %v14697_v5  ;;  %v7868_v5 = vunpack.c.l.b16 %v14497_v62 }
 0xde5   :  { %v8068_v37 = vunpack.c.h.b16 %v15251_v2 }
 0xde6   :  { %v15243_v22 = vpop.permute.xlu0 %6741  ;;  %v15245_v46 = vpop.permute.xlu1 %6666 }
 0xde7   :  { %18120 = vst [vmem:[#allocation25_spill] sm:$0xff] %v15243_v22  ;;  %18121 = vst [vmem:[#allocation150_spill] sm:$0xff] %v15245_v46  ;;  %8103 = vperm.xlu0 %9528, %v8064_v6   ;;  %7883 = vperm.xlu1 %9527, %v7862_v59   ;;  %v15261_v6 = vpack.c.bf16 %v14564_v19, %v14711_v55  ;;  %v7870_v55 = vunpack.c.l.b16 %v15151_v16 }
 0xde9   :  { %v8247_v57 = vunpack.c.h.b16 %v15261_v6 }
 0xdea   :  { %v15253_v21 = vpop.permute.xlu0 %6747  ;;  %v15255_v3 = vpop.permute.xlu1 %6672 }
 0xdeb   :  { %18122 = vst [vmem:[#allocation28_spill] sm:$0xff] %v15253_v21  ;;  %18123 = vst [vmem:[#allocation161_spill] sm:$0xff] %v15255_v3  ;;  %8109 = vperm.xlu0 %9528, %v8066_v42   ;;  %7889 = vperm.xlu1 %9527, %v7864_v24   ;;  %v15271_v42 = vpack.c.bf16 %v14569_v15, %v14725_v48  ;;  %v7872_v48 = vunpack.c.l.b16 %v15161_v29 }
 0xded   :  { %v8249_v19 = vunpack.c.h.b16 %v15271_v42 }
 0xdee   :  { %v15263_v59 = vpop.permute.xlu0 %6753  ;;  %v15265_v28 = vpop.permute.xlu1 %6678 }
 0xdef   :  { %18124 = vst [vmem:[#allocation128_spill] sm:$0xff] %v15263_v59  ;;  %18125 = vst [vmem:[#allocation166_spill] sm:$0xff] %v15265_v28  ;;  %8115 = vperm.xlu0 %9528, %v8068_v37   ;;  %7895 = vperm.xlu1 %9527, %v7866_v44   ;;  %v15281_v37 = vpack.c.bf16 %v14579_v9, %v14739_v50  ;;  %v7874_v50 = vunpack.c.l.b16 %v15171_v26 }
 0xdf1   :  { %v8251_v15 = vunpack.c.h.b16 %v15281_v37 }
 0xdf2   :  { %v15273_v24 = vpop.permute.xlu1 %6684  ;;  %v15275_v14 = vpop.permute.xlu0 %7494 }
 0xdf3   :  { %18126 = vst [vmem:[#allocation52_spill] sm:$0xff] %v15273_v24  ;;  %8266 = vperm.xlu0 %9528, %v8247_v57   ;;  %7901 = vperm.xlu1 %9527, %v7868_v5   ;;  %v18128_v57 = vld [vmem:[#allocation119_spill] sm:$0xff] }
 0xdf4   :  { %v15291_v5 = vpack.c.bf16 %v18128_v57, %v14753_v31  ;;  %v8053_v57 = vunpack.c.l.b16 %v15181_v51 }
 0xdf6   :  { %v15283_v44 = vpop.permute.xlu1 %6690  ;;  %v15285_v62 = vpop.permute.xlu0 %7500  ;;  %v8253_v9 = vunpack.c.h.b16 %v15291_v5 }
 0xdf7   :  { %18127 = vst [vmem:[#allocation170_spill] sm:$0xff] %v15283_v44  ;;  %8272 = vperm.xlu0 %9528, %v8249_v19   ;;  %7907 = vperm.xlu1 %9527, %v7870_v55   ;;  %v18130_v19 = vld [vmem:[#allocation158_spill] sm:$0xff]  ;;  %v18131_v55 = vld [vmem:[#allocation121_spill] sm:$0xff]  ;;  %v18160_v44 = vld [vmem:[#allocation84_spill] sm:$0xff] }
 0xdf8   :  { %v15301_v39 = vpack.c.bf16 %v18131_v55, %v18130_v19  ;;  %v8055_v55 = vunpack.c.l.b16 %v15191_v40 }
 0xdfa   :  { %v15293_v59 = vpop.permute.xlu1 %6696  ;;  %v15295_v16 = vpop.permute.xlu0 %7506  ;;  %v8255_v31 = vunpack.c.h.b16 %v15301_v39 }
 0xdfb   :  { %18129 = vst [vmem:[#allocation174_spill] sm:$0xff] %v15293_v59  ;;  %8278 = vperm.xlu0 %9528, %v8251_v15   ;;  %7913 = vperm.xlu1 %9527, %v7872_v48   ;;  %v18133_v15 = vld [vmem:[#allocation87_spill] sm:$0xff] }
 0xdfc   :  { %v18134_v48 = vld [vmem:[#allocation123_spill] sm:$0xff] }
 0xdfd   :  { %v15311_v4 = vpack.c.bf16 %v18134_v48, %v18133_v15  ;;  %v8057_v48 = vunpack.c.l.b16 %v15201_v32 }
 0xdfe   :  { %v15303_v21 = vpop.permute.xlu1 %6702  ;;  %v15305_v29 = vpop.permute.xlu0 %7512 }
 0xdff   :  { %18132 = vst [vmem:[#allocation178_spill] sm:$0xff] %v15303_v21  ;;  %8284 = vperm.xlu0 %9528, %v8253_v9   ;;  %7919 = vperm.xlu1 %9527, %v7874_v50   ;;  %v8257_v19 = vunpack.c.h.b16 %v15311_v4  ;;  %v18136_v9 = vld [vmem:[#allocation89_spill] sm:$0xff] }
 0xe00   :  { %v18137_v50 = vld [vmem:[#allocation93_spill] sm:$0xff] }
 0xe01   :  { %v15321_v22 = vpack.c.bf16 %v18137_v50, %v18136_v9  ;;  %v8059_v50 = vunpack.c.l.b16 %v15211_v63 }
 0xe02   :  { %v15313_v30 = vpop.permute.xlu1 %6708  ;;  %v15315_v26 = vpop.permute.xlu0 %7518 }
 0xe03   :  { %18135 = vst [vmem:[#allocation35_spill] sm:$0xff] %v15313_v30  ;;  %8290 = vperm.xlu0 %9528, %v8255_v31   ;;  %8070 = vperm.xlu1 %9527, %v8053_v57   ;;  %v8259_v15 = vunpack.c.h.b16 %v15321_v22  ;;  %v18139_v31 = vld [vmem:[#allocation91_spill] sm:$0xff]  ;;  %v18140_v57 = vld [vmem:[#allocation129_spill] sm:$0xff] }
 0xe04   :  { %v15331_v30 = vpack.c.bf16 %v18140_v57, %v18139_v31  ;;  %v8061_v57 = vunpack.c.l.b16 %v15221_v53 }
 0xe06   :  { %v15323_v23 = vpop.permute.xlu1 %6714  ;;  %v15325_v51 = vpop.permute.xlu0 %7524  ;;  %v8261_v9 = vunpack.c.h.b16 %v15331_v30 }
 0xe07   :  { %18138 = vst [vmem:[#allocation133_spill] sm:$0xff] %v15323_v23  ;;  %8296 = vperm.xlu0 %9528, %v8257_v19   ;;  %8076 = vperm.xlu1 %9527, %v8055_v55   ;;  %v18142_v19 = vld [vmem:[#allocation120_spill] sm:$0xff]  ;;  %v18143_v55 = vld [vmem:[#allocation127_spill] sm:$0xff] }
 0xe08   :  { %v15341_v21 = vpack.c.bf16 %v18143_v55, %v18142_v19  ;;  %v8063_v55 = vunpack.c.l.b16 %v15231_v18 }
 0xe0a   :  { %v15333_v10 = vpop.permute.xlu1 %6720  ;;  %v15335_v40 = vpop.permute.xlu0 %7530  ;;  %v8440_v31 = vunpack.c.h.b16 %v15341_v21 }
 0xe0b   :  { %18141 = vst [vmem:[#allocation50_spill] sm:$0xff] %v15333_v10  ;;  %8302 = vperm.xlu0 %9528, %v8259_v15   ;;  %8082 = vperm.xlu1 %9527, %v8057_v48   ;;  %v18145_v15 = vld [vmem:[#allocation109_spill] sm:$0xff]  ;;  %v18146_v48 = vld [vmem:[#allocation43_spill] sm:$0xff] }
 0xe0c   :  { %v15351_v56 = vpack.c.bf16 %v18146_v48, %v18145_v15  ;;  %v8065_v48 = vunpack.c.l.b16 %v15241_v52 }
 0xe0e   :  { %v15343_v8 = vpop.permute.xlu1 %6726  ;;  %v15345_v32 = vpop.permute.xlu0 %7536  ;;  %v8442_v19 = vunpack.c.h.b16 %v15351_v56 }
 0xe0f   :  { %18144 = vst [vmem:[#allocation30_spill] sm:$0xff] %v15343_v8  ;;  %8308 = vperm.xlu0 %9528, %v8261_v9   ;;  %8088 = vperm.xlu1 %9527, %v8059_v50   ;;  %v18148_v9 = vld [vmem:[#allocation94_spill] sm:$0xff]  ;;  %v18149_v50 = vld [vmem:[#allocation47_spill] sm:$0xff]  ;;  %v18162_v8 = vld [vmem:[#allocation217_spill] sm:$0xff] }
 0xe10   :  { %v15361_v59 = vpack.c.bf16 %v18149_v50, %v18148_v9  ;;  %v8067_v50 = vunpack.c.l.b16 %v15251_v2 }
 0xe12   :  { %v15353_v49 = vpop.permute.xlu1 %6732  ;;  %v15355_v63 = vpop.permute.xlu0 %7687  ;;  %v8444_v15 = vunpack.c.h.b16 %v15361_v59 }
 0xe13   :  { %18147 = vst [vmem:[#allocation135_spill] sm:$0xff] %v15353_v49  ;;  %8459 = vperm.xlu0 %9528, %v8440_v31   ;;  %8094 = vperm.xlu1 %9527, %v8061_v57   ;;  %v18151_v31 = vld [vmem:[#allocation159_spill] sm:$0xff] }
 0xe14   :  { %v15371_v57 = vpack.c.bf16 %v18151_v31, %v14869_v35  ;;  %v8246_v31 = vunpack.c.l.b16 %v15261_v6  ;;  %v18161_v6 = vld [vmem:[#allocation19_spill] sm:$0xff] }
 0xe15   :  { %v7545_v36 = vrot.slane %v15275_v14, %v18161_v6  ;;  %v18164_v14 = vld [vmem:[#allocation219_spill] sm:$0xff] }
 0xe16   :  { %v15363_v1 = vpop.permute.xlu1 %6738  ;;  %v15365_v53 = vpop.permute.xlu0 %7693  ;;  %v8446_v9 = vunpack.c.h.b16 %v15371_v57  ;;  %v7555_v24 = vrot.slane %v15285_v62, %v18164_v14  ;;  %v18168_v62 = vld [vmem:[#allocation224_spill] sm:$0xff] }
 0xe17   :  { %18150 = vst [vmem:[#allocation125_spill] sm:$0xff] %v15363_v1  ;;  %8465 = vperm.xlu0 %9528, %v8442_v19   ;;  %8100 = vperm.xlu1 %9527, %v8063_v55   ;;  %v18153_v19 = vld [vmem:[#allocation147_spill] sm:$0xff]  ;;  %v18154_v55 = vld [vmem:[#allocation180_spill] sm:$0xff]  ;;  %v7565_v58 = vrot.slane %v15295_v16, %v18168_v62 }
 0xe18   :  { %v15381_v1 = vpack.c.bf16 %v18154_v55, %v18153_v19  ;;  %v18158_v19 = vld [vmem:[#allocation218_spill] sm:$0xff]  ;;  %v18172_v16 = vld [vmem:[#allocation227_spill] sm:$0xff] }
 0xe19   :  { %v7575_v17 = vrot.slane %v15305_v29, %v18172_v16  ;;  %v18178_v29 = vld [vmem:[#allocation229_spill] sm:$0xff] }
 0xe1a   :  { %v15373_v12 = vpop.permute.xlu1 %6744  ;;  %v15375_v18 = vpop.permute.xlu0 %7699  ;;  %v8448_v35 = vunpack.c.h.b16 %v15381_v1  ;;  %v7585_v28 = vrot.slane %v15315_v26, %v18178_v29  ;;  %v18184_v26 = vld [vmem:[#allocation232_spill] sm:$0xff] }
 0xe1b   :  { %18152 = vst [vmem:[#allocation48_spill] sm:$0xff] %v15373_v12  ;;  %8471 = vperm.xlu0 %9528, %v8444_v15   ;;  %8106 = vperm.xlu1 %9527, %v8065_v48   ;;  %v18156_v15 = vld [vmem:[#allocation63_spill] sm:$0xff]  ;;  %v18157_v48 = vld [vmem:[#allocation130_spill] sm:$0xff]  ;;  %v7595_v3 = vrot.slane %v15325_v51, %v18184_v26 }
 0xe1c   :  { %v15391_v12 = vpack.c.bf16 %v18157_v48, %v18156_v15  ;;  %v18190_v51 = vld [vmem:[#allocation234_spill] sm:$0xff] }
 0xe1d   :  { %v7605_v13 = vrot.slane %v15335_v40, %v18190_v51  ;;  %v18194_v40 = vld [vmem:[#allocation122_spill] sm:$0xff] }
 0xe1e   :  { %v15383_v49 = vpop.permute.xlu1 %6750  ;;  %v15385_v52 = vpop.permute.xlu0 %7705 }
 0xe1f   :  { %18155 = vst [vmem:[#allocation39_spill] sm:$0xff] %v15383_v49  ;;  %8477 = vperm.xlu0 %9528, %v8446_v9   ;;  %8112 = vperm.xlu1 %9527, %v8067_v50   ;;  %v8450_v49 = vunpack.c.h.b16 %v15391_v12  ;;  %v8248_v9 = vunpack.c.l.b16 %v15271_v42  ;;  %v18159_v50 = vld [vmem:[#allocation68_spill] sm:$0xff] }
 0xe20   :  { %v15400_v38 = vpack.c.bf16 %v18160_v44, %v18159_v50  ;;  %v18163_v44 = vld [vmem:[#allocation114_spill] sm:$0xff] }
 0xe21   :  { %v15413_v50 = vpack.c.bf16 %v18163_v44, %v14929_v11  ;;  %v18166_v11 = vld [vmem:[#allocation152_spill] sm:$0xff] }
 0xe22   :  { %v15393_v20 = vpop.permute.xlu0 %7711  ;;  %v7492_v2 = vpop.permute.xlu1 %7491  ;;  %v8452_v42 = vunpack.c.h.b16 %v15400_v38 }
 0xe23   :  { %8483 = vperm.xlu0 %9528, %v8448_v35   ;;  %8263 = vperm.xlu1 %9527, %v8246_v31   ;;  %v7541_v55 = vrot.slane %v7492_v2, %v18158_v19  ;;  %v8250_v2 = vunpack.c.l.b16 %v15281_v37  ;;  %v8454_v37 = vunpack.c.h.b16 %v15413_v50 }
 0xe25   :  { %v7546_v35 = vsel %vm3830_vm1, %v7545_v36, %v7541_v55  ;;  %v8252_v55 = vunpack.c.l.b16 %v15291_v5 }
 0xe26   :  { %v15404_v15 = vpop.permute.xlu0 %7717  ;;  %v7498_v48 = vpop.permute.xlu1 %7497 }
 0xe27   :  { %v7550_v34 = vrot.slane %v7498_v48, %v18162_v8  ;;  %8489 = vperm.xlu0 %9528, %v8450_v49   ;;  %8269 = vperm.xlu1 %9527, %v8248_v9   ;;  %v18165_v49 = vld [vmem:[#allocation223_spill] sm:$0xff] }
 0xe29   :  { %v7551_v31 = vsel %vm3837_vm2, %v7550_v34, %v7546_v35  ;;  %v18167_v35 = vld [vmem:[#allocation145_spill] sm:$0xff] }
 0xe2a   :  { %v15417_v54 = vpop.permute.xlu0 %7723  ;;  %v7504_v48 = vpop.permute.xlu1 %7503  ;;  %v7556_v34 = vsel %vm3844_vm3, %v7555_v24, %v7551_v31  ;;  %v15426_v44 = vpack.c.bf16 %v18167_v35, %v18166_v11  ;;  %v18171_v11 = vld [vmem:[#allocation97_spill] sm:$0xff] }
 0xe2b   :  { %v7560_v9 = vrot.slane %v7504_v48, %v18165_v49  ;;  %8495 = vperm.xlu0 %9528, %v8452_v42   ;;  %8275 = vperm.xlu1 %9527, %v8250_v2   ;;  %v18169_v42 = vld [vmem:[#allocation226_spill] sm:$0xff] }
 0xe2c   :  { %v8633_v5 = vunpack.c.h.b16 %v15426_v44 }
 0xe2d   :  { %v7561_v36 = vsel %vm3851_vm4, %v7560_v9, %v7556_v34  ;;  %v8254_v9 = vunpack.c.l.b16 %v15301_v39  ;;  %v18170_v34 = vld [vmem:[#allocation41_spill] sm:$0xff] }
 0xe2e   :  { %v15430_v10 = vpop.permute.xlu0 %7729  ;;  %v7510_v48 = vpop.permute.xlu1 %7509  ;;  %v7566_v24 = vsel %vm3858_vm5, %v7565_v58, %v7561_v36  ;;  %v15439_v35 = vpack.c.bf16 %v18171_v11, %v18170_v34  ;;  %v18177_v34 = vld [vmem:[#allocation100_spill] sm:$0xff] }
 0xe2f   :  { %v7570_v2 = vrot.slane %v7510_v48, %v18169_v42  ;;  %8501 = vperm.xlu0 %9528, %v8454_v37   ;;  %8281 = vperm.xlu1 %9527, %v8252_v55   ;;  %v18173_v37 = vld [vmem:[#allocation228_spill] sm:$0xff] }
 0xe30   :  { %v8635_v39 = vunpack.c.h.b16 %v15439_v35 }
 0xe31   :  { %v7571_v31 = vsel %vm3865_vm6, %v7570_v2, %v7566_v24  ;;  %v8256_v2 = vunpack.c.l.b16 %v15311_v4  ;;  %v18176_v24 = vld [vmem:[#allocation22_spill] sm:$0xff] }
 0xe32   :  { %v15443_v23 = vpop.permute.xlu0 %7880  ;;  %v7516_v48 = vpop.permute.xlu1 %7515  ;;  %v7576_v58 = vsel %vm18174_vm9, %v7575_v17, %v7571_v31  ;;  %v15452_v11 = vpack.c.bf16 %v18177_v34, %v18176_v24  ;;  %v18183_v24 = vld [vmem:[#allocation103_spill] sm:$0xff]  ;;  %vm18187_vm9 = vcmask 851712  }
 0xe33   :  { %v7580_v55 = vrot.slane %v7516_v48, %v18173_v37  ;;  %8652 = vperm.xlu0 %9528, %v8633_v5   ;;  %8287 = vperm.xlu1 %9527, %v8254_v9   ;;  %v18179_v5 = vld [vmem:[#allocation230_spill] sm:$0xff] }
 0xe34   :  { %v8637_v4 = vunpack.c.h.b16 %v15452_v11 }
 0xe35   :  { %v7581_v36 = vsel %vm18175_vm10, %v7580_v55, %v7576_v58  ;;  %v8258_v55 = vunpack.c.l.b16 %v15321_v22  ;;  %v18182_v58 = vld [vmem:[#allocation200_spill] sm:$0xff]  ;;  %vm18198_vm10 = vmmov 0  }
 0xe36   :  { %v15456_v45 = vpop.permute.xlu0 %7886  ;;  %v7522_v48 = vpop.permute.xlu1 %7521  ;;  %v7586_v17 = vsel %vm18180_vm7, %v7585_v28, %v7581_v36  ;;  %v15465_v34 = vpack.c.bf16 %v18183_v24, %v18182_v58  ;;  %v18189_v58 = vld [vmem:[#allocation107_spill] sm:$0xff]  ;;  %vm18204_vm7 = vcmask 523712  }
 0xe37   :  { %v7590_v9 = vrot.slane %v7522_v48, %v18179_v5  ;;  %8658 = vperm.xlu0 %9528, %v8635_v39   ;;  %8293 = vperm.xlu1 %9527, %v8256_v2   ;;  %v18185_v39 = vld [vmem:[#allocation233_spill] sm:$0xff] }
 0xe38   :  { %v8639_v22 = vunpack.c.h.b16 %v15465_v34 }
 0xe39   :  { %v7591_v31 = vsel %vm18181_vm12, %v7590_v9, %v7586_v17  ;;  %v8260_v9 = vunpack.c.l.b16 %v15331_v30  ;;  %v18188_v17 = vld [vmem:[#allocation153_spill] sm:$0xff]  ;;  %vm18205_vm12 = vcmask 589312  }
 0xe3a   :  { %v15469_v46 = vpop.permute.xlu0 %7892  ;;  %v7528_v48 = vpop.permute.xlu1 %7527  ;;  %v7596_v28 = vsel %vm18186_vm11, %v7595_v3, %v7591_v31  ;;  %v15478_v24 = vpack.c.bf16 %v18189_v58, %v18188_v17  ;;  %v18192_v3 = vld [vmem:[#allocation222_spill] sm:$0xff]  ;;  %v8439_v17 = vunpack.c.l.b16 %v15341_v21  ;;  %v18193_v58 = vld [vmem:[#allocation80_spill] sm:$0xff]  ;;  %vm18208_vm11 = vcmask 654912  }
 0xe3b   :  { %v7600_v2 = vrot.slane %v7528_v48, %v18185_v39  ;;  %8664 = vperm.xlu0 %9528, %v8637_v4   ;;  %8299 = vperm.xlu1 %9527, %v8258_v55   ;;  %v18191_v4 = vld [vmem:[#allocation220_spill] sm:$0xff]  ;;  %v7615_v31 = vrot.slane %v15345_v32, %v18192_v3  ;;  %v15493_v25 = vpack.c.bf16 %v18194_v40, %v18193_v58 }
 0xe3c   :  { %v18195_v21 = vld [vmem:[#allocation204_spill] sm:$0xff] }
 0xe3d   :  { %v7601_v36 = vsel %vm18187_vm9, %v7600_v2, %v7596_v28  ;;  %v8641_v28 = vunpack.c.h.b16 %v15478_v24  ;;  %v8643_v32 = vunpack.c.h.b16 %v15493_v25  ;;  %v10264_v58 = vld [vmem:[#allocation5 + $0x80] ss:$8 sps:$4 sm:$0xff]   ;;  %vm18209_vm9 = vcmask 720512  }
 0xe3e   :  { %v15482_v7 = vpop.permute.xlu0 %7898  ;;  %v7534_v48 = vpop.permute.xlu1 %7533  ;;  %v7606_v2 = vsel %vm3914_vm13, %v7605_v13, %v7601_v36  ;;  %v8441_v36 = vunpack.c.l.b16 %v15351_v56 }
 0xe3f   :  { %v7610_v55 = vrot.slane %v7534_v48, %v18191_v4  ;;  %8670 = vperm.xlu0 %9528, %v8639_v22   ;;  %8305 = vperm.xlu1 %9527, %v8260_v9  }
 0xe41   :  { %v7611_v30 = vsel %vm3921_vm14, %v7610_v55, %v7606_v2  ;;  %v18196_v55 = vld [vmem:[#allocation124_spill] sm:$0xff] }
 0xe42   :  { %v7616_v33 = vsel %vm3928_vm15, %v7615_v31, %v7611_v30  ;;  %v15496_v48 = vpop.permute.xlu0 %7904  ;;  %v7685_v22 = vpop.permute.xlu1 %7684  ;;  %v15503_v2 = vpack.c.bf16 %v18196_v55, %v18195_v21  ;;  %v7738_v31 = vrot.slane %v15355_v63, %v18161_v6  ;;  %v7748_v55 = vrot.slane %v15365_v53, %v18164_v14  ;;  %v18200_v53 = vld [vmem:[#allocation205_spill] sm:$0xff] }
 0xe43   :  { %v7617_v9 = vpack.c.b16 %v7616_v33, %v7616_v33  ;;  %8676 = vperm.xlu0 %9528, %v8641_v28   ;;  %8456 = vperm.xlu1 %9527, %v8439_v17   ;;  %v7734_v13 = vrot.slane %v7685_v22, %v18158_v19  ;;  %v18197_v28 = vmov 0.0   ;;  %v8443_v22 = vunpack.c.l.b16 %v15361_v59 }
 0xe44   :  { %v8645_v63 = vunpack.c.h.b16 %v15503_v2 }
 0xe45   :  { %9337 = vmatmul.mubr.bf16.vlgmr.msra.gmra.mrb[64].mxu0 %v7617_v9  ;;  %v7739_v56 = vsel %vm3830_vm1, %v7738_v31, %v7734_v13  ;;  %v18199_v9 = vld [vmem:[#allocation115_spill] sm:$0xff] }
 0xe46   :  { %v15507_v30 = vpop.permute.xlu0 %7910  ;;  %9341 = vmatpush3.bf16.msra.mxu0 %v10264_v58  ;;  %v7691_v33 = vpop.permute.xlu1 %7690  ;;  %9356 = vmatprep.mubr.msk.bf16.mxu0 %vm18198_vm10, %v18197_v28  ;;  %v15519_v21 = vpack.c.bf16 %v18199_v9, %v15021_v27  ;;  %v7758_v9 = vrot.slane %v15375_v18, %v18168_v62  ;;  %v18202_v18 = vld [vmem:[#allocation186_spill] sm:$0xff] }
 0xe47   :  { %v7743_v17 = vrot.slane %v7691_v33, %v18162_v8  ;;  %8682 = vperm.xlu0 %9528, %v8643_v32   ;;  %8462 = vperm.xlu1 %9527, %v8441_v36   ;;  %v10265_v32 = vld [vmem:[#allocation5 + $0x90] ss:$8 sps:$4 sm:$0xff]   ;;  %v8445_v33 = vunpack.c.l.b16 %v15371_v57 }
 0xe48   :  { %9342 = vmatprep.subr.bf16.mxu0 %v18197_v28  ;;  %v8647_v27 = vunpack.c.h.b16 %v15519_v21 }
 0xe49   :  { %v7744_v40 = vsel %vm3837_vm2, %v7743_v17, %v7739_v56  ;;  %v18201_v17 = vld [vmem:[#allocation73_spill] sm:$0xff] }
 0xe4a   :  { %v15523_v58 = vpop.permute.xlu0 %7916  ;;  %9343 = vmatpush3.bf16.msra.mxu0 %v10265_v32  ;;  %v7697_v13 = vpop.permute.xlu1 %7696  ;;  %v7749_v31 = vsel %vm3844_vm3, %v7748_v55, %v7744_v40  ;;  %v15533_v56 = vpack.c.bf16 %v18201_v17, %v18200_v53  ;;  %v7768_v17 = vrot.slane %v15385_v52, %v18172_v16  ;;  %v18206_v52 = vld [vmem:[#allocation23_spill] sm:$0xff] }
 0xe4b   :  { %v7753_v36 = vrot.slane %v7697_v13, %v18165_v49  ;;  %8688 = vperm.xlu0 %9528, %v8645_v63   ;;  %8468 = vperm.xlu1 %9527, %v8443_v22   ;;  %v10266_v63 = vld [vmem:[#allocation5 + $0xa0] ss:$8 sps:$4 sm:$0xff]  }
 0xe4c   :  { %9344 = vmatprep.subr.bf16.mxu0 %v18197_v28  ;;  %v8826_v13 = vunpack.c.h.b16 %v15533_v56 }
 0xe4d   :  { %v7754_v59 = vsel %vm3851_vm4, %v7753_v36, %v7749_v31  ;;  %v8447_v36 = vunpack.c.l.b16 %v15381_v1  ;;  %v18203_v31 = vld [vmem:[#allocation21_spill] sm:$0xff] }
 0xe4e   :  { %v15537_v32 = vpop.permute.xlu0 %7922  ;;  %9345 = vmatpush3.bf16.msra.mxu0 %v10266_v63  ;;  %v7703_v40 = vpop.permute.xlu1 %7702  ;;  %v7759_v55 = vsel %vm3858_vm5, %v7758_v9, %v7754_v59  ;;  %v15547_v53 = vpack.c.bf16 %v18203_v31, %v18202_v18  ;;  %v7778_v31 = vrot.slane %v15393_v20, %v18178_v29  ;;  %v18210_v20 = vld [vmem:[#allocation199_spill] sm:$0xff] }
 0xe4f   :  { %v7763_v22 = vrot.slane %v7703_v40, %v18169_v42  ;;  %8694 = vperm.xlu0 %9528, %v8647_v27   ;;  %8474 = vperm.xlu1 %9527, %v8445_v33   ;;  %v10267_v27 = vld [vmem:[#allocation5 + $0xb0] ss:$8 sps:$4 sm:$0xff]  }
 0xe50   :  { %9346 = vmatprep.subr.bf16.mxu0 %v18197_v28  ;;  %v8828_v40 = vunpack.c.h.b16 %v15547_v53 }
 0xe51   :  { %v7764_v57 = vsel %vm3865_vm6, %v7763_v22, %v7759_v55  ;;  %v8449_v22 = vunpack.c.l.b16 %v15391_v12  ;;  %v18207_v55 = vld [vmem:[#allocation181_spill] sm:$0xff] }
 0xe52   :  { %v15551_v63 = vpop.permute.xlu0 %8073  ;;  %9347 = vmatpush3.bf16.msra.mxu0 %v10267_v27  ;;  %v7709_v59 = vpop.permute.xlu1 %7708  ;;  %v7769_v9 = vsel %vm18204_vm7, %v7768_v17, %v7764_v57  ;;  %v15561_v18 = vpack.c.bf16 %v18207_v55, %v18206_v52  ;;  %v7788_v55 = vrot.slane %v15404_v15, %v18184_v26  ;;  %vm18212_vm7 = vcmask 786112   ;;  %v18214_v15 = vld [vmem:[#allocation201_spill] sm:$0xff] }
 0xe53   :  { %v7773_v33 = vrot.slane %v7709_v59, %v18173_v37  ;;  %8845 = vperm.xlu0 %9528, %v8826_v13   ;;  %8480 = vperm.xlu1 %9527, %v8447_v36   ;;  %v10268_v13 = vld [vmem:[#allocation5 + $0xc0] ss:$8 sps:$4 sm:$0xff]  }
 0xe54   :  { %9348 = vmatprep.subr.bf16.mxu0 %v18197_v28  ;;  %v8830_v59 = vunpack.c.h.b16 %v15561_v18 }
 0xe55   :  { %v7774_v1 = vsel %vm18205_vm12, %v7773_v33, %v7769_v9  ;;  %v8451_v33 = vunpack.c.l.b16 %v15400_v38  ;;  %v18211_v9 = vld [vmem:[#allocation71_spill] sm:$0xff]  ;;  %vm18213_vm12 = vcmask 851712  }
 0xe56   :  { %v15565_v27 = vpop.permute.xlu0 %8079  ;;  %9349 = vmatpush3.bf16.msra.mxu0 %v10268_v13  ;;  %v7715_v57 = vpop.permute.xlu1 %7714  ;;  %v7779_v17 = vsel %vm18208_vm11, %v7778_v31, %v7774_v1  ;;  %v15575_v52 = vpack.c.bf16 %v18211_v9, %v18210_v20  ;;  %v7798_v9 = vrot.slane %v15417_v54, %v18190_v51  ;;  %vm18222_vm11 = vcmask 523712  }
 0xe57   :  { %v7783_v36 = vrot.slane %v7715_v57, %v18179_v5  ;;  %8851 = vperm.xlu0 %9528, %v8828_v40   ;;  %8486 = vperm.xlu1 %9527, %v8449_v22   ;;  %v10269_v40 = vld [vmem:[#allocation5 + $0xd0] ss:$8 sps:$4 sm:$0xff]  }
 0xe58   :  { %9350 = vmatprep.subr.bf16.mxu0 %v18197_v28  ;;  %v8832_v57 = vunpack.c.h.b16 %v15575_v52 }
 0xe59   :  { %v7784_v12 = vsel %vm18209_vm9, %v7783_v36, %v7779_v17  ;;  %v8453_v36 = vunpack.c.l.b16 %v15413_v50  ;;  %v18215_v17 = vld [vmem:[#allocation148_spill] sm:$0xff]  ;;  %vm18223_vm9 = vcmask 589312  }
 0xe5a   :  { %v15579_v13 = vpop.permute.xlu0 %8085  ;;  %9351 = vmatpush3.bf16.msra.mxu0 %v10269_v40  ;;  %v7721_v1 = vpop.permute.xlu1 %7720  ;;  %v7789_v31 = vsel %vm18212_vm7, %v7788_v55, %v7784_v12  ;;  %v15589_v20 = vpack.c.bf16 %v18215_v17, %v18214_v15  ;;  %v7808_v55 = vrot.slane %v15430_v10, %v18192_v3  ;;  %vm18224_vm7 = vcmask 654912  }
 0xe5b   :  { %v7793_v22 = vrot.slane %v7721_v1, %v18185_v39  ;;  %8857 = vperm.xlu0 %9528, %v8830_v59   ;;  %8492 = vperm.xlu1 %9527, %v8451_v33   ;;  %v10270_v59 = vld [vmem:[#allocation5 + $0xe0] ss:$8 sps:$4 sm:$0xff]  }
 0xe5c   :  { %9352 = vmatprep.subr.bf16.mxu0 %v18197_v28  ;;  %v8834_v54 = vunpack.c.h.b16 %v15589_v20 }
 0xe5d   :  { %v7794_v38 = vsel %vm18213_vm12, %v7793_v22, %v7789_v31  ;;  %v8632_v22 = vunpack.c.l.b16 %v15426_v44  ;;  %v18216_v31 = vld [vmem:[#allocation155_spill] sm:$0xff]  ;;  %v8634_v44 = vunpack.c.l.b16 %v15439_v35  ;;  %v10272_v35 = vld [vmem:[#allocation5 + $0x100] ss:$8 sps:$4 sm:$0xff]   ;;  %vm18225_vm12 = vcmask 720512  }
 0xe5e   :  { %v15593_v40 = vpop.permute.xlu0 %8091  ;;  %9353 = vmatpush3.bf16.msra.mxu0 %v10270_v59  ;;  %v7727_v12 = vpop.permute.xlu1 %7726  ;;  %v7799_v50 = vsel %vm3914_vm13, %v7798_v9, %v7794_v38  ;;  %v15605_v15 = vpack.c.bf16 %v18216_v31, %v15081_v47  ;;  %v18217_v59 = vld [vmem:[#allocation194_spill] sm:$0xff]  ;;  %v18220_v31 = vld [vmem:[#allocation81_spill] sm:$0xff] }
 0xe5f   :  { %v7803_v33 = vrot.slane %v7727_v12, %v18191_v4  ;;  %8863 = vperm.xlu0 %9528, %v8832_v57   ;;  %8498 = vperm.xlu1 %9527, %v8453_v36   ;;  %v10271_v57 = vld [vmem:[#allocation5 + $0xf0] ss:$8 sps:$4 sm:$0xff]  }
 0xe60   :  { %9354 = vmatprep.subr.bf16.mxu0 %v18197_v28  ;;  %v8836_v47 = vunpack.c.h.b16 %v15605_v15  ;;  %v18218_v12 = vld [vmem:[#allocation59_spill] sm:$0xff] }
 0xe61   :  { %v7804_v1 = vsel %vm3921_vm14, %v7803_v33, %v7799_v50  ;;  %v15616_v33 = vpack.c.bf16 %v18218_v12, %v18217_v59  ;;  %v18219_v50 = vld [vmem:[#allocation117_spill] sm:$0xff]  ;;  %v8636_v12 = vunpack.c.l.b16 %v15452_v11 }
 0xe62   :  { %v15607_v17 = vpop.permute.xlu0 %8097  ;;  %9355 = vmatpush3.bf16.msra.mxu0 %v10271_v57  ;;  %v7878_v36 = vpop.permute.xlu1 %7877  ;;  %v7809_v10 = vsel %vm3928_vm15, %v7808_v55, %v7804_v1  ;;  %v15620_v57 = vmul.f32 %v18220_v31, %v18219_v50  ;;  %v18221_v55 = vld [vmem:[#allocation67_spill] sm:$0xff]  ;;  %v7941_v31 = vrot.slane %v15456_v45, %v18164_v14  ;;  %v7951_v45 = vrot.slane %v15469_v46, %v18168_v62 }
 0xe63   :  { %8869 = vperm.xlu0 %9528, %v8834_v54   ;;  %8649 = vperm.xlu1 %9527, %v8632_v22   ;;  %v7810_v38 = vpack.c.b16 %v7809_v10, %v7809_v10  ;;  %v7927_v9 = vrot.slane %v7878_v36, %v18158_v19  ;;  %v6248_v1 = vmul.f32 %v18221_v55, %v18219_v50 }
 0xe64   :  { %9360 = vmatprep.subr.bf16.mxu0 %v18197_v28  ;;  %v7931_v54 = vrot.slane %v15443_v23, %v18161_v6  ;;  %v8838_v23 = vunpack.c.h.b16 %v15616_v33  ;;  %v7961_v46 = vrot.slane %v15482_v7, %v18172_v16  ;;  %v7971_v7 = vrot.slane %v15496_v48, %v18178_v29 }
 0xe65   :  { %9357 = vmatmul.mubr.bf16.vlgmr.msra.gmra.mrb[68].mxu0 %v7810_v38  ;;  %v15637_v50 = vpack.c.bf16 %v6248_v1, %v15620_v57 }
 0xe66   :  { %v15626_v22 = vpop.permute.xlu0 %8103  ;;  %9361 = vmatpush3.bf16.msra.mxu0 %v10272_v35  ;;  %v7884_v36 = vpop.permute.xlu1 %7883  ;;  %9376 = vmatprep.mubr.msk.bf16.mxu0 %vm18198_vm10, %v18197_v28  ;;  %v7932_v38 = vsel %vm3830_vm1, %v7931_v54, %v7927_v9 }
 0xe67   :  { %v7936_v10 = vrot.slane %v7884_v36, %v18162_v8  ;;  %8875 = vperm.xlu0 %9528, %v8836_v47   ;;  %8655 = vperm.xlu1 %9527, %v8634_v44   ;;  %v10273_v47 = vld [vmem:[#allocation5 + $0x110] ss:$8 sps:$4 sm:$0xff]   ;;  %v8840_v35 = vunpack.c.h.b16 %v15637_v50  ;;  %v8638_v36 = vunpack.c.l.b16 %v15465_v34  ;;  %v8640_v34 = vunpack.c.l.b16 %v15478_v24 }
 0xe68   :  { %9362 = vmatprep.subr.bf16.mxu0 %v18197_v28  ;;  %v8642_v24 = vunpack.c.l.b16 %v15493_v25  ;;  %v7981_v25 = vrot.slane %v15507_v30, %v18184_v26 }
 0xe69   :  { %v7937_v59 = vsel %vm3837_vm2, %v7936_v10, %v7932_v38  ;;  %v10274_v38 = vld [vmem:[#allocation5 + $0x120] ss:$8 sps:$4 sm:$0xff]  }
 0xe6a   :  { %v15641_v55 = vpop.permute.xlu0 %8109  ;;  %9363 = vmatpush3.bf16.msra.mxu0 %v10273_v47  ;;  %v7890_v44 = vpop.permute.xlu1 %7889  ;;  %v7942_v54 = vsel %vm3844_vm3, %v7941_v31, %v7937_v59 }
 0xe6b   :  { %v7946_v9 = vrot.slane %v7890_v44, %v18165_v49  ;;  %8881 = vperm.xlu0 %9528, %v8838_v23   ;;  %8661 = vperm.xlu1 %9527, %v8636_v12   ;;  %v10275_v44 = vld [vmem:[#allocation5 + $0x130] ss:$8 sps:$4 sm:$0xff]  }
 0xe6c   :  { %9364 = vmatprep.subr.bf16.mxu0 %v18197_v28 }
 0xe6d   :  { %v7947_v11 = vsel %vm3851_vm4, %v7946_v9, %v7942_v54 }
 0xe6e   :  { %v15651_v10 = vpop.permute.xlu0 %8115  ;;  %9365 = vmatpush3.bf16.msra.mxu0 %v10274_v38  ;;  %v7896_v47 = vpop.permute.xlu1 %7895  ;;  %v7952_v59 = vsel %vm3858_vm5, %v7951_v45, %v7947_v11  ;;  %v10276_v45 = vld [vmem:[#allocation5 + $0x140] ss:$8 sps:$4 sm:$0xff]  }
 0xe6f   :  { %v7956_v23 = vrot.slane %v7896_v47, %v18169_v42  ;;  %8887 = vperm.xlu0 %9528, %v8840_v35   ;;  %8667 = vperm.xlu1 %9527, %v8638_v36  }
 0xe70   :  { %9366 = vmatprep.subr.bf16.mxu0 %v18197_v28 }
 0xe71   :  { %v7957_v12 = vsel %vm3865_vm6, %v7956_v23, %v7952_v59  ;;  %v8644_v59 = vunpack.c.l.b16 %v15503_v2  ;;  %v7991_v2 = vrot.slane %v15523_v58, %v18190_v51 }
 0xe72   :  { %v15660_v31 = vpop.permute.xlu0 %8266  ;;  %9367 = vmatpush3.bf16.msra.mxu0 %v10275_v44  ;;  %v7902_v9 = vpop.permute.xlu1 %7901  ;;  %v7962_v11 = vsel %vm18222_vm11, %v7961_v46, %v7957_v12  ;;  %v10277_v12 = vld [vmem:[#allocation5 + $0x150] ss:$8 sps:$4 sm:$0xff]   ;;  %vm18226_vm11 = vcmask 786112  }
 0xe73   :  { %v7966_v54 = vrot.slane %v7902_v9, %v18173_v37  ;;  %6759 = vperm.xlu0 %9528, %v6248_v1   ;;  %8673 = vperm.xlu1 %9527, %v8640_v34  }
 0xe74   :  { %9368 = vmatprep.subr.bf16.mxu0 %v18197_v28 }
 0xe75   :  { %v7967_v35 = vsel %vm18223_vm9, %v7966_v54, %v7962_v11  ;;  %vm18227_vm9 = vcmask 851712   ;;  %v8646_v54 = vunpack.c.l.b16 %v15519_v21  ;;  %v10278_v11 = vld [vmem:[#allocation5 + $0x160] ss:$8 sps:$4 sm:$0xff]  }
 0xe76   :  { %v15669_v36 = vpop.permute.xlu0 %8272  ;;  %9369 = vmatpush3.bf16.msra.mxu0 %v10276_v45  ;;  %v7908_v38 = vpop.permute.xlu1 %7907  ;;  %v7972_v1 = vsel %vm18224_vm7, %v7971_v7, %v7967_v35  ;;  %v8001_v7 = vrot.slane %v15537_v32, %v18192_v3  ;;  %v8827_v32 = vunpack.c.l.b16 %v15547_v53  ;;  %vm18228_vm7 = vcmask 523712  }
 0xe77   :  { %v7976_v47 = vrot.slane %v7908_v38, %v18179_v5  ;;  %8679 = vperm.xlu1 %9527, %v8642_v24   ;;  %9370 = vmatprep.subr.bf16.mxu0 %v18197_v28  ;;  %v8825_v38 = vunpack.c.l.b16 %v15533_v56 }
 0xe79   :  { %v7977_v23 = vsel %vm18225_vm12, %v7976_v47, %v7972_v1  ;;  %v10279_v1 = vld [vmem:[#allocation5 + $0x170] ss:$8 sps:$4 sm:$0xff]   ;;  %vm18229_vm12 = vcmask 589312  }
 0xe7a   :  { %v15678_v48 = vpop.permute.xlu0 %8278  ;;  %9371 = vmatpush3.bf16.msra.mxu0 %v10277_v12  ;;  %v7914_v34 = vpop.permute.xlu1 %7913  ;;  %v7982_v44 = vsel %vm18226_vm11, %v7981_v25, %v7977_v23  ;;  %v8124_v12 = vrot.slane %v15551_v63, %v18161_v6  ;;  %v8134_v63 = vrot.slane %v15565_v27, %v18164_v14  ;;  %vm18230_vm11 = vcmask 654912  }
 0xe7b   :  { %v7986_v46 = vrot.slane %v7914_v34, %v18185_v39  ;;  %8685 = vperm.xlu1 %9527, %v8644_v59   ;;  %9372 = vmatprep.subr.bf16.mxu0 %v18197_v28  ;;  %v10280_v34 = vld [vmem:[#allocation5 + $0x180] ss:$8 sps:$4 sm:$0xff]  }
 0xe7d   :  { %v7987_v9 = vsel %vm18227_vm9, %v7986_v46, %v7982_v44  ;;  %vm18231_vm9 = vcmask 720512  }
 0xe7e   :  { %v15687_v30 = vpop.permute.xlu0 %8284  ;;  %9373 = vmatpush3.bf16.msra.mxu0 %v10278_v11  ;;  %v7920_v35 = vpop.permute.xlu1 %7919  ;;  %v7992_v45 = vsel %vm3914_vm13, %v7991_v2, %v7987_v9  ;;  %v10281_v11 = vld [vmem:[#allocation5 + $0x190] ss:$8 sps:$4 sm:$0xff]  }
 0xe7f   :  { %v7996_v24 = vrot.slane %v7920_v35, %v18191_v4  ;;  %8691 = vperm.xlu1 %9527, %v8646_v54   ;;  %9374 = vmatprep.subr.bf16.mxu0 %v18197_v28  ;;  %v8829_v54 = vunpack.c.l.b16 %v15561_v18  ;;  %v8144_v18 = vrot.slane %v15579_v13, %v18168_v62 }
 0xe81   :  { %v7997_v21 = vsel %vm3921_vm14, %v7996_v24, %v7992_v45 }
 0xe82   :  { %v8002_v58 = vsel %vm3928_vm15, %v8001_v7, %v7997_v21  ;;  %v15697_v47 = vpop.permute.xlu0 %8290  ;;  %9375 = vmatpush3.bf16.msra.mxu0 %v10279_v1  ;;  %v8071_v23 = vpop.permute.xlu1 %8070  ;;  %v8831_v21 = vunpack.c.l.b16 %v15575_v52  ;;  %v8154_v52 = vrot.slane %v15593_v40, %v18172_v16  ;;  %v10284_v40 = vld [vmem:[#allocation5 + $0x1c0] ss:$8 sps:$4 sm:$0xff]  }
 0xe83   :  { %8842 = vperm.xlu1 %9527, %v8825_v38   ;;  %v8003_v59 = vpack.c.b16 %v8002_v58, %v8002_v58  ;;  %9380 = vmatprep.subr.bf16.mxu0 %v18197_v28  ;;  %v8120_v25 = vrot.slane %v8071_v23, %v18158_v19  ;;  %v10282_v38 = vld [vmem:[#allocation5 + $0x1a0] ss:$8 sps:$4 sm:$0xff]  }
 0xe85   :  { %9377 = vmatmul.mubr.bf16.vlgmr.msra.gmra.mrb[72].mxu0 %v8003_v59  ;;  %v8125_v9 = vsel %vm3830_vm1, %v8124_v12, %v8120_v25  ;;  %v8833_v25 = vunpack.c.l.b16 %v15589_v20  ;;  %v8164_v20 = vrot.slane %v15607_v17, %v18178_v29  ;;  %v10285_v17 = vld [vmem:[#allocation5 + $0x1d0] ss:$8 sps:$4 sm:$0xff]  }
 0xe86   :  { %v15704_v56 = vpop.permute.xlu0 %8296  ;;  %9381 = vmatpush3.bf16.msra.mxu0 %v10280_v34  ;;  %v8077_v46 = vpop.permute.xlu1 %8076  ;;  %9396 = vmatprep.mubr.msk.bf16.mxu0 %vm18198_vm10, %v18197_v28 }
 0xe87   :  { %v8129_v44 = vrot.slane %v8077_v46, %v18162_v8  ;;  %8848 = vperm.xlu1 %9527, %v8827_v32   ;;  %9382 = vmatprep.subr.bf16.mxu0 %v18197_v28  ;;  %v10283_v32 = vld [vmem:[#allocation5 + $0x1b0] ss:$8 sps:$4 sm:$0xff]  }
 0xe89   :  { %v8130_v53 = vsel %vm3837_vm2, %v8129_v44, %v8125_v9  ;;  %v8835_v9 = vunpack.c.l.b16 %v15605_v15  ;;  %v8174_v15 = vrot.slane %v15626_v22, %v18184_v26  ;;  %v10286_v22 = vld [vmem:[#allocation5 + $0x1e0] ss:$8 sps:$4 sm:$0xff]  }
 0xe8a   :  { %v15715_v2 = vpop.permute.xlu0 %8302  ;;  %9383 = vmatpush3.bf16.msra.mxu0 %v10281_v11  ;;  %v8083_v35 = vpop.permute.xlu1 %8082  ;;  %v8135_v7 = vsel %vm3844_vm3, %v8134_v63, %v8130_v53 }
 0xe8b   :  { %v8139_v24 = vrot.slane %v8083_v35, %v18165_v49  ;;  %8854 = vperm.xlu1 %9527, %v8829_v54   ;;  %9384 = vmatprep.subr.bf16.mxu0 %v18197_v28 }
 0xe8d   :  { %v8140_v45 = vsel %vm3851_vm4, %v8139_v24, %v8135_v7  ;;  %v8837_v24 = vunpack.c.l.b16 %v15616_v33  ;;  %v8184_v33 = vrot.slane %v15641_v55, %v18190_v51 }
 0xe8e   :  { %v15724_v27 = vpop.permute.xlu0 %8308  ;;  %9385 = vmatpush3.bf16.msra.mxu0 %v10282_v38  ;;  %v8089_v58 = vpop.permute.xlu1 %8088  ;;  %v8145_v23 = vsel %vm3858_vm5, %v8144_v18, %v8140_v45 }
 0xe8f   :  { %v8149_v1 = vrot.slane %v8089_v58, %v18169_v42  ;;  %8860 = vperm.xlu1 %9527, %v8831_v21   ;;  %9386 = vmatprep.subr.bf16.mxu0 %v18197_v28  ;;  %v8839_v58 = vunpack.c.l.b16 %v15637_v50 }
 0xe91   :  { %v8150_v59 = vsel %vm3865_vm6, %v8149_v1, %v8145_v23 }
 0xe92   :  { %v15733_v13 = vpop.permute.xlu0 %8459  ;;  %9387 = vmatpush3.bf16.msra.mxu0 %v10283_v32  ;;  %v8095_v12 = vpop.permute.xlu1 %8094  ;;  %v8155_v46 = vsel %vm18228_vm7, %v8154_v52, %v8150_v59  ;;  %vm18232_vm7 = vcmask 786112   ;;  %v8194_v59 = vrot.slane %v15651_v10, %v18192_v3  ;;  %v10287_v32 = vld [vmem:[#allocation5 + $0x1f0] ss:$8 sps:$4 sm:$0xff]   ;;  %v8317_v10 = vrot.slane %v15660_v31, %v18161_v6 }
 0xe93   :  { %v8159_v34 = vrot.slane %v8095_v12, %v18173_v37  ;;  %8866 = vperm.xlu1 %9527, %v8833_v25   ;;  %9388 = vmatprep.subr.bf16.mxu0 %v18197_v28  ;;  %v10289_v31 = vld [vmem:[#allocation5 + $0x210] ss:$8 sps:$4 sm:$0xff]  }
 0xe95   :  { %v8160_v44 = vsel %vm18229_vm12, %v8159_v34, %v8155_v46  ;;  %vm18233_vm12 = vcmask 851712  }
 0xe96   :  { %9389 = vmatpush3.bf16.msra.mxu0 %v10284_v40  ;;  %v8101_v53 = vpop.permute.xlu1 %8100  ;;  %v15742_v54 = vpop.permute.xlu0 %8465  ;;  %v8165_v11 = vsel %vm18230_vm11, %v8164_v20, %v8160_v44  ;;  %v10288_v44 = vld [vmem:[#allocation5 + $0x200] ss:$8 sps:$4 sm:$0xff]   ;;  %vm18234_vm11 = vcmask 523712  }
 0xe97   :  { %v8169_v63 = vrot.slane %v8101_v53, %v18179_v5  ;;  %8872 = vperm.xlu1 %9527, %v8835_v9   ;;  %9390 = vmatprep.subr.bf16.mxu0 %v18197_v28 }
 0xe99   :  { %v8170_v35 = vsel %vm18231_vm9, %v8169_v63, %v8165_v11  ;;  %v8327_v63 = vrot.slane %v15669_v36, %v18164_v14  ;;  %vm18235_vm9 = vcmask 589312  }
 0xe9a   :  { %9391 = vmatpush3.bf16.msra.mxu0 %v10285_v17  ;;  %v8107_v7 = vpop.permute.xlu1 %8106  ;;  %v8175_v21 = vsel %vm18232_vm7, %v8174_v15, %v8170_v35  ;;  %v15754_v18 = vpop.permute.xlu0 %8471  ;;  %v8337_v17 = vrot.slane %v15678_v48, %v18168_v62  ;;  %vm18236_vm7 = vcmask 654912  }
 0xe9b   :  { %v8179_v45 = vrot.slane %v8107_v7, %v18185_v39  ;;  %8878 = vperm.xlu1 %9527, %v8837_v24   ;;  %9392 = vmatprep.subr.bf16.mxu0 %v18197_v28  ;;  %v10290_v7 = vld [vmem:[#allocation5 + $0x220] ss:$8 sps:$4 sm:$0xff]  }
 0xe9d   :  { %v8180_v38 = vsel %vm18233_vm12, %v8179_v45, %v8175_v21  ;;  %vm18237_vm12 = vcmask 720512  }
 0xe9e   :  { %9393 = vmatpush3.bf16.msra.mxu0 %v10286_v22  ;;  %v8113_v1 = vpop.permute.xlu1 %8112  ;;  %v8185_v25 = vsel %vm3914_vm13, %v8184_v33, %v8180_v38  ;;  %v15767_v12 = vpop.permute.xlu0 %8477  ;;  %v8347_v33 = vrot.slane %v15687_v30, %v18172_v16  ;;  %v10291_v22 = vld [vmem:[#allocation5 + $0x230] ss:$8 sps:$4 sm:$0xff]  }
 0xe9f   :  { %v8189_v23 = vrot.slane %v8113_v1, %v18191_v4  ;;  %8884 = vperm.xlu1 %9527, %v8839_v58   ;;  %9394 = vmatprep.subr.bf16.mxu0 %v18197_v28 }
 0xea1   :  { %v8190_v52 = vsel %vm3921_vm14, %v8189_v23, %v8185_v25 }
 0xea2   :  { %v8195_v50 = vsel %vm3928_vm15, %v8194_v59, %v8190_v52  ;;  %9395 = vmatpush3.bf16.msra.mxu0 %v10287_v32  ;;  %v8264_v55 = vpop.permute.xlu1 %8263  ;;  %v15779_v40 = vpop.permute.xlu0 %8483  ;;  %v8357_v52 = vrot.slane %v15697_v47, %v18178_v29 }
 0xea3   :  { %6756 = vperm.xlu1 %9527, %v15620_v57   ;;  %v8196_v34 = vpack.c.b16 %v8195_v50, %v8195_v50  ;;  %9400 = vmatprep.subr.bf16.mxu0 %v18197_v28  ;;  %v8313_v46 = vrot.slane %v8264_v55, %v18158_v19  ;;  %v10292_v50 = vld [vmem:[#allocation5 + $0x240] ss:$8 sps:$4 sm:$0xff]  }
 0xea5   :  { %9397 = vmatmul.mubr.bf16.vlgmr.msra.gmra.mrb[76].mxu0 %v8196_v34  ;;  %v8318_v57 = vsel %vm3830_vm1, %v8317_v10, %v8313_v46  ;;  %v8367_v46 = vrot.slane %v15704_v56, %v18184_v26  ;;  %v10293_v10 = vld [vmem:[#allocation5 + $0x250] ss:$8 sps:$4 sm:$0xff]  }
 0xea6   :  { %9401 = vmatpush3.bf16.msra.mxu0 %v10288_v44  ;;  %v8270_v9 = vpop.permute.xlu1 %8269  ;;  %9416 = vmatprep.mubr.msk.bf16.mxu0 %vm18198_vm10, %v18197_v28  ;;  %v15790_v21 = vpop.permute.xlu0 %8489 }
 0xea7   :  { %v8322_v20 = vrot.slane %v8270_v9, %v18162_v8  ;;  %9402 = vmatprep.subr.bf16.mxu0 %v18197_v28 }
 0xea9   :  { %v8323_v53 = vsel %vm3837_vm2, %v8322_v20, %v8318_v57 }
 0xeaa   :  { %9403 = vmatpush3.bf16.msra.mxu0 %v10289_v31  ;;  %v8276_v11 = vpop.permute.xlu1 %8275  ;;  %v8328_v24 = vsel %vm3844_vm3, %v8327_v63, %v8323_v53  ;;  %v15801_v59 = vpop.permute.xlu0 %8495  ;;  %v8377_v53 = vrot.slane %v15715_v2, %v18190_v51  ;;  %v10294_v63 = vld [vmem:[#allocation5 + $0x260] ss:$8 sps:$4 sm:$0xff]  }
 0xeab   :  { %v8332_v35 = vrot.slane %v8276_v11, %v18165_v49  ;;  %9404 = vmatprep.subr.bf16.mxu0 %v18197_v28  ;;  %v8387_v11 = vrot.slane %v15724_v27, %v18192_v3  ;;  %v8510_v27 = vrot.slane %v15733_v13, %v18161_v6  ;;  %v10297_v13 = vld [vmem:[#allocation5 + $0x290] ss:$8 sps:$4 sm:$0xff]  }
 0xead   :  { %v8333_v15 = vsel %vm3851_vm4, %v8332_v35, %v8328_v24 }
 0xeae   :  { %9405 = vmatpush3.bf16.msra.mxu0 %v10290_v7  ;;  %v8282_v45 = vpop.permute.xlu1 %8281  ;;  %v8338_v38 = vsel %vm3858_vm5, %v8337_v17, %v8333_v15  ;;  %v15812_v9 = vpop.permute.xlu0 %8501  ;;  %v10295_v7 = vld [vmem:[#allocation5 + $0x270] ss:$8 sps:$4 sm:$0xff]  }
 0xeaf   :  { %v8342_v36 = vrot.slane %v8282_v45, %v18169_v42  ;;  %9406 = vmatprep.subr.bf16.mxu0 %v18197_v28 }
 0xeb1   :  { %v8343_v58 = vsel %vm3865_vm6, %v8342_v36, %v8338_v38  ;;  %v10296_v38 = vld [vmem:[#allocation5 + $0x280] ss:$8 sps:$4 sm:$0xff]  }
 0xeb2   :  { %9407 = vmatpush3.bf16.msra.mxu0 %v10291_v22  ;;  %v8288_v1 = vpop.permute.xlu1 %8287  ;;  %v8348_v23 = vsel %vm18234_vm11, %v8347_v33, %v8343_v58  ;;  %vm18238_vm11 = vcmask 786112   ;;  %v15825_v24 = vpop.permute.xlu0 %8652 }
 0xeb3   :  { %v8352_v48 = vrot.slane %v8288_v1, %v18173_v37  ;;  %9408 = vmatprep.subr.bf16.mxu0 %v18197_v28 }
 0xeb5   :  { %v8353_v25 = vsel %vm18235_vm9, %v8352_v48, %v8348_v23  ;;  %vm18239_vm9 = vcmask 851712   ;;  %v8520_v23 = vrot.slane %v15742_v54, %v18164_v14  ;;  %v18240_v54 = vld [vmem:[#allocation140_spill] sm:$0xff] }
 0xeb6   :  { %9409 = vmatpush3.bf16.msra.mxu0 %v10292_v50  ;;  %v8294_v32 = vpop.permute.xlu1 %8293  ;;  %v8358_v55 = vsel %vm18236_vm7, %v8357_v52, %v8353_v25  ;;  %v15835_v33 = vpop.permute.xlu0 %8658  ;;  %vm18251_vm7 = vcmask 523712  }
 0xeb7   :  { %v8362_v30 = vrot.slane %v8294_v32, %v18179_v5  ;;  %9410 = vmatprep.subr.bf16.mxu0 %v18197_v28 }
 0xeb9   :  { %v8363_v34 = vsel %vm18237_vm12, %v8362_v30, %v8358_v55  ;;  %v8530_v55 = vrot.slane %v15754_v18, %v18168_v62  ;;  %v18243_v18 = vld [vmem:[#allocation86_spill] sm:$0xff]  ;;  %vm18254_vm12 = vcmask 589312  }
 0xeba   :  { %9411 = vmatpush3.bf16.msra.mxu0 %v10293_v10  ;;  %v8300_v44 = vpop.permute.xlu1 %8299  ;;  %v8368_v20 = vsel %vm18238_vm11, %v8367_v46, %v8363_v34  ;;  %v15846_v32 = vpop.permute.xlu0 %8664  ;;  %v10298_v34 = vld [vmem:[#allocation5 + $0x2a0] ss:$8 sps:$4 sm:$0xff]   ;;  %v6768_v10 = vrot.slane %v18240_v54, %v18161_v6  ;;  %vm18259_vm11 = vcmask 654912  }
 0xebb   :  { %v8372_v47 = vrot.slane %v8300_v44, %v18185_v39  ;;  %9412 = vmatprep.subr.bf16.mxu0 %v18197_v28 }
 0xebd   :  { %v8373_v57 = vsel %vm18239_vm9, %v8372_v47, %v8368_v20  ;;  %v18241_v47 = vld [vmem:[#allocation162_spill] sm:$0xff]  ;;  %vm18261_vm9 = vmmov %vm18251_vm7 }
 0xebe   :  { %9413 = vmatpush3.bf16.msra.mxu0 %v10294_v63  ;;  %v8306_v31 = vpop.permute.xlu1 %8305  ;;  %v8378_v35 = vsel %vm3914_vm13, %v8377_v53, %v8373_v57  ;;  %v6773_v20 = vrot.slane %v18241_v47, %v18162_v8  ;;  %v18242_v53 = vld [vmem:[#allocation60_spill] sm:$0xff] }
 0xebf   :  { %v8382_v56 = vrot.slane %v8306_v31, %v18191_v4  ;;  %9414 = vmatprep.subr.bf16.mxu0 %v18197_v28  ;;  %v6764_v63 = vrot.slane %v18242_v53, %v18158_v19  ;;  %v6778_v31 = vrot.slane %v18243_v18, %v18164_v14  ;;  %v8550_v18 = vrot.slane %v15779_v40, %v18178_v29 }
 0xec1   :  { %v8383_v15 = vsel %vm3921_vm14, %v8382_v56, %v8378_v35 }
 0xec2   :  { %v8388_v17 = vsel %vm3928_vm15, %v8387_v11, %v8383_v15  ;;  %9415 = vmatpush3.bf16.msra.mxu0 %v10295_v7  ;;  %v8457_v2 = vpop.permute.xlu1 %8456  ;;  %v18244_v11 = vld [vmem:[#allocation32_spill] sm:$0xff]  ;;  %v18245_v15 = vld [vmem:[#allocation51_spill] sm:$0xff] }
 0xec3   :  { %v8389_v45 = vpack.c.b16 %v8388_v17, %v8388_v17  ;;  %9420 = vmatprep.subr.bf16.mxu0 %v18197_v28  ;;  %v8506_v36 = vrot.slane %v8457_v2, %v18158_v19  ;;  %v6803_v35 = vrot.slane %v18244_v11, %v18173_v37  ;;  %v6783_v17 = vrot.slane %v18245_v15, %v18165_v49  ;;  %v18246_v7 = vld [vmem:[#allocation111_spill] sm:$0xff] }
 0xec4   :  { %v6843_v2 = vrot.slane %v18246_v7, %v18158_v19  ;;  %v18256_v7 = vld [vmem:[#allocation96_spill] sm:$0xff] }
 0xec5   :  { %9417 = vmatmul.mubr.bf16.vlgmr.msra.gmra.mrb[80].mxu0 %v8389_v45  ;;  %v8511_v1 = vsel %vm3830_vm1, %v8510_v27, %v8506_v36  ;;  %v8540_v45 = vrot.slane %v15767_v12, %v18172_v16  ;;  %v10299_v36 = vld [vmem:[#allocation5 + $0x2b0] ss:$8 sps:$4 sm:$0xff]  }
 0xec6   :  { %9421 = vmatpush3.bf16.msra.mxu0 %v10296_v38  ;;  %v8463_v58 = vpop.permute.xlu1 %8462  ;;  %9436 = vmatprep.mubr.msk.bf16.mxu0 %vm18198_vm10, %v18197_v28  ;;  %v6769_v38 = vsel %vm3830_vm1, %v6768_v10, %v6764_v63  ;;  %v18253_v10 = vld [vmem:[#allocation40_spill] sm:$0xff] }
 0xec7   :  { %v8515_v22 = vrot.slane %v8463_v58, %v18162_v8  ;;  %9422 = vmatprep.subr.bf16.mxu0 %v18197_v28  ;;  %v18247_v58 = vld [vmem:[#allocation144_spill] sm:$0xff] }
 0xec9   :  { %v8516_v48 = vsel %vm3837_vm2, %v8515_v22, %v8511_v1  ;;  %v6788_v22 = vrot.slane %v18247_v58, %v18168_v62  ;;  %v18248_v1 = vld [vmem:[#allocation110_spill] sm:$0xff] }
 0xeca   :  { %9423 = vmatpush3.bf16.msra.mxu0 %v10297_v13  ;;  %v8469_v25 = vpop.permute.xlu1 %8468  ;;  %v8521_v50 = vsel %vm3844_vm3, %v8520_v23, %v8516_v48  ;;  %v6852_v48 = vrot.slane %v18248_v1, %v18162_v8  ;;  %v15876_v23 = vpop.permute.xlu0 %8670 }
 0xecb   :  { %v8525_v52 = vrot.slane %v8469_v25, %v18165_v49  ;;  %9424 = vmatprep.subr.bf16.mxu0 %v18197_v28  ;;  %v18249_v25 = vld [vmem:[#allocation132_spill] sm:$0xff] }
 0xecc   :  { %v6847_v12 = vrot.slane %v18249_v25, %v18161_v6 }
 0xecd   :  { %v8526_v30 = vsel %vm3851_vm4, %v8525_v52, %v8521_v50  ;;  %v6774_v52 = vsel %vm3837_vm2, %v6773_v20, %v6769_v38  ;;  %v18250_v50 = vld [vmem:[#allocation143_spill] sm:$0xff] }
 0xece   :  { %9425 = vmatpush3.bf16.msra.mxu0 %v10298_v34  ;;  %v8475_v46 = vpop.permute.xlu1 %8474  ;;  %v8531_v57 = vsel %vm3858_vm5, %v8530_v55, %v8526_v30  ;;  %v6793_v30 = vrot.slane %v18250_v50, %v18169_v42  ;;  %v18252_v34 = vld [vmem:[#allocation53_spill] sm:$0xff]  ;;  %v6779_v54 = vsel %vm3844_vm3, %v6778_v31, %v6774_v52  ;;  %v6848_v63 = vsel %vm3830_vm1, %v6847_v12, %v6843_v2  ;;  %v15915_v12 = vpop.permute.xlu0 %8676 }
 0xecf   :  { %v8535_v44 = vrot.slane %v8475_v46, %v18169_v42  ;;  %9426 = vmatprep.subr.bf16.mxu0 %v18197_v28  ;;  %v6838_v46 = vrot.slane %v18252_v34, %v18192_v3  ;;  %v6784_v20 = vsel %vm3851_vm4, %v6783_v17, %v6779_v54  ;;  %v6853_v15 = vsel %vm3837_vm2, %v6852_v48, %v6848_v63  ;;  %v18257_v17 = vld [vmem:[#allocation37_spill] sm:$0xff]  ;;  %v18265_v54 = vld [vmem:[#allocation126_spill] sm:$0xff]  ;;  %v18266_v63 = vld [vmem:[#allocation20_spill] sm:$0xff] }
 0xed0   :  { %v6789_v31 = vsel %vm3858_vm5, %v6788_v22, %v6784_v20  ;;  %v6867_v2 = vrot.slane %v18257_v17, %v18168_v62  ;;  %v18260_v22 = vld [vmem:[#allocation61_spill] sm:$0xff] }
 0xed1   :  { %v8536_v56 = vsel %vm3865_vm6, %v8535_v44, %v8531_v57  ;;  %v6798_v44 = vrot.slane %v18253_v10, %v18172_v16  ;;  %v18255_v57 = vld [vmem:[#allocation26_spill] sm:$0xff]  ;;  %v6794_v38 = vsel %vm3865_vm6, %v6793_v30, %v6789_v31  ;;  %v6887_v1 = vrot.slane %v18260_v22, %v18178_v29  ;;  %v18264_v50 = vld [vmem:[#allocation137_spill] sm:$0xff] }
 0xed2   :  { %9427 = vmatpush3.bf16.msra.mxu0 %v10299_v36  ;;  %v8481_v27 = vpop.permute.xlu1 %8480  ;;  %v8541_v55 = vsel %vm18251_vm7, %v8540_v45, %v8536_v56  ;;  %v6857_v53 = vrot.slane %v18255_v57, %v18164_v14  ;;  %v10300_v56 = vld [vmem:[#allocation5 + $0x2c0] ss:$8 sps:$4 sm:$0xff]   ;;  %v6862_v45 = vrot.slane %v18256_v7, %v18165_v49  ;;  %vm18263_vm7 = vcmask 720512   ;;  %v10301_v57 = vld [vmem:[#allocation5 + $0x2d0] ss:$8 sps:$4 sm:$0xff]  }
 0xed3   :  { %v8545_v13 = vrot.slane %v8481_v27, %v18173_v37  ;;  %9428 = vmatprep.subr.bf16.mxu0 %v18197_v28  ;;  %v18258_v27 = vld [vmem:[#allocation142_spill] sm:$0xff]  ;;  %v6799_v48 = vsel %vm18261_vm9, %v6798_v44, %v6794_v38  ;;  %v6813_v30 = vrot.slane %v18265_v54, %v18179_v5  ;;  %v18269_v7 = vld [vmem:[#allocation211_spill] sm:$0xff]  ;;  %vm18271_vm9 = vcmask 654912  }
 0xed4   :  { %v6877_v40 = vrot.slane %v18258_v27, %v18172_v16  ;;  %v6858_v10 = vsel %vm3844_vm3, %v6857_v53, %v6853_v15  ;;  %v18268_v53 = vld [vmem:[#allocation112_spill] sm:$0xff]  ;;  %v18272_v27 = vld [vmem:[#allocation77_spill] sm:$0xff] }
 0xed5   :  { %v8546_v47 = vsel %vm18254_vm12, %v8545_v13, %v8541_v55  ;;  %v18262_v13 = vld [vmem:[#allocation56_spill] sm:$0xff]  ;;  %v6897_v55 = vrot.slane %v18264_v50, %v18184_v26  ;;  %v6863_v20 = vsel %vm3851_vm4, %v6862_v45, %v6858_v10  ;;  %v6907_v15 = vrot.slane %v18268_v53, %v18190_v51 }
 0xed6   :  { %9429 = vmatpush3.bf16.msra.mxu0 %v10300_v56  ;;  %v8487_v11 = vpop.permute.xlu1 %8486  ;;  %v8551_v58 = vsel %vm18259_vm11, %v8550_v18, %v8546_v47  ;;  %v6808_v25 = vrot.slane %v18262_v13, %v18178_v29  ;;  %v8560_v47 = vrot.slane %v15790_v21, %v18184_v26  ;;  %v6872_v18 = vrot.slane %v18266_v63, %v18169_v42  ;;  %v18267_v56 = vld [vmem:[#allocation62_spill] sm:$0xff]  ;;  %v18277_v63 = vld [vmem:[#allocation65_spill] sm:$0xff] }
 0xed7   :  { %v8555_v36 = vrot.slane %v8487_v11, %v18179_v5  ;;  %9430 = vmatprep.subr.bf16.mxu0 %v18197_v28  ;;  %v6922_v11 = vrot.slane %v18267_v56, %v18158_v19  ;;  %v6804_v21 = vsel %vm18254_vm12, %v6803_v35, %v6799_v48  ;;  %vm18270_vm11 = vcmask 786112  }
 0xed8   :  { %v6809_v17 = vsel %vm18271_vm9, %v6808_v25, %v6804_v21  ;;  %v6926_v38 = vrot.slane %v18272_v27, %v18161_v6  ;;  %v6868_v48 = vsel %vm3858_vm5, %v6867_v2, %v6863_v20  ;;  %v6882_v56 = vrot.slane %v18277_v63, %v18173_v37  ;;  %v15954_v21 = vpop.permute.xlu0 %8682  ;;  %v18281_v27 = vld [vmem:[#allocation108_spill] sm:$0xff] }
 0xed9   :  { %v8556_v52 = vsel %vm18263_vm7, %v8555_v36, %v8551_v58  ;;  %v6931_v36 = vrot.slane %v18269_v7, %v18162_v8  ;;  %v18273_v58 = vld [vmem:[#allocation98_spill] sm:$0xff]  ;;  %vm18274_vm7 = vcmask 851712   ;;  %v6814_v10 = vsel %vm18275_vm8, %v6813_v30, %v6809_v17  ;;  %vm18279_vm8 = vmmov %vm18270_vm11 }
 0xeda   :  { %9431 = vmatpush3.bf16.msra.mxu0 %v10301_v57  ;;  %v8493_v44 = vpop.permute.xlu1 %8492  ;;  %v8561_v45 = vsel %vm18270_vm11, %v8560_v47, %v8556_v52  ;;  %v6818_v13 = vrot.slane %v18273_v58, %v18184_v26  ;;  %v18276_v57 = vld [vmem:[#allocation83_spill] sm:$0xff]  ;;  %v8570_v52 = vrot.slane %v15801_v59, %v18190_v51  ;;  %v10302_v47 = vld [vmem:[#allocation5 + $0x2e0] ss:$8 sps:$4 sm:$0xff]   ;;  %v8580_v7 = vrot.slane %v15812_v9, %v18192_v3  ;;  %vm18283_vm12 = vmmov %vm18274_vm7 }
 0xedb   :  { %v8565_v31 = vrot.slane %v8493_v44, %v18185_v39  ;;  %9432 = vmatprep.subr.bf16.mxu0 %v18197_v28  ;;  %v6823_v35 = vrot.slane %v18276_v57, %v18185_v39  ;;  %v6873_v44 = vsel %vm3865_vm6, %v6872_v18, %v6868_v48  ;;  %v18278_v59 = vld [vmem:[#allocation184_spill] sm:$0xff]  ;;  %vm18284_vm11 = vcmask 523712  }
 0xedc   :  { %v6941_v20 = vrot.slane %v18278_v59, %v18165_v49  ;;  %vm18285_vm9 = vcmask 589312  }
 0xedd   :  { %v8566_v54 = vsel %vm18274_vm7, %v8565_v31, %v8561_v45  ;;  %v6927_v31 = vsel %vm3830_vm1, %v6926_v38, %v6922_v11  ;;  %v6819_v45 = vsel %vm18279_vm8, %v6818_v13, %v6814_v10  ;;  %v18280_v11 = vld [vmem:[#allocation106_spill] sm:$0xff]  ;;  %v6828_v38 = vrot.slane %v18281_v27, %v18190_v51 }
 0xede   :  { %9433 = vmatpush3.bf16.msra.mxu0 %v10302_v47  ;;  %v8499_v25 = vpop.permute.xlu1 %8498  ;;  %v6932_v2 = vsel %vm3837_vm2, %v6931_v36, %v6927_v31  ;;  %v8571_v18 = vsel %vm3914_vm13, %v8570_v52, %v8566_v54  ;;  %v6936_v17 = vrot.slane %v18280_v11, %v18164_v14  ;;  %v18282_v36 = vld [vmem:[#allocation92_spill] sm:$0xff]  ;;  %v6824_v48 = vsel %vm18283_vm12, %v6823_v35, %v6819_v45  ;;  %v10303_v54 = vld [vmem:[#allocation5 + $0x2f0] ss:$8 sps:$4 sm:$0xff]   ;;  %v18287_v35 = vld [vmem:[#allocation185_spill] sm:$0xff] }
 0xedf   :  { %v8575_v30 = vrot.slane %v8499_v25, %v18191_v4  ;;  %9434 = vmatprep.subr.bf16.mxu0 %v18197_v28  ;;  %v6917_v57 = vrot.slane %v18282_v36, %v18192_v3  ;;  %v6878_v47 = vsel %vm18284_vm11, %v6877_v40, %v6873_v44  ;;  %v18286_v52 = vld [vmem:[#allocation156_spill] sm:$0xff]  ;;  %v6951_v40 = vrot.slane %v18287_v35, %v18169_v42  ;;  %v18288_v44 = vld [vmem:[#allocation231_spill] sm:$0xff] }
 0xee0   :  { %v6883_v10 = vsel %vm18285_vm9, %v6882_v56, %v6878_v47  ;;  %v6892_v25 = vrot.slane %v18286_v52, %v18179_v5  ;;  %v6937_v63 = vsel %vm3844_vm3, %v6936_v17, %v6932_v2  ;;  %v7001_v59 = vrot.slane %v18288_v44, %v18158_v19  ;;  %v18289_v56 = vld [vmem:[#allocation102_spill] sm:$0xff]  ;;  %v18290_v2 = vld [vmem:[#allocation85_spill] sm:$0xff] }
 0xee1   :  { %v8576_v58 = vsel %vm3921_vm14, %v8575_v30, %v8571_v18  ;;  %v6942_v30 = vsel %vm3851_vm4, %v6941_v20, %v6937_v63  ;;  %v6946_v18 = vrot.slane %v18289_v56, %v18168_v62  ;;  %v6829_v45 = vsel %vm3914_vm13, %v6828_v38, %v6824_v48  ;;  %v18291_v17 = vld [vmem:[#allocation198_spill] sm:$0xff]  ;;  %v15993_v20 = vpop.permute.xlu0 %8688  ;;  %v10304_v48 = vld [vmem:[#allocation5 + $0x300] ss:$8 sps:$4 sm:$0xff]  }
 0xee2   :  { %v8581_v9 = vsel %vm3928_vm15, %v8580_v7, %v8576_v58  ;;  %9435 = vmatpush3.bf16.msra.mxu0 %v10303_v54  ;;  %v8650_v13 = vpop.permute.xlu1 %8649  ;;  %v6833_v11 = vrot.slane %v18290_v2, %v18191_v4  ;;  %v7010_v27 = vrot.slane %v18291_v17, %v18162_v8  ;;  %v18292_v58 = vld [vmem:[#allocation69_spill] sm:$0xff]  ;;  %vm18293_vm7 = vcmask 654912  }
 0xee3   :  { %v8582_v31 = vpack.c.b16 %v8581_v9, %v8581_v9  ;;  %9440 = vmatprep.subr.bf16.mxu0 %v18197_v28  ;;  %v8699_v7 = vrot.slane %v8650_v13, %v18158_v19  ;;  %v7005_v47 = vrot.slane %v18292_v58, %v18161_v6  ;;  %v6888_v9 = vsel %vm18293_vm7, %v6887_v1, %v6883_v10  ;;  %v18295_v52 = vld [vmem:[#allocation157_spill] sm:$0xff] }
 0xee4   :  { %v8703_v38 = vrot.slane %v15825_v24, %v18161_v6  ;;  %vm18294_vm8 = vcmask 720512   ;;  %v6902_v63 = vrot.slane %v18295_v52, %v18185_v39  ;;  %v18296_v24 = vld [vmem:[#allocation66_spill] sm:$0xff]  ;;  %v6834_v58 = vsel %vm3921_vm14, %v6833_v11, %v6829_v45 }
 0xee5   :  { %9437 = vmatmul.mubr.bf16.vlgmr.msra.gmra.mrb[84].mxu0 %v8582_v31  ;;  %v6893_v13 = vsel %vm18294_vm8, %v6892_v25, %v6888_v9  ;;  %v6947_v31 = vsel %vm3858_vm5, %v6946_v18, %v6942_v30  ;;  %v6961_v10 = vrot.slane %v18296_v24, %v18173_v37  ;;  %v7006_v35 = vsel %vm3830_vm1, %v7005_v47, %v7001_v59  ;;  %v18297_v25 = vld [vmem:[#allocation105_spill] sm:$0xff]  ;;  %v18298_v30 = vld [vmem:[#allocation190_spill] sm:$0xff]  ;;  %v16035_v11 = vpop.permute.xlu0 %8694  ;;  %v18307_v24 = vld [vmem:[#allocation191_spill] sm:$0xff] }
 0xee6   :  { %9441 = vmatpush3.bf16.msra.mxu0 %v10304_v48  ;;  %v8656_v54 = vpop.permute.xlu1 %8655  ;;  %9456 = vmatprep.mubr.msk.bf16.mxu0 %vm18198_vm10, %v18197_v28  ;;  %v6952_v1 = vsel %vm3865_vm6, %v6951_v40, %v6947_v31  ;;  %v8704_v44 = vsel %vm3830_vm1, %v8703_v38, %v8699_v7  ;;  %v6956_v56 = vrot.slane %v18297_v25, %v18172_v16  ;;  %v18299_v40 = vld [vmem:[#allocation154_spill] sm:$0xff]  ;;  %vm18300_vm12 = vcmask 786112   ;;  %v18306_v31 = vld [vmem:[#allocation116_spill] sm:$0xff] }
 0xee7   :  { %v8708_v22 = vrot.slane %v8656_v54, %v18162_v8  ;;  %9442 = vmatprep.subr.bf16.mxu0 %v18197_v28  ;;  %v7011_v2 = vsel %vm3837_vm2, %v7010_v27, %v7006_v35  ;;  %v7020_v18 = vrot.slane %v18298_v30, %v18165_v49  ;;  %v7015_v9 = vrot.slane %v18299_v40, %v18164_v14  ;;  %v10305_v47 = vld [vmem:[#allocation5 + $0x310] ss:$8 sps:$4 sm:$0xff]  }
 0xee8   :  { %v6898_v59 = vsel %vm18300_vm12, %v6897_v55, %v6893_v13  ;;  %v8713_v7 = vrot.slane %v15835_v33, %v18164_v14  ;;  %vm18301_vm11 = vcmask 851712   ;;  %v18302_v48 = vld [vmem:[#allocation146_spill] sm:$0xff]  ;;  %vm18303_vm9 = vcmask 523712   ;;  %v18305_v33 = vld [vmem:[#allocation187_spill] sm:$0xff] }
 0xee9   :  { %v8709_v17 = vsel %vm3837_vm2, %v8708_v22, %v8704_v44  ;;  %v6903_v38 = vsel %vm18301_vm11, %v6902_v63, %v6898_v59  ;;  %v6912_v54 = vrot.slane %v18302_v48, %v18191_v4  ;;  %v6957_v45 = vsel %vm18303_vm9, %v6956_v56, %v6952_v1  ;;  %v18308_v25 = vld [vmem:[#allocation74_spill] sm:$0xff] }
 0xeea   :  { %9443 = vmatpush3.bf16.msra.mxu0 %v10305_v47  ;;  %v8662_v27 = vpop.permute.xlu1 %8661  ;;  %vm18304_vm7 = vcmask 589312   ;;  %v6971_v55 = vrot.slane %v18305_v33, %v18179_v5  ;;  %v7016_v13 = vsel %vm3844_vm3, %v7015_v9, %v7011_v2  ;;  %v8714_v63 = vsel %vm3844_vm3, %v8713_v7, %v8709_v17  ;;  %v18309_v40 = vld [vmem:[#allocation118_spill] sm:$0xff]  ;;  %v18315_v33 = vld [vmem:[#allocation76_spill] sm:$0xff] }
 0xeeb   :  { %v8718_v52 = vrot.slane %v8662_v27, %v18165_v49  ;;  %9444 = vmatprep.subr.bf16.mxu0 %v18197_v28  ;;  %v6962_v50 = vsel %vm18304_vm7, %v6961_v10, %v6957_v45  ;;  %v6966_v22 = vrot.slane %v18306_v31, %v18178_v29  ;;  %v7021_v1 = vsel %vm3851_vm4, %v7020_v18, %v7016_v13  ;;  %v10306_v18 = vld [vmem:[#allocation5 + $0x320] ss:$8 sps:$4 sm:$0xff]   ;;  %v10307_v31 = vld [vmem:[#allocation5 + $0x330] ss:$8 sps:$4 sm:$0xff]  }
 0xeec   :  { %v7030_v35 = vrot.slane %v18307_v24, %v18169_v42  ;;  %v6839_v10 = vsel %vm3928_vm15, %v6838_v46, %v6834_v58  ;;  %v7025_v56 = vrot.slane %v18308_v25, %v18168_v62  ;;  %v6908_v2 = vsel %vm3914_vm13, %v6907_v15, %v6903_v38  ;;  %v18312_v15 = vld [vmem:[#allocation70_spill] sm:$0xff]  ;;  %v18313_v27 = vld [vmem:[#allocation192_spill] sm:$0xff] }
 0xeed   :  { %v8719_v44 = vsel %vm3851_vm4, %v8718_v52, %v8714_v63  ;;  %v8723_v30 = vrot.slane %v15846_v32, %v18168_v62  ;;  %v6976_v9 = vrot.slane %v18309_v40, %v18184_v26  ;;  %v6913_v34 = vsel %vm3921_vm14, %v6912_v54, %v6908_v2  ;;  %v16078_v54 = vpop.permute.xlu0 %8845  ;;  %v18314_v52 = vld [vmem:[#allocation99_spill] sm:$0xff]  ;;  %v18325_v40 = vld [vmem:[#allocation72_spill] sm:$0xff] }
 0xeee   :  { %9445 = vmatpush3.bf16.msra.mxu0 %v10306_v18  ;;  %v8668_v17 = vpop.permute.xlu1 %8667  ;;  %vm18310_vm8 = vcmask 654912   ;;  %vm18311_vm12 = vcmask 720512   ;;  %v6981_v59 = vrot.slane %v18312_v15, %v18185_v39  ;;  %v7026_v32 = vsel %vm3858_vm5, %v7025_v56, %v7021_v1  ;;  %v18316_v1 = vld [vmem:[#allocation202_spill] sm:$0xff]  ;;  %v18323_v2 = vld [vmem:[#allocation203_spill] sm:$0xff] }
 0xeef   :  { %v6967_v46 = vsel %vm18310_vm8, %v6966_v22, %v6962_v50  ;;  %v8728_v58 = vrot.slane %v8668_v17, %v18169_v42  ;;  %9446 = vmatprep.subr.bf16.mxu0 %v18197_v28  ;;  %v8724_v7 = vsel %vm3858_vm5, %v8723_v30, %v8719_v44  ;;  %v7031_v47 = vsel %vm3865_vm6, %v7030_v35, %v7026_v32 }
 0xef0   :  { %v6972_v53 = vsel %vm18311_vm12, %v6971_v55, %v6967_v46  ;;  %v7040_v38 = vrot.slane %v18313_v27, %v18173_v37  ;;  %v7080_v48 = vrot.slane %v15109_v41, %v18158_v19  ;;  %v6986_v50 = vrot.slane %v18314_v52, %v18190_v51 }
 0xef1   :  { %v8729_v45 = vsel %vm3865_vm6, %v8728_v58, %v8724_v7  ;;  %v7035_v55 = vrot.slane %v18315_v33, %v18172_v16  ;;  %v7089_v13 = vrot.slane %v15115_v60, %v18162_v8  ;;  %v8733_v63 = vrot.slane %v15876_v23, %v18172_v16  ;;  %v18319_v23 = vld [vmem:[#allocation183_spill] sm:$0xff] }
 0xef2   :  { %9447 = vmatpush3.bf16.msra.mxu0 %v10307_v31  ;;  %v8674_v22 = vpop.permute.xlu1 %8673  ;;  %v6918_v41 = vsel %vm3928_vm15, %v6917_v57, %v6913_v34  ;;  %v7084_v24 = vrot.slane %v18316_v1, %v18161_v6  ;;  %vm18317_vm11 = vcmask 786112   ;;  %vm18318_vm9 = vcmask 851712   ;;  %v18327_v7 = vld [vmem:[#allocation215_spill] sm:$0xff]  ;;  %v18334_v31 = vld [vmem:[#allocation182_spill] sm:$0xff] }
 0xef3   :  { %v6977_v35 = vsel %vm18317_vm11, %v6976_v9, %v6972_v53  ;;  %v8738_v44 = vrot.slane %v8674_v22, %v18173_v37  ;;  %9448 = vmatprep.subr.bf16.mxu0 %v18197_v28  ;;  %v6991_v25 = vrot.slane %v18319_v23, %v18191_v4  ;;  %vm18320_vm7 = vcmask 523712   ;;  %v10308_v53 = vld [vmem:[#allocation5 + $0x340] ss:$8 sps:$4 sm:$0xff]  }
 0xef4   :  { %v6982_v60 = vsel %vm18318_vm9, %v6981_v59, %v6977_v35  ;;  %v7036_v56 = vsel %vm18320_vm7, %v7035_v55, %v7031_v47  ;;  %vm18321_vm8 = vmmov %vm18320_vm7  ;;  %vm18322_vm12 = vcmask 589312   ;;  %v7050_v30 = vrot.slane %v18323_v2, %v18179_v5  ;;  %v18326_v59 = vld [vmem:[#allocation113_spill] sm:$0xff]  ;;  %v18332_v55 = vld [vmem:[#allocation207_spill] sm:$0xff] }
 0xef5   :  { %v8734_v36 = vsel %vm18321_vm8, %v8733_v63, %v8729_v45  ;;  %v7041_v57 = vsel %vm18322_vm12, %v7040_v38, %v7036_v56  ;;  %v7085_v18 = vsel %vm3830_vm1, %v7084_v24, %v7080_v48  ;;  %vm18324_vm11 = vmmov %vm18322_vm12  ;;  %v7045_v9 = vrot.slane %v18325_v40, %v18178_v29  ;;  %v16120_v38 = vpop.permute.xlu0 %8851  ;;  %v10309_v24 = vld [vmem:[#allocation5 + $0x350] ss:$8 sps:$4 sm:$0xff]   ;;  %v18336_v23 = vld [vmem:[#allocation213_spill] sm:$0xff] }
 0xef6   :  { %v8739_v17 = vsel %vm18324_vm11, %v8738_v44, %v8734_v36  ;;  %v7090_v34 = vsel %vm3837_vm2, %v7089_v13, %v7085_v18  ;;  %v7099_v46 = vrot.slane %v15121_v0, %v18165_v49  ;;  %v8743_v58 = vrot.slane %v15915_v12, %v18178_v29  ;;  %9449 = vmatpush3.bf16.msra.mxu0 %v10308_v53  ;;  %v8680_v15 = vpop.permute.xlu1 %8679  ;;  %v18335_v44 = vld [vmem:[#allocation212_spill] sm:$0xff]  ;;  %v18337_v56 = vld [vmem:[#allocation221_spill] sm:$0xff] }
 0xef7   :  { %v6996_v32 = vrot.slane %v18326_v59, %v18192_v3  ;;  %v7094_v47 = vrot.slane %v18327_v7, %v18164_v14  ;;  %v6987_v27 = vsel %vm3914_vm13, %v6986_v50, %v6982_v60  ;;  %v8748_v48 = vrot.slane %v8680_v15, %v18179_v5  ;;  %9450 = vmatprep.subr.bf16.mxu0 %v18197_v28  ;;  %v18344_v59 = vld [vmem:[#allocation210_spill] sm:$0xff] }
 0xef8   :  { %vm18328_vm9 = vcmask 1041409   ;;  %v6992_v12 = vsel %vm3921_vm14, %v6991_v25, %v6987_v27  ;;  %vm18329_vm7 = vcmask 654912   ;;  %vm18331_vm12 = vcmask 720512   ;;  %v18345_v27 = vld [vmem:[#allocation189_spill] sm:$0xff] }
 0xef9   :  { %v16125_v0 = vsel %vm18328_vm9, %v6918_v41, %v6839_v10  ;;  %v7046_v45 = vsel %vm18329_vm7, %v7045_v9, %v7041_v57  ;;  %vm18330_vm8 = vmmov %vm18329_vm7  ;;  %v7060_v50 = vrot.slane %v18332_v55, %v18185_v39  ;;  %v7095_v13 = vsel %vm3844_vm3, %v7094_v47, %v7090_v34  ;;  %v16161_v34 = vpop.permute.xlu0 %8857  ;;  %v10310_v47 = vld [vmem:[#allocation5 + $0x360] ss:$8 sps:$4 sm:$0xff]  }
 0xefa   :  { %v8744_v52 = vsel %vm18330_vm8, %v8743_v58, %v8739_v17  ;;  %v7051_v33 = vsel %vm18331_vm12, %v7050_v30, %v7046_v45  ;;  %vm18333_vm11 = vmmov %vm18331_vm12  ;;  %v7055_v22 = vrot.slane %v18334_v31, %v18184_v26  ;;  %v7100_v10 = vsel %vm3851_vm4, %v7099_v46, %v7095_v13  ;;  %9451 = vmatpush3.bf16.msra.mxu0 %v10309_v24  ;;  %v8686_v35 = vpop.permute.xlu1 %8685  ;;  %v18343_v58 = vld [vmem:[#allocation88_spill] sm:$0xff] }
 0xefb   :  { %v8749_v63 = vsel %vm18333_vm11, %v8748_v48, %v8744_v52  ;;  %v7109_v41 = vrot.slane %v15127_v61, %v18169_v42  ;;  %v8753_v1 = vrot.slane %v15954_v21, %v18184_v26  ;;  %v7065_v60 = vrot.slane %v18335_v44, %v18190_v51  ;;  %9452 = vmatprep.subr.bf16.mxu0 %v18197_v28  ;;  %v18338_v61 = vld [vmem:[#allocation188_spill] sm:$0xff] }
 0xefc   :  { %v7075_v25 = vrot.slane %v18336_v23, %v18192_v3  ;;  %v7104_v36 = vrot.slane %v18337_v56, %v18168_v62  ;;  %v8758_v57 = vrot.slane %v8686_v35, %v18185_v39  ;;  %v7114_v2 = vrot.slane %v18338_v61, %v18172_v16  ;;  %v18347_v52 = vld [vmem:[#allocation216_spill] sm:$0xff]  ;;  %v18354_v61 = vld [vmem:[#allocation193_spill] sm:$0xff] }
 0xefd   :  { %v16153_v21 = vsel %vm3928_vm15, %v6996_v32, %v6992_v12  ;;  %vm18339_vm9 = vcmask 786112   ;;  %vm18341_vm8 = vcmask 851712   ;;  %v7070_v40 = vrot.slane %v15103_v43, %v18191_v4  ;;  %v18346_v12 = vld [vmem:[#allocation214_spill] sm:$0xff]  ;;  %v18352_v44 = vld [vmem:[#allocation160_spill] sm:$0xff] }
 0xefe   :  { %v7056_v30 = vsel %vm18339_vm9, %v7055_v22, %v7051_v33  ;;  %vm18340_vm7 = vmmov %vm18339_vm9  ;;  %v7105_v9 = vsel %vm3858_vm5, %v7104_v36, %v7100_v10  ;;  %v7124_v53 = vrot.slane %v18343_v58, %v18178_v29  ;;  %v7119_v32 = vrot.slane %v18344_v59, %v18173_v37  ;;  %9453 = vmatpush3.bf16.msra.mxu0 %v10310_v47  ;;  %v8692_v43 = vpop.permute.xlu1 %8691  ;;  %v18349_v22 = vld [vmem:[#allocation24_spill] sm:$0xff]  ;;  %v10311_v36 = vld [vmem:[#allocation5 + $0x370] ss:$8 sps:$4 sm:$0xff]  }
 0xeff   :  { %v8754_v18 = vsel %vm18340_vm7, %v8753_v1, %v8749_v63  ;;  %v7061_v17 = vsel %vm18341_vm8, %v7060_v50, %v7056_v30  ;;  %vm18342_vm12 = vmmov %vm18341_vm8  ;;  %v7110_v15 = vsel %vm3865_vm6, %v7109_v41, %v7105_v9  ;;  %v8763_v7 = vrot.slane %v15993_v20, %v18190_v51  ;;  %9454 = vmatprep.subr.bf16.mxu0 %v18197_v28  ;;  %v18348_v50 = vld [vmem:[#allocation225_spill] sm:$0xff]  ;;  %v16202_v9 = vpop.permute.xlu0 %8863  ;;  %v18357_v58 = vld [vmem:[#allocation206_spill] sm:$0xff] }
 0xf00   :  { %v8759_v46 = vsel %vm18342_vm12, %v8758_v57, %v8754_v18  ;;  %v7134_v48 = vrot.slane %v18345_v27, %v18184_v26  ;;  %v7144_v45 = vrot.slane %v18346_v12, %v18190_v51  ;;  %v7154_v33 = vrot.slane %v18347_v52, %v18192_v3  ;;  %v18397_v12 = vld [vmem:[#allocation131_spill] sm:$0xff] }
 0xf01   :  { %v8768_v55 = vrot.slane %v8692_v43, %v18191_v4  ;;  %v7163_v13 = vrot.slane %v18348_v50, %v18161_v6  ;;  %v7066_v20 = vsel %vm3914_vm13, %v7065_v60, %v7061_v17  ;;  %v8773_v63 = vrot.slane %v16035_v11, %v18192_v3  ;;  %v18353_v60 = vld [vmem:[#allocation165_spill] sm:$0xff]  ;;  %v18356_v17 = vld [vmem:[#allocation150_spill] sm:$0xff] }
 0xf02   :  { %v8764_v31 = vsel %vm3914_vm13, %v8763_v7, %v8759_v46  ;;  %v7173_v10 = vrot.slane %v18349_v22, %v18164_v14  ;;  %v7071_v41 = vsel %vm3921_vm14, %v7070_v40, %v7066_v20  ;;  %vm18350_vm11 = vcmask 523712   ;;  %9455 = vmatpush3.bf16.msra.mxu0 %v10311_v36  ;;  %v8843_v57 = vpop.permute.xlu1 %8842  ;;  %v18359_v43 = vld [vmem:[#allocation197_spill] sm:$0xff]  ;;  %v18361_v20 = vld [vmem:[#allocation196_spill] sm:$0xff] }
 0xf03   :  { %v7115_v1 = vsel %vm18350_vm11, %v7114_v2, %v7110_v15  ;;  %v8769_v24 = vsel %vm3921_vm14, %v8768_v55, %v8764_v31  ;;  %vm18351_vm9 = vcmask 589312   ;;  %v7129_v23 = vrot.slane %v18352_v44, %v18179_v5  ;;  %v18355_v2 = vld [vmem:[#allocation167_spill] sm:$0xff]  ;;  %9460 = vmatprep.subr.bf16.mxu0 %v18197_v28 }
 0xf04   :  { %v7120_v35 = vsel %vm18351_vm9, %v7119_v32, %v7115_v1  ;;  %v7159_v56 = vrot.slane %v18353_v60, %v18158_v19  ;;  %v8774_v11 = vsel %vm3928_vm15, %v8773_v63, %v8769_v24  ;;  %v7183_v30 = vrot.slane %v18354_v61, %v18168_v62  ;;  %v18358_v32 = vld [vmem:[#allocation161_spill] sm:$0xff]  ;;  %v18360_v55 = vld [vmem:[#allocation195_spill] sm:$0xff] }
 0xf05   :  { %v7168_v18 = vrot.slane %v18355_v2, %v18162_v8  ;;  %v7238_v40 = vrot.slane %v18356_v17, %v18158_v19  ;;  %v8775_v46 = vpack.c.b16 %v8774_v11, %v8774_v11  ;;  %v7193_v15 = vrot.slane %v18357_v58, %v18172_v16  ;;  %v10312_v1 = vld [vmem:[#allocation5 + $0x380] ss:$8 sps:$4 sm:$0xff]  }
 0xf06   :  { %v16208_v59 = vsel %vm3928_vm15, %v7075_v25, %v7071_v41  ;;  %v7247_v7 = vrot.slane %v18358_v32, %v18162_v8  ;;  %v8892_v47 = vrot.slane %v8843_v57, %v18158_v19  ;;  %v7203_v27 = vrot.slane %v18359_v43, %v18178_v29  ;;  %v8849_v24 = vpop.permute.xlu1 %8848  ;;  %v18364_v60 = vld [vmem:[#allocation169_spill] sm:$0xff]  ;;  %v16244_v32 = vpop.permute.xlu0 %8869 }
 0xf07   :  { %v7213_v50 = vrot.slane %v18360_v55, %v18184_v26  ;;  %v7242_v63 = vrot.slane %v18361_v20, %v18161_v6  ;;  %vm18362_vm7 = vcmask 654912   ;;  %9457 = vmatmul.mubr.bf16.vlgmr.msra.gmra.mrb[88].mxu0 %v8775_v46  ;;  %vm18363_vm8 = vcmask 720512   ;;  %v18367_v61 = vld [vmem:[#allocation209_spill] sm:$0xff] }
 0xf08   :  { %v7125_v31 = vsel %vm18362_vm7, %v7124_v53, %v7120_v35  ;;  %v7164_v22 = vsel %vm3830_vm1, %v7163_v13, %v7159_v56  ;;  %v8896_v41 = vrot.slane %v16078_v54, %v18161_v6  ;;  %9461 = vmatpush3.bf16.msra.mxu0 %v10312_v1  ;;  %9476 = vmatprep.mubr.msk.bf16.mxu0 %vm18198_vm10, %v18197_v28  ;;  %v18365_v54 = vld [vmem:[#allocation166_spill] sm:$0xff]  ;;  %v18366_v56 = vld [vmem:[#allocation133_spill] sm:$0xff]  ;;  %vm18370_vm10 = vcmask 786112  }
 0xf09   :  { %v7130_v25 = vsel %vm18363_vm8, %v7129_v23, %v7125_v31  ;;  %v7169_v44 = vsel %vm3837_vm2, %v7168_v18, %v7164_v22  ;;  %v7178_v11 = vrot.slane %v18364_v60, %v18165_v49  ;;  %v7243_v53 = vsel %vm3830_vm1, %v7242_v63, %v7238_v40  ;;  %9462 = vmatprep.subr.bf16.mxu0 %v18197_v28  ;;  %v18368_v18 = vld [vmem:[#allocation177_spill] sm:$0xff]  ;;  %v18369_v40 = vld [vmem:[#allocation50_spill] sm:$0xff] }
 0xf0a   :  { %v8901_v35 = vrot.slane %v8849_v24, %v18162_v8  ;;  %v7248_v13 = vsel %vm3837_vm2, %v7247_v7, %v7243_v53  ;;  %v7257_v23 = vrot.slane %v18365_v54, %v18165_v49  ;;  %v7317_v36 = vrot.slane %v18366_v56, %v18158_v19  ;;  %v18371_v19 = vld [vmem:[#allocation136_spill] sm:$0xff]  ;;  %v10313_v22 = vld [vmem:[#allocation5 + $0x390] ss:$8 sps:$4 sm:$0xff]  }
 0xf0b   :  { %v8897_v57 = vsel %vm3830_vm1, %v8896_v41, %v8892_v47  ;;  %v7223_v2 = vrot.slane %v18367_v61, %v18190_v51  ;;  %v7252_v17 = vrot.slane %v18368_v18, %v18164_v14  ;;  %v7326_v46 = vrot.slane %v18369_v40, %v18162_v8  ;;  %v8855_v41 = vpop.permute.xlu1 %8854  ;;  %v18372_v8 = vld [vmem:[#allocation171_spill] sm:$0xff] }
 0xf0c   :  { %v8902_v7 = vsel %vm3837_vm2, %v8901_v35, %v8897_v57  ;;  %v7135_v20 = vsel %vm18370_vm10, %v7134_v48, %v7130_v25  ;;  %v7174_v63 = vsel %vm3844_vm3, %v7173_v10, %v7169_v44  ;;  %v7321_v47 = vrot.slane %v18371_v19, %v18161_v6  ;;  %9463 = vmatpush3.bf16.msra.mxu0 %v10313_v22  ;;  %v18373_v6 = vld [vmem:[#allocation52_spill] sm:$0xff]  ;;  %v18376_v57 = vld [vmem:[#allocation29_spill] sm:$0xff] }
 0xf0d   :  { %v8906_v31 = vrot.slane %v16120_v38, %v18164_v14  ;;  %v7179_v1 = vsel %vm3851_vm4, %v7178_v11, %v7174_v63  ;;  %v7188_v24 = vrot.slane %v18372_v8, %v18169_v42  ;;  %v7253_v60 = vsel %vm3844_vm3, %v7252_v17, %v7248_v13  ;;  %9464 = vmatprep.subr.bf16.mxu0 %v18197_v28  ;;  %v18374_v11 = vld [vmem:[#allocation49_spill] sm:$0xff]  ;;  %v18375_v13 = vld [vmem:[#allocation30_spill] sm:$0xff]  ;;  %v18377_v17 = vld [vmem:[#allocation36_spill] sm:$0xff] }
 0xf0e   :  { %v8911_v48 = vrot.slane %v8855_v41, %v18165_v49  ;;  %v7258_v10 = vsel %vm3851_vm4, %v7257_v23, %v7253_v60  ;;  %v7267_v25 = vrot.slane %v18373_v6, %v18169_v42  ;;  %v7322_v38 = vsel %vm3830_vm1, %v7321_v47, %v7317_v36  ;;  %v18380_v8 = vld [vmem:[#allocation34_spill] sm:$0xff]  ;;  %vm18382_vm1 = vmmov %vm18342_vm12 }
 0xf0f   :  { %v8907_v44 = vsel %vm3844_vm3, %v8906_v31, %v8902_v7  ;;  %v7262_v53 = vrot.slane %v18374_v11, %v18168_v62  ;;  %v7327_v35 = vsel %vm3837_vm2, %v7326_v46, %v7322_v38  ;;  %v7336_v54 = vrot.slane %v18375_v13, %v18165_v49  ;;  %v10314_v7 = vld [vmem:[#allocation5 + $0x3a0] ss:$8 sps:$4 sm:$0xff]   ;;  %v8861_v63 = vpop.permute.xlu1 %8860  ;;  %v16281_v31 = vpop.permute.xlu0 %8875  ;;  %vm18383_vm2 = vmmov %vm18350_vm11 }
 0xf10   :  { %v8912_v56 = vsel %vm3851_vm4, %v8911_v48, %v8907_v44  ;;  %v7139_v23 = vrot.slane %v18376_v57, %v18185_v39  ;;  %v7184_v18 = vsel %vm3858_vm5, %v7183_v30, %v7179_v1  ;;  %v7331_v36 = vrot.slane %v18377_v17, %v18164_v14  ;;  %9465 = vmatpush3.bf16.msra.mxu0 %v10314_v7  ;;  %v18378_v49 = vld [vmem:[#allocation173_spill] sm:$0xff]  ;;  %v18381_v48 = vld [vmem:[#allocation135_spill] sm:$0xff]  ;;  %vm18390_vm11 = vmmov %vm18383_vm2 }
 0xf11   :  { %v8916_v40 = vrot.slane %v16161_v34, %v18168_v62  ;;  %v7189_v46 = vsel %vm3865_vm6, %v7188_v24, %v7184_v18  ;;  %v7198_v19 = vrot.slane %v18378_v49, %v18173_v37  ;;  %v7263_v47 = vsel %vm3858_vm5, %v7262_v53, %v7258_v10  ;;  %9466 = vmatprep.subr.bf16.mxu0 %v18197_v28  ;;  %v18379_v34 = vld [vmem:[#allocation170_spill] sm:$0xff]  ;;  %v18384_v44 = vld [vmem:[#allocation179_spill] sm:$0xff]  ;;  %vm18401_vm10 = vmmov %vm18383_vm2 }
 0xf12   :  { %v8921_v30 = vrot.slane %v8861_v63, %v18169_v42  ;;  %v7268_v14 = vsel %vm3865_vm6, %v7267_v25, %v7263_v47  ;;  %v7277_v22 = vrot.slane %v18379_v34, %v18173_v37  ;;  %v7332_v41 = vsel %vm3844_vm3, %v7331_v36, %v7327_v35  ;;  %v10315_v35 = vld [vmem:[#allocation5 + $0x3b0] ss:$8 sps:$4 sm:$0xff]   ;;  %vm18385_vm3 = vmmov %vm18351_vm9  ;;  %v18395_v47 = vld [vmem:[#allocation141_spill] sm:$0xff] }
 0xf13   :  { %v8917_v1 = vsel %vm3858_vm5, %v8916_v40, %v8912_v56  ;;  %v7272_v24 = vrot.slane %v18380_v8, %v18172_v16  ;;  %v7337_v60 = vsel %vm3851_vm4, %v7336_v54, %v7332_v41  ;;  %v7346_v10 = vrot.slane %v18381_v48, %v18169_v42  ;;  %v8867_v13 = vpop.permute.xlu1 %8866  ;;  %v18386_v54 = vld [vmem:[#allocation175_spill] sm:$0xff]  ;;  %vm18387_vm4 = vmmov %vm18383_vm2  ;;  %v18391_v18 = vld [vmem:[#allocation54_spill] sm:$0xff]  ;;  %v16321_v63 = vpop.permute.xlu0 %8881 }
 0xf14   :  { %v8922_v6 = vsel %vm3865_vm6, %v8921_v30, %v8917_v1  ;;  %v7140_v38 = vsel %vm18382_vm1, %v7139_v23, %v7135_v20  ;;  %v7194_v25 = vsel %vm18383_vm2, %v7193_v15, %v7189_v46  ;;  %v7341_v11 = vrot.slane %v18384_v44, %v18168_v62  ;;  %9467 = vmatpush3.bf16.msra.mxu0 %v10315_v35  ;;  %vm18388_vm12 = vmmov %vm18385_vm3  ;;  %v18389_v62 = vld [vmem:[#allocation174_spill] sm:$0xff]  ;;  %v18392_v40 = vld [vmem:[#allocation125_spill] sm:$0xff] }
 0xf15   :  { %v8926_v53 = vrot.slane %v16202_v9, %v18172_v16  ;;  %v7199_v42 = vsel %vm18385_vm3, %v7198_v19, %v7194_v25  ;;  %v7208_v56 = vrot.slane %v18386_v54, %v18179_v5  ;;  %v7273_v20 = vsel %vm18387_vm4, %v7272_v24, %v7268_v14  ;;  %9468 = vmatprep.subr.bf16.mxu0 %v18197_v28  ;;  %vm18393_vm9 = vmmov %vm18385_vm3  ;;  %v10316_v14 = vld [vmem:[#allocation5 + $0x3c0] ss:$8 sps:$4 sm:$0xff]  }
 0xf16   :  { %v8931_v58 = vrot.slane %v8867_v13, %v18173_v37  ;;  %v7278_v15 = vsel %vm18388_vm12, %v7277_v22, %v7273_v20  ;;  %v7287_v57 = vrot.slane %v18389_v62, %v18179_v5  ;;  %v7342_v9 = vsel %vm3858_vm5, %v7341_v11, %v7337_v60  ;;  %vm18394_vm5 = vmmov %vm18362_vm7  ;;  %v18403_v60 = vld [vmem:[#allocation31_spill] sm:$0xff]  ;;  %v18409_v13 = vld [vmem:[#allocation25_spill] sm:$0xff] }
 0xf17   :  { %v8927_v23 = vsel %vm18390_vm11, %v8926_v53, %v8922_v6  ;;  %v7282_v17 = vrot.slane %v18391_v18, %v18178_v29  ;;  %v7347_v36 = vsel %vm3865_vm6, %v7346_v10, %v7342_v9  ;;  %v7356_v7 = vrot.slane %v18392_v40, %v18173_v37  ;;  %v8873_v34 = vpop.permute.xlu1 %8872  ;;  %vm18396_vm6 = vmmov %vm18363_vm8  ;;  %v18405_v6 = vld [vmem:[#allocation48_spill] sm:$0xff]  ;;  %v18407_v11 = vld [vmem:[#allocation163_spill] sm:$0xff]  ;;  %v8888_v55 = vpop.permute.xlu0 %8887 }
 0xf18   :  { %v8932_v46 = vsel %vm18393_vm9, %v8931_v58, %v8927_v23  ;;  %v7145_v49 = vsel %vm3914_vm13, %v7144_v45, %v7140_v38  ;;  %v7204_v19 = vsel %vm18394_vm5, %v7203_v27, %v7199_v42  ;;  %v7351_v30 = vrot.slane %v18395_v47, %v18172_v16  ;;  %9469 = vmatpush3.bf16.msra.mxu0 %v10316_v14  ;;  %vm18398_vm7 = vmmov %vm18394_vm5  ;;  %v18400_v16 = vld [vmem:[#allocation178_spill] sm:$0xff]  ;;  %v16347_v24 = vpop.f32.mrb[64].mxu0  ;;  %v18421_v14 = vld [vmem:[#allocation28_spill] sm:$0xff] }
 0xf19   :  { %v8936_v37 = vrot.slane %v16244_v32, %v18178_v29  ;;  %v7209_v22 = vsel %vm18396_vm6, %v7208_v56, %v7204_v19  ;;  %v7218_v41 = vrot.slane %v18397_v12, %v18185_v39  ;;  %v7283_v45 = vsel %vm18398_vm7, %v7282_v17, %v7278_v15  ;;  %9470 = vmatprep.subr.bf16.mxu0 %v18197_v28  ;;  %vm18399_vm8 = vmmov %vm18396_vm6  ;;  %v9338_v44 = vpop.f32.mrb[65].mxu0  ;;  %v10317_v56 = vld [vmem:[#allocation5 + $0x3d0] ss:$8 sps:$4 sm:$0xff]   ;;  %v18411_v15 = vld [vmem:[#allocation45_spill] sm:$0xff] }
 0xf1a   :  { %v8941_v43 = vrot.slane %v8873_v34, %v18179_v5  ;;  %v7288_v27 = vsel %vm18399_vm8, %v7287_v57, %v7283_v45  ;;  %v7297_v1 = vrot.slane %v18400_v16, %v18185_v39  ;;  %v7352_v32 = vsel %vm18401_vm10, %v7351_v30, %v7347_v36  ;;  %vm18402_vm1 = vmmov %vm18394_vm5  ;;  %v7656_v20 = vpop.f32.mrb[66].mxu0  ;;  %v18417_v36 = vld [vmem:[#allocation134_spill] sm:$0xff]  ;;  %v10318_v12 = vld [vmem:[#allocation5 + $0x3e0] ss:$8 sps:$4 sm:$0xff]  }
 0xf1b   :  { %v8937_v8 = vsel %vm18402_vm1, %v8936_v37, %v8932_v46  ;;  %v7292_v48 = vrot.slane %v18403_v60, %v18184_v26  ;;  %vm18404_vm2 = vmmov %vm18385_vm3  ;;  %v7366_v38 = vrot.slane %v18405_v6, %v18179_v5  ;;  %v7149_v53 = vrot.slane %v18407_v11, %v18191_v4  ;;  %v8879_v5 = vpop.permute.xlu1 %8878  ;;  %v9339_v9 = vpop.f32.mrb[67].mxu0  ;;  %v18419_v46 = vld [vmem:[#allocation39_spill] sm:$0xff]  ;;  %v18426_v6 = vld [vmem:[#allocation128_spill] sm:$0xff] }
 0xf1c   :  { %v7357_v10 = vsel %vm18404_vm2, %v7356_v7, %v7352_v32  ;;  %vm18406_vm3 = vmmov %vm18396_vm6  ;;  %vm18408_vm4 = vcmask 786112   ;;  %v7361_v42 = vrot.slane %v18409_v13, %v18178_v29  ;;  %v8946_v54 = vrot.slane %v16281_v31, %v18184_v26  ;;  %9471 = vmatpush3.bf16.msra.mxu0 %v10317_v56  ;;  %v18414_v31 = vld [vmem:[#allocation35_spill] sm:$0xff]  ;;  %v6760_v60 = vpop.permute.xlu0 %6759 }
 0xf1d   :  { %v8942_v25 = vsel %vm18406_vm3, %v8941_v43, %v8937_v8  ;;  %v7214_v35 = vsel %vm18408_vm4, %v7213_v50, %v7209_v22  ;;  %vm18410_vm12 = vcmask 851712   ;;  %v7228_v62 = vrot.slane %v18411_v15, %v18191_v4  ;;  %vm18412_vm11 = vmmov %vm18408_vm4  ;;  %9472 = vmatprep.subr.bf16.mxu0 %v18197_v28 }
 0xf1e   :  { %v7219_v58 = vsel %vm18410_vm12, %v7218_v41, %v7214_v35  ;;  %v7293_v57 = vsel %vm18412_vm11, %v7292_v48, %v7288_v27  ;;  %v8951_v50 = vrot.slane %v8879_v5, %v18185_v39  ;;  %vm18413_vm9 = vmmov %vm18410_vm12  ;;  %v7307_v23 = vrot.slane %v18414_v31, %v18191_v4 }
 0xf1f   :  { %v7298_v29 = vsel %vm18413_vm9, %v7297_v1, %v7293_v57  ;;  %vm18415_vm5 = vmmov %vm18402_vm1  ;;  %v7302_v40 = vrot.slane %v18417_v36, %v18190_v51  ;;  %v7376_v19 = vrot.slane %v18419_v46, %v18185_v39  ;;  %v7150_v30 = vsel %vm3921_vm14, %v7149_v53, %v7145_v49  ;;  %v8885_v41 = vpop.permute.xlu1 %8884  ;;  %v18422_v39 = vld [vmem:[#allocation208_spill] sm:$0xff]  ;;  %v18424_v1 = vld [vmem:[#allocation33_spill] sm:$0xff] }
 0xf20   :  { %v7362_v18 = vsel %vm18415_vm5, %v7361_v42, %v7357_v10  ;;  %vm18416_vm6 = vmmov %vm18408_vm4  ;;  %v7224_v37 = vsel %vm3914_vm13, %v7223_v2, %v7219_v58  ;;  %v7371_v34 = vrot.slane %v18421_v14, %v18184_v26  ;;  %v8956_v22 = vrot.slane %v16321_v63, %v18190_v51  ;;  %9473 = vmatpush3.bf16.msra.mxu0 %v10318_v12 }
 0xf21   :  { %v8947_v17 = vsel %vm18416_vm6, %v8946_v54, %v8942_v25  ;;  %vm18418_vm7 = vmmov %vm18406_vm3  ;;  %v7233_v45 = vrot.slane %v18422_v39, %v18192_v3  ;;  %v7229_v43 = vsel %vm3921_vm14, %v7228_v62, %v7224_v37  ;;  %v7303_v49 = vsel %vm3914_vm13, %v7302_v40, %v7298_v29  ;;  %9474 = vmatprep.subr.bf16.mxu0 %v18197_v28 }
 0xf22   :  { %v7367_v7 = vsel %vm18418_vm7, %v7366_v38, %v7362_v18  ;;  %vm18420_vm8 = vmmov %vm18413_vm9  ;;  %v8961_v61 = vrot.slane %v8885_v41, %v18191_v4  ;;  %v7308_v2 = vsel %vm3921_vm14, %v7307_v23, %v7303_v49  ;;  %v8966_v63 = vrot.slane %v8888_v55, %v18192_v3 }
 0xf23   :  { %v8952_v47 = vsel %vm18420_vm8, %v8951_v50, %v8947_v17  ;;  %vm18423_vm10 = vmmov %vm18408_vm4  ;;  %v7155_v16 = vsel %vm3928_vm15, %v7154_v33, %v7150_v30  ;;  %v7312_v32 = vrot.slane %v18424_v1, %v18192_v3  ;;  %v7394_v48 = vsel %vm4485_vm0, %v16153_v21, %v16125_v0  ;;  %v10319_v33 = vld [vmem:[#allocation5 + $0x3f0] ss:$8 sps:$4 sm:$0xff]   ;;  %v6757_v25 = vpop.permute.xlu1 %6756 }
 0xf24   :  { %v7372_v26 = vsel %vm18423_vm10, %v7371_v34, %v7367_v7  ;;  %v8957_v27 = vsel %vm3914_vm13, %v8956_v22, %v8952_v47  ;;  %vm18425_vm1 = vmmov %vm18420_vm8  ;;  %v7234_v10 = vsel %vm3928_vm15, %v7233_v45, %v7229_v43  ;;  %v7381_v38 = vrot.slane %v18426_v6, %v18190_v51  ;;  %9475 = vmatpush3.bf16.msra.mxu0 %v10319_v33 }
 0xf25   :  { %v7377_v8 = vsel %vm18425_vm1, %v7376_v19, %v7372_v26  ;;  %v8962_v28 = vsel %vm3921_vm14, %v8961_v61, %v8957_v27  ;;  %vm18427_vm2 = vcmask 1043459   ;;  %v7386_v11 = vrot.slane %v6757_v25, %v18191_v4 }
 0xf26   :  { %v8967_v52 = vsel %vm3928_vm15, %v8966_v63, %v8962_v28  ;;  %v7395_v44 = vsel %vm18427_vm2, %v16208_v59, %v7394_v48  ;;  %v7313_v35 = vsel %vm3928_vm15, %v7312_v32, %v7308_v2  ;;  %v7391_v0 = vrot.slane %v6760_v60, %v18192_v3 }
 0xf27   :  { %v8968_v53 = vpack.c.b16 %v8967_v52, %v8967_v52  ;;  %v7382_v21 = vsel %vm3914_vm13, %v7381_v38, %v7377_v8  ;;  %vm18428_vm3 = vcmask 1044484   ;;  %vm18429_vm4 = vcmask 1045509  }
 0xf28   :  { %v7396_v13 = vsel %vm18428_vm3, %v7155_v16, %v7395_v44  ;;  %v7387_v51 = vsel %vm3921_vm14, %v7386_v11, %v7382_v21  ;;  %vm18430_vm12 = vcmask 1046534   ;;  %vm18431_vm11 = vcmask 1047559   ;;  %vm18433_vm14 = vmmov %vm18427_vm2 }
 0xf29   :  { %9477 = vmatmul.mubr.bf16.vlgmr.msra.gmra.mrb[92].mxu0 %v8968_v53  ;;  %v7397_v42 = vsel %vm18429_vm4, %v7234_v10, %v7396_v13  ;;  %v7392_v54 = vsel %vm3928_vm15, %v7391_v0, %v7387_v51  ;;  %vm18432_vm13 = vcmask 1041409  }
 0xf2a   :  { %v7398_v59 = vsel %vm18430_vm12, %v7313_v35, %v7397_v42 }
 0xf2b   :  { %v7399_v4 = vsel %vm18431_vm11, %v7392_v54, %v7398_v59 }
 0xf2c   :  { %7401 = vst [vmem:[#allocation12] sm:$0xff] %v7399_v4 }
 0xf38   :  { %v7846_v56 = vpop.f32.mrb[68].mxu0 }
 0xf39   :  { %v9018_v5 = vrot.slane %v7846_v56, 7  ;;  %v9358_v20 = vpop.f32.mrb[69].mxu0 }
 0xf3a   :  { %v7849_v3 = vpop.f32.mrb[70].mxu0 }
 0xf3b   :  { %v9019_v58 = vsel %vm18432_vm13, %v9018_v5, %v16347_v24  ;;  %v9359_v15 = vpop.f32.mrb[71].mxu0 }
 0xf58   :  { %v8039_v62 = vpop.f32.mrb[72].mxu0 }
 0xf59   :  { %v9020_v57 = vrot.slane %v8039_v62, 6  ;;  %v9378_v55 = vpop.f32.mrb[73].mxu0 }
 0xf5a   :  { %v8042_v50 = vpop.f32.mrb[74].mxu0 }
 0xf5b   :  { %v9021_v9 = vsel %vm4485_vm0, %v9020_v57, %v9019_v58  ;;  %v9379_v29 = vpop.f32.mrb[75].mxu0 }
 0xf78   :  { %v8232_v31 = vpop.f32.mrb[76].mxu0 }
 0xf79   :  { %v9022_v23 = vrot.slane %v8232_v31, 5  ;;  %v9398_v18 = vpop.f32.mrb[77].mxu0 }
 0xf7a   :  { %v8235_v17 = vpop.f32.mrb[78].mxu0 }
 0xf7b   :  { %v9023_v36 = vsel %vm18433_vm14, %v9022_v23, %v9021_v9  ;;  %v9399_v40 = vpop.f32.mrb[79].mxu0 }
 0xf7c   :  { %10441 = shalt.err (!%p10438_p2)
}
 0xf7d   :  { %s10442_s11 = scalar_lea.hbm %s16468_s8, 128 }
 0xf7e   :  { %p10443_p3 = scmp.ne.s32.totalorder %s16468_s8, %s10442_s11  ;;  %p10446_p4 = scmp.lt.u32.totalorder %s10442_s11, %s16468_s8 }
 0xf80   :  { %p10448_p5 = pnand %p10446_p4, %p10443_p3 }
 0xf82   :  { %10451 = shalt.err (!%p10448_p5)
}
 0xf83   :  { %9053 = dma.vmem_to_hbm [thread:$0]  %s9051_s30, 128, %s16468_s8, [#allocation13]   ;;  %vm18434_vm0 = vmmov %vm18428_vm3 }
 0xf84   :  { %vm18435_vm15 = vmmov %vm18429_vm4  ;;  %s10498_s8 = smov [#allocation11]  }
 0xf85   :  { %vm18436_vm9 = vmmov %vm18430_vm12  ;;  %s9040_s19 = sshll.u32 %s10498_s8, 4  ;;  %s9041_s19 = int_to_ptr.vmem [resolvable:$true] %s9040_s19 }
 0xf86   :  { %vm18437_vm5 = vmmov %vm18431_vm11  ;;  %s10452_s21 = scalar_lea.vmem %s9041_s19, 128  ;;  %p10457_p7 = scmp.lt.s32.totalorder %s9041_s19, %s9041_s19 }
 0xf87   :  { %p10453_p6 = scmp.ne.s32.totalorder %s9041_s19, %s10452_s21  ;;  %p10458_p8 = scmp.lt.s32.totalorder %s10452_s21, %s10452_s21 }
 0xf89   :  { %p10459_p9 = por %p10458_p8, %p10457_p7 }
 0xf8b   :  { %p10460_p10 = pnand %p10459_p9, %p10453_p6 }
 0xf98   :  { %v8425_v24 = vpop.f32.mrb[80].mxu0 }
 0xf99   :  { %v9024_v7 = vrot.slane %v8425_v24, 4  ;;  %v9418_v46 = vpop.f32.mrb[81].mxu0 }
 0xf9a   :  { %v8428_v19 = vpop.f32.mrb[82].mxu0 }
 0xf9b   :  { %v9025_v47 = vsel %vm18434_vm0, %v9024_v7, %v9023_v36  ;;  %v9419_v30 = vpop.f32.mrb[83].mxu0 }
 0xfb8   :  { %v8618_v37 = vpop.f32.mrb[84].mxu0 }
 0xfb9   :  { %v9026_v14 = vrot.slane %v8618_v37, 3  ;;  %v9438_v34 = vpop.f32.mrb[85].mxu0 }
 0xfba   :  { %v8621_v22 = vpop.f32.mrb[86].mxu0 }
 0xfbb   :  { %v9027_v12 = vsel %vm18435_vm15, %v9026_v14, %v9025_v47  ;;  %v9439_v41 = vpop.f32.mrb[87].mxu0 }
 0xfda   :  { %v8811_v39 = vpop.f32.mrb[88].mxu0 }
 0xfdb   :  { %v9028_v45 = vrot.slane %v8811_v39, 2  ;;  %v9458_v43 = vpop.f32.mrb[89].mxu0 }
 0xfdc   :  { %v8814_v49 = vpop.f32.mrb[90].mxu0 }
 0xfdd   :  { %v9459_v61 = vpop.f32.mrb[91].mxu0  ;;  %v9029_v2 = vsel %vm18436_vm9, %v9028_v45, %v9027_v12 }
 0xffc   :  { %v9004_v26 = vpop.f32.mrb[92].mxu0 }
 0xffd   :  { %v9030_v63 = vrot.slane %v9004_v26, 1  ;;  %v9478_v27 = vpop.f32.mrb[93].mxu0 }
 0xffe   :  { %v9007_v16 = vpop.f32.mrb[94].mxu0 }
 0xfff   :  { %v9479_v1 = vpop.f32.mrb[95].mxu0  ;;  %v9031_v32 = vsel %vm18437_vm5, %v9030_v63, %v9029_v2 }
0x1000   :  { %9033 = vst [vmem:[#allocation11] sm:$0xff] %v9031_v32 }
0x1001   :  { %10463 = shalt.err (!%p10460_p10)
}
0x1002   :  { %s10464_s13 = scalar_lea.hbm %s16467_s7, 128 }
0x1003   :  { %p10465_p11 = scmp.ne.s32.totalorder %s16467_s7, %s10464_s13  ;;  %p10468_p12 = scmp.lt.u32.totalorder %s10464_s13, %s16467_s7 }
0x1005   :  { %p10470_p13 = pnand %p10468_p12, %p10465_p11 }
0x1007   :  { %10473 = shalt.err (!%p10470_p13)
}
0x1008   :  { %9043 = dma.vmem_to_hbm [thread:$0]  %s9041_s19, 128, %s16467_s7, [#allocation4]  }
0x1009   :  { %10480 = dma.done.wait [#allocation4], 128  }
0x100a   :  { %10481 = vsyncadd [#allocation4], 4294967168 }
0x100b   :  { %10482 = dma.done.wait [#allocation13], 128  }
0x100c   :  { %10483 = vsyncadd [#allocation13], 4294967168 }
0x100d   :  { %9060 = vsyncpa [#allocation3], 1 }
0x100e   :  { %9061 = vsyncpa [#allocation6], 1 }
0x100f   :  { %9062 = vsyncpa [#allocation9], 1 }
0x1010   :  { %9063 = vsyncpa [#allocation4], 1 }
0x1011   :  { %9064 = vsyncpa [#allocation13], 1 }

</bundles_post_ra>
